<compile_context>
chip_gen: v7x
topology: tpu7x:2x2x1
jax: 0.10.0
libtpu: 0.0.40
codegen_flags: <defaults>
</compile_context>

<pallas_src>
import numpy as np
import jax
import jax.numpy as jnp
from jax import lax
from jax.experimental import pallas as pl
from jax.experimental.pallas import tpu as pltpu

# ---- model constants ----
C_E = 59                    # EEG electrodes (conv height)
T = 288                     # time samples (forced by Linear(144, .))
K1, PAD1_L, PAD1_R = 32, 15, 16
F1 = 8                      # block_1 output channels (distinct temporal filters)
F2 = 16                     # block_2 / block_3 channels
K3, PAD3_L, PAD3_R = 16, 7, 8
P_A, P_B = 4, 8             # avg-pool widths
T2 = T // P_A               # 72
T3 = T2 // P_B              # 9
NUM_CLASSES = 2
EPS = 1e-5


def _elu(v):
    return jnp.where(v > 0, v, jnp.exp(v) - 1.0)


def _make_kernel(S):
    R = S * F2                                   # channel-major rows per step

    def kernel(x_ref, w2b_ref, band1_ref, b12_ref, dband_ref, w4k_ref, b3_ref,
               wfcp_ref, sel_ref, bfc_ref, o_ref, y_sc, h3_sc):
        # 1) block_2 spatial conv (BN2 scale folded) for all S samples:
        #    one block-diagonal MXU matmul producing channel-major rows
        #    (row = c*S + s).  Fully overwrites y_sc every step.
        y_sc[...] = jnp.dot(w2b_ref[...], x_ref[...],
                            preferred_element_type=jnp.float32)       # (R, 288)

        # 2) block_1 temporal conv as banded-Toeplitz matmuls (one per filter;
        #    channels 2f, 2f+1 share filter f => contiguous 2S-row block),
        #    then folded BN1+BN2 bias + ELU, then the fused
        #    AvgPool(1,4) + zero-pad + block_3 depthwise (1,16) conv matmul.
        #    (Static 8-iteration loop: matmul-bound, results go to VMEM scratch.)
        for f in range(F1):
            lo = 2 * f * S
            z = jnp.dot(y_sc[lo:lo + 2 * S, :], band1_ref[f],
                        preferred_element_type=jnp.float32)            # (2S, 288)
            h = _elu(z + b12_ref[lo:lo + 2 * S, :])
            h3_sc[lo:lo + S, :] = jnp.dot(
                h[:S], dband_ref[2 * f], preferred_element_type=jnp.float32)
            h3_sc[lo + S:lo + 2 * S, :] = jnp.dot(
                h[S:], dband_ref[2 * f + 1], preferred_element_type=jnp.float32)

        # 3) block_3 pointwise (1,1) conv (BN3 scale folded) as kron(w4, I_S)
        #    row-mixing matmul, + BN3 bias, ELU.
        g = _elu(jnp.dot(w4k_ref[...], h3_sc[...],
                         preferred_element_type=jnp.float32) + b3_ref[...])  # (R,72)

        # 4) fc head: AvgPool(1,8) folded into the fc weights; both classes in a
        #    single broadcasted contraction, then one per-sample row-sum matmul.
        v = jnp.sum(wfcp_ref[...] * g[None, :, :], axis=-1)            # (NC, R)
        vp = jnp.concatenate(
            [v, jnp.zeros((8 - NUM_CLASSES, R), jnp.float32)], axis=0)  # pad M to 8
        logits = jnp.dot(vp, sel_ref[...],
                         preferred_element_type=jnp.float32)[:NUM_CLASSES]
        o_ref[0, :, :] = logits + bfc_ref[...]                         # (NC, S)

    return kernel


def eegnet_forward(x, p, samples_per_step=16):
    """x: (B, 59, 288) float32  ->  logits (B, NUM_CLASSES)."""
    x = x.astype(jnp.float32)
    B = x.shape[0]
    # S must be a multiple of 8 so the stacked (S*59, 288) x block stays
    # sublane-aligned; keep >= 2 grid steps (both v7x cores busy) once B allows.
    sps = max(8, (samples_per_step // 8) * 8)
    S = sps if B >= 2 * sps else 8
    B_pad = ((B + S - 1) // S) * S
    if B_pad != B:
        x = jnp.pad(x, ((0, B_pad - B), (0, 0), (0, 0)))
    G = B_pad // S
    R = S * F2
    f32 = jnp.float32

    # ---- fold eval-mode BatchNorm scales into the (bias-free) conv weights ----
    s1 = p['g1'] / jnp.sqrt(p['v1'] + EPS)
    b1s = p['be1'] - p['m1'] * s1
    s2 = p['g2'] / jnp.sqrt(p['v2'] + EPS)
    b2s = p['be2'] - p['m2'] * s2
    s3 = p['g3'] / jnp.sqrt(p['v3'] + EPS)
    b3s = p['be3'] - p['m3'] * s3

    grp = jnp.arange(F2) // 2                                    # output ch -> group
    W2f = p['w2'].reshape(F2, C_E) * s2[:, None]                 # (16,59)  BN2 folded
    W1f = p['w1'].reshape(F1, K1) * s1[:, None]                  # (8,32)   BN1 folded
    # BN1 bias pushed through the (BN2-scaled) spatial weights + BN2 bias
    b12 = b1s[grp] * jnp.sum(W2f, axis=1) + b2s                  # (16,)

    eyeS = jnp.eye(S, dtype=f32)
    # block-diagonal spatial conv weights: out row = c*S + s, in col = s*59 + e
    W2_big = (W2f[:, None, None, :] * eyeS[None, :, :, None]).reshape(R, S * C_E)

    # banded Toeplitz matrices for the (1,32) temporal conv (zero-pad folded in):
    # band1[f, q, t] = W1f[f, q + 15 - t] when 0 <= q+15-t < 32 else 0
    qq = jnp.arange(T)[:, None]
    tt = jnp.arange(T)[None, :]
    k1 = qq + PAD1_L - tt
    band1 = jnp.where((k1 >= 0) & (k1 < K1),
                      W1f[:, jnp.clip(k1, 0, K1 - 1)], 0.0)      # (8,288,288)

    # fused AvgPool(1,4) + ZeroPad(7,8) + block_3 depthwise (1,16) conv, per channel:
    # dband[c, j, t] = w3[c, j//4 + 7 - t] / 4 when the tap index is in [0,16)
    w3 = p['w3'].reshape(F2, K3)
    k3 = (jnp.arange(T)[:, None] // P_A) + PAD3_L - jnp.arange(T2)[None, :]
    dband = jnp.where((k3 >= 0) & (k3 < K3),
                      w3[:, jnp.clip(k3, 0, K3 - 1)], 0.0) / P_A  # (16,288,72)

    w4f = p['w4'].reshape(F2, F2) * s3[:, None]                   # (16,16) BN3 folded
    W4k = jnp.kron(w4f, eyeS)                                     # (R,R) channel-major

    b12_cm = jnp.repeat(b12, S)[:, None]                          # (R,1)
    b3_cm = jnp.repeat(b3s, S)[:, None]                           # (R,1)

    # fc weights with AvgPool(1,8) folded in, tiled channel-major
    wfc3 = p['wfc'].reshape(NUM_CLASSES, F2, T3)
    wfcp = jnp.repeat(jnp.repeat(wfc3, P_B, axis=2) / P_B, S, axis=1)  # (NC,R,72)
    sel = jnp.tile(eyeS, (F2, 1))                                 # (R,S) per-sample sum
    bfc = p['bfc'][:, None]                                       # (NC,1)

    x2 = x.reshape(B_pad * C_E, T)                                # free reshape

    c2 = lambda i: (0, 0)
    c3 = lambda i: (0, 0, 0)

    flops_per_step = 2 * (R * S * C_E * T          # block-diag spatial matmul
                          + F1 * 2 * S * T * T     # Toeplitz temporal conv
                          + F2 * S * T * T2        # fused pool4 + depthwise conv
                          + R * R * T2             # pointwise conv
                          + NUM_CLASSES * R * T2   # fc head product
                          + 8 * R * S)             # row-sum matmul
    bytes_per_step = 4 * (S * C_E * T + R * S * C_E + F1 * T * T + F2 * T * T2
                          + R * R + NUM_CLASSES * R * T2 + R * S
                          + 3 * R + NUM_CLASSES * (S + 1))
    cost = pl.CostEstimate(flops=G * flops_per_step,
                           transcendentals=G * (R * T + R * T2),
                           bytes_accessed=G * bytes_per_step)

    out = pl.pallas_call(
        _make_kernel(S),
        out_shape=jax.ShapeDtypeStruct((G, NUM_CLASSES, S), f32),
        grid=(G,),
        in_specs=[
            pl.BlockSpec((S * C_E, T), lambda i: (i, 0)),   # x, S samples stacked
            pl.BlockSpec((R, S * C_E), c2),                 # block-diag spatial W
            pl.BlockSpec((F1, T, T), c3),                   # temporal conv bands
            pl.BlockSpec((R, 1), c2),                       # folded BN1+BN2 bias
            pl.BlockSpec((F2, T, T2), c3),                  # pool4 + conv3 bands
            pl.BlockSpec((R, R), c2),                       # pointwise conv kron
            pl.BlockSpec((R, 1), c2),                       # BN3 bias
            pl.BlockSpec((NUM_CLASSES, R, T2), c3),         # fc (pool8 folded)
            pl.BlockSpec((R, S), c2),                       # per-sample row sum
            pl.BlockSpec((NUM_CLASSES, 1), c2),             # fc bias
        ],
        out_specs=pl.BlockSpec((1, NUM_CLASSES, S), lambda i: (i, 0, 0)),
        scratch_shapes=[
            pltpu.VMEM((R, T), f32),     # spatial-conv output (channel-major)
            pltpu.VMEM((R, T2), f32),    # depthwise-conv output
        ],
        compiler_params=pltpu.CompilerParams(dimension_semantics=("parallel",)),
        cost_estimate=cost,
    )(x2, W2_big, band1, b12_cm, dband, W4k, b3_cm, wfcp, sel, bfc)

    return jnp.transpose(out, (0, 2, 1)).reshape(B_pad, NUM_CLASSES)[:B]


# ---------------- pure-JAX reference (mirrors the PyTorch module) ----------------
def _bn(h, g, be, m, v):
    inv = g / jnp.sqrt(v + EPS)
    return (h - m[None, :, None, None]) * inv[None, :, None, None] + be[None, :, None, None]


def reference_forward(x, p):
    B = x.shape[0]
    dn = ('NCHW', 'OIHW', 'NCHW')
    hp = lax.Precision.HIGHEST
    h = x[:, None, :, :]                                           # (B,1,59,T)
    h = jnp.pad(h, ((0, 0), (0, 0), (0, 0), (PAD1_L, PAD1_R)))
    h = lax.conv_general_dilated(h, p['w1'], (1, 1), 'VALID',
                                 dimension_numbers=dn, precision=hp)
    h = _bn(h, p['g1'], p['be1'], p['m1'], p['v1'])
    h = lax.conv_general_dilated(h, p['w2'], (1, 1), 'VALID', dimension_numbers=dn,
                                 feature_group_count=F1, precision=hp)
    h = _bn(h, p['g2'], p['be2'], p['m2'], p['v2'])
    h = jnp.where(h > 0, h, jnp.exp(h) - 1.0)
    h = h.reshape(B, F2, 1, T2, P_A).mean(-1)
    h = jnp.pad(h, ((0, 0), (0, 0), (0, 0), (PAD3_L, PAD3_R)))
    h = lax.conv_general_dilated(h, p['w3'], (1, 1), 'VALID', dimension_numbers=dn,
                                 feature_group_count=F2, precision=hp)
    h = lax.conv_general_dilated(h, p['w4'], (1, 1), 'VALID',
                                 dimension_numbers=dn, precision=hp)
    h = _bn(h, p['g3'], p['be3'], p['m3'], p['v3'])
    h = jnp.where(h > 0, h, jnp.exp(h) - 1.0)
    h = h.reshape(B, F2, 1, T3, P_B).mean(-1)
    feat = h.reshape(B, -1)                                        # (B, 144)
    return jnp.dot(feat, p['wfc'].T, precision=hp) + p['bfc'][None, :]


def init_params(key):
    ks = jax.random.split(key, 18)
    n = lambda k, s, sc=0.1: (sc * jax.random.normal(k, s)).astype(jnp.float32)
    pos = lambda k, s: (1.0 + 0.2 * jnp.abs(jax.random.normal(k, s))).astype(jnp.float32)
    return dict(
        w1=n(ks[0], (F1, 1, 1, K1)),
        g1=pos(ks[1], (F1,)), be1=n(ks[2], (F1,)), m1=n(ks[3], (F1,)), v1=pos(ks[4], (F1,)),
        w2=n(ks[5], (F2, 1, C_E, 1)),
        g2=pos(ks[6], (F2,)), be2=n(ks[7], (F2,)), m2=n(ks[8], (F2,)), v2=pos(ks[9], (F2,)),
        w3=n(ks[10], (F2, 1, 1, K3)),
        w4=n(ks[11], (F2, F2, 1, 1)),
        g3=pos(ks[12], (F2,)), be3=n(ks[13], (F2,)), m3=n(ks[14], (F2,)), v3=pos(ks[15], (F2,)),
        wfc=n(ks[16], (NUM_CLASSES, F2 * T3)),
        bfc=n(ks[17], (NUM_CLASSES,)),
    )


if __name__ == "__main__":
    key = jax.random.PRNGKey(0)
    pkey, xkey = jax.random.split(key)
    params = init_params(pkey)

    B = 2
    x = jax.random.normal(xkey, (B, C_E, T), jnp.float32)   # (2, 59, 288)

    out = jax.block_until_ready(jax.jit(eegnet_forward)(x, params))
    ref = jax.block_until_ready(reference_forward(x, params))
    np.testing.assert_allclose(np.asarray(out), np.asarray(ref), rtol=1e-2, atol=1e-3)
    print("KERNEL_OK")
</pallas_src>

<mosaic_0001>
module attributes {stable_mosaic.version = 11 : i64} {
  func.func @kernel(%arg0: i32, %arg1: memref<472x288xf32, #tpu.memory_space<vmem>>, %arg2: memref<128x472xf32, #tpu.memory_space<vmem>>, %arg3: memref<8x288x288xf32, #tpu.memory_space<vmem>>, %arg4: memref<128x1xf32, #tpu.memory_space<vmem>>, %arg5: memref<16x288x72xf32, #tpu.memory_space<vmem>>, %arg6: memref<128x128xf32, #tpu.memory_space<vmem>>, %arg7: memref<128x1xf32, #tpu.memory_space<vmem>>, %arg8: memref<2x128x72xf32, #tpu.memory_space<vmem>>, %arg9: memref<128x8xf32, #tpu.memory_space<vmem>>, %arg10: memref<2x1xf32, #tpu.memory_space<vmem>>, %arg11: memref<1x2x8xf32, #tpu.memory_space<vmem>>, %arg12: memref<128x288xf32, #tpu.memory_space<vmem>>, %arg13: memref<128x72xf32, #tpu.memory_space<vmem>>) attributes {dimension_semantics = [#tpu.dimension_semantics<parallel>], iteration_bounds = array<i64: 1>, scalar_prefetch = 0 : i64, scratch_operands = 2 : i64, tpu.core_type = #tpu.core_type<tc>, window_params = [{transform_indices = @transform_0, window_bounds = array<i64: 472, 288>}, {pipeline_mode = #tpu.pipeline_mode<synchronous>, transform_indices = @transform_1, window_bounds = array<i64: 128, 472>}, {pipeline_mode = #tpu.pipeline_mode<synchronous>, transform_indices = @transform_2, window_bounds = array<i64: 8, 288, 288>}, {pipeline_mode = #tpu.pipeline_mode<synchronous>, transform_indices = @transform_3, window_bounds = array<i64: 128, 1>}, {pipeline_mode = #tpu.pipeline_mode<synchronous>, transform_indices = @transform_4, window_bounds = array<i64: 16, 288, 72>}, {pipeline_mode = #tpu.pipeline_mode<synchronous>, transform_indices = @transform_5, window_bounds = array<i64: 128, 128>}, {pipeline_mode = #tpu.pipeline_mode<synchronous>, transform_indices = @transform_6, window_bounds = array<i64: 128, 1>}, {pipeline_mode = #tpu.pipeline_mode<synchronous>, transform_indices = @transform_7, window_bounds = array<i64: 2, 128, 72>}, {pipeline_mode = #tpu.pipeline_mode<synchronous>, transform_indices = @transform_8, window_bounds = array<i64: 128, 8>}, {pipeline_mode = #tpu.pipeline_mode<synchronous>, transform_indices = @transform_9, window_bounds = array<i64: 2, 1>}, {transform_indices = @transform_10, window_bounds = array<i64: 1, 2, 8>}]} {
    %c0 = arith.constant 0 : index
    %c0_0 = arith.constant 0 : index
    %0 = vector.load %arg2[%c0, %c0_0] : memref<128x472xf32, #tpu.memory_space<vmem>>, vector<128x472xf32>
    %c0_1 = arith.constant 0 : index
    %c0_2 = arith.constant 0 : index
    %1 = vector.load %arg1[%c0_1, %c0_2] : memref<472x288xf32, #tpu.memory_space<vmem>>, vector<472x288xf32>
    %cst = arith.constant dense<0.000000e+00> : vector<128x288xf32>
    %2 = tpu.matmul %0, %1, %cst {dimension_numbers = #tpu.dot_dimension_numbers<[1], [0], [0], [1], [0, 0, 1, 1], [], []>} : vector<128x472xf32>, vector<472x288xf32>, vector<128x288xf32> -> vector<128x288xf32>
    %c0_3 = arith.constant 0 : index
    %c0_4 = arith.constant 0 : index
    %3 = vector.load %arg12[%c0_3, %c0_4] : memref<128x288xf32, #tpu.memory_space<vmem>>, vector<128x288xf32>
    tpu.vector_store %arg12[%c0_3, %c0_4], %2 {strides = array<i32>} : memref<128x288xf32, #tpu.memory_space<vmem>>, vector<128x288xf32>,
    %c0_5 = arith.constant 0 : index
    %c0_6 = arith.constant 0 : index
    %4 = vector.load %arg12[%c0_5, %c0_6] : memref<128x288xf32, #tpu.memory_space<vmem>>, vector<16x288xf32>
    %c0_7 = arith.constant 0 : index
    %c0_8 = arith.constant 0 : index
    %c0_9 = arith.constant 0 : index
    %5 = vector.load %arg3[%c0_7, %c0_8, %c0_9] : memref<8x288x288xf32, #tpu.memory_space<vmem>>, vector<1x288x288xf32>
    %6 = vector.shape_cast %5 : vector<1x288x288xf32> to vector<288x288xf32>
    %cst_10 = arith.constant dense<0.000000e+00> : vector<16x288xf32>
    %7 = tpu.matmul %4, %6, %cst_10 {dimension_numbers = #tpu.dot_dimension_numbers<[1], [0], [0], [1], [0, 0, 1, 1], [], []>} : vector<16x288xf32>, vector<288x288xf32>, vector<16x288xf32> -> vector<16x288xf32>
    %c0_11 = arith.constant 0 : index
    %c0_12 = arith.constant 0 : index
    %8 = vector.load %arg4[%c0_11, %c0_12] : memref<128x1xf32, #tpu.memory_space<vmem>>, vector<16x1xf32>
    %9 = vector.broadcast %8 : vector<16x1xf32> to vector<16x288xf32>
    %10 = arith.addf %7, %9 : vector<16x288xf32>
    %cst_13 = arith.constant 0.000000e+00 : f32
    %11 = vector.broadcast %cst_13 : f32 to vector<16x288xf32>
    %12 = arith.cmpf ogt, %10, %11 : vector<16x288xf32>
    %13 = math.exp %10 : vector<16x288xf32>
    %cst_14 = arith.constant 1.000000e+00 : f32
    %14 = vector.broadcast %cst_14 : f32 to vector<16x288xf32>
    %15 = arith.subf %13, %14 : vector<16x288xf32>
    %16 = arith.select %12, %10, %15 : vector<16x288xi1>, vector<16x288xf32>
    %17 = vector.extract_strided_slice %16 {offsets = [0, 0], sizes = [8, 288], strides = [1, 1]} : vector<16x288xf32> to vector<8x288xf32>
    %c0_15 = arith.constant 0 : index
    %c0_16 = arith.constant 0 : index
    %c0_17 = arith.constant 0 : index
    %18 = vector.load %arg5[%c0_15, %c0_16, %c0_17] : memref<16x288x72xf32, #tpu.memory_space<vmem>>, vector<1x288x72xf32>
    %19 = vector.shape_cast %18 : vector<1x288x72xf32> to vector<288x72xf32>
    %cst_18 = arith.constant dense<0.000000e+00> : vector<8x72xf32>
    %20 = tpu.matmul %17, %19, %cst_18 {dimension_numbers = #tpu.dot_dimension_numbers<[1], [0], [0], [1], [0, 0, 1, 1], [], []>} : vector<8x288xf32>, vector<288x72xf32>, vector<8x72xf32> -> vector<8x72xf32>
    %c0_19 = arith.constant 0 : index
    %c0_20 = arith.constant 0 : index
    %21 = vector.load %arg13[%c0_19, %c0_20] : memref<128x72xf32, #tpu.memory_space<vmem>>, vector<8x72xf32>
    tpu.vector_store %arg13[%c0_19, %c0_20], %20 {strides = array<i32>} : memref<128x72xf32, #tpu.memory_space<vmem>>, vector<8x72xf32>,
    %22 = vector.extract_strided_slice %16 {offsets = [8, 0], sizes = [8, 288], strides = [1, 1]} : vector<16x288xf32> to vector<8x288xf32>
    %c1 = arith.constant 1 : index
    %c0_21 = arith.constant 0 : index
    %c0_22 = arith.constant 0 : index
    %23 = vector.load %arg5[%c1, %c0_21, %c0_22] : memref<16x288x72xf32, #tpu.memory_space<vmem>>, vector<1x288x72xf32>
    %24 = vector.shape_cast %23 : vector<1x288x72xf32> to vector<288x72xf32>
    %cst_23 = arith.constant dense<0.000000e+00> : vector<8x72xf32>
    %25 = tpu.matmul %22, %24, %cst_23 {dimension_numbers = #tpu.dot_dimension_numbers<[1], [0], [0], [1], [0, 0, 1, 1], [], []>} : vector<8x288xf32>, vector<288x72xf32>, vector<8x72xf32> -> vector<8x72xf32>
    %c8 = arith.constant 8 : index
    %c0_24 = arith.constant 0 : index
    %26 = vector.load %arg13[%c8, %c0_24] : memref<128x72xf32, #tpu.memory_space<vmem>>, vector<8x72xf32>
    tpu.vector_store %arg13[%c8, %c0_24], %25 {strides = array<i32>} : memref<128x72xf32, #tpu.memory_space<vmem>>, vector<8x72xf32>,
    %c16 = arith.constant 16 : index
    %c0_25 = arith.constant 0 : index
    %27 = vector.load %arg12[%c16, %c0_25] : memref<128x288xf32, #tpu.memory_space<vmem>>, vector<16x288xf32>
    %c1_26 = arith.constant 1 : index
    %c0_27 = arith.constant 0 : index
    %c0_28 = arith.constant 0 : index
    %28 = vector.load %arg3[%c1_26, %c0_27, %c0_28] : memref<8x288x288xf32, #tpu.memory_space<vmem>>, vector<1x288x288xf32>
    %29 = vector.shape_cast %28 : vector<1x288x288xf32> to vector<288x288xf32>
    %cst_29 = arith.constant dense<0.000000e+00> : vector<16x288xf32>
    %30 = tpu.matmul %27, %29, %cst_29 {dimension_numbers = #tpu.dot_dimension_numbers<[1], [0], [0], [1], [0, 0, 1, 1], [], []>} : vector<16x288xf32>, vector<288x288xf32>, vector<16x288xf32> -> vector<16x288xf32>
    %c16_30 = arith.constant 16 : index
    %c0_31 = arith.constant 0 : index
    %31 = vector.load %arg4[%c16_30, %c0_31] : memref<128x1xf32, #tpu.memory_space<vmem>>, vector<16x1xf32>
    %32 = vector.broadcast %31 : vector<16x1xf32> to vector<16x288xf32>
    %33 = arith.addf %30, %32 : vector<16x288xf32>
    %cst_32 = arith.constant 0.000000e+00 : f32
    %34 = vector.broadcast %cst_32 : f32 to vector<16x288xf32>
    %35 = arith.cmpf ogt, %33, %34 : vector<16x288xf32>
    %36 = math.exp %33 : vector<16x288xf32>
    %cst_33 = arith.constant 1.000000e+00 : f32
    %37 = vector.broadcast %cst_33 : f32 to vector<16x288xf32>
    %38 = arith.subf %36, %37 : vector<16x288xf32>
    %39 = arith.select %35, %33, %38 : vector<16x288xi1>, vector<16x288xf32>
    %40 = vector.extract_strided_slice %39 {offsets = [0, 0], sizes = [8, 288], strides = [1, 1]} : vector<16x288xf32> to vector<8x288xf32>
    %c2 = arith.constant 2 : index
    %c0_34 = arith.constant 0 : index
    %c0_35 = arith.constant 0 : index
    %41 = vector.load %arg5[%c2, %c0_34, %c0_35] : memref<16x288x72xf32, #tpu.memory_space<vmem>>, vector<1x288x72xf32>
    %42 = vector.shape_cast %41 : vector<1x288x72xf32> to vector<288x72xf32>
    %cst_36 = arith.constant dense<0.000000e+00> : vector<8x72xf32>
    %43 = tpu.matmul %40, %42, %cst_36 {dimension_numbers = #tpu.dot_dimension_numbers<[1], [0], [0], [1], [0, 0, 1, 1], [], []>} : vector<8x288xf32>, vector<288x72xf32>, vector<8x72xf32> -> vector<8x72xf32>
    %c16_37 = arith.constant 16 : index
    %c0_38 = arith.constant 0 : index
    %44 = vector.load %arg13[%c16_37, %c0_38] : memref<128x72xf32, #tpu.memory_space<vmem>>, vector<8x72xf32>
    tpu.vector_store %arg13[%c16_37, %c0_38], %43 {strides = array<i32>} : memref<128x72xf32, #tpu.memory_space<vmem>>, vector<8x72xf32>,
    %45 = vector.extract_strided_slice %39 {offsets = [8, 0], sizes = [8, 288], strides = [1, 1]} : vector<16x288xf32> to vector<8x288xf32>
    %c3 = arith.constant 3 : index
    %c0_39 = arith.constant 0 : index
    %c0_40 = arith.constant 0 : index
    %46 = vector.load %arg5[%c3, %c0_39, %c0_40] : memref<16x288x72xf32, #tpu.memory_space<vmem>>, vector<1x288x72xf32>
    %47 = vector.shape_cast %46 : vector<1x288x72xf32> to vector<288x72xf32>
    %cst_41 = arith.constant dense<0.000000e+00> : vector<8x72xf32>
    %48 = tpu.matmul %45, %47, %cst_41 {dimension_numbers = #tpu.dot_dimension_numbers<[1], [0], [0], [1], [0, 0, 1, 1], [], []>} : vector<8x288xf32>, vector<288x72xf32>, vector<8x72xf32> -> vector<8x72xf32>
    %c24 = arith.constant 24 : index
    %c0_42 = arith.constant 0 : index
    %49 = vector.load %arg13[%c24, %c0_42] : memref<128x72xf32, #tpu.memory_space<vmem>>, vector<8x72xf32>
    tpu.vector_store %arg13[%c24, %c0_42], %48 {strides = array<i32>} : memref<128x72xf32, #tpu.memory_space<vmem>>, vector<8x72xf32>,
    %c32 = arith.constant 32 : index
    %c0_43 = arith.constant 0 : index
    %50 = vector.load %arg12[%c32, %c0_43] : memref<128x288xf32, #tpu.memory_space<vmem>>, vector<16x288xf32>
    %c2_44 = arith.constant 2 : index
    %c0_45 = arith.constant 0 : index
    %c0_46 = arith.constant 0 : index
    %51 = vector.load %arg3[%c2_44, %c0_45, %c0_46] : memref<8x288x288xf32, #tpu.memory_space<vmem>>, vector<1x288x288xf32>
    %52 = vector.shape_cast %51 : vector<1x288x288xf32> to vector<288x288xf32>
    %cst_47 = arith.constant dense<0.000000e+00> : vector<16x288xf32>
    %53 = tpu.matmul %50, %52, %cst_47 {dimension_numbers = #tpu.dot_dimension_numbers<[1], [0], [0], [1], [0, 0, 1, 1], [], []>} : vector<16x288xf32>, vector<288x288xf32>, vector<16x288xf32> -> vector<16x288xf32>
    %c32_48 = arith.constant 32 : index
    %c0_49 = arith.constant 0 : index
    %54 = vector.load %arg4[%c32_48, %c0_49] : memref<128x1xf32, #tpu.memory_space<vmem>>, vector<16x1xf32>
    %55 = vector.broadcast %54 : vector<16x1xf32> to vector<16x288xf32>
    %56 = arith.addf %53, %55 : vector<16x288xf32>
    %cst_50 = arith.constant 0.000000e+00 : f32
    %57 = vector.broadcast %cst_50 : f32 to vector<16x288xf32>
    %58 = arith.cmpf ogt, %56, %57 : vector<16x288xf32>
    %59 = math.exp %56 : vector<16x288xf32>
    %cst_51 = arith.constant 1.000000e+00 : f32
    %60 = vector.broadcast %cst_51 : f32 to vector<16x288xf32>
    %61 = arith.subf %59, %60 : vector<16x288xf32>
    %62 = arith.select %58, %56, %61 : vector<16x288xi1>, vector<16x288xf32>
    %63 = vector.extract_strided_slice %62 {offsets = [0, 0], sizes = [8, 288], strides = [1, 1]} : vector<16x288xf32> to vector<8x288xf32>
    %c4 = arith.constant 4 : index
    %c0_52 = arith.constant 0 : index
    %c0_53 = arith.constant 0 : index
    %64 = vector.load %arg5[%c4, %c0_52, %c0_53] : memref<16x288x72xf32, #tpu.memory_space<vmem>>, vector<1x288x72xf32>
    %65 = vector.shape_cast %64 : vector<1x288x72xf32> to vector<288x72xf32>
    %cst_54 = arith.constant dense<0.000000e+00> : vector<8x72xf32>
    %66 = tpu.matmul %63, %65, %cst_54 {dimension_numbers = #tpu.dot_dimension_numbers<[1], [0], [0], [1], [0, 0, 1, 1], [], []>} : vector<8x288xf32>, vector<288x72xf32>, vector<8x72xf32> -> vector<8x72xf32>
    %c32_55 = arith.constant 32 : index
    %c0_56 = arith.constant 0 : index
    %67 = vector.load %arg13[%c32_55, %c0_56] : memref<128x72xf32, #tpu.memory_space<vmem>>, vector<8x72xf32>
    tpu.vector_store %arg13[%c32_55, %c0_56], %66 {strides = array<i32>} : memref<128x72xf32, #tpu.memory_space<vmem>>, vector<8x72xf32>,
    %68 = vector.extract_strided_slice %62 {offsets = [8, 0], sizes = [8, 288], strides = [1, 1]} : vector<16x288xf32> to vector<8x288xf32>
    %c5 = arith.constant 5 : index
    %c0_57 = arith.constant 0 : index
    %c0_58 = arith.constant 0 : index
    %69 = vector.load %arg5[%c5, %c0_57, %c0_58] : memref<16x288x72xf32, #tpu.memory_space<vmem>>, vector<1x288x72xf32>
    %70 = vector.shape_cast %69 : vector<1x288x72xf32> to vector<288x72xf32>
    %cst_59 = arith.constant dense<0.000000e+00> : vector<8x72xf32>
    %71 = tpu.matmul %68, %70, %cst_59 {dimension_numbers = #tpu.dot_dimension_numbers<[1], [0], [0], [1], [0, 0, 1, 1], [], []>} : vector<8x288xf32>, vector<288x72xf32>, vector<8x72xf32> -> vector<8x72xf32>
    %c40 = arith.constant 40 : index
    %c0_60 = arith.constant 0 : index
    %72 = vector.load %arg13[%c40, %c0_60] : memref<128x72xf32, #tpu.memory_space<vmem>>, vector<8x72xf32>
    tpu.vector_store %arg13[%c40, %c0_60], %71 {strides = array<i32>} : memref<128x72xf32, #tpu.memory_space<vmem>>, vector<8x72xf32>,
    %c48 = arith.constant 48 : index
    %c0_61 = arith.constant 0 : index
    %73 = vector.load %arg12[%c48, %c0_61] : memref<128x288xf32, #tpu.memory_space<vmem>>, vector<16x288xf32>
    %c3_62 = arith.constant 3 : index
    %c0_63 = arith.constant 0 : index
    %c0_64 = arith.constant 0 : index
    %74 = vector.load %arg3[%c3_62, %c0_63, %c0_64] : memref<8x288x288xf32, #tpu.memory_space<vmem>>, vector<1x288x288xf32>
    %75 = vector.shape_cast %74 : vector<1x288x288xf32> to vector<288x288xf32>
    %cst_65 = arith.constant dense<0.000000e+00> : vector<16x288xf32>
    %76 = tpu.matmul %73, %75, %cst_65 {dimension_numbers = #tpu.dot_dimension_numbers<[1], [0], [0], [1], [0, 0, 1, 1], [], []>} : vector<16x288xf32>, vector<288x288xf32>, vector<16x288xf32> -> vector<16x288xf32>
    %c48_66 = arith.constant 48 : index
    %c0_67 = arith.constant 0 : index
    %77 = vector.load %arg4[%c48_66, %c0_67] : memref<128x1xf32, #tpu.memory_space<vmem>>, vector<16x1xf32>
    %78 = vector.broadcast %77 : vector<16x1xf32> to vector<16x288xf32>
    %79 = arith.addf %76, %78 : vector<16x288xf32>
    %cst_68 = arith.constant 0.000000e+00 : f32
    %80 = vector.broadcast %cst_68 : f32 to vector<16x288xf32>
    %81 = arith.cmpf ogt, %79, %80 : vector<16x288xf32>
    %82 = math.exp %79 : vector<16x288xf32>
    %cst_69 = arith.constant 1.000000e+00 : f32
    %83 = vector.broadcast %cst_69 : f32 to vector<16x288xf32>
    %84 = arith.subf %82, %83 : vector<16x288xf32>
    %85 = arith.select %81, %79, %84 : vector<16x288xi1>, vector<16x288xf32>
    %86 = vector.extract_strided_slice %85 {offsets = [0, 0], sizes = [8, 288], strides = [1, 1]} : vector<16x288xf32> to vector<8x288xf32>
    %c6 = arith.constant 6 : index
    %c0_70 = arith.constant 0 : index
    %c0_71 = arith.constant 0 : index
    %87 = vector.load %arg5[%c6, %c0_70, %c0_71] : memref<16x288x72xf32, #tpu.memory_space<vmem>>, vector<1x288x72xf32>
    %88 = vector.shape_cast %87 : vector<1x288x72xf32> to vector<288x72xf32>
    %cst_72 = arith.constant dense<0.000000e+00> : vector<8x72xf32>
    %89 = tpu.matmul %86, %88, %cst_72 {dimension_numbers = #tpu.dot_dimension_numbers<[1], [0], [0], [1], [0, 0, 1, 1], [], []>} : vector<8x288xf32>, vector<288x72xf32>, vector<8x72xf32> -> vector<8x72xf32>
    %c48_73 = arith.constant 48 : index
    %c0_74 = arith.constant 0 : index
    %90 = vector.load %arg13[%c48_73, %c0_74] : memref<128x72xf32, #tpu.memory_space<vmem>>, vector<8x72xf32>
    tpu.vector_store %arg13[%c48_73, %c0_74], %89 {strides = array<i32>} : memref<128x72xf32, #tpu.memory_space<vmem>>, vector<8x72xf32>,
    %91 = vector.extract_strided_slice %85 {offsets = [8, 0], sizes = [8, 288], strides = [1, 1]} : vector<16x288xf32> to vector<8x288xf32>
    %c7 = arith.constant 7 : index
    %c0_75 = arith.constant 0 : index
    %c0_76 = arith.constant 0 : index
    %92 = vector.load %arg5[%c7, %c0_75, %c0_76] : memref<16x288x72xf32, #tpu.memory_space<vmem>>, vector<1x288x72xf32>
    %93 = vector.shape_cast %92 : vector<1x288x72xf32> to vector<288x72xf32>
    %cst_77 = arith.constant dense<0.000000e+00> : vector<8x72xf32>
    %94 = tpu.matmul %91, %93, %cst_77 {dimension_numbers = #tpu.dot_dimension_numbers<[1], [0], [0], [1], [0, 0, 1, 1], [], []>} : vector<8x288xf32>, vector<288x72xf32>, vector<8x72xf32> -> vector<8x72xf32>
    %c56 = arith.constant 56 : index
    %c0_78 = arith.constant 0 : index
    %95 = vector.load %arg13[%c56, %c0_78] : memref<128x72xf32, #tpu.memory_space<vmem>>, vector<8x72xf32>
    tpu.vector_store %arg13[%c56, %c0_78], %94 {strides = array<i32>} : memref<128x72xf32, #tpu.memory_space<vmem>>, vector<8x72xf32>,
    %c64 = arith.constant 64 : index
    %c0_79 = arith.constant 0 : index
    %96 = vector.load %arg12[%c64, %c0_79] : memref<128x288xf32, #tpu.memory_space<vmem>>, vector<16x288xf32>
    %c4_80 = arith.constant 4 : index
    %c0_81 = arith.constant 0 : index
    %c0_82 = arith.constant 0 : index
    %97 = vector.load %arg3[%c4_80, %c0_81, %c0_82] : memref<8x288x288xf32, #tpu.memory_space<vmem>>, vector<1x288x288xf32>
    %98 = vector.shape_cast %97 : vector<1x288x288xf32> to vector<288x288xf32>
    %cst_83 = arith.constant dense<0.000000e+00> : vector<16x288xf32>
    %99 = tpu.matmul %96, %98, %cst_83 {dimension_numbers = #tpu.dot_dimension_numbers<[1], [0], [0], [1], [0, 0, 1, 1], [], []>} : vector<16x288xf32>, vector<288x288xf32>, vector<16x288xf32> -> vector<16x288xf32>
    %c64_84 = arith.constant 64 : index
    %c0_85 = arith.constant 0 : index
    %100 = vector.load %arg4[%c64_84, %c0_85] : memref<128x1xf32, #tpu.memory_space<vmem>>, vector<16x1xf32>
    %101 = vector.broadcast %100 : vector<16x1xf32> to vector<16x288xf32>
    %102 = arith.addf %99, %101 : vector<16x288xf32>
    %cst_86 = arith.constant 0.000000e+00 : f32
    %103 = vector.broadcast %cst_86 : f32 to vector<16x288xf32>
    %104 = arith.cmpf ogt, %102, %103 : vector<16x288xf32>
    %105 = math.exp %102 : vector<16x288xf32>
    %cst_87 = arith.constant 1.000000e+00 : f32
    %106 = vector.broadcast %cst_87 : f32 to vector<16x288xf32>
    %107 = arith.subf %105, %106 : vector<16x288xf32>
    %108 = arith.select %104, %102, %107 : vector<16x288xi1>, vector<16x288xf32>
    %109 = vector.extract_strided_slice %108 {offsets = [0, 0], sizes = [8, 288], strides = [1, 1]} : vector<16x288xf32> to vector<8x288xf32>
    %c8_88 = arith.constant 8 : index
    %c0_89 = arith.constant 0 : index
    %c0_90 = arith.constant 0 : index
    %110 = vector.load %arg5[%c8_88, %c0_89, %c0_90] : memref<16x288x72xf32, #tpu.memory_space<vmem>>, vector<1x288x72xf32>
    %111 = vector.shape_cast %110 : vector<1x288x72xf32> to vector<288x72xf32>
    %cst_91 = arith.constant dense<0.000000e+00> : vector<8x72xf32>
    %112 = tpu.matmul %109, %111, %cst_91 {dimension_numbers = #tpu.dot_dimension_numbers<[1], [0], [0], [1], [0, 0, 1, 1], [], []>} : vector<8x288xf32>, vector<288x72xf32>, vector<8x72xf32> -> vector<8x72xf32>
    %c64_92 = arith.constant 64 : index
    %c0_93 = arith.constant 0 : index
    %113 = vector.load %arg13[%c64_92, %c0_93] : memref<128x72xf32, #tpu.memory_space<vmem>>, vector<8x72xf32>
    tpu.vector_store %arg13[%c64_92, %c0_93], %112 {strides = array<i32>} : memref<128x72xf32, #tpu.memory_space<vmem>>, vector<8x72xf32>,
    %114 = vector.extract_strided_slice %108 {offsets = [8, 0], sizes = [8, 288], strides = [1, 1]} : vector<16x288xf32> to vector<8x288xf32>
    %c9 = arith.constant 9 : index
    %c0_94 = arith.constant 0 : index
    %c0_95 = arith.constant 0 : index
    %115 = vector.load %arg5[%c9, %c0_94, %c0_95] : memref<16x288x72xf32, #tpu.memory_space<vmem>>, vector<1x288x72xf32>
    %116 = vector.shape_cast %115 : vector<1x288x72xf32> to vector<288x72xf32>
    %cst_96 = arith.constant dense<0.000000e+00> : vector<8x72xf32>
    %117 = tpu.matmul %114, %116, %cst_96 {dimension_numbers = #tpu.dot_dimension_numbers<[1], [0], [0], [1], [0, 0, 1, 1], [], []>} : vector<8x288xf32>, vector<288x72xf32>, vector<8x72xf32> -> vector<8x72xf32>
    %c72 = arith.constant 72 : index
    %c0_97 = arith.constant 0 : index
    %118 = vector.load %arg13[%c72, %c0_97] : memref<128x72xf32, #tpu.memory_space<vmem>>, vector<8x72xf32>
    tpu.vector_store %arg13[%c72, %c0_97], %117 {strides = array<i32>} : memref<128x72xf32, #tpu.memory_space<vmem>>, vector<8x72xf32>,
    %c80 = arith.constant 80 : index
    %c0_98 = arith.constant 0 : index
    %119 = vector.load %arg12[%c80, %c0_98] : memref<128x288xf32, #tpu.memory_space<vmem>>, vector<16x288xf32>
    %c5_99 = arith.constant 5 : index
    %c0_100 = arith.constant 0 : index
    %c0_101 = arith.constant 0 : index
    %120 = vector.load %arg3[%c5_99, %c0_100, %c0_101] : memref<8x288x288xf32, #tpu.memory_space<vmem>>, vector<1x288x288xf32>
    %121 = vector.shape_cast %120 : vector<1x288x288xf32> to vector<288x288xf32>
    %cst_102 = arith.constant dense<0.000000e+00> : vector<16x288xf32>
    %122 = tpu.matmul %119, %121, %cst_102 {dimension_numbers = #tpu.dot_dimension_numbers<[1], [0], [0], [1], [0, 0, 1, 1], [], []>} : vector<16x288xf32>, vector<288x288xf32>, vector<16x288xf32> -> vector<16x288xf32>
    %c80_103 = arith.constant 80 : index
    %c0_104 = arith.constant 0 : index
    %123 = vector.load %arg4[%c80_103, %c0_104] : memref<128x1xf32, #tpu.memory_space<vmem>>, vector<16x1xf32>
    %124 = vector.broadcast %123 : vector<16x1xf32> to vector<16x288xf32>
    %125 = arith.addf %122, %124 : vector<16x288xf32>
    %cst_105 = arith.constant 0.000000e+00 : f32
    %126 = vector.broadcast %cst_105 : f32 to vector<16x288xf32>
    %127 = arith.cmpf ogt, %125, %126 : vector<16x288xf32>
    %128 = math.exp %125 : vector<16x288xf32>
    %cst_106 = arith.constant 1.000000e+00 : f32
    %129 = vector.broadcast %cst_106 : f32 to vector<16x288xf32>
    %130 = arith.subf %128, %129 : vector<16x288xf32>
    %131 = arith.select %127, %125, %130 : vector<16x288xi1>, vector<16x288xf32>
    %132 = vector.extract_strided_slice %131 {offsets = [0, 0], sizes = [8, 288], strides = [1, 1]} : vector<16x288xf32> to vector<8x288xf32>
    %c10 = arith.constant 10 : index
    %c0_107 = arith.constant 0 : index
    %c0_108 = arith.constant 0 : index
    %133 = vector.load %arg5[%c10, %c0_107, %c0_108] : memref<16x288x72xf32, #tpu.memory_space<vmem>>, vector<1x288x72xf32>
    %134 = vector.shape_cast %133 : vector<1x288x72xf32> to vector<288x72xf32>
    %cst_109 = arith.constant dense<0.000000e+00> : vector<8x72xf32>
    %135 = tpu.matmul %132, %134, %cst_109 {dimension_numbers = #tpu.dot_dimension_numbers<[1], [0], [0], [1], [0, 0, 1, 1], [], []>} : vector<8x288xf32>, vector<288x72xf32>, vector<8x72xf32> -> vector<8x72xf32>
    %c80_110 = arith.constant 80 : index
    %c0_111 = arith.constant 0 : index
    %136 = vector.load %arg13[%c80_110, %c0_111] : memref<128x72xf32, #tpu.memory_space<vmem>>, vector<8x72xf32>
    tpu.vector_store %arg13[%c80_110, %c0_111], %135 {strides = array<i32>} : memref<128x72xf32, #tpu.memory_space<vmem>>, vector<8x72xf32>,
    %137 = vector.extract_strided_slice %131 {offsets = [8, 0], sizes = [8, 288], strides = [1, 1]} : vector<16x288xf32> to vector<8x288xf32>
    %c11 = arith.constant 11 : index
    %c0_112 = arith.constant 0 : index
    %c0_113 = arith.constant 0 : index
    %138 = vector.load %arg5[%c11, %c0_112, %c0_113] : memref<16x288x72xf32, #tpu.memory_space<vmem>>, vector<1x288x72xf32>
    %139 = vector.shape_cast %138 : vector<1x288x72xf32> to vector<288x72xf32>
    %cst_114 = arith.constant dense<0.000000e+00> : vector<8x72xf32>
    %140 = tpu.matmul %137, %139, %cst_114 {dimension_numbers = #tpu.dot_dimension_numbers<[1], [0], [0], [1], [0, 0, 1, 1], [], []>} : vector<8x288xf32>, vector<288x72xf32>, vector<8x72xf32> -> vector<8x72xf32>
    %c88 = arith.constant 88 : index
    %c0_115 = arith.constant 0 : index
    %141 = vector.load %arg13[%c88, %c0_115] : memref<128x72xf32, #tpu.memory_space<vmem>>, vector<8x72xf32>
    tpu.vector_store %arg13[%c88, %c0_115], %140 {strides = array<i32>} : memref<128x72xf32, #tpu.memory_space<vmem>>, vector<8x72xf32>,
    %c96 = arith.constant 96 : index
    %c0_116 = arith.constant 0 : index
    %142 = vector.load %arg12[%c96, %c0_116] : memref<128x288xf32, #tpu.memory_space<vmem>>, vector<16x288xf32>
    %c6_117 = arith.constant 6 : index
    %c0_118 = arith.constant 0 : index
    %c0_119 = arith.constant 0 : index
    %143 = vector.load %arg3[%c6_117, %c0_118, %c0_119] : memref<8x288x288xf32, #tpu.memory_space<vmem>>, vector<1x288x288xf32>
    %144 = vector.shape_cast %143 : vector<1x288x288xf32> to vector<288x288xf32>
    %cst_120 = arith.constant dense<0.000000e+00> : vector<16x288xf32>
    %145 = tpu.matmul %142, %144, %cst_120 {dimension_numbers = #tpu.dot_dimension_numbers<[1], [0], [0], [1], [0, 0, 1, 1], [], []>} : vector<16x288xf32>, vector<288x288xf32>, vector<16x288xf32> -> vector<16x288xf32>
    %c96_121 = arith.constant 96 : index
    %c0_122 = arith.constant 0 : index
    %146 = vector.load %arg4[%c96_121, %c0_122] : memref<128x1xf32, #tpu.memory_space<vmem>>, vector<16x1xf32>
    %147 = vector.broadcast %146 : vector<16x1xf32> to vector<16x288xf32>
    %148 = arith.addf %145, %147 : vector<16x288xf32>
    %cst_123 = arith.constant 0.000000e+00 : f32
    %149 = vector.broadcast %cst_123 : f32 to vector<16x288xf32>
    %150 = arith.cmpf ogt, %148, %149 : vector<16x288xf32>
    %151 = math.exp %148 : vector<16x288xf32>
    %cst_124 = arith.constant 1.000000e+00 : f32
    %152 = vector.broadcast %cst_124 : f32 to vector<16x288xf32>
    %153 = arith.subf %151, %152 : vector<16x288xf32>
    %154 = arith.select %150, %148, %153 : vector<16x288xi1>, vector<16x288xf32>
    %155 = vector.extract_strided_slice %154 {offsets = [0, 0], sizes = [8, 288], strides = [1, 1]} : vector<16x288xf32> to vector<8x288xf32>
    %c12 = arith.constant 12 : index
    %c0_125 = arith.constant 0 : index
    %c0_126 = arith.constant 0 : index
    %156 = vector.load %arg5[%c12, %c0_125, %c0_126] : memref<16x288x72xf32, #tpu.memory_space<vmem>>, vector<1x288x72xf32>
    %157 = vector.shape_cast %156 : vector<1x288x72xf32> to vector<288x72xf32>
    %cst_127 = arith.constant dense<0.000000e+00> : vector<8x72xf32>
    %158 = tpu.matmul %155, %157, %cst_127 {dimension_numbers = #tpu.dot_dimension_numbers<[1], [0], [0], [1], [0, 0, 1, 1], [], []>} : vector<8x288xf32>, vector<288x72xf32>, vector<8x72xf32> -> vector<8x72xf32>
    %c96_128 = arith.constant 96 : index
    %c0_129 = arith.constant 0 : index
    %159 = vector.load %arg13[%c96_128, %c0_129] : memref<128x72xf32, #tpu.memory_space<vmem>>, vector<8x72xf32>
    tpu.vector_store %arg13[%c96_128, %c0_129], %158 {strides = array<i32>} : memref<128x72xf32, #tpu.memory_space<vmem>>, vector<8x72xf32>,
    %160 = vector.extract_strided_slice %154 {offsets = [8, 0], sizes = [8, 288], strides = [1, 1]} : vector<16x288xf32> to vector<8x288xf32>
    %c13 = arith.constant 13 : index
    %c0_130 = arith.constant 0 : index
    %c0_131 = arith.constant 0 : index
    %161 = vector.load %arg5[%c13, %c0_130, %c0_131] : memref<16x288x72xf32, #tpu.memory_space<vmem>>, vector<1x288x72xf32>
    %162 = vector.shape_cast %161 : vector<1x288x72xf32> to vector<288x72xf32>
    %cst_132 = arith.constant dense<0.000000e+00> : vector<8x72xf32>
    %163 = tpu.matmul %160, %162, %cst_132 {dimension_numbers = #tpu.dot_dimension_numbers<[1], [0], [0], [1], [0, 0, 1, 1], [], []>} : vector<8x288xf32>, vector<288x72xf32>, vector<8x72xf32> -> vector<8x72xf32>
    %c104 = arith.constant 104 : index
    %c0_133 = arith.constant 0 : index
    %164 = vector.load %arg13[%c104, %c0_133] : memref<128x72xf32, #tpu.memory_space<vmem>>, vector<8x72xf32>
    tpu.vector_store %arg13[%c104, %c0_133], %163 {strides = array<i32>} : memref<128x72xf32, #tpu.memory_space<vmem>>, vector<8x72xf32>,
    %c112 = arith.constant 112 : index
    %c0_134 = arith.constant 0 : index
    %165 = vector.load %arg12[%c112, %c0_134] : memref<128x288xf32, #tpu.memory_space<vmem>>, vector<16x288xf32>
    %c7_135 = arith.constant 7 : index
    %c0_136 = arith.constant 0 : index
    %c0_137 = arith.constant 0 : index
    %166 = vector.load %arg3[%c7_135, %c0_136, %c0_137] : memref<8x288x288xf32, #tpu.memory_space<vmem>>, vector<1x288x288xf32>
    %167 = vector.shape_cast %166 : vector<1x288x288xf32> to vector<288x288xf32>
    %cst_138 = arith.constant dense<0.000000e+00> : vector<16x288xf32>
    %168 = tpu.matmul %165, %167, %cst_138 {dimension_numbers = #tpu.dot_dimension_numbers<[1], [0], [0], [1], [0, 0, 1, 1], [], []>} : vector<16x288xf32>, vector<288x288xf32>, vector<16x288xf32> -> vector<16x288xf32>
    %c112_139 = arith.constant 112 : index
    %c0_140 = arith.constant 0 : index
    %169 = vector.load %arg4[%c112_139, %c0_140] : memref<128x1xf32, #tpu.memory_space<vmem>>, vector<16x1xf32>
    %170 = vector.broadcast %169 : vector<16x1xf32> to vector<16x288xf32>
    %171 = arith.addf %168, %170 : vector<16x288xf32>
    %cst_141 = arith.constant 0.000000e+00 : f32
    %172 = vector.broadcast %cst_141 : f32 to vector<16x288xf32>
    %173 = arith.cmpf ogt, %171, %172 : vector<16x288xf32>
    %174 = math.exp %171 : vector<16x288xf32>
    %cst_142 = arith.constant 1.000000e+00 : f32
    %175 = vector.broadcast %cst_142 : f32 to vector<16x288xf32>
    %176 = arith.subf %174, %175 : vector<16x288xf32>
    %177 = arith.select %173, %171, %176 : vector<16x288xi1>, vector<16x288xf32>
    %178 = vector.extract_strided_slice %177 {offsets = [0, 0], sizes = [8, 288], strides = [1, 1]} : vector<16x288xf32> to vector<8x288xf32>
    %c14 = arith.constant 14 : index
    %c0_143 = arith.constant 0 : index
    %c0_144 = arith.constant 0 : index
    %179 = vector.load %arg5[%c14, %c0_143, %c0_144] : memref<16x288x72xf32, #tpu.memory_space<vmem>>, vector<1x288x72xf32>
    %180 = vector.shape_cast %179 : vector<1x288x72xf32> to vector<288x72xf32>
    %cst_145 = arith.constant dense<0.000000e+00> : vector<8x72xf32>
    %181 = tpu.matmul %178, %180, %cst_145 {dimension_numbers = #tpu.dot_dimension_numbers<[1], [0], [0], [1], [0, 0, 1, 1], [], []>} : vector<8x288xf32>, vector<288x72xf32>, vector<8x72xf32> -> vector<8x72xf32>
    %c112_146 = arith.constant 112 : index
    %c0_147 = arith.constant 0 : index
    %182 = vector.load %arg13[%c112_146, %c0_147] : memref<128x72xf32, #tpu.memory_space<vmem>>, vector<8x72xf32>
    tpu.vector_store %arg13[%c112_146, %c0_147], %181 {strides = array<i32>} : memref<128x72xf32, #tpu.memory_space<vmem>>, vector<8x72xf32>,
    %183 = vector.extract_strided_slice %177 {offsets = [8, 0], sizes = [8, 288], strides = [1, 1]} : vector<16x288xf32> to vector<8x288xf32>
    %c15 = arith.constant 15 : index
    %c0_148 = arith.constant 0 : index
    %c0_149 = arith.constant 0 : index
    %184 = vector.load %arg5[%c15, %c0_148, %c0_149] : memref<16x288x72xf32, #tpu.memory_space<vmem>>, vector<1x288x72xf32>
    %185 = vector.shape_cast %184 : vector<1x288x72xf32> to vector<288x72xf32>
    %cst_150 = arith.constant dense<0.000000e+00> : vector<8x72xf32>
    %186 = tpu.matmul %183, %185, %cst_150 {dimension_numbers = #tpu.dot_dimension_numbers<[1], [0], [0], [1], [0, 0, 1, 1], [], []>} : vector<8x288xf32>, vector<288x72xf32>, vector<8x72xf32> -> vector<8x72xf32>
    %c120 = arith.constant 120 : index
    %c0_151 = arith.constant 0 : index
    %187 = vector.load %arg13[%c120, %c0_151] : memref<128x72xf32, #tpu.memory_space<vmem>>, vector<8x72xf32>
    tpu.vector_store %arg13[%c120, %c0_151], %186 {strides = array<i32>} : memref<128x72xf32, #tpu.memory_space<vmem>>, vector<8x72xf32>,
    %c0_152 = arith.constant 0 : index
    %c0_153 = arith.constant 0 : index
    %188 = vector.load %arg6[%c0_152, %c0_153] : memref<128x128xf32, #tpu.memory_space<vmem>>, vector<128x128xf32>
    %c0_154 = arith.constant 0 : index
    %c0_155 = arith.constant 0 : index
    %189 = vector.load %arg13[%c0_154, %c0_155] : memref<128x72xf32, #tpu.memory_space<vmem>>, vector<128x72xf32>
    %cst_156 = arith.constant dense<0.000000e+00> : vector<128x72xf32>
    %190 = tpu.matmul %188, %189, %cst_156 {dimension_numbers = #tpu.dot_dimension_numbers<[1], [0], [0], [1], [0, 0, 1, 1], [], []>} : vector<128x128xf32>, vector<128x72xf32>, vector<128x72xf32> -> vector<128x72xf32>
    %c0_157 = arith.constant 0 : index
    %c0_158 = arith.constant 0 : index
    %191 = vector.load %arg7[%c0_157, %c0_158] : memref<128x1xf32, #tpu.memory_space<vmem>>, vector<128x1xf32>
    %192 = vector.broadcast %191 : vector<128x1xf32> to vector<128x72xf32>
    %193 = arith.addf %190, %192 : vector<128x72xf32>
    %cst_159 = arith.constant 0.000000e+00 : f32
    %194 = vector.broadcast %cst_159 : f32 to vector<128x72xf32>
    %195 = arith.cmpf ogt, %193, %194 : vector<128x72xf32>
    %196 = math.exp %193 : vector<128x72xf32>
    %cst_160 = arith.constant 1.000000e+00 : f32
    %197 = vector.broadcast %cst_160 : f32 to vector<128x72xf32>
    %198 = arith.subf %196, %197 : vector<128x72xf32>
    %199 = arith.select %195, %193, %198 : vector<128x72xi1>, vector<128x72xf32>
    %c0_161 = arith.constant 0 : index
    %c0_162 = arith.constant 0 : index
    %c0_163 = arith.constant 0 : index
    %200 = vector.load %arg8[%c0_161, %c0_162, %c0_163] : memref<2x128x72xf32, #tpu.memory_space<vmem>>, vector<2x128x72xf32>
    %201 = vector.shape_cast %199 : vector<128x72xf32> to vector<1x128x72xf32>
    %202 = vector.broadcast %201 : vector<1x128x72xf32> to vector<2x128x72xf32>
    %203 = arith.mulf %200, %202 : vector<2x128x72xf32>
    %cst_164 = arith.constant dense<0.000000e+00> : vector<2x128xf32>
    %204 = vector.multi_reduction <add>, %203, %cst_164 [2] : vector<2x128x72xf32> to vector<2x128xf32>
    %cst_165 = arith.constant 0.000000e+00 : f32
    %205 = vector.broadcast %cst_165 : f32 to vector<6x128xf32>
    %206 = tpu.concatenate %204, %205 in 0 : vector<2x128xf32>, vector<6x128xf32> -> vector<8x128xf32>
    %c0_166 = arith.constant 0 : index
    %c0_167 = arith.constant 0 : index
    %207 = vector.load %arg9[%c0_166, %c0_167] : memref<128x8xf32, #tpu.memory_space<vmem>>, vector<128x8xf32>
    %cst_168 = arith.constant dense<0.000000e+00> : vector<8x8xf32>
    %208 = tpu.matmul %206, %207, %cst_168 {dimension_numbers = #tpu.dot_dimension_numbers<[1], [0], [0], [1], [0, 0, 1, 1], [], []>} : vector<8x128xf32>, vector<128x8xf32>, vector<8x8xf32> -> vector<8x8xf32>
    %209 = vector.extract_strided_slice %208 {offsets = [0, 0], sizes = [2, 8], strides = [1, 1]} : vector<8x8xf32> to vector<2x8xf32>
    %c0_169 = arith.constant 0 : index
    %c0_170 = arith.constant 0 : index
    %210 = vector.load %arg10[%c0_169, %c0_170] : memref<2x1xf32, #tpu.memory_space<vmem>>, vector<2x1xf32>
    %211 = vector.broadcast %210 : vector<2x1xf32> to vector<2x8xf32>
    %212 = arith.addf %209, %211 : vector<2x8xf32>
    %c0_171 = arith.constant 0 : index
    %c0_172 = arith.constant 0 : index
    %c0_173 = arith.constant 0 : index
    %213 = vector.load %arg11[%c0_171, %c0_172, %c0_173] : memref<1x2x8xf32, #tpu.memory_space<vmem>>, vector<1x2x8xf32>
    %214 = vector.shape_cast %213 : vector<1x2x8xf32> to vector<2x8xf32>
    %215 = vector.shape_cast %212 : vector<2x8xf32> to vector<1x2x8xf32>
    tpu.vector_store %arg11[%c0_171, %c0_172, %c0_173], %215 {strides = array<i32>} : memref<1x2x8xf32, #tpu.memory_space<vmem>>, vector<1x2x8xf32>,
    return
  }
  func.func @transform_0(%arg0: i32) -> (i32, i32) {
    %c0_i32 = arith.constant 0 : i32
    %c0_i32_0 = arith.constant 0 : i32
    return %arg0, %c0_i32 : i32, i32
  }
  func.func @transform_1(%arg0: i32) -> (i32, i32) {
    %c0_i32 = arith.constant 0 : i32
    %c0_i32_0 = arith.constant 0 : i32
    %c0_i32_1 = arith.constant 0 : i32
    return %c0_i32, %c0_i32_0 : i32, i32
  }
  func.func @transform_2(%arg0: i32) -> (i32, i32, i32) {
    %c0_i32 = arith.constant 0 : i32
    %c0_i32_0 = arith.constant 0 : i32
    %c0_i32_1 = arith.constant 0 : i32
    %c0_i32_2 = arith.constant 0 : i32
    return %c0_i32, %c0_i32_0, %c0_i32_1 : i32, i32, i32
  }
  func.func @transform_3(%arg0: i32) -> (i32, i32) {
    %c0_i32 = arith.constant 0 : i32
    %c0_i32_0 = arith.constant 0 : i32
    %c0_i32_1 = arith.constant 0 : i32
    return %c0_i32, %c0_i32_0 : i32, i32
  }
  func.func @transform_4(%arg0: i32) -> (i32, i32, i32) {
    %c0_i32 = arith.constant 0 : i32
    %c0_i32_0 = arith.constant 0 : i32
    %c0_i32_1 = arith.constant 0 : i32
    %c0_i32_2 = arith.constant 0 : i32
    return %c0_i32, %c0_i32_0, %c0_i32_1 : i32, i32, i32
  }
  func.func @transform_5(%arg0: i32) -> (i32, i32) {
    %c0_i32 = arith.constant 0 : i32
    %c0_i32_0 = arith.constant 0 : i32
    %c0_i32_1 = arith.constant 0 : i32
    return %c0_i32, %c0_i32_0 : i32, i32
  }
  func.func @transform_6(%arg0: i32) -> (i32, i32) {
    %c0_i32 = arith.constant 0 : i32
    %c0_i32_0 = arith.constant 0 : i32
    %c0_i32_1 = arith.constant 0 : i32
    return %c0_i32, %c0_i32_0 : i32, i32
  }
  func.func @transform_7(%arg0: i32) -> (i32, i32, i32) {
    %c0_i32 = arith.constant 0 : i32
    %c0_i32_0 = arith.constant 0 : i32
    %c0_i32_1 = arith.constant 0 : i32
    %c0_i32_2 = arith.constant 0 : i32
    return %c0_i32, %c0_i32_0, %c0_i32_1 : i32, i32, i32
  }
  func.func @transform_8(%arg0: i32) -> (i32, i32) {
    %c0_i32 = arith.constant 0 : i32
    %c0_i32_0 = arith.constant 0 : i32
    %c0_i32_1 = arith.constant 0 : i32
    return %c0_i32, %c0_i32_0 : i32, i32
  }
  func.func @transform_9(%arg0: i32) -> (i32, i32) {
    %c0_i32 = arith.constant 0 : i32
    %c0_i32_0 = arith.constant 0 : i32
    %c0_i32_1 = arith.constant 0 : i32
    return %c0_i32, %c0_i32_0 : i32, i32
  }
  func.func @transform_10(%arg0: i32) -> (i32, i32, i32) {
    %c0_i32 = arith.constant 0 : i32
    %c0_i32_0 = arith.constant 0 : i32
    %c0_i32_1 = arith.constant 0 : i32
    return %arg0, %c0_i32, %c0_i32_0 : i32, i32, i32
  }
}

</mosaic_0001>

<bundles_post_ra>
// kernel: eegnet_forward.1
= control target key start
LH: loop header
LB: loop body
LE: loop exit
PB: predicated region body
PF: predicated region fallthrough
CT: control target
= control target key end

     0   :  { %vm276_vm0 = vcmask 719872   ;;  %vm939_vm1 = vcmask 261120   ;;  %vm13356_vm5 = vmmov 0   ;;  %vm1631_vm9 = vcmask 588800   ;;  %s19717_s0 = inlined_call_operand.vmem [shape: f32[472,288], index: 0, kind: input, shape index: {}]   ;;  %s19718_s1 = inlined_call_operand.vmem [shape: f32[128,472], index: 1, kind: input, shape index: {}]   ;;  %s19719_s2 = inlined_call_operand.vmem [shape: f32[8,288,288], index: 2, kind: input, shape index: {}]   ;;  %s19720_s3 = inlined_call_operand.vmem [shape: f32[128,1], index: 3, kind: input, shape index: {}]   ;;  %s19721_s6 = inlined_call_operand.vmem [shape: f32[128,1], index: 6, kind: input, shape index: {}]   ;;  %s19722_s4 = inlined_call_operand.vmem [shape: f32[16,288,72], index: 4, kind: input, shape index: {}]   ;;  %s19723_s5 = inlined_call_operand.vmem [shape: f32[128,128], index: 5, kind: input, shape index: {}]   ;;  %s19724_s7 = inlined_call_operand.vmem [shape: f32[2,128,72], index: 7, kind: input, shape index: {}]   ;;  %s19725_s8 = inlined_call_operand.vmem [shape: f32[128,8], index: 8, kind: input, shape index: {}]   ;;  %s19726_s9 = inlined_call_operand.vmem [shape: f32[2,1], index: 9, kind: input, shape index: {}]   ;;  %s19727_s10 = inlined_call_operand.vmem [shape: f32[1,2,8], index: 10, kind: output, shape index: {}]  }
   0x1   :  { %v100_v0 = vld [vmem:[%s19717_s0 + $0x8] sm:$0xff]  ;;  %v103_v1 = vld [vmem:[%s19717_s0 + $0x20] sm:$0xff]  ;;  %v149_v2 = vld [vmem:[%s19717_s0 + $0x190] sm:$0xff] }
   0x2   :  { %v11373_v3 = vpack.c.bf16 %v103_v1, %v100_v0  ;;  %v152_v4 = vld [vmem:[%s19717_s0 + $0x1a8] sm:$0xff]  ;;  %v99_v5 = vld [vmem:[%s19717_s0] sm:$0xff]  ;;  %v102_v6 = vld [vmem:[%s19717_s0 + $0x18] sm:$0xff] }
   0x3   :  { %v11489_v7 = vpack.c.bf16 %v152_v4, %v149_v2  ;;  %v11375_v8 = vpack.c.bf16 %v102_v6, %v99_v5  ;;  %v101_v9 = vld [vmem:[%s19717_s0 + $0x10] sm:$0xff]  ;;  %v104_v10 = vld [vmem:[%s19717_s0 + $0x28] sm:$0xff]  ;;  %v106_v11 = vld [vmem:[%s19717_s0 + $0x38] sm:$0xff] }
   0x4   :  { %11374 = vmatprep.subr.bf16.mxu0 %v11373_v3  ;;  %v11491_v12 = vpack.c.bf16 %v104_v10, %v101_v9  ;;  %v109_v13 = vld [vmem:[%s19717_s0 + $0x50] sm:$0xff]  ;;  %v155_v14 = vld [vmem:[%s19717_s0 + $0x1c0] sm:$0xff]  ;;  %v158_v15 = vld [vmem:[%s19717_s0 + $0x1d8] sm:$0xff] }
   0x5   :  { %11490 = vmatprep.subr.bf16.mxu1 %v11489_v7  ;;  %11376 = vmatpush1.bf16.msra.mxu0 %v11375_v8  ;;  %v11377_v16 = vpack.c.bf16 %v109_v13, %v106_v11  ;;  %v11493_v17 = vpack.c.bf16 %v158_v15, %v155_v14  ;;  %v105_v18 = vld [vmem:[%s19717_s0 + $0x30] sm:$0xff]  ;;  %v108_v19 = vld [vmem:[%s19717_s0 + $0x48] sm:$0xff]  ;;  %v107_v20 = vld [vmem:[%s19717_s0 + $0x40] sm:$0xff] }
   0x6   :  { %11492 = vmatpush3.bf16.msra.mxu1 %v11491_v12  ;;  %v11379_v21 = vpack.c.bf16 %v108_v19, %v105_v18  ;;  %v110_v22 = vld [vmem:[%s19717_s0 + $0x58] sm:$0xff]  ;;  %v112_v23 = vld [vmem:[%s19717_s0 + $0x68] sm:$0xff]  ;;  %v115_v24 = vld [vmem:[%s19717_s0 + $0x80] sm:$0xff] }
   0x7   :  { %11378 = vmatprep.subr.bf16.mxu0 %v11377_v16  ;;  %11494 = vmatprep.subr.bf16.mxu1 %v11493_v17  ;;  %v11495_v25 = vpack.c.bf16 %v110_v22, %v107_v20  ;;  %v11381_v26 = vpack.c.bf16 %v115_v24, %v112_v23  ;;  %v161_v27 = vld [vmem:[%s19717_s0 + $0x1f0] sm:$0xff]  ;;  %v164_v28 = vld [vmem:[%s19717_s0 + $0x208] sm:$0xff]  ;;  %v111_v29 = vld [vmem:[%s19717_s0 + $0x60] sm:$0xff] }
   0x8   :  { %v11497_v30 = vpack.c.bf16 %v164_v28, %v161_v27  ;;  %v114_v31 = vld [vmem:[%s19717_s0 + $0x78] sm:$0xff]  ;;  %v113_v32 = vld [vmem:[%s19717_s0 + $0x70] sm:$0xff]  ;;  %v116_v33 = vld [vmem:[%s19717_s0 + $0x88] sm:$0xff] }
   0x9   :  { %11380 = vmatpush1.bf16.msra.mxu0 %v11379_v21  ;;  %v11383_v34 = vpack.c.bf16 %v114_v31, %v111_v29  ;;  %v118_v35 = vld [vmem:[%s19717_s0 + $0x98] sm:$0xff]  ;;  %v121_v36 = vld [vmem:[%s19717_s0 + $0xb0] sm:$0xff]  ;;  %v167_v37 = vld [vmem:[%s19717_s0 + $0x220] sm:$0xff]  ;;  %v11499_v38 = vpack.c.bf16 %v116_v33, %v113_v32 }
   0xa   :  { %11496 = vmatpush3.bf16.msra.mxu1 %v11495_v25  ;;  %11382 = vmatprep.subr.bf16.mxu0 %v11381_v26  ;;  %v11385_v39 = vpack.c.bf16 %v121_v36, %v118_v35  ;;  %v170_v40 = vld [vmem:[%s19717_s0 + $0x238] sm:$0xff]  ;;  %v117_v41 = vld [vmem:[%s19717_s0 + $0x90] sm:$0xff]  ;;  %v120_v42 = vld [vmem:[%s19717_s0 + $0xa8] sm:$0xff] }
   0xb   :  { %11498 = vmatprep.subr.bf16.mxu1 %v11497_v30  ;;  %v11501_v43 = vpack.c.bf16 %v170_v40, %v167_v37  ;;  %v119_v44 = vld [vmem:[%s19717_s0 + $0xa0] sm:$0xff]  ;;  %v122_v45 = vld [vmem:[%s19717_s0 + $0xb8] sm:$0xff]  ;;  %v124_v46 = vld [vmem:[%s19717_s0 + $0xc8] sm:$0xff]  ;;  %v11387_v50 = vpack.c.bf16 %v120_v42, %v117_v41 }
   0xc   :  { %v127_v47 = vld [vmem:[%s19717_s0 + $0xe0] sm:$0xff]  ;;  %v173_v48 = vld [vmem:[%s19717_s0 + $0x250] sm:$0xff]  ;;  %v176_v49 = vld [vmem:[%s19717_s0 + $0x268] sm:$0xff]  ;;  %v11503_v51 = vpack.c.bf16 %v122_v45, %v119_v44 }
   0xd   :  { %11384 = vmatpush1.bf16.msra.mxu0 %v11383_v34  ;;  %v11389_v52 = vpack.c.bf16 %v127_v47, %v124_v46  ;;  %v123_v53 = vld [vmem:[%s19717_s0 + $0xc0] sm:$0xff]  ;;  %v126_v54 = vld [vmem:[%s19717_s0 + $0xd8] sm:$0xff]  ;;  %v125_v55 = vld [vmem:[%s19717_s0 + $0xd0] sm:$0xff]  ;;  %v11505_v56 = vpack.c.bf16 %v176_v49, %v173_v48 }
   0xe   :  { %11500 = vmatpush3.bf16.msra.mxu1 %v11499_v38  ;;  %11386 = vmatprep.subr.bf16.mxu0 %v11385_v39  ;;  %v128_v57 = vld [vmem:[%s19717_s0 + $0xe8] sm:$0xff]  ;;  %v130_v58 = vld [vmem:[%s19717_s0 + $0xf8] sm:$0xff]  ;;  %v133_v59 = vld [vmem:[%s19717_s0 + $0x110] sm:$0xff]  ;;  %v11391_v62 = vpack.c.bf16 %v126_v54, %v123_v53 }
   0xf   :  { %11502 = vmatprep.subr.bf16.mxu1 %v11501_v43  ;;  %v179_v60 = vld [vmem:[%s19717_s0 + $0x280] sm:$0xff]  ;;  %v182_v61 = vld [vmem:[%s19717_s0 + $0x298] sm:$0xff]  ;;  %v11507_v63 = vpack.c.bf16 %v128_v57, %v125_v55  ;;  %v11393_v0 = vpack.c.bf16 %v133_v59, %v130_v58  ;;  %v129_v1 = vld [vmem:[%s19717_s0 + $0xf0] sm:$0xff] }
  0x10   :  { %v132_v2 = vld [vmem:[%s19717_s0 + $0x108] sm:$0xff]  ;;  %v131_v3 = vld [vmem:[%s19717_s0 + $0x100] sm:$0xff]  ;;  %v11509_v4 = vpack.c.bf16 %v182_v61, %v179_v60  ;;  %v134_v5 = vld [vmem:[%s19717_s0 + $0x118] sm:$0xff] }
  0x11   :  { %11388 = vmatpush1.bf16.msra.mxu0 %v11387_v50  ;;  %v136_v6 = vld [vmem:[%s19717_s0 + $0x128] sm:$0xff]  ;;  %v139_v7 = vld [vmem:[%s19717_s0 + $0x140] sm:$0xff]  ;;  %v185_v8 = vld [vmem:[%s19717_s0 + $0x2b0] sm:$0xff]  ;;  %v11395_v10 = vpack.c.bf16 %v132_v2, %v129_v1  ;;  %v11511_v12 = vpack.c.bf16 %v134_v5, %v131_v3  ;;  %v13353_v50 = vmov 0.0|0.0  }
  0x12   :  { %11504 = vmatpush3.bf16.msra.mxu1 %v11503_v51  ;;  %11390 = vmatprep.subr.bf16.mxu0 %v11389_v52  ;;  %v188_v9 = vld [vmem:[%s19717_s0 + $0x2c8] sm:$0xff]  ;;  %v135_v11 = vld [vmem:[%s19717_s0 + $0x120] sm:$0xff]  ;;  %v11397_v13 = vpack.c.bf16 %v139_v7, %v136_v6  ;;  %v138_v14 = vld [vmem:[%s19717_s0 + $0x138] sm:$0xff] }
  0x13   :  { %11506 = vmatprep.subr.bf16.mxu1 %v11505_v56  ;;  %v137_v15 = vld [vmem:[%s19717_s0 + $0x130] sm:$0xff]  ;;  %v36_v16 = vld [vmem:[%s19718_s1 + $0x8] sm:$0xff]  ;;  %v11513_v17 = vpack.c.bf16 %v188_v9, %v185_v8  ;;  %v142_v19 = vld [vmem:[%s19717_s0 + $0x158] sm:$0xff]  ;;  %v11399_v23 = vpack.c.bf16 %v138_v14, %v135_v11 }
  0x14   :  { %v140_v18 = vld [vmem:[%s19717_s0 + $0x148] sm:$0xff]  ;;  %v145_v20 = vld [vmem:[%s19717_s0 + $0x170] sm:$0xff]  ;;  %711 = vmatprep.mubr.f32.mxu1 %v36_v16  ;;  %v191_v21 = vld [vmem:[%s19717_s0 + $0x2e0] sm:$0xff]  ;;  %389 = vmatprep.mubr.f32.mxu0 %v36_v16 }
  0x15   :  { %11392 = vmatpush1.bf16.msra.mxu0 %v11391_v62  ;;  %v194_v22 = vld [vmem:[%s19717_s0 + $0x2f8] sm:$0xff]  ;;  %v11515_v24 = vpack.c.bf16 %v140_v18, %v137_v15  ;;  %v11401_v25 = vpack.c.bf16 %v145_v20, %v142_v19  ;;  %v141_v26 = vld [vmem:[%s19717_s0 + $0x150] sm:$0xff]  ;;  %v144_v27 = vld [vmem:[%s19717_s0 + $0x168] sm:$0xff] }
  0x16   :  { %11508 = vmatpush3.bf16.msra.mxu1 %v11507_v63  ;;  %11394 = vmatprep.subr.bf16.mxu0 %v11393_v0  ;;  %v143_v28 = vld [vmem:[%s19717_s0 + $0x160] sm:$0xff]  ;;  %v11517_v29 = vpack.c.bf16 %v194_v22, %v191_v21  ;;  %v146_v30 = vld [vmem:[%s19717_s0 + $0x178] sm:$0xff]  ;;  %v148_v31 = vld [vmem:[%s19717_s0 + $0x188] sm:$0xff]  ;;  %v11403_v33 = vpack.c.bf16 %v144_v27, %v141_v26 }
  0x17   :  { %11510 = vmatprep.subr.bf16.mxu1 %v11509_v4  ;;  %v151_v32 = vld [vmem:[%s19717_s0 + $0x1a0] sm:$0xff]  ;;  %v11519_v34 = vpack.c.bf16 %v146_v30, %v143_v28  ;;  %v150_v37 = vld [vmem:[%s19717_s0 + $0x198] sm:$0xff]  ;;  %v157_v39 = vld [vmem:[%s19717_s0 + $0x1d0] sm:$0xff] }
  0x18   :  { %v11405_v35 = vpack.c.bf16 %v151_v32, %v148_v31  ;;  %v147_v36 = vld [vmem:[%s19717_s0 + $0x180] sm:$0xff]  ;;  %v154_v38 = vld [vmem:[%s19717_s0 + $0x1b8] sm:$0xff]  ;;  %v197_v40 = vld [vmem:[%s19717_s0 + $0x310] sm:$0xff] }
  0x19   :  { %11396 = vmatpush1.bf16.msra.mxu0 %v11395_v10  ;;  %v200_v41 = vld [vmem:[%s19717_s0 + $0x328] sm:$0xff]  ;;  %v11407_v42 = vpack.c.bf16 %v150_v37, %v147_v36  ;;  %v13634_v43 = vld [vmem:[%s19718_s1] sm:$0xff]  ;;  %v11409_v44 = vpack.c.bf16 %v157_v39, %v154_v38  ;;  %v153_v45 = vld [vmem:[%s19717_s0 + $0x1b0] sm:$0xff] }
  0x1a   :  { %11512 = vmatpush3.bf16.msra.mxu1 %v11511_v12  ;;  %11398 = vmatprep.subr.bf16.mxu0 %v11397_v13  ;;  %v156_v46 = vld [vmem:[%s19717_s0 + $0x1c8] sm:$0xff]  ;;  %v163_v49 = vld [vmem:[%s19717_s0 + $0x200] sm:$0xff]  ;;  %v11522_v51 = vpack.c.bf16 %v200_v41, %v197_v40  ;;  %v206_v53 = vld [vmem:[%s19717_s0 + $0x358] sm:$0xff] }
  0x1b   :  { %11514 = vmatprep.subr.bf16.mxu1 %v11513_v17  ;;  %v13645_v47 = vld [vmem:[%s19718_s1 + $0x28] sm:$0xff]  ;;  %v203_v52 = vld [vmem:[%s19717_s0 + $0x340] sm:$0xff]  ;;  %v11411_v54 = vpack.c.bf16 %v156_v46, %v153_v45  ;;  %v162_v58 = vld [vmem:[%s19717_s0 + $0x1f8] sm:$0xff] }
  0x1c   :  { %v160_v48 = vld [vmem:[%s19717_s0 + $0x1e8] sm:$0xff]  ;;  %v13665_v55 = vld [vmem:[%s19718_s1 + $0x20] sm:$0xff]  ;;  %v166_v60 = vld [vmem:[%s19717_s0 + $0x218] sm:$0xff]  ;;  %v11525_v62 = vpack.c.bf16 %v206_v53, %v203_v52 }
  0x1d   :  { %11400 = vmatpush1.bf16.msra.mxu0 %v11399_v23  ;;  %v11413_v56 = vpack.c.bf16 %v163_v49, %v160_v48  ;;  %v159_v57 = vld [vmem:[%s19717_s0 + $0x1e0] sm:$0xff]  ;;  %v13676_v59 = vld [vmem:[%s19718_s1 + $0x48] sm:$0xff]  ;;  %v169_v61 = vld [vmem:[%s19717_s0 + $0x230] sm:$0xff] }
  0x1e   :  { %11516 = vmatpush3.bf16.msra.mxu1 %v11515_v24  ;;  %11402 = vmatprep.subr.bf16.mxu0 %v11401_v25  ;;  %v209_v63 = vld [vmem:[%s19717_s0 + $0x370] sm:$0xff]  ;;  %v212_v0 = vld [vmem:[%s19717_s0 + $0x388] sm:$0xff]  ;;  %v11415_v1 = vpack.c.bf16 %v162_v58, %v159_v57  ;;  %v13696_v2 = vld [vmem:[%s19718_s1 + $0x40] sm:$0xff]  ;;  %v11417_v3 = vpack.c.bf16 %v169_v61, %v166_v60 }
  0x1f   :  { %11518 = vmatprep.subr.bf16.mxu1 %v11517_v29  ;;  %v165_v4 = vld [vmem:[%s19717_s0 + $0x210] sm:$0xff]  ;;  %v168_v5 = vld [vmem:[%s19717_s0 + $0x228] sm:$0xff]  ;;  %v175_v8 = vld [vmem:[%s19717_s0 + $0x260] sm:$0xff]  ;;  %v11528_v9 = vpack.c.bf16 %v212_v0, %v209_v63 }
  0x20   :  { %v13707_v6 = vld [vmem:[%s19718_s1 + $0x68] sm:$0xff]  ;;  %v215_v10 = vld [vmem:[%s19717_s0 + $0x3a0] sm:$0xff]  ;;  %v218_v11 = vld [vmem:[%s19717_s0 + $0x3b8] sm:$0xff]  ;;  %v11419_v12 = vpack.c.bf16 %v168_v5, %v165_v4 }
  0x21   :  { %11404 = vmatpush1.bf16.msra.mxu0 %v11403_v33  ;;  %v172_v7 = vld [vmem:[%s19717_s0 + $0x248] sm:$0xff]  ;;  %v13727_v13 = vld [vmem:[%s19718_s1 + $0x60] sm:$0xff]  ;;  %v174_v16 = vld [vmem:[%s19717_s0 + $0x258] sm:$0xff]  ;;  %v11531_v20 = vpack.c.bf16 %v218_v11, %v215_v10 }
  0x22   :  { %11520 = vmatpush3.bf16.msra.mxu1 %v11519_v34  ;;  %11406 = vmatprep.subr.bf16.mxu0 %v11405_v35  ;;  %v11421_v14 = vpack.c.bf16 %v175_v8, %v172_v7  ;;  %v171_v15 = vld [vmem:[%s19717_s0 + $0x240] sm:$0xff]  ;;  %v13738_v17 = vld [vmem:[%s19718_s1 + $0x88] sm:$0xff]  ;;  %v178_v18 = vld [vmem:[%s19717_s0 + $0x278] sm:$0xff] }
  0x23   :  { %11521 = vmatprep.subr.bf16.mxu1 %v13353_v50  ;;  %v181_v19 = vld [vmem:[%s19717_s0 + $0x290] sm:$0xff]  ;;  %v224_v22 = vld [vmem:[%s19717_s0 + $0x3e8] sm:$0xff]  ;;  %v11423_v23 = vpack.c.bf16 %v174_v16, %v171_v15  ;;  %v13758_v24 = vld [vmem:[%s19718_s1 + $0x80] sm:$0xff] }
  0x24   :  { %v221_v21 = vld [vmem:[%s19717_s0 + $0x3d0] sm:$0xff]  ;;  %v11425_v25 = vpack.c.bf16 %v181_v19, %v178_v18  ;;  %v180_v27 = vld [vmem:[%s19717_s0 + $0x288] sm:$0xff]  ;;  %v187_v30 = vld [vmem:[%s19717_s0 + $0x2c0] sm:$0xff] }
  0x25   :  { %712 = vmatmul.mubr.f32.vlgmr.msra.gmra.mrb[0].mxu1 %v13634_v43  ;;  %11408 = vmatpush1.bf16.msra.mxu0 %v11407_v42  ;;  %v177_v26 = vld [vmem:[%s19717_s0 + $0x270] sm:$0xff]  ;;  %v13769_v28 = vld [vmem:[%s19718_s1 + $0xa8] sm:$0xff]  ;;  %v11534_v31 = vpack.c.bf16 %v224_v22, %v221_v21  ;;  %v227_v32 = vld [vmem:[%s19717_s0 + $0x400] sm:$0xff] }
  0x26   :  { %716 = vmatprep.mubr.f32.mxu1 %v13645_v47  ;;  %11410 = vmatprep.subr.bf16.mxu0 %v11409_v44  ;;  %v184_v29 = vld [vmem:[%s19717_s0 + $0x2a8] sm:$0xff]  ;;  %v230_v33 = vld [vmem:[%s19717_s0 + $0x418] sm:$0xff]  ;;  %v11427_v34 = vpack.c.bf16 %v180_v27, %v177_v26  ;;  %v13789_v35 = vld [vmem:[%s19718_s1 + $0xa0] sm:$0xff] }
  0x27   :  { %11523 = vmatpush1.bf16.msra.mxu1 %v11522_v51  ;;  %v11429_v36 = vpack.c.bf16 %v187_v30, %v184_v29  ;;  %v183_v37 = vld [vmem:[%s19717_s0 + $0x2a0] sm:$0xff]  ;;  %v186_v38 = vld [vmem:[%s19717_s0 + $0x2b8] sm:$0xff]  ;;  %v13800_v39 = vld [vmem:[%s19718_s1 + $0xc8] sm:$0xff]  ;;  %v11537_v42 = vpack.c.bf16 %v230_v33, %v227_v32 }
  0x28   :  { %11524 = vmatprep.subr.bf16.mxu1 %v13353_v50  ;;  %v190_v40 = vld [vmem:[%s19717_s0 + $0x2d8] sm:$0xff]  ;;  %v193_v41 = vld [vmem:[%s19717_s0 + $0x2f0] sm:$0xff]  ;;  %v236_v45 = vld [vmem:[%s19717_s0 + $0x448] sm:$0xff]  ;;  %v11431_v46 = vpack.c.bf16 %v186_v38, %v183_v37 }
  0x29   :  { %717 = vmatmul.mubr.f32.gmra.mrb[2].mxu1 %v13665_v55  ;;  %11412 = vmatpush1.bf16.msra.mxu0 %v11411_v54  ;;  %v233_v44 = vld [vmem:[%s19717_s0 + $0x430] sm:$0xff]  ;;  %v13820_v48 = vld [vmem:[%s19718_s1 + $0xc0] sm:$0xff]  ;;  %v11433_v49 = vpack.c.bf16 %v193_v41, %v190_v40  ;;  %v192_v52 = vld [vmem:[%s19717_s0 + $0x2e8] sm:$0xff] }
  0x2a   :  { %721 = vmatprep.mubr.f32.mxu1 %v13676_v59  ;;  %11414 = vmatprep.subr.bf16.mxu0 %v11413_v56  ;;  %v189_v51 = vld [vmem:[%s19717_s0 + $0x2d0] sm:$0xff]  ;;  %v13831_v53 = vld [vmem:[%s19718_s1 + $0xe8] sm:$0xff]  ;;  %v199_v56 = vld [vmem:[%s19717_s0 + $0x320] sm:$0xff]  ;;  %v11540_v57 = vpack.c.bf16 %v236_v45, %v233_v44 }
  0x2b   :  { %11526 = vmatpush1.bf16.msra.mxu1 %v11525_v62  ;;  %v196_v54 = vld [vmem:[%s19717_s0 + $0x308] sm:$0xff]  ;;  %v239_v58 = vld [vmem:[%s19717_s0 + $0x460] sm:$0xff]  ;;  %v242_v60 = vld [vmem:[%s19717_s0 + $0x478] sm:$0xff]  ;;  %v11435_v61 = vpack.c.bf16 %v192_v52, %v189_v51 }
  0x2c   :  { %11527 = vmatprep.subr.bf16.mxu1 %v13353_v50  ;;  %v13851_v62 = vld [vmem:[%s19718_s1 + $0xe0] sm:$0xff]  ;;  %v11437_v63 = vpack.c.bf16 %v199_v56, %v196_v54  ;;  %v202_v4 = vld [vmem:[%s19717_s0 + $0x338] sm:$0xff]  ;;  %v11543_v5 = vpack.c.bf16 %v242_v60, %v239_v58  ;;  %v205_v7 = vld [vmem:[%s19717_s0 + $0x350] sm:$0xff] }
  0x2d   :  { %722 = vmatmul.mubr.f32.gmra.mrb[4].mxu1 %v13696_v2  ;;  %11416 = vmatpush1.bf16.msra.mxu0 %v11415_v1  ;;  %v195_v0 = vld [vmem:[%s19717_s0 + $0x300] sm:$0xff]  ;;  %v198_v1 = vld [vmem:[%s19717_s0 + $0x318] sm:$0xff]  ;;  %v245_v8 = vld [vmem:[%s19717_s0 + $0x490] sm:$0xff]  ;;  %v11441_v16 = vpack.c.bf16 %v205_v7, %v202_v4 }
  0x2e   :  { %726 = vmatprep.mubr.f32.mxu1 %v13707_v6  ;;  %11418 = vmatprep.subr.bf16.mxu0 %v11417_v3  ;;  %v13862_v3 = vld [vmem:[%s19718_s1 + $0x108] sm:$0xff]  ;;  %v11439_v10 = vpack.c.bf16 %v198_v1, %v195_v0  ;;  %v13882_v11 = vld [vmem:[%s19718_s1 + $0x100] sm:$0xff]  ;;  %v254_v22 = vld [vmem:[%s19717_s0 + $0x4d8] sm:$0xff] }
  0x2f   :  { %11529 = vmatpush1.bf16.msra.mxu1 %v11528_v9  ;;  %v248_v9 = vld [vmem:[%s19717_s0 + $0x4a8] sm:$0xff]  ;;  %v251_v21 = vld [vmem:[%s19717_s0 + $0x4c0] sm:$0xff]  ;;  %v214_v29 = vld [vmem:[%s19717_s0 + $0x398] sm:$0xff] }
  0x30   :  { %11530 = vmatprep.subr.bf16.mxu1 %v13353_v50  ;;  %v13893_v15 = vld [vmem:[%s19718_s1 + $0x128] sm:$0xff]  ;;  %v11546_v19 = vpack.c.bf16 %v248_v9, %v245_v8  ;;  %v207_v27 = vld [vmem:[%s19717_s0 + $0x360] sm:$0xff]  ;;  %v11549_v30 = vpack.c.bf16 %v254_v22, %v251_v21  ;;  %v257_v32 = vld [vmem:[%s19717_s0 + $0x4f0] sm:$0xff] }
  0x31   :  { %727 = vmatmul.mubr.f32.gmra.mrb[6].mxu1 %v13727_v13  ;;  %11420 = vmatpush1.bf16.msra.mxu0 %v11419_v12  ;;  %v201_v12 = vld [vmem:[%s19717_s0 + $0x330] sm:$0xff]  ;;  %v208_v18 = vld [vmem:[%s19717_s0 + $0x368] sm:$0xff]  ;;  %v263_v44 = vld [vmem:[%s19717_s0 + $0x520] sm:$0xff] }
  0x32   :  { %731 = vmatprep.mubr.f32.mxu1 %v13738_v17  ;;  %11422 = vmatprep.subr.bf16.mxu0 %v11421_v14  ;;  %v204_v14 = vld [vmem:[%s19717_s0 + $0x348] sm:$0xff]  ;;  %v213_v38 = vld [vmem:[%s19717_s0 + $0x390] sm:$0xff]  ;;  %v266_v45 = vld [vmem:[%s19717_s0 + $0x538] sm:$0xff] }
  0x33   :  { %11532 = vmatpush1.bf16.msra.mxu1 %v11531_v20  ;;  %v211_v20 = vld [vmem:[%s19717_s0 + $0x380] sm:$0xff]  ;;  %v260_v33 = vld [vmem:[%s19717_s0 + $0x508] sm:$0xff]  ;;  %v222_v52 = vld [vmem:[%s19717_s0 + $0x3d8] sm:$0xff]  ;;  %v11555_v56 = vpack.c.bf16 %v266_v45, %v263_v44 }
  0x34   :  { %11533 = vmatprep.subr.bf16.mxu1 %v13353_v50  ;;  %v11445_v26 = vpack.c.bf16 %v211_v20, %v208_v18  ;;  %v220_v40 = vld [vmem:[%s19717_s0 + $0x3c8] sm:$0xff]  ;;  %v11552_v41 = vpack.c.bf16 %v260_v33, %v257_v32  ;;  %v226_v54 = vld [vmem:[%s19717_s0 + $0x3f8] sm:$0xff]  ;;  %v269_v58 = vld [vmem:[%s19717_s0 + $0x550] sm:$0xff] }
  0x35   :  { %732 = vmatmul.mubr.f32.gmra.mrb[8].mxu1 %v13758_v24  ;;  %11424 = vmatpush1.bf16.msra.mxu0 %v11423_v23  ;;  %v11443_v23 = vpack.c.bf16 %v204_v14, %v201_v12  ;;  %v272_v60 = vld [vmem:[%s19717_s0 + $0x568] sm:$0xff]  ;;  %v235_v7 = vld [vmem:[%s19717_s0 + $0x440] sm:$0xff]  ;;  %v234_v12 = vld [vmem:[%s19717_s0 + $0x438] sm:$0xff]  ;;  %v13354_v14 = vmov 0.0  }
  0x36   :  { %736 = vmatprep.mubr.f32.mxu1 %v13769_v28  ;;  %11426 = vmatprep.subr.bf16.mxu0 %v11425_v25  ;;  %v13920_v25 = vld [vmem:[%s19718_s1 + $0x148] sm:$0xff]  ;;  %v11558_v4 = vpack.c.bf16 %v272_v60, %v269_v58  ;;  %v238_v18 = vld [vmem:[%s19717_s0 + $0x458] sm:$0xff]  ;;  %v253_v33 = vld [vmem:[%s19717_s0 + $0x4d0] sm:$0xff] }
  0x37   :  { %11535 = vmatpush1.bf16.msra.mxu1 %v11534_v31  ;;  %v217_v31 = vld [vmem:[%s19717_s0 + $0x3b0] sm:$0xff]  ;;  %v228_v1 = vld [vmem:[%s19717_s0 + $0x408] sm:$0xff]  ;;  %v250_v32 = vld [vmem:[%s19717_s0 + $0x4b8] sm:$0xff] }
  0x38   :  { %11536 = vmatprep.subr.bf16.mxu1 %v13353_v50  ;;  %v11449_v37 = vpack.c.bf16 %v217_v31, %v214_v29  ;;  %v14046_v9 = vld [vmem:[%s19718_s1 + $0x1c8] sm:$0xff]  ;;  %v14102_v29 = vld [vmem:[%s19718_s1 + $0x18] sm:$0xff]  ;;  %v271_v60 = vld [vmem:[%s19717_s0 + $0x560] sm:$0xff] }
  0x39   :  { %737 = vmatmul.mubr.f32.gmra.mrb[10].mxu1 %v13789_v35  ;;  %11428 = vmatpush1.bf16.msra.mxu0 %v11427_v34  ;;  %v14076_v21 = vld [vmem:[%s19718_s1 + $0x1e8] sm:$0xff]  ;;  %v246_v31 = vld [vmem:[%s19717_s0 + $0x498] sm:$0xff] }
  0x3a   :  { %741 = vmatprep.mubr.f32.mxu1 %v13800_v39  ;;  %11430 = vmatprep.subr.bf16.mxu0 %v11429_v36  ;;  %v13953_v36 = vld [vmem:[%s19718_s1 + $0x168] sm:$0xff]  ;;  %v14156_v44 = vld [vmem:[%s19718_s1 + $0x58] sm:$0xff] }
  0x3b   :  { %11538 = vmatpush1.bf16.msra.mxu1 %v11537_v42  ;;  %v223_v42 = vld [vmem:[%s19717_s0 + $0x3e0] sm:$0xff]  ;;  %v268_v58 = vld [vmem:[%s19717_s0 + $0x548] sm:$0xff] }
  0x3c   :  { %11539 = vmatprep.subr.bf16.mxu1 %v13353_v50  ;;  %v11453_v51 = vpack.c.bf16 %v223_v42, %v220_v40  ;;  %v256_v40 = vld [vmem:[%s19717_s0 + $0x4e8] sm:$0xff]  ;;  %v14151_v42 = vld [vmem:[%s19718_s1 + $0x30] sm:$0xff] }
  0x3d   :  { %742 = vmatmul.mubr.f32.gmra.mrb[12].mxu1 %v13820_v48  ;;  %11432 = vmatpush1.bf16.msra.mxu0 %v11431_v46 }
  0x3e   :  { %746 = vmatprep.mubr.f32.mxu1 %v13831_v53  ;;  %11434 = vmatprep.subr.bf16.mxu0 %v11433_v49  ;;  %v13986_v49 = vld [vmem:[%s19718_s1 + $0x188] sm:$0xff] }
  0x3f   :  { %11541 = vmatpush1.bf16.msra.mxu1 %v11540_v57  ;;  %v229_v57 = vld [vmem:[%s19717_s0 + $0x410] sm:$0xff] }
  0x40   :  { %11542 = vmatprep.subr.bf16.mxu1 %v13353_v50  ;;  %v11457_v0 = vpack.c.bf16 %v229_v57, %v226_v54  ;;  %v14183_v54 = vld [vmem:[%s19718_s1 + $0x78] sm:$0xff]  ;;  %v264_v57 = vld [vmem:[%s19717_s0 + $0x528] sm:$0xff] }
  0x41   :  { %747 = vmatmul.mubr.f32.gmra.mrb[14].mxu1 %v13851_v62  ;;  %11436 = vmatpush1.bf16.msra.mxu0 %v11435_v61 }
  0x42   :  { %751 = vmatprep.mubr.f32.mxu1 %v13862_v3  ;;  %11438 = vmatprep.subr.bf16.mxu0 %v11437_v63  ;;  %v14019_v63 = vld [vmem:[%s19718_s1 + $0x1a8] sm:$0xff] }
  0x43   :  { %11544 = vmatpush1.bf16.msra.mxu1 %v11543_v5  ;;  %v232_v5 = vld [vmem:[%s19717_s0 + $0x428] sm:$0xff] }
  0x44   :  { %390 = vmatmul.mubr.f32.vlgmr.msra.gmra.mrb[0].mxu0 %v13634_v43  ;;  %11545 = vmatprep.subr.bf16.mxu1 %v13353_v50  ;;  %v13915_v43 = vld [vmem:[%s19718_s1 + $0x120] sm:$0xff] }
  0x45   :  { %752 = vmatmul.mubr.f32.gmra.mrb[16].mxu1 %v13882_v11  ;;  %11440 = vmatpush1.bf16.msra.mxu0 %v11439_v10  ;;  %v11461_v10 = vpack.c.bf16 %v235_v7, %v232_v5  ;;  %v14231_v7 = vld [vmem:[%s19718_s1 + $0xb8] sm:$0xff] }
  0x46   :  { %395 = vmatprep.mubr.f32.mxu0 %v13645_v47  ;;  %756 = vmatprep.mubr.f32.mxu1 %v13893_v15  ;;  %v210_v47 = vld [vmem:[%s19717_s0 + $0x378] sm:$0xff] }
  0x47   :  { %11442 = vmatprep.subr.bf16.mxu0 %v11441_v16  ;;  %11547 = vmatpush1.bf16.msra.mxu1 %v11546_v19  ;;  %v11447_v34 = vpack.c.bf16 %v210_v47, %v207_v27  ;;  %v275_v16 = vld [vmem:[%s19717_s0 + $0x580] sm:$0xff]  ;;  %v241_v19 = vld [vmem:[%s19717_s0 + $0x470] sm:$0xff] }
  0x48   :  { %396 = vmatmul.mubr.f32.gmra.mrb[2].mxu0 %v13665_v55  ;;  %11548 = vmatprep.subr.bf16.mxu1 %v13353_v50  ;;  %v13948_v55 = vld [vmem:[%s19718_s1 + $0x140] sm:$0xff]  ;;  %v11465_v22 = vpack.c.bf16 %v241_v19, %v238_v18  ;;  %v14314_v18 = vld [vmem:[%s19718_s1 + $0x158] sm:$0xff]  ;;  %v14325_v19 = vld [vmem:[%s19718_s1 + $0x150] sm:$0xff] }
  0x49   :  { %757 = vmatmul.mubr.f32.gmra.mrb[18].mxu1 %v13915_v43  ;;  %11444 = vmatpush1.bf16.msra.mxu0 %v11443_v23  ;;  %v240_v23 = vld [vmem:[%s19717_s0 + $0x468] sm:$0xff]  ;;  %v247_v27 = vld [vmem:[%s19717_s0 + $0x4a0] sm:$0xff] }
  0x4a   :  { %401 = vmatprep.mubr.f32.mxu0 %v13676_v59  ;;  %761 = vmatprep.mubr.f32.mxu1 %v13920_v25  ;;  %v216_v59 = vld [vmem:[%s19717_s0 + $0x3a8] sm:$0xff]  ;;  %v14097_v47 = vld [vmem:[%s19718_s1 + $0x1e0] sm:$0xff] }
  0x4b   :  { %11446 = vmatprep.subr.bf16.mxu0 %v11445_v26  ;;  %11550 = vmatpush1.bf16.msra.mxu1 %v11549_v30  ;;  %v11451_v46 = vpack.c.bf16 %v216_v59, %v213_v38  ;;  %v244_v26 = vld [vmem:[%s19717_s0 + $0x488] sm:$0xff]  ;;  %v11473_v38 = vpack.c.bf16 %v253_v33, %v250_v32  ;;  %v14396_v32 = vld [vmem:[%s19718_s1 + $0x1d8] sm:$0xff] }
  0x4c   :  { %402 = vmatmul.mubr.f32.gmra.mrb[4].mxu0 %v13696_v2  ;;  %11551 = vmatprep.subr.bf16.mxu1 %v13353_v50  ;;  %v13981_v2 = vld [vmem:[%s19718_s1 + $0x160] sm:$0xff]  ;;  %v11469_v30 = vpack.c.bf16 %v247_v27, %v244_v26  ;;  %v252_v59 = vld [vmem:[%s19717_s0 + $0x4c8] sm:$0xff]  ;;  %v995_v27 = vld [vmem:[%s19719_s2 + $0x18] sm:$0xff] }
  0x4d   :  { %762 = vmatmul.mubr.f32.gmra.mrb[20].mxu1 %v13948_v55  ;;  %407 = vmatprep.mubr.f32.mxu0 %v13707_v6  ;;  %v219_v6 = vld [vmem:[%s19717_s0 + $0x3c0] sm:$0xff] }
  0x4e   :  { %11448 = vmatpush1.bf16.msra.mxu0 %v11447_v34  ;;  %766 = vmatprep.mubr.f32.mxu1 %v13953_v36  ;;  %v11455_v61 = vpack.c.bf16 %v222_v52, %v219_v6  ;;  %v14124_v34 = vld [vmem:[%s19718_s1 + $0x10] sm:$0xff]  ;;  %v992_v26 = vld [vmem:[%s19719_s2] sm:$0xff] }
  0x4f   :  { %11450 = vmatprep.subr.bf16.mxu0 %v11449_v37  ;;  %11553 = vmatpush1.bf16.msra.mxu1 %v11552_v41  ;;  %v14129_v37 = vld [vmem:[%s19718_s1 + $0x38] sm:$0xff]  ;;  %v259_v41 = vld [vmem:[%s19717_s0 + $0x500] sm:$0xff]  ;;  %v265_v6 = vld [vmem:[%s19717_s0 + $0x530] sm:$0xff] }
  0x50   :  { %408 = vmatmul.mubr.f32.gmra.mrb[6].mxu0 %v13727_v13  ;;  %11554 = vmatprep.subr.bf16.mxu1 %v13353_v50  ;;  %v14014_v13 = vld [vmem:[%s19718_s1 + $0x180] sm:$0xff]  ;;  %v11477_v45 = vpack.c.bf16 %v259_v41, %v256_v40  ;;  %v14178_v52 = vld [vmem:[%s19718_s1 + $0x50] sm:$0xff]  ;;  %v1005_v40 = vld [vmem:[%s19719_s2 + $0x68] sm:$0xff] }
  0x51   :  { %767 = vmatmul.mubr.f32.gmra.mrb[22].mxu1 %v13981_v2  ;;  %413 = vmatprep.mubr.f32.mxu0 %v13738_v17  ;;  %v225_v17 = vld [vmem:[%s19717_s0 + $0x3f0] sm:$0xff]  ;;  %v1008_v41 = vld [vmem:[%s19719_s2 + $0x80] sm:$0xff] }
  0x52   :  { %11452 = vmatpush1.bf16.msra.mxu0 %v11451_v46  ;;  %771 = vmatprep.mubr.f32.mxu1 %v13986_v49  ;;  %v11459_v8 = vpack.c.bf16 %v228_v1, %v225_v17  ;;  %v258_v46 = vld [vmem:[%s19717_s0 + $0x4f8] sm:$0xff]  ;;  %v11485_v17 = vpack.c.bf16 %v271_v60, %v268_v58  ;;  %v1020_v58 = vld [vmem:[%s19719_s2 + $0xe0] sm:$0xff] }
  0x53   :  { %11454 = vmatprep.subr.bf16.mxu0 %v11453_v51  ;;  %11556 = vmatpush1.bf16.msra.mxu1 %v11555_v56  ;;  %v262_v51 = vld [vmem:[%s19717_s0 + $0x518] sm:$0xff]  ;;  %v1016_v60 = vld [vmem:[%s19719_s2 + $0xc0] sm:$0xff] }
  0x54   :  { %414 = vmatmul.mubr.f32.gmra.mrb[8].mxu0 %v13758_v24  ;;  %11557 = vmatprep.subr.bf16.mxu1 %v13353_v50  ;;  %v14041_v24 = vld [vmem:[%s19718_s1 + $0x1a0] sm:$0xff]  ;;  %v11481_v56 = vpack.c.bf16 %v265_v6, %v262_v51  ;;  %v270_v1 = vld [vmem:[%s19717_s0 + $0x558] sm:$0xff]  ;;  %v1010_v6 = vld [vmem:[%s19719_s2 + $0x90] sm:$0xff] }
  0x55   :  { %772 = vmatmul.mubr.f32.gmra.mrb[24].mxu1 %v14014_v13  ;;  %419 = vmatprep.mubr.f32.mxu0 %v13769_v28  ;;  %v231_v28 = vld [vmem:[%s19717_s0 + $0x420] sm:$0xff] }
  0x56   :  { %776 = vmatprep.mubr.f32.mxu1 %v14019_v63  ;;  %11456 = vmatpush1.bf16.msra.mxu0 %v11455_v61  ;;  %v11463_v20 = vpack.c.bf16 %v234_v12, %v231_v28  ;;  %v14205_v61 = vld [vmem:[%s19718_s1 + $0x70] sm:$0xff]  ;;  %v14298_v12 = vld [vmem:[%s19718_s1 + $0x138] sm:$0xff] }
  0x57   :  { %11458 = vmatprep.subr.bf16.mxu0 %v11457_v0  ;;  %11559 = vmatpush1.bf16.msra.mxu1 %v11558_v4  ;;  %v14210_v0 = vld [vmem:[%s19718_s1 + $0x98] sm:$0xff]  ;;  %v14226_v4 = vld [vmem:[%s19718_s1 + $0x90] sm:$0xff] }
  0x58   :  { %420 = vmatmul.mubr.f32.gmra.mrb[10].mxu0 %v13789_v35  ;;  %844 = vmatprep.subr.mxu1 %v13354_v14  ;;  %v14071_v35 = vld [vmem:[%s19718_s1 + $0x1c0] sm:$0xff]  ;;  %v14293_v28 = vld [vmem:[%s19718_s1 + $0x110] sm:$0xff] }
  0x59   :  { %777 = vmatmul.mubr.f32.gmra.mrb[26].mxu1 %v14041_v24  ;;  %425 = vmatprep.mubr.f32.mxu0 %v13800_v39  ;;  %v237_v39 = vld [vmem:[%s19717_s0 + $0x450] sm:$0xff] }
  0x5a   :  { %781 = vmatprep.mubr.f32.mxu1 %v14046_v9  ;;  %11460 = vmatpush1.bf16.msra.mxu0 %v11459_v8  ;;  %v273_v8 = vld [vmem:[%s19717_s0 + $0x570] sm:$0xff] }
  0x5b   :  { %11462 = vmatprep.subr.bf16.mxu0 %v11461_v10  ;;  %845 = vmatpush1.msra.mxu1 %v275_v16  ;;  %v14267_v10 = vld [vmem:[%s19718_s1 + $0xf8] sm:$0xff]  ;;  %v14309_v16 = vld [vmem:[%s19718_s1 + $0x130] sm:$0xff] }
  0x5c   :  { %426 = vmatmul.mubr.f32.gmra.mrb[12].mxu0 %v13820_v48  ;;  %v11467_v48 = vpack.c.bf16 %v240_v23, %v237_v39  ;;  %v996_v39 = vld [vmem:[%s19719_s2 + $0x20] sm:$0xff] }
  0x5d   :  { %782 = vmatmul.mubr.f32.gmra.mrb[28].mxu1 %v14071_v35  ;;  %431 = vmatprep.mubr.f32.mxu0 %v13831_v53  ;;  %v243_v53 = vld [vmem:[%s19717_s0 + $0x480] sm:$0xff] }
  0x5e   :  { %786 = vmatprep.mubr.f32.mxu1 %v14076_v21  ;;  %11464 = vmatpush1.bf16.msra.mxu0 %v11463_v20  ;;  %v14341_v20 = vld [vmem:[%s19718_s1 + $0x170] sm:$0xff] }
  0x5f   :  { %11466 = vmatprep.subr.bf16.mxu0 %v11465_v22  ;;  %v993_v22 = vld [vmem:[%s19719_s2 + $0x8] sm:$0xff] }
  0x60   :  { %432 = vmatmul.mubr.f32.gmra.mrb[14].mxu0 %v13851_v62  ;;  %v11471_v62 = vpack.c.bf16 %v246_v31, %v243_v53  ;;  %v11560_v23 = vpack.c.bf16 %v996_v39, %v993_v22  ;;  %v999_v53 = vld [vmem:[%s19719_s2 + $0x38] sm:$0xff]  ;;  %v1002_v31 = vld [vmem:[%s19719_s2 + $0x50] sm:$0xff]  ;;  %v1044_v22 = vld [vmem:[%s19719_s2 + $0x1a0] sm:$0xff] }
  0x61   :  { %787 = vmatmul.mubr.f32.gmra.mrb[30].mxu1 %v14097_v47  ;;  %437 = vmatprep.mubr.f32.mxu0 %v13862_v3  ;;  %v249_v3 = vld [vmem:[%s19717_s0 + $0x4b0] sm:$0xff]  ;;  %v11564_v33 = vpack.c.bf16 %v1002_v31, %v999_v53  ;;  %v1003_v53 = vld [vmem:[%s19719_s2 + $0x58] sm:$0xff] }
  0x62   :  { %8472 = vmatprep.mubr.msk.f32.mxu1 %vm276_vm0, %v14102_v29  ;;  %11468 = vmatpush1.bf16.msra.mxu0 %v11467_v48  ;;  %v14369_v48 = vld [vmem:[%s19718_s1 + $0x190] sm:$0xff]  ;;  %v1047_v31 = vld [vmem:[%s19719_s2 + $0x1b8] sm:$0xff] }
  0x63   :  { %11470 = vmatprep.subr.bf16.mxu0 %v11469_v30  ;;  %11561 = vmatprep.subr.bf16.mxu1 %v11560_v23  ;;  %v14385_v30 = vld [vmem:[%s19718_s1 + $0x1b0] sm:$0xff]  ;;  %v1040_v23 = vld [vmem:[%s19719_s2 + $0x180] sm:$0xff] }
  0x64   :  { %438 = vmatmul.mubr.f32.gmra.mrb[16].mxu0 %v13882_v11  ;;  %v11475_v11 = vpack.c.bf16 %v252_v59, %v249_v3  ;;  %v14418_v3 = vld [vmem:[%s19718_s1 + $0x1f8] sm:$0xff]  ;;  %v14429_v59 = vld [vmem:[%s19718_s1 + $0x1f0] sm:$0xff] }
  0x65   :  { %857 = vmatmul.mubr.f32.vlgmr.msra.gmra.mrb[32].mxu1 %v14124_v34  ;;  %443 = vmatprep.mubr.f32.mxu0 %v13893_v15  ;;  %v255_v15 = vld [vmem:[%s19717_s0 + $0x4e0] sm:$0xff] }
  0x66   :  { %8473 = vmatprep.mubr.msk.f32.mxu1 %vm276_vm0, %v14129_v37  ;;  %11472 = vmatpush1.bf16.msra.mxu0 %v11471_v62  ;;  %v1001_v62 = vld [vmem:[%s19719_s2 + $0x48] sm:$0xff] }
  0x67   :  { %11474 = vmatprep.subr.bf16.mxu0 %v11473_v38  ;;  %v14413_v38 = vld [vmem:[%s19718_s1 + $0x1d0] sm:$0xff] }
  0x68   :  { %444 = vmatmul.mubr.f32.gmra.mrb[18].mxu0 %v13915_v43  ;;  %v11479_v43 = vpack.c.bf16 %v258_v46, %v255_v15  ;;  %v1011_v15 = vld [vmem:[%s19719_s2 + $0x98] sm:$0xff]  ;;  %v1014_v46 = vld [vmem:[%s19719_s2 + $0xb0] sm:$0xff] }
  0x69   :  { %862 = vmatmul.mubr.f32.gmra.mrb[34].mxu1 %v14151_v42  ;;  %449 = vmatprep.mubr.f32.mxu0 %v13920_v25  ;;  %v261_v25 = vld [vmem:[%s19717_s0 + $0x510] sm:$0xff]  ;;  %v11572_v51 = vpack.c.bf16 %v1014_v46, %v1011_v15  ;;  %v1052_v46 = vld [vmem:[%s19719_s2 + $0x1e0] sm:$0xff] }
  0x6a   :  { %8474 = vmatprep.mubr.msk.f32.mxu1 %vm276_vm0, %v14156_v44  ;;  %11476 = vmatpush1.bf16.msra.mxu0 %v11475_v11  ;;  %v1004_v11 = vld [vmem:[%s19719_s2 + $0x60] sm:$0xff] }
  0x6b   :  { %11478 = vmatprep.subr.bf16.mxu0 %v11477_v45 }
  0x6c   :  { %450 = vmatmul.mubr.f32.gmra.mrb[20].mxu0 %v13948_v55  ;;  %v11483_v55 = vpack.c.bf16 %v264_v57, %v261_v25  ;;  %v1017_v25 = vld [vmem:[%s19719_s2 + $0xc8] sm:$0xff] }
  0x6d   :  { %867 = vmatmul.mubr.f32.gmra.mrb[36].mxu1 %v14178_v52  ;;  %455 = vmatprep.mubr.f32.mxu0 %v13953_v36  ;;  %v267_v36 = vld [vmem:[%s19717_s0 + $0x540] sm:$0xff] }
  0x6e   :  { %8475 = vmatprep.mubr.msk.f32.mxu1 %vm276_vm0, %v14183_v54  ;;  %11480 = vmatpush1.bf16.msra.mxu0 %v11479_v43  ;;  %v11487_v5 = vpack.c.bf16 %v270_v1, %v267_v36 }
  0x6f   :  { %11482 = vmatprep.subr.bf16.mxu0 %v11481_v56  ;;  %v1045_v56 = vld [vmem:[%s19719_s2 + $0x1a8] sm:$0xff] }
  0x70   :  { %456 = vmatmul.mubr.f32.gmra.mrb[22].mxu0 %v13981_v2  ;;  %v274_v2 = vld [vmem:[%s19717_s0 + $0x578] sm:$0xff] }
  0x71   :  { %872 = vmatmul.mubr.f32.gmra.mrb[38].mxu1 %v14205_v61  ;;  %461 = vmatprep.mubr.f32.mxu0 %v13986_v49  ;;  %v14244_v49 = vld [vmem:[%s19718_s1 + $0xb0] sm:$0xff] }
  0x72   :  { %8476 = vmatprep.mubr.msk.f32.mxu1 %vm276_vm0, %v14210_v0  ;;  %11484 = vmatpush1.bf16.msra.mxu0 %v11483_v55  ;;  %v994_v55 = vld [vmem:[%s19719_s2 + $0x10] sm:$0xff] }
  0x73   :  { %11486 = vmatprep.subr.bf16.mxu0 %v11485_v17  ;;  %v11576_v17 = vpack.c.bf16 %v1020_v58, %v1017_v25  ;;  %v1012_v25 = vld [vmem:[%s19719_s2 + $0xa0] sm:$0xff]  ;;  %v1062_v58 = vld [vmem:[%s19719_s2 + $0x230] sm:$0xff] }
  0x74   :  { %462 = vmatmul.mubr.f32.gmra.mrb[24].mxu0 %v14014_v13  ;;  %v14249_v13 = vld [vmem:[%s19718_s1 + $0xd8] sm:$0xff] }
  0x75   :  { %877 = vmatmul.mubr.f32.gmra.mrb[40].mxu1 %v14226_v4  ;;  %467 = vmatprep.mubr.f32.mxu0 %v14019_v63  ;;  %v14262_v63 = vld [vmem:[%s19718_s1 + $0xd0] sm:$0xff] }
  0x76   :  { %8477 = vmatprep.mubr.msk.f32.mxu1 %vm276_vm0, %v14231_v7  ;;  %11488 = vmatpush1.bf16.msra.mxu0 %v11487_v5  ;;  %v1026_v5 = vld [vmem:[%s19719_s2 + $0x110] sm:$0xff] }
  0x77   :  { %538 = vmatprep.subr.mxu0 %v274_v2  ;;  %v1022_v2 = vld [vmem:[%s19719_s2 + $0xf0] sm:$0xff] }
  0x78   :  { %468 = vmatmul.mubr.f32.gmra.mrb[26].mxu0 %v14041_v24  ;;  %v14277_v24 = vld [vmem:[%s19718_s1 + $0xf0] sm:$0xff] }
  0x79   :  { %882 = vmatmul.mubr.f32.gmra.mrb[42].mxu1 %v14244_v49  ;;  %473 = vmatprep.mubr.f32.mxu0 %v14046_v9  ;;  %v14282_v9 = vld [vmem:[%s19718_s1 + $0x118] sm:$0xff] }
  0x7a   :  { %8478 = vmatprep.mubr.msk.f32.mxu1 %vm276_vm0, %v14249_v13  ;;  %539 = vmatpush1.msra.mxu0 %v273_v8  ;;  %v1029_v8 = vld [vmem:[%s19719_s2 + $0x128] sm:$0xff] }
  0x7c   :  { %474 = vmatmul.mubr.f32.gmra.mrb[28].mxu0 %v14071_v35  ;;  %v14330_v35 = vld [vmem:[%s19718_s1 + $0x178] sm:$0xff] }
  0x7d   :  { %887 = vmatmul.mubr.f32.gmra.mrb[44].mxu1 %v14262_v63  ;;  %479 = vmatprep.mubr.f32.mxu0 %v14076_v21  ;;  %v14346_v21 = vld [vmem:[%s19718_s1 + $0x198] sm:$0xff] }
  0x7e   :  { %8479 = vmatprep.mubr.msk.f32.mxu1 %vm276_vm0, %v14267_v10 }
  0x80   :  { %480 = vmatmul.mubr.f32.gmra.mrb[30].mxu0 %v14097_v47  ;;  %v11562_v47 = vpack.c.bf16 %v995_v27, %v992_v26  ;;  %v1043_v26 = vld [vmem:[%s19719_s2 + $0x198] sm:$0xff] }
  0x81   :  { %892 = vmatmul.mubr.f32.gmra.mrb[46].mxu1 %v14277_v24  ;;  %8456 = vmatprep.mubr.msk.f32.mxu0 %vm276_vm0, %v14102_v29  ;;  %v14374_v29 = vld [vmem:[%s19718_s1 + $0x1b8] sm:$0xff]  ;;  %v11594_v27 = vpack.c.bf16 %v1043_v26, %v1040_v23  ;;  %v1077_v26 = vld [vmem:[%s19719_s2 + $0x2a8] sm:$0xff] }
  0x82   :  { %8480 = vmatprep.mubr.msk.f32.mxu1 %vm276_vm0, %v14282_v9  ;;  %11563 = vmatpush1.bf16.msra.mxu1 %v11562_v47  ;;  %v1048_v47 = vld [vmem:[%s19719_s2 + $0x1c0] sm:$0xff] }
  0x83   :  { %11565 = vmatprep.subr.bf16.mxu1 %v11564_v33 }
  0x84   :  { %551 = vmatmul.mubr.f32.vlgmr.msra.gmra.mrb[0].mxu0 %v14124_v34  ;;  %v998_v34 = vld [vmem:[%s19719_s2 + $0x30] sm:$0xff] }
  0x85   :  { %897 = vmatmul.mubr.f32.gmra.mrb[48].mxu1 %v14293_v28  ;;  %8457 = vmatprep.mubr.msk.f32.mxu0 %vm276_vm0, %v14129_v37  ;;  %v11566_v37 = vpack.c.bf16 %v1001_v62, %v998_v34  ;;  %v1046_v62 = vld [vmem:[%s19719_s2 + $0x1b0] sm:$0xff] }
  0x86   :  { %8481 = vmatprep.mubr.msk.f32.mxu1 %vm276_vm0, %v14298_v12 }
  0x87   :  { %11567 = vmatpush1.bf16.msra.mxu1 %v11566_v37  ;;  %v1049_v37 = vld [vmem:[%s19719_s2 + $0x1c8] sm:$0xff] }
  0x88   :  { %557 = vmatmul.mubr.f32.gmra.mrb[2].mxu0 %v14151_v42  ;;  %v11568_v42 = vpack.c.bf16 %v1008_v41, %v1005_v40  ;;  %v1057_v40 = vld [vmem:[%s19719_s2 + $0x208] sm:$0xff] }
  0x89   :  { %902 = vmatmul.mubr.f32.gmra.mrb[50].mxu1 %v14309_v16  ;;  %8458 = vmatprep.mubr.msk.f32.mxu0 %vm276_vm0, %v14156_v44  ;;  %v1007_v44 = vld [vmem:[%s19719_s2 + $0x78] sm:$0xff]  ;;  %v1053_v41 = vld [vmem:[%s19719_s2 + $0x1e8] sm:$0xff] }
  0x8a   :  { %8482 = vmatprep.mubr.msk.f32.mxu1 %vm276_vm0, %v14314_v18  ;;  %v11570_v45 = vpack.c.bf16 %v1007_v44, %v1004_v11  ;;  %11569 = vmatprep.subr.bf16.mxu1 %v11568_v42  ;;  %v1006_v11 = vld [vmem:[%s19719_s2 + $0x70] sm:$0xff]  ;;  %v1056_v44 = vld [vmem:[%s19719_s2 + $0x200] sm:$0xff] }
  0x8b   :  { %v11600_v15 = vpack.c.bf16 %v1056_v44, %v1053_v41  ;;  %v1087_v41 = vld [vmem:[%s19719_s2 + $0x2f8] sm:$0xff] }
  0x8c   :  { %563 = vmatmul.mubr.f32.gmra.mrb[4].mxu0 %v14178_v52  ;;  %11571 = vmatpush1.bf16.msra.mxu1 %v11570_v45  ;;  %v1013_v52 = vld [vmem:[%s19719_s2 + $0xa8] sm:$0xff] }
  0x8d   :  { %907 = vmatmul.mubr.f32.gmra.mrb[52].mxu1 %v14325_v19  ;;  %8459 = vmatprep.mubr.msk.f32.mxu0 %vm276_vm0, %v14183_v54  ;;  %v11574_v43 = vpack.c.bf16 %v1013_v52, %v1010_v6  ;;  %v1042_v54 = vld [vmem:[%s19719_s2 + $0x190] sm:$0xff]  ;;  %v1060_v52 = vld [vmem:[%s19719_s2 + $0x220] sm:$0xff] }
  0x8e   :  { %8483 = vmatprep.mubr.msk.f32.mxu1 %vm276_vm0, %v14330_v35  ;;  %11573 = vmatprep.subr.bf16.mxu1 %v11572_v51  ;;  %v11632_v57 = vpack.c.bf16 %v1045_v56, %v1042_v54  ;;  %v1055_v51 = vld [vmem:[%s19719_s2 + $0x1f8] sm:$0xff] }
  0x8f   :  { %v11602_v6 = vpack.c.bf16 %v1055_v51, %v1052_v46  ;;  %v1059_v54 = vld [vmem:[%s19719_s2 + $0x218] sm:$0xff]  ;;  %v1089_v51 = vld [vmem:[%s19719_s2 + $0x308] sm:$0xff] }
  0x90   :  { %569 = vmatmul.mubr.f32.gmra.mrb[6].mxu0 %v14205_v61  ;;  %11575 = vmatpush1.bf16.msra.mxu1 %v11574_v43  ;;  %v1019_v61 = vld [vmem:[%s19719_s2 + $0xd8] sm:$0xff] }
  0x91   :  { %912 = vmatmul.mubr.f32.gmra.mrb[54].mxu1 %v14341_v20  ;;  %8460 = vmatprep.mubr.msk.f32.mxu0 %vm276_vm0, %v14210_v0  ;;  %v997_v0 = vld [vmem:[%s19719_s2 + $0x28] sm:$0xff]  ;;  %v11578_v36 = vpack.c.bf16 %v1019_v61, %v1016_v60  ;;  %v1063_v43 = vld [vmem:[%s19719_s2 + $0x238] sm:$0xff]  ;;  %v11604_v61 = vpack.c.bf16 %v1062_v58, %v1059_v54 }
  0x92   :  { %8484 = vmatprep.mubr.msk.f32.mxu1 %vm276_vm0, %v14346_v21  ;;  %11633 = vmatprep.subr.bf16.mxu0 %v11632_v57  ;;  %v11634_v1 = vpack.c.bf16 %v997_v0, %v994_v55  ;;  %v11644_v56 = vpack.c.bf16 %v1063_v43, %v1060_v52  ;;  %v1015_v57 = vld [vmem:[%s19719_s2 + $0xb8] sm:$0xff]  ;;  %v1058_v55 = vld [vmem:[%s19719_s2 + $0x210] sm:$0xff]  ;;  %v1061_v0 = vld [vmem:[%s19719_s2 + $0x228] sm:$0xff] }
  0x93   :  { %11577 = vmatprep.subr.bf16.mxu1 %v11576_v17  ;;  %v11646_v60 = vpack.c.bf16 %v1015_v57, %v1012_v25  ;;  %v11606_v17 = vpack.c.bf16 %v1061_v0, %v1058_v55  ;;  %v13355_v25 = vmov 0   ;;  %v1100_v57 = vld [vmem:[%s19720_s3] sm:$0xff]  ;;  %v1101_v55 = vld [vmem:[%s19720_s3 + $0x8] sm:$0xff] }
  0x94   :  { %575 = vmatmul.mubr.f32.gmra.mrb[8].mxu0 %v14226_v4  ;;  %v1023_v4 = vld [vmem:[%s19719_s2 + $0xf8] sm:$0xff]  ;;  %11579 = vmatpush1.bf16.msra.mxu1 %v11578_v36  ;;  %v1066_v36 = vld [vmem:[%s19719_s2 + $0x250] sm:$0xff] }
  0x95   :  { %917 = vmatmul.mubr.f32.gmra.mrb[56].mxu1 %v14369_v48  ;;  %8461 = vmatprep.mubr.msk.f32.mxu0 %vm276_vm0, %v14231_v7  ;;  %v11580_v7 = vpack.c.bf16 %v1026_v5, %v1023_v4  ;;  %v1065_v4 = vld [vmem:[%s19719_s2 + $0x248] sm:$0xff] }
  0x96   :  { %8485 = vmatprep.mubr.msk.f32.mxu1 %vm276_vm0, %v14374_v29  ;;  %11635 = vmatpush3.bf16.msra.mxu0 %v11634_v1  ;;  %v1069_v1 = vld [vmem:[%s19719_s2 + $0x268] sm:$0xff] }
  0x97   :  { %11581 = vmatprep.subr.bf16.mxu1 %v11580_v7  ;;  %v11648_v5 = vpack.c.bf16 %v1069_v1, %v1066_v36  ;;  %v1018_v7 = vld [vmem:[%s19719_s2 + $0xd0] sm:$0xff]  ;;  %13220 = vset.pattern.permute.xlu0 %v13355_v25  ;;  %v2758_v1 = vld [vmem:[%s19720_s3 + $0x20] sm:$0xff] }
  0x98   :  { %581 = vmatmul.mubr.f32.gmra.mrb[10].mxu0 %v14244_v49  ;;  %v1025_v49 = vld [vmem:[%s19719_s2 + $0x108] sm:$0xff]  ;;  %13221 = vset.pattern.permute.xlu1 %v13355_v25 }
  0x99   :  { %922 = vmatmul.mubr.f32.gmra.mrb[58].mxu1 %v14385_v30  ;;  %8462 = vmatprep.mubr.msk.f32.mxu0 %vm276_vm0, %v14249_v13  ;;  %v11582_v13 = vpack.c.bf16 %v1025_v49, %v1022_v2  ;;  %v1021_v2 = vld [vmem:[%s19719_s2 + $0xe8] sm:$0xff]  ;;  %v1068_v49 = vld [vmem:[%s19719_s2 + $0x260] sm:$0xff] }
  0x9a   :  { %8486 = vmatprep.mubr.msk.f32.mxu1 %vm276_vm0, %v14396_v32  ;;  %1104 = vperm.xlu0 %13220, %v1100_v57  }
  0x9b   :  { %11583 = vmatpush1.bf16.msra.mxu1 %v11582_v13  ;;  %v11650_v13 = vpack.c.bf16 %v1021_v2, %v1018_v7  ;;  %v3587_v2 = vld [vmem:[%s19720_s3 + $0x30] sm:$0xff] }
  0x9c   :  { %587 = vmatmul.mubr.f32.gmra.mrb[12].mxu0 %v14262_v63  ;;  %v1032_v63 = vld [vmem:[%s19719_s2 + $0x140] sm:$0xff] }
  0x9d   :  { %927 = vmatmul.mubr.f32.gmra.mrb[60].mxu1 %v14413_v38  ;;  %8463 = vmatprep.mubr.msk.f32.mxu0 %vm276_vm0, %v14267_v10  ;;  %v11584_v10 = vpack.c.bf16 %v1032_v63, %v1029_v8  ;;  %v11608_v8 = vpack.c.bf16 %v1068_v49, %v1065_v4  ;;  %v1064_v63 = vld [vmem:[%s19719_s2 + $0x240] sm:$0xff] }
  0x9e   :  { %8487 = vmatprep.mubr.msk.f32.mxu1 %vm276_vm0, %v14418_v3  ;;  %1109 = vperm.xlu0 %13220, %v1101_v55  }
  0x9f   :  { %11585 = vmatprep.subr.bf16.mxu1 %v11584_v10  ;;  %v1067_v10 = vld [vmem:[%s19719_s2 + $0x258] sm:$0xff] }
  0xa0   :  { %593 = vmatmul.mubr.f32.gmra.mrb[14].mxu0 %v14277_v24  ;;  %v1028_v24 = vld [vmem:[%s19719_s2 + $0x120] sm:$0xff] }
  0xa1   :  { %932 = vmatmul.mubr.f32.gmra.mrb[62].mxu1 %v14429_v59  ;;  %8464 = vmatprep.mubr.msk.f32.mxu0 %vm276_vm0, %v14282_v9  ;;  %v1031_v9 = vld [vmem:[%s19719_s2 + $0x138] sm:$0xff] }
  0xa2   :  { %2762 = vperm.xlu0 %13220, %v2758_v1  }
  0xa4   :  { %599 = vmatmul.mubr.f32.gmra.mrb[16].mxu0 %v14293_v28  ;;  %v11586_v28 = vpack.c.bf16 %v1031_v9, %v1028_v24  ;;  %v11610_v24 = vpack.c.bf16 %v1067_v10, %v1064_v63  ;;  %v1071_v9 = vld [vmem:[%s19719_s2 + $0x278] sm:$0xff]  ;;  %v4416_v63 = vld [vmem:[%s19720_s3 + $0x40] sm:$0xff] }
  0xa5   :  { %8465 = vmatprep.mubr.msk.f32.mxu0 %vm276_vm0, %v14298_v12  ;;  %v1035_v12 = vld [vmem:[%s19719_s2 + $0x158] sm:$0xff] }
  0xa6   :  { %11587 = vmatpush1.bf16.msra.mxu1 %v11586_v28  ;;  %v1074_v28 = vld [vmem:[%s19719_s2 + $0x290] sm:$0xff]  ;;  %3591 = vperm.xlu0 %13220, %v3587_v2  }
  0xa8   :  { %605 = vmatmul.mubr.f32.gmra.mrb[18].mxu0 %v14309_v16  ;;  %v1038_v16 = vld [vmem:[%s19719_s2 + $0x170] sm:$0xff] }
  0xa9   :  { %8466 = vmatprep.mubr.msk.f32.mxu0 %vm276_vm0, %v14314_v18  ;;  %v11588_v18 = vpack.c.bf16 %v1038_v16, %v1035_v12  ;;  %v1072_v12 = vld [vmem:[%s19719_s2 + $0x280] sm:$0xff]  ;;  %v11612_v16 = vpack.c.bf16 %v1074_v28, %v1071_v9  ;;  %v5245_v28 = vld [vmem:[%s19720_s3 + $0x50] sm:$0xff] }
  0xaa   :  { %4420 = vperm.xlu0 %13220, %v4416_v63  }
  0xab   :  { %11589 = vmatprep.subr.bf16.mxu1 %v11588_v18  ;;  %v1075_v18 = vld [vmem:[%s19719_s2 + $0x298] sm:$0xff] }
  0xac   :  { %611 = vmatmul.mubr.f32.gmra.mrb[20].mxu0 %v14325_v19  ;;  %v1034_v19 = vld [vmem:[%s19719_s2 + $0x150] sm:$0xff] }
  0xad   :  { %8467 = vmatprep.mubr.msk.f32.mxu0 %vm276_vm0, %v14330_v35  ;;  %v1037_v35 = vld [vmem:[%s19719_s2 + $0x168] sm:$0xff] }
  0xae   :  { %5249 = vperm.xlu0 %13220, %v5245_v28  }
  0xb0   :  { %617 = vmatmul.mubr.f32.gmra.mrb[22].mxu0 %v14341_v20  ;;  %v11590_v20 = vpack.c.bf16 %v1037_v35, %v1034_v19  ;;  %v1070_v19 = vld [vmem:[%s19719_s2 + $0x270] sm:$0xff]  ;;  %v1073_v35 = vld [vmem:[%s19719_s2 + $0x288] sm:$0xff] }
  0xb1   :  { %8468 = vmatprep.mubr.msk.f32.mxu0 %vm276_vm0, %v14346_v21  ;;  %v1041_v21 = vld [vmem:[%s19719_s2 + $0x188] sm:$0xff] }
  0xb2   :  { %v11592_v39 = vpack.c.bf16 %v1044_v22, %v1041_v21  ;;  %11591 = vmatpush1.bf16.msra.mxu1 %v11590_v20  ;;  %v11652_v20 = vpack.c.bf16 %v1075_v18, %v1072_v12  ;;  %v11614_v21 = vpack.c.bf16 %v1073_v35, %v1070_v19  ;;  %v1024_v22 = vld [vmem:[%s19719_s2 + $0x100] sm:$0xff] }
  0xb3   :  { %v6074_v19 = vld [vmem:[%s19720_s3 + $0x60] sm:$0xff] }
  0xb4   :  { %623 = vmatmul.mubr.f32.gmra.mrb[24].mxu0 %v14369_v48  ;;  %v1051_v48 = vld [vmem:[%s19719_s2 + $0x1d8] sm:$0xff]  ;;  %11593 = vmatprep.subr.bf16.mxu1 %v11592_v39 }
  0xb5   :  { %8469 = vmatprep.mubr.msk.f32.mxu0 %vm276_vm0, %v14374_v29  ;;  %v1000_v29 = vld [vmem:[%s19719_s2 + $0x40] sm:$0xff]  ;;  %v1027_v39 = vld [vmem:[%s19719_s2 + $0x118] sm:$0xff]  ;;  %6078 = vperm.xlu0 %13220, %v6074_v19  }
  0xb6   :  { %v11638_v33 = vpack.c.bf16 %v1003_v53, %v1000_v29  ;;  %11595 = vmatpush1.bf16.msra.mxu1 %v11594_v27  ;;  %v11654_v23 = vpack.c.bf16 %v1027_v39, %v1024_v22  ;;  %v1080_v27 = vld [vmem:[%s19719_s2 + $0x2c0] sm:$0xff]  ;;  %v1081_v29 = vld [vmem:[%s19719_s2 + $0x2c8] sm:$0xff]  ;;  %v1079_v53 = vld [vmem:[%s19719_s2 + $0x2b8] sm:$0xff] }
  0xb7   :  { %v1091_v19 = vld [vmem:[%s19719_s2 + $0x318] sm:$0xff] }
  0xb8   :  { %629 = vmatmul.mubr.f32.gmra.mrb[26].mxu0 %v14385_v30  ;;  %v11636_v30 = vpack.c.bf16 %v1051_v48, %v1048_v47  ;;  %v1078_v47 = vld [vmem:[%s19719_s2 + $0x2b0] sm:$0xff]  ;;  %v11616_v48 = vpack.c.bf16 %v1080_v27, %v1077_v26  ;;  %v7649_v26 = vld [vmem:[%s19721_s6] sm:$0xff] }
  0xb9   :  { %8470 = vmatprep.mubr.msk.f32.mxu0 %vm276_vm0, %v14396_v32  ;;  %v1050_v32 = vld [vmem:[%s19719_s2 + $0x1d0] sm:$0xff] }
  0xba   :  { %v11596_v34 = vpack.c.bf16 %v1050_v32, %v1047_v31  ;;  %11637 = vmatprep.subr.bf16.mxu0 %v11636_v30  ;;  %v1076_v30 = vld [vmem:[%s19719_s2 + $0x2a0] sm:$0xff]  ;;  %v11656_v31 = vpack.c.bf16 %v1081_v29, %v1078_v47  ;;  %v7651_v29 = vld [vmem:[%s19721_s6 + $0x10] sm:$0xff] }
  0xbb   :  { %11639 = vmatpush3.bf16.msra.mxu0 %v11638_v33  ;;  %v11618_v32 = vpack.c.bf16 %v1079_v53, %v1076_v30  ;;  %v1030_v33 = vld [vmem:[%s19719_s2 + $0x130] sm:$0xff] }
  0xbc   :  { %635 = vmatmul.mubr.f32.gmra.mrb[28].mxu0 %v14413_v38  ;;  %v11598_v38 = vpack.c.bf16 %v1049_v37, %v1046_v62  ;;  %11597 = vmatprep.subr.bf16.mxu1 %v11596_v34  ;;  %v1033_v34 = vld [vmem:[%s19719_s2 + $0x148] sm:$0xff]  ;;  %v1083_v37 = vld [vmem:[%s19719_s2 + $0x2d8] sm:$0xff] }
  0xbd   :  { %8471 = vmatprep.mubr.msk.f32.mxu0 %vm276_vm0, %v14418_v3  ;;  %v1054_v3 = vld [vmem:[%s19719_s2 + $0x1f0] sm:$0xff]  ;;  %v11658_v62 = vpack.c.bf16 %v1033_v34, %v1030_v33 }
  0xbe   :  { %v11640_v42 = vpack.c.bf16 %v1057_v40, %v1054_v3  ;;  %11599 = vmatpush1.bf16.msra.mxu1 %v11598_v38  ;;  %v1086_v38 = vld [vmem:[%s19719_s2 + $0x2f0] sm:$0xff]  ;;  %v1084_v3 = vld [vmem:[%s19719_s2 + $0x2e0] sm:$0xff] }
  0xbf   :  { %11601 = vmatprep.subr.bf16.mxu1 %v11600_v15  ;;  %v11620_v40 = vpack.c.bf16 %v1086_v38, %v1083_v37  ;;  %v1039_v15 = vld [vmem:[%s19719_s2 + $0x178] sm:$0xff]  ;;  %v7655_v37 = vld [vmem:[%s19721_s6 + $0x30] sm:$0xff] }
  0xc0   :  { %641 = vmatmul.mubr.f32.gmra.mrb[30].mxu0 %v14429_v59  ;;  %v1009_v59 = vld [vmem:[%s19719_s2 + $0x88] sm:$0xff]  ;;  %11641 = vmatprep.subr.bf16.mxu0 %v11640_v42  ;;  %v1082_v42 = vld [vmem:[%s19719_s2 + $0x2d0] sm:$0xff] }
  0xc1   :  { %v11642_v45 = vpack.c.bf16 %v1009_v59, %v1006_v11  ;;  %v1085_v11 = vld [vmem:[%s19719_s2 + $0x2e8] sm:$0xff]  ;;  %v11660_v59 = vpack.c.bf16 %v1087_v41, %v1084_v3  ;;  %v7657_v41 = vld [vmem:[%s19721_s6 + $0x40] sm:$0xff] }
  0xc2   :  { %11603 = vmatpush1.bf16.msra.mxu1 %v11602_v6  ;;  %v11622_v44 = vpack.c.bf16 %v1085_v11, %v1082_v42  ;;  %v1092_v6 = vld [vmem:[%s19719_s2 + $0x320] sm:$0xff] }
  0xc3   :  { %11643 = vmatpush3.bf16.msra.mxu0 %v11642_v45  ;;  %11605 = vmatprep.subr.bf16.mxu1 %v11604_v61  ;;  %v1036_v45 = vld [vmem:[%s19719_s2 + $0x160] sm:$0xff]  ;;  %v11624_v52 = vpack.c.bf16 %v1092_v6, %v1089_v51 }
  0xc4   :  { %11645 = vmatprep.subr.bf16.mxu0 %v11644_v56  ;;  %v11662_v46 = vpack.c.bf16 %v1039_v15, %v1036_v45  ;;  %v7661_v51 = vld [vmem:[%s19721_s6 + $0x60] sm:$0xff] }
  0xc6   :  { %11607 = vmatpush1.bf16.msra.mxu1 %v11606_v17 }
  0xc7   :  { %11647 = vmatpush3.bf16.msra.mxu0 %v11646_v60  ;;  %11609 = vmatprep.subr.bf16.mxu1 %v11608_v8 }
  0xc8   :  { %11649 = vmatprep.subr.bf16.mxu0 %v11648_v5 }
  0xca   :  { %11611 = vmatpush1.bf16.msra.mxu1 %v11610_v24 }
  0xcb   :  { %11651 = vmatpush3.bf16.msra.mxu0 %v11650_v13  ;;  %11613 = vmatprep.subr.bf16.mxu1 %v11612_v16 }
  0xcc   :  { %11653 = vmatprep.subr.bf16.mxu0 %v11652_v20 }
  0xce   :  { %11615 = vmatpush1.bf16.msra.mxu1 %v11614_v21  ;;  %v6903_v21 = vld [vmem:[%s19720_s3 + $0x70] sm:$0xff] }
  0xcf   :  { %11655 = vmatpush3.bf16.msra.mxu0 %v11654_v23  ;;  %11617 = vmatprep.subr.bf16.mxu1 %v11616_v48 }
  0xd0   :  { %11657 = vmatprep.subr.bf16.mxu0 %v11656_v31  ;;  %6907 = vperm.xlu0 %13220, %v6903_v21  }
  0xd2   :  { %11619 = vmatpush1.bf16.msra.mxu1 %v11618_v32  ;;  %v7653_v32 = vld [vmem:[%s19721_s6 + $0x20] sm:$0xff] }
  0xd3   :  { %11659 = vmatpush3.bf16.msra.mxu0 %v11658_v62  ;;  %11621 = vmatprep.subr.bf16.mxu1 %v11620_v40 }
  0xd4   :  { %11661 = vmatprep.subr.bf16.mxu0 %v11660_v59  ;;  %7667 = vperm.xlu0 %13220, %v7649_v26  }
  0xd6   :  { %11623 = vmatpush1.bf16.msra.mxu1 %v11622_v44  ;;  %v7659_v44 = vld [vmem:[%s19721_s6 + $0x50] sm:$0xff] }
  0xd7   :  { %11663 = vmatpush3.bf16.msra.mxu0 %v11662_v46  ;;  %11625 = vmatprep.subr.bf16.mxu1 %v11624_v52 }
  0xd8   :  { %7677 = vperm.xlu0 %13220, %v7651_v29  }
  0xdc   :  { %7687 = vperm.xlu0 %13220, %v7653_v32   ;;  %v1093_v32 = vld [vmem:[%s19719_s2 + $0x328] sm:$0xff] }
  0xe0   :  { %7697 = vperm.xlu0 %13220, %v7655_v37  }
  0xe4   :  { %7707 = vperm.xlu0 %13220, %v7657_v41  }
  0xe8   :  { %7717 = vperm.xlu0 %13220, %v7659_v44  }
  0xec   :  { %7727 = vperm.xlu0 %13220, %v7661_v51  }
  0xf8   :  { %v9929_v43 = vpop.f32.mrb[0].mxu1 }
  0xf9   :  { %v9930_v54 = vpop.f32.mrb[1].mxu1 }
  0xfa   :  { %v14727_v56 = vadd.f32 %v9930_v54, %v9929_v43  ;;  %v7663_v54 = vld [vmem:[%s19721_s6 + $0x70] sm:$0xff] }
  0xfb   :  { %7737 = vperm.xlu0 %13220, %v7663_v54   ;;  %v1468_v54 = vld [vmem:[%s19722_s4 + $0x80] sm:$0xff] }
  0xfc   :  { %v9932_v58 = vpop.f32.mrb[2].mxu1 }
  0xfd   :  { %v9933_v60 = vpop.f32.mrb[3].mxu1 }
  0xfe   :  { %v14732_v61 = vadd.f32 %v9933_v60, %v9932_v58 }
 0x100   :  { %v9935_v0 = vpop.f32.mrb[4].mxu1 }
 0x101   :  { %v9936_v17 = vpop.f32.mrb[5].mxu1 }
 0x102   :  { %v14737_v36 = vadd.f32 %v9936_v17, %v9935_v0 }
 0x104   :  { %v9938_v4 = vpop.f32.mrb[6].mxu1 }
 0x105   :  { %v9939_v5 = vpop.f32.mrb[7].mxu1 }
 0x106   :  { %v14742_v7 = vadd.f32 %v9939_v5, %v9938_v4 }
 0x108   :  { %v9941_v49 = vpop.f32.mrb[8].mxu1 }
 0x109   :  { %v9942_v13 = vpop.f32.mrb[9].mxu1 }
 0x10a   :  { %v14747_v8 = vadd.f32 %v9942_v13, %v9941_v49 }
 0x10c   :  { %v9944_v10 = vpop.f32.mrb[10].mxu1 }
 0x10d   :  { %v9945_v24 = vpop.f32.mrb[11].mxu1 }
 0x10e   :  { %v14752_v9 = vadd.f32 %v9945_v24, %v9944_v10 }
 0x110   :  { %v9947_v12 = vpop.f32.mrb[12].mxu1 }
 0x111   :  { %v9948_v16 = vpop.f32.mrb[13].mxu1 }
 0x112   :  { %v14757_v18 = vadd.f32 %v9948_v16, %v9947_v12 }
 0x114   :  { %v9950_v35 = vpop.f32.mrb[14].mxu1 }
 0x115   :  { %v9951_v20 = vpop.f32.mrb[15].mxu1 }
 0x116   :  { %v14765_v22 = vadd.f32 %v9951_v20, %v9950_v35  ;;  %v1095_v20 = vld [vmem:[%s19719_s2 + $0x338] sm:$0xff] }
 0x118   :  { %v9953_v39 = vpop.f32.mrb[16].mxu1 }
 0x119   :  { %v9954_v23 = vpop.f32.mrb[17].mxu1 }
 0x11a   :  { %v14770_v27 = vadd.f32 %v9954_v23, %v9953_v39 }
 0x11c   :  { %v9956_v47 = vpop.f32.mrb[18].mxu1 }
 0x11d   :  { %v9957_v48 = vpop.f32.mrb[19].mxu1 }
 0x11e   :  { %v14775_v30 = vadd.f32 %v9957_v48, %v9956_v47  ;;  %v1097_v48 = vld [vmem:[%s19719_s2 + $0x348] sm:$0xff] }
 0x120   :  { %v9959_v53 = vpop.f32.mrb[20].mxu1 }
 0x121   :  { %v9960_v31 = vpop.f32.mrb[21].mxu1 }
 0x122   :  { %v14780_v33 = vadd.f32 %v9960_v31, %v9959_v53  ;;  %v1090_v31 = vld [vmem:[%s19719_s2 + $0x310] sm:$0xff] }
 0x124   :  { %v9962_v34 = vpop.f32.mrb[22].mxu1 }
 0x125   :  { %v9963_v62 = vpop.f32.mrb[23].mxu1 }
 0x126   :  { %v14785_v38 = vadd.f32 %v9963_v62, %v9962_v34 }
 0x128   :  { %v9965_v3 = vpop.f32.mrb[24].mxu1 }
 0x129   :  { %v9966_v40 = vpop.f32.mrb[25].mxu1 }
 0x12a   :  { %v14790_v42 = vadd.f32 %v9966_v40, %v9965_v3  ;;  %v11664_v3 = vpack.c.bf16 %v1093_v32, %v1090_v31 }
 0x12c   :  { %v9968_v11 = vpop.f32.mrb[26].mxu1 }
 0x12d   :  { %v9969_v59 = vpop.f32.mrb[27].mxu1 }
 0x12e   :  { %v14795_v45 = vadd.f32 %v9969_v59, %v9968_v11  ;;  %v1096_v11 = vld [vmem:[%s19719_s2 + $0x340] sm:$0xff]  ;;  %v1099_v59 = vld [vmem:[%s19719_s2 + $0x358] sm:$0xff] }
 0x130   :  { %v9971_v15 = vpop.f32.mrb[28].mxu1 }
 0x131   :  { %v9972_v46 = vpop.f32.mrb[29].mxu1 }
 0x132   :  { %v14800_v6 = vadd.f32 %v9972_v46, %v9971_v15  ;;  %v11668_v46 = vpack.c.bf16 %v1099_v59, %v1096_v11  ;;  %v1454_v11 = vld [vmem:[%s19722_s4 + $0x10] sm:$0xff]  ;;  %v1455_v59 = vld [vmem:[%s19722_s4 + $0x18] sm:$0xff] }
 0x134   :  { %v9974_v52 = vpop.f32.mrb[30].mxu1 }
 0x135   :  { %v9975_v43 = vpop.f32.mrb[31].mxu1 }
 0x136   :  { %v14805_v25 = vadd.f32 %v9975_v43, %v9974_v52 }
 0x138   :  { %v858_v57 = vpop.f32.mrb[32].mxu1 }
 0x139   :  { %v859_v58 = vadd.f32 %v14727_v56, %v858_v57  ;;  %v860_v60 = vpop.f32.mrb[33].mxu1  ;;  %v1469_v57 = vld [vmem:[%s19722_s4 + $0x88] sm:$0xff] }
 0x13b   :  { %940 = vst.msk [vmem:[#allocation2 + $0x10] sm:$0xff] %vm939_vm1, %v859_v58 }
 0x13c   :  { %v863_v55 = vpop.f32.mrb[34].mxu1 }
 0x13d   :  { %v864_v0 = vadd.f32 %v14732_v61, %v863_v55  ;;  %v865_v17 = vpop.f32.mrb[35].mxu1  ;;  %v11672_v55 = vpack.c.bf16 %v1469_v57, %v1468_v54  ;;  %v1472_v54 = vld [vmem:[%s19722_s4 + $0xa0] sm:$0xff]  ;;  %v1473_v57 = vld [vmem:[%s19722_s4 + $0xa8] sm:$0xff] }
 0x13e   :  { %v1453_v17 = vld [vmem:[%s19722_s4 + $0x8] sm:$0xff] }
 0x13f   :  { %943 = vst.msk [vmem:[#allocation2 + $0x28] sm:$0xff] %vm939_vm1, %v864_v0  ;;  %v1452_v0 = vld [vmem:[%s19722_s4] sm:$0xff] }
 0x140   :  { %v868_v1 = vpop.f32.mrb[36].mxu1 }
 0x141   :  { %v869_v4 = vadd.f32 %v14737_v36, %v868_v1  ;;  %v870_v5 = vpop.f32.mrb[37].mxu1 }
 0x142   :  { %v988_v43 = vld [vmem:[#allocation2 + $0x10] sm:$0xff] }
 0x143   :  { %946 = vst.msk [vmem:[#allocation2 + $0x40] sm:$0xff] %vm939_vm1, %v869_v4 }
 0x144   :  { %v873_v2 = vpop.f32.mrb[38].mxu1 }
 0x145   :  { %v874_v49 = vadd.f32 %v14742_v7, %v873_v2  ;;  %v875_v13 = vpop.f32.mrb[39].mxu1 }
 0x146   :  { %v991_v5 = vld [vmem:[#allocation2 + $0x28] sm:$0xff] }
 0x147   :  { %949 = vst.msk [vmem:[#allocation2 + $0x58] sm:$0xff] %vm939_vm1, %v874_v49  ;;  %v11674_v49 = vpack.c.bf16 %v1453_v17, %v1452_v0  ;;  %v8518_v0 = vld [vmem:[%s19722_s4 + $0x1b8] sm:$0xff]  ;;  %v1456_v17 = vld [vmem:[%s19722_s4 + $0x20] sm:$0xff] }
 0x148   :  { %v878_v56 = vpop.f32.mrb[40].mxu1 }
 0x149   :  { %v879_v63 = vadd.f32 %v14747_v8, %v878_v56  ;;  %v880_v10 = vpop.f32.mrb[41].mxu1  ;;  %v1088_v8 = vld [vmem:[%s19719_s2 + $0x300] sm:$0xff] }
 0x14a   :  { %v11626_v39 = vpack.c.bf16 %v1091_v19, %v1088_v8 }
 0x14b   :  { %952 = vst.msk [vmem:[#allocation2 + $0x70] sm:$0xff] %vm939_vm1, %v879_v63 }
 0x14c   :  { %v883_v61 = vpop.f32.mrb[42].mxu1 }
 0x14d   :  { %v884_v24 = vadd.f32 %v14752_v9, %v883_v61  ;;  %v885_v28 = vpop.f32.mrb[43].mxu1 }
 0x14f   :  { %955 = vst.msk [vmem:[#allocation2 + $0x88] sm:$0xff] %vm939_vm1, %v884_v24 }
 0x150   :  { %v888_v36 = vpop.f32.mrb[44].mxu1 }
 0x151   :  { %v889_v12 = vadd.f32 %v14757_v18, %v888_v36  ;;  %v890_v16 = vpop.f32.mrb[45].mxu1  ;;  %v1098_v18 = vld [vmem:[%s19719_s2 + $0x350] sm:$0xff] }
 0x152   :  { %v11628_v47 = vpack.c.bf16 %v1098_v18, %v1095_v20 }
 0x153   :  { %958 = vst.msk [vmem:[#allocation2 + $0xa0] sm:$0xff] %vm939_vm1, %v889_v12 }
 0x154   :  { %v893_v7 = vpop.f32.mrb[46].mxu1 }
 0x155   :  { %v894_v9 = vadd.f32 %v14765_v22, %v893_v7  ;;  %v895_v35 = vpop.f32.mrb[47].mxu1  ;;  %v1094_v22 = vld [vmem:[%s19719_s2 + $0x330] sm:$0xff] }
 0x156   :  { %v11630_v62 = vpack.c.bf16 %v1097_v48, %v1094_v22 }
 0x157   :  { %961 = vst.msk [vmem:[#allocation2 + $0xb8] sm:$0xff] %vm939_vm1, %v894_v9  ;;  %v552_v21 = vpop.f32.mrb[0].mxu0 }
 0x158   :  { %v898_v23 = vpop.f32.mrb[48].mxu1  ;;  %v554_v26 = vpop.f32.mrb[1].mxu0 }
 0x159   :  { %v899_v29 = vadd.f32 %v14770_v27, %v898_v23  ;;  %v900_v53 = vpop.f32.mrb[49].mxu1  ;;  %1182 = vmatprep.mubr.f32.mxu1 %v554_v26  ;;  %1336 = vmatprep.mubr.f32.mxu0 %v554_v26 }
 0x15a   :  { %1183 = vmatmul.mubr.f32.vlgmr.msra.gmra.mrb[64].mxu1 %v552_v21  ;;  %1337 = vmatmul.mubr.f32.vlgmr.msra.gmra.mrb[32].mxu0 %v552_v21 }
 0x15b   :  { %964 = vst.msk [vmem:[#allocation2 + $0xd0] sm:$0xff] %vm939_vm1, %v899_v29  ;;  %v558_v34 = vpop.f32.mrb[2].mxu0  ;;  %11627 = vmatpush1.bf16.msra.mxu1 %v11626_v39 }
 0x15c   :  { %v903_v37 = vpop.f32.mrb[50].mxu1  ;;  %v560_v27 = vpop.f32.mrb[3].mxu0  ;;  %11629 = vmatprep.subr.bf16.mxu1 %v11628_v47 }
 0x15d   :  { %v904_v40 = vadd.f32 %v14775_v30, %v903_v37  ;;  %v905_v41 = vpop.f32.mrb[51].mxu1  ;;  %1188 = vmatprep.mubr.f32.mxu1 %v560_v27  ;;  %1341 = vmatprep.mubr.f32.mxu0 %v560_v27  ;;  %v1470_v37 = vld [vmem:[%s19722_s4 + $0x90] sm:$0xff]  ;;  %v1471_v27 = vld [vmem:[%s19722_s4 + $0x98] sm:$0xff] }
 0x15e   :  { %1189 = vmatmul.mubr.f32.gmra.mrb[66].mxu1 %v558_v34  ;;  %1342 = vmatmul.mubr.f32.gmra.mrb[34].mxu0 %v558_v34  ;;  %v8516_v41 = vld [vmem:[%s19722_s4 + $0x1a8] sm:$0xff] }
 0x15f   :  { %967 = vst.msk [vmem:[#allocation2 + $0xe8] sm:$0xff] %vm939_vm1, %v904_v40  ;;  %v14857_v44 = vpop.f32.mrb[4].mxu0  ;;  %11631 = vmatpush1.bf16.msra.mxu1 %v11630_v62  ;;  %1259 = vmatprep.mubr.f32.mxu1 %v13354_v14  ;;  %v11676_v40 = vpack.c.bf16 %v1471_v27, %v1470_v37  ;;  %v8508_v37 = vld [vmem:[%s19722_s4 + $0x168] sm:$0xff] }
 0x160   :  { %944 = vst [vmem:[#allocation2 + $0x30] sm:$0xff] %v14857_v44  ;;  %v908_v30 = vpop.f32.mrb[52].mxu1  ;;  %v14861_v15 = vpop.f32.mrb[5].mxu0  ;;  %11665 = vmatprep.subr.bf16.mxu1 %v11664_v3 }
 0x161   :  { %v909_v51 = vadd.f32 %v14780_v33, %v908_v30  ;;  %v910_v52 = vpop.f32.mrb[53].mxu1 }
 0x162   :  { %8488 = vmatmul.mubr.msk.f32.vlgmr.msra.gmra.mrb[64].mxu1 %vm939_vm1, %v988_v43  ;;  %v8500_v52 = vld [vmem:[%s19722_s4 + $0x128] sm:$0xff] }
 0x163   :  { %970 = vst.msk [vmem:[#allocation2 + $0x100] sm:$0xff] %vm939_vm1, %v909_v51  ;;  %v14872_v58 = vpop.f32.mrb[6].mxu0  ;;  %11667 = vmatpush3.bf16.msra.mxu1 %v11664_v3  ;;  %1265 = vmatprep.mubr.f32.mxu1 %v13354_v14  ;;  %v8515_v3 = vld [vmem:[%s19722_s4 + $0x1a0] sm:$0xff] }
 0x164   :  { %947 = vst [vmem:[#allocation2 + $0x48] sm:$0xff] %v14872_v58  ;;  %v913_v33 = vpop.f32.mrb[54].mxu1  ;;  %v14876_v60 = vpop.f32.mrb[7].mxu0  ;;  %11669 = vmatprep.subr.bf16.mxu1 %v11668_v46  ;;  %v11710_v30 = vpack.c.bf16 %v8516_v41, %v8515_v3  ;;  %v8499_v51 = vld [vmem:[%s19722_s4 + $0x120] sm:$0xff]  ;;  %v8525_v41 = vld [vmem:[%s19722_s4 + $0x1f0] sm:$0xff] }
 0x165   :  { %v914_v1 = vadd.f32 %v14785_v38, %v913_v33  ;;  %948 = vst [vmem:[#allocation2 + $0x50] sm:$0xff] %v14876_v60  ;;  %v915_v4 = vpop.f32.mrb[55].mxu1  ;;  %v8517_v33 = vld [vmem:[%s19722_s4 + $0x1b0] sm:$0xff]  ;;  %v1480_v3 = vld [vmem:[%s19722_s4 + $0xe0] sm:$0xff] }
 0x166   :  { %8489 = vmatmul.mubr.msk.f32.gmra.mrb[66].mxu1 %vm939_vm1, %v991_v5  ;;  %11711 = vmatprep.subr.bf16.mxu0 %v11710_v30  ;;  %v11714_v4 = vpack.c.bf16 %v8518_v0, %v8517_v33  ;;  %v1464_v30 = vld [vmem:[%s19722_s4 + $0x60] sm:$0xff]  ;;  %v1482_v33 = vld [vmem:[%s19722_s4 + $0xf0] sm:$0xff] }
 0x167   :  { %973 = vst.msk [vmem:[#allocation2 + $0x118] sm:$0xff] %vm939_vm1, %v914_v1  ;;  %v576_v2 = vpop.f32.mrb[8].mxu0  ;;  %11671 = vmatpush3.bf16.msra.mxu1 %v11668_v46  ;;  %11026 = vmatprep.mubr.msk.f32.mxu1 %vm939_vm1, %v988_v43  ;;  %v11678_v46 = vpack.c.bf16 %v1455_v59, %v1454_v11  ;;  %v11712_v43 = vpack.c.bf16 %v8500_v52, %v8499_v51  ;;  %v1457_v1 = vld [vmem:[%s19722_s4 + $0x28] sm:$0xff]  ;;  %v8526_v59 = vld [vmem:[%s19722_s4 + $0x1f8] sm:$0xff]  ;;  %v8527_v0 = vld [vmem:[%s19722_s4 + $0x200] sm:$0xff] }
 0x168   :  { %950 = vst [vmem:[#allocation2 + $0x60] sm:$0xff] %v576_v2  ;;  %v918_v13 = vpop.f32.mrb[56].mxu1  ;;  %v578_v56 = vpop.f32.mrb[9].mxu0  ;;  %11673 = vmatprep.subr.bf16.mxu1 %v11672_v55  ;;  %v11680_v55 = vpack.c.bf16 %v1473_v57, %v1472_v54  ;;  %v8501_v2 = vld [vmem:[%s19722_s4 + $0x130] sm:$0xff]  ;;  %v11730_v51 = vpack.c.bf16 %v8526_v59, %v8525_v41  ;;  %v8510_v54 = vld [vmem:[%s19722_s4 + $0x178] sm:$0xff] }
 0x169   :  { %v919_v63 = vadd.f32 %v14790_v42, %v918_v13  ;;  %951 = vst [vmem:[#allocation2 + $0x68] sm:$0xff] %v578_v56  ;;  %v920_v38 = vpop.f32.mrb[57].mxu1  ;;  %11713 = vmatpush3.bf16.msra.mxu0 %v11712_v43  ;;  %v1474_v56 = vld [vmem:[%s19722_s4 + $0xb0] sm:$0xff] }
 0x16a   :  { %11027 = vmatmul.mubr.msk.f32.vlgmr.msra.gmra.mrb[68].mxu1 %vm939_vm1, %v991_v5  ;;  %v11682_v5 = vpack.c.bf16 %v1457_v1, %v1456_v17  ;;  %11715 = vmatprep.subr.bf16.mxu0 %v11714_v4  ;;  %v8519_v38 = vld [vmem:[%s19722_s4 + $0x1c0] sm:$0xff]  ;;  %v8509_v43 = vld [vmem:[%s19722_s4 + $0x170] sm:$0xff]  ;;  %v8528_v1 = vld [vmem:[%s19722_s4 + $0x208] sm:$0xff] }
 0x16b   :  { %976 = vst.msk [vmem:[#allocation2 + $0x130] sm:$0xff] %vm939_vm1, %v919_v63  ;;  %v582_v10 = vpop.f32.mrb[10].mxu0  ;;  %11675 = vmatpush3.bf16.msra.mxu1 %v11674_v49  ;;  %v8502_v49 = vld [vmem:[%s19722_s4 + $0x138] sm:$0xff]  ;;  %v11732_v57 = vpack.c.bf16 %v8510_v54, %v8509_v43  ;;  %v1466_v4 = vld [vmem:[%s19722_s4 + $0x70] sm:$0xff] }
 0x16c   :  { %953 = vst [vmem:[#allocation2 + $0x78] sm:$0xff] %v582_v10  ;;  %v923_v61 = vpop.f32.mrb[58].mxu1  ;;  %v584_v24 = vpop.f32.mrb[11].mxu0  ;;  %11677 = vmatprep.subr.bf16.mxu1 %v11676_v40  ;;  %v11716_v13 = vpack.c.bf16 %v8502_v49, %v8501_v2  ;;  %v1475_v63 = vld [vmem:[%s19722_s4 + $0xb8] sm:$0xff]  ;;  %v1481_v40 = vld [vmem:[%s19722_s4 + $0xe8] sm:$0xff]  ;;  %v11734_v2 = vpack.c.bf16 %v8528_v1, %v8527_v0 }
 0x16d   :  { %v924_v28 = vadd.f32 %v14795_v45, %v923_v61  ;;  %954 = vst [vmem:[#allocation2 + $0x80] sm:$0xff] %v584_v24  ;;  %v925_v36 = vpop.f32.mrb[59].mxu1  ;;  %v11684_v10 = vpack.c.bf16 %v1475_v63, %v1474_v56  ;;  %v8520_v61 = vld [vmem:[%s19722_s4 + $0x1c8] sm:$0xff]  ;;  %v1458_v24 = vld [vmem:[%s19722_s4 + $0x30] sm:$0xff]  ;;  %v11696_v11 = vpack.c.bf16 %v1481_v40, %v1480_v3 }
 0x16e   :  { %11717 = vmatpush3.bf16.msra.mxu0 %v11716_v13  ;;  %v11718_v36 = vpack.c.bf16 %v8520_v61, %v8519_v38  ;;  %v8511_v13 = vld [vmem:[%s19722_s4 + $0x180] sm:$0xff]  ;;  %v8512_v56 = vld [vmem:[%s19722_s4 + $0x188] sm:$0xff]  ;;  %v8529_v38 = vld [vmem:[%s19722_s4 + $0x210] sm:$0xff] }
 0x16f   :  { %979 = vst.msk [vmem:[#allocation2 + $0x148] sm:$0xff] %vm939_vm1, %v924_v28  ;;  %v588_v12 = vpop.f32.mrb[12].mxu0  ;;  %11679 = vmatpush3.bf16.msra.mxu1 %v11678_v46  ;;  %v1459_v28 = vld [vmem:[%s19722_s4 + $0x38] sm:$0xff]  ;;  %v1465_v46 = vld [vmem:[%s19722_s4 + $0x68] sm:$0xff]  ;;  %v11736_v63 = vpack.c.bf16 %v8512_v56, %v8511_v13 }
 0x170   :  { %956 = vst [vmem:[#allocation2 + $0x90] sm:$0xff] %v588_v12  ;;  %v928_v42 = vpop.f32.mrb[60].mxu1  ;;  %v590_v16 = vpop.f32.mrb[13].mxu0  ;;  %11681 = vmatprep.subr.bf16.mxu1 %v11680_v55  ;;  %v11686_v12 = vpack.c.bf16 %v1459_v28, %v1458_v24  ;;  %11719 = vmatprep.subr.bf16.mxu0 %v11718_v36  ;;  %v11698_v52 = vpack.c.bf16 %v1465_v46, %v1464_v30  ;;  %v1483_v55 = vld [vmem:[%s19722_s4 + $0xf8] sm:$0xff]  ;;  %v8513_v24 = vld [vmem:[%s19722_s4 + $0x190] sm:$0xff]  ;;  %v6075_v40 = vld [vmem:[%s19720_s3 + $0x68] sm:$0xff] }
 0x171   :  { %v929_v7 = vadd.f32 %v14800_v6, %v928_v42  ;;  %957 = vst [vmem:[#allocation2 + $0x98] sm:$0xff] %v590_v16  ;;  %v930_v8 = vpop.f32.mrb[61].mxu1  ;;  %v8503_v42 = vld [vmem:[%s19722_s4 + $0x140] sm:$0xff]  ;;  %v8504_v16 = vld [vmem:[%s19722_s4 + $0x148] sm:$0xff]  ;;  %v11700_v17 = vpack.c.bf16 %v1483_v55, %v1482_v33  ;;  %v8514_v28 = vld [vmem:[%s19722_s4 + $0x198] sm:$0xff] }
 0x172   :  { %v1476_v8 = vld [vmem:[%s19722_s4 + $0xc0] sm:$0xff]  ;;  %v11740_v36 = vpack.c.bf16 %v8514_v28, %v8513_v24  ;;  %v1485_v55 = vld [vmem:[%s19722_s4 + $0x108] sm:$0xff]  ;;  %v1487_v56 = vld [vmem:[%s19722_s4 + $0x118] sm:$0xff] }
 0x173   :  { %982 = vst.msk [vmem:[#allocation2 + $0x160] sm:$0xff] %vm939_vm1, %v929_v7  ;;  %v594_v19 = vpop.f32.mrb[14].mxu0  ;;  %11683 = vmatpush3.bf16.msra.mxu1 %v11682_v5  ;;  %v11720_v7 = vpack.c.bf16 %v8504_v16, %v8503_v42  ;;  %v1467_v5 = vld [vmem:[%s19722_s4 + $0x78] sm:$0xff]  ;;  %v8589_v42 = vld [vmem:[%s19719_s2 + $0x508] sm:$0xff]  ;;  %v1484_v33 = vld [vmem:[%s19722_s4 + $0x100] sm:$0xff] }
 0x174   :  { %959 = vst [vmem:[#allocation2 + $0xa8] sm:$0xff] %v594_v19  ;;  %v933_v9 = vpop.f32.mrb[62].mxu1  ;;  %v596_v35 = vpop.f32.mrb[15].mxu0  ;;  %11685 = vmatprep.subr.bf16.mxu1 %v11684_v10  ;;  %v1477_v19 = vld [vmem:[%s19722_s4 + $0xc8] sm:$0xff]  ;;  %v11702_v49 = vpack.c.bf16 %v1467_v5, %v1466_v4  ;;  %v8530_v10 = vld [vmem:[%s19722_s4 + $0x218] sm:$0xff]  ;;  %v11705_v5 = vpack.c.bf16 %v1485_v55, %v1484_v33  ;;  %v8546_v55 = vld [vmem:[%s19719_s2 + $0x3b0] sm:$0xff] }
 0x175   :  { %v934_v45 = vadd.f32 %v14805_v25, %v933_v9  ;;  %960 = vst [vmem:[#allocation2 + $0xb0] sm:$0xff] %v596_v35  ;;  %v935_v20 = vpop.f32.mrb[63].mxu1  ;;  %v8521_v9 = vld [vmem:[%s19722_s4 + $0x1d0] sm:$0xff]  ;;  %11721 = vmatpush3.bf16.msra.mxu0 %v11720_v7  ;;  %v11688_v35 = vpack.c.bf16 %v1477_v19, %v1476_v8  ;;  %v11738_v61 = vpack.c.bf16 %v8530_v10, %v8529_v38  ;;  %v1930_v8 = vld [vmem:[%s19720_s3 + $0x18] sm:$0xff]  ;;  %v2759_v19 = vld [vmem:[%s19720_s3 + $0x28] sm:$0xff] }
 0x176   :  { %v1460_v20 = vld [vmem:[%s19722_s4 + $0x40] sm:$0xff]  ;;  %v1929_v7 = vld [vmem:[%s19720_s3 + $0x10] sm:$0xff]  ;;  %v7650_v0 = vld [vmem:[%s19721_s6 + $0x8] sm:$0xff] }
 0x177   :  { %985 = vst.msk [vmem:[#allocation2 + $0x178] sm:$0xff] %vm939_vm1, %v934_v45  ;;  %v600_v18 = vpop.f32.mrb[16].mxu0  ;;  %11687 = vmatpush3.bf16.msra.mxu1 %v11686_v12  ;;  %v8522_v45 = vld [vmem:[%s19722_s4 + $0x1d8] sm:$0xff]  ;;  %v8586_v12 = vld [vmem:[%s19719_s2 + $0x4f0] sm:$0xff]  ;;  %1933 = vperm.xlu1 %13221, %v1929_v7   ;;  %v8541_v38 = vld [vmem:[%s19719_s2 + $0x388] sm:$0xff] }
 0x178   :  { %962 = vst [vmem:[#allocation2 + $0xc0] sm:$0xff] %v600_v18  ;;  %v602_v21 = vpop.f32.mrb[17].mxu0  ;;  %v1461_v18 = vld [vmem:[%s19722_s4 + $0x48] sm:$0xff]  ;;  %11689 = vmatprep.subr.bf16.mxu1 %v11688_v35  ;;  %v11820_v16 = vpack.c.bf16 %v8589_v42, %v8586_v12  ;;  %v7652_v28 = vld [vmem:[%s19721_s6 + $0x18] sm:$0xff]  ;;  %v8592_v12 = vld [vmem:[%s19719_s2 + $0x520] sm:$0xff] }
 0x179   :  { %963 = vst [vmem:[#allocation2 + $0xc8] sm:$0xff] %v602_v21  ;;  %v11722_v21 = vpack.c.bf16 %v8522_v45, %v8521_v9  ;;  %v8595_v42 = vld [vmem:[%s19719_s2 + $0x538] sm:$0xff] }
 0x17a   :  { %v8543_v33 = vld [vmem:[%s19719_s2 + $0x398] sm:$0xff] }
 0x17b   :  { %v606_v39 = vpop.f32.mrb[18].mxu0  ;;  %11723 = vmatprep.subr.bf16.mxu0 %v11722_v21  ;;  %1938 = vperm.xlu1 %13221, %v1930_v8   ;;  %v8531_v8 = vld [vmem:[%s19722_s4 + $0x220] sm:$0xff] }
 0x17c   :  { %965 = vst [vmem:[#allocation2 + $0xd8] sm:$0xff] %v606_v39  ;;  %v608_v6 = vpop.f32.mrb[19].mxu0  ;;  %v11690_v39 = vpack.c.bf16 %v1461_v18, %v1460_v20  ;;  %v3588_v20 = vld [vmem:[%s19720_s3 + $0x38] sm:$0xff] }
 0x17d   :  { %966 = vst [vmem:[#allocation2 + $0xe0] sm:$0xff] %v608_v6  ;;  %v8505_v6 = vld [vmem:[%s19722_s4 + $0x150] sm:$0xff] }
 0x17e   :  { %11691 = vmatpush3.bf16.msra.mxu1 %v11690_v39  ;;  %v1105_v39 = vpop.permute.xlu0 %1104 }
 0x17f   :  { %v612_v23 = vpop.f32.mrb[20].mxu0  ;;  %2767 = vperm.xlu1 %13221, %v2759_v19  }
 0x180   :  { %968 = vst [vmem:[#allocation2 + $0xf0] sm:$0xff] %v612_v23  ;;  %v614_v26 = vpop.f32.mrb[21].mxu0  ;;  %v8506_v23 = vld [vmem:[%s19722_s4 + $0x158] sm:$0xff] }
 0x181   :  { %969 = vst [vmem:[#allocation2 + $0xf8] sm:$0xff] %v614_v26  ;;  %v11724_v26 = vpack.c.bf16 %v8506_v23, %v8505_v6  ;;  %v4417_v23 = vld [vmem:[%s19720_s3 + $0x48] sm:$0xff] }
 0x183   :  { %v618_v47 = vpop.f32.mrb[22].mxu0  ;;  %11725 = vmatpush3.bf16.msra.mxu0 %v11724_v26  ;;  %3596 = vperm.xlu1 %13221, %v3588_v20  }
 0x184   :  { %971 = vst [vmem:[#allocation2 + $0x108] sm:$0xff] %v618_v47  ;;  %v620_v22 = vpop.f32.mrb[23].mxu0  ;;  %v1478_v47 = vld [vmem:[%s19722_s4 + $0xd0] sm:$0xff] }
 0x185   :  { %972 = vst [vmem:[#allocation2 + $0x110] sm:$0xff] %v620_v22  ;;  %v1479_v22 = vld [vmem:[%s19722_s4 + $0xd8] sm:$0xff] }
 0x187   :  { %v624_v25 = vpop.f32.mrb[24].mxu0  ;;  %4425 = vperm.xlu1 %13221, %v4417_v23  }
 0x188   :  { %974 = vst [vmem:[#allocation2 + $0x120] sm:$0xff] %v624_v25  ;;  %v626_v48 = vpop.f32.mrb[25].mxu0  ;;  %v8523_v25 = vld [vmem:[%s19722_s4 + $0x1e0] sm:$0xff] }
 0x189   :  { %975 = vst [vmem:[#allocation2 + $0x128] sm:$0xff] %v626_v48  ;;  %v11692_v48 = vpack.c.bf16 %v1479_v22, %v1478_v47 }
 0x18b   :  { %v630_v29 = vpop.f32.mrb[26].mxu0  ;;  %11693 = vmatprep.subr.bf16.mxu1 %v11692_v48 }
 0x18c   :  { %977 = vst [vmem:[#allocation2 + $0x138] sm:$0xff] %v630_v29  ;;  %v632_v53 = vpop.f32.mrb[27].mxu0  ;;  %v8524_v29 = vld [vmem:[%s19722_s4 + $0x1e8] sm:$0xff] }
 0x18d   :  { %978 = vst [vmem:[#allocation2 + $0x140] sm:$0xff] %v632_v53  ;;  %v1462_v53 = vld [vmem:[%s19722_s4 + $0x50] sm:$0xff] }
 0x18f   :  { %v636_v31 = vpop.f32.mrb[28].mxu0 }
 0x190   :  { %980 = vst [vmem:[#allocation2 + $0x150] sm:$0xff] %v636_v31  ;;  %v638_v32 = vpop.f32.mrb[29].mxu0  ;;  %v1463_v31 = vld [vmem:[%s19722_s4 + $0x58] sm:$0xff] }
 0x191   :  { %981 = vst [vmem:[#allocation2 + $0x158] sm:$0xff] %v638_v32  ;;  %v11726_v32 = vpack.c.bf16 %v8524_v29, %v8523_v25  ;;  %v5246_v29 = vld [vmem:[%s19720_s3 + $0x58] sm:$0xff] }
 0x192   :  { %5254 = vperm.xlu1 %13221, %v5246_v29  }
 0x193   :  { %v642_v34 = vpop.f32.mrb[30].mxu0  ;;  %11727 = vmatprep.subr.bf16.mxu0 %v11726_v32 }
 0x194   :  { %983 = vst [vmem:[#allocation2 + $0x168] sm:$0xff] %v642_v34  ;;  %v644_v62 = vpop.f32.mrb[31].mxu0  ;;  %v11694_v34 = vpack.c.bf16 %v1463_v31, %v1462_v53  ;;  %v1110_v53 = vpop.permute.xlu0 %1109 }
 0x195   :  { %984 = vst [vmem:[#allocation2 + $0x170] sm:$0xff] %v644_v62  ;;  %v8507_v62 = vld [vmem:[%s19722_s4 + $0x160] sm:$0xff] }
 0x196   :  { %v11728_v27 = vpack.c.bf16 %v8508_v37, %v8507_v62  ;;  %11695 = vmatpush3.bf16.msra.mxu1 %v11694_v34  ;;  %6083 = vperm.xlu1 %13221, %v6075_v40   ;;  %v7656_v40 = vld [vmem:[%s19721_s6 + $0x38] sm:$0xff] }
 0x197   :  { %11697 = vmatprep.subr.bf16.mxu1 %v11696_v11 }
 0x198   :  { %11729 = vmatpush3.bf16.msra.mxu0 %v11728_v27 }
 0x199   :  { %11731 = vmatprep.subr.bf16.mxu0 %v11730_v51 }
 0x19a   :  { %11699 = vmatpush3.bf16.msra.mxu1 %v11698_v52  ;;  %v6904_v52 = vld [vmem:[%s19720_s3 + $0x78] sm:$0xff] }
 0x19b   :  { %11701 = vmatprep.subr.bf16.mxu1 %v11700_v17  ;;  %6912 = vperm.xlu1 %13221, %v6904_v52   ;;  %v8539_v52 = vld [vmem:[%s19719_s2 + $0x378] sm:$0xff] }
 0x19c   :  { %11733 = vmatpush3.bf16.msra.mxu0 %v11732_v57 }
 0x19d   :  { %11735 = vmatprep.subr.bf16.mxu0 %v11734_v2  ;;  %v1486_v2 = vld [vmem:[%s19722_s4 + $0x110] sm:$0xff] }
 0x19e   :  { %11703 = vmatpush3.bf16.msra.mxu1 %v11702_v49 }
 0x19f   :  { %11704 = vmatprep.subr.bf16.mxu1 %v13353_v50  ;;  %7672 = vperm.xlu1 %13221, %v7650_v0   ;;  %v8610_v0 = vld [vmem:[%s19719_s2 + $0x5b0] sm:$0xff] }
 0x1a0   :  { %11737 = vmatpush3.bf16.msra.mxu0 %v11736_v63  ;;  %v8538_v63 = vld [vmem:[%s19719_s2 + $0x370] sm:$0xff] }
 0x1a1   :  { %11739 = vmatprep.subr.bf16.mxu0 %v11738_v61  ;;  %v11822_v7 = vpack.c.bf16 %v8541_v38, %v8538_v63 }
 0x1a3   :  { %7682 = vperm.xlu1 %13221, %v7652_v28   ;;  %v8619_v28 = vld [vmem:[%s19719_s2 + $0x5f8] sm:$0xff] }
 0x1a4   :  { %11741 = vmatpush3.bf16.msra.mxu0 %v11740_v36 }
 0x1a5   :  { %11821 = vmatprep.subr.bf16.mxu0 %v11820_v16  ;;  %v11708_v16 = vpack.c.bf16 %v1487_v56, %v1486_v2  ;;  %v11752_v2 = vpack.c.bf16 %v8546_v55, %v8543_v33  ;;  %v8562_v56 = vld [vmem:[%s19719_s2 + $0x430] sm:$0xff] }
 0x1a6   :  { %v8566_v55 = vld [vmem:[%s19719_s2 + $0x450] sm:$0xff] }
 0x22d   :  { %v10009_v9 = vpop.f32.mrb[32].mxu0 }
 0x22e   :  { %v10010_v35 = vpop.f32.mrb[33].mxu0 }
 0x22f   :  { %v10011_v45 = vadd.f32 %v10010_v35, %v10009_v9  ;;  %v8532_v9 = vld [vmem:[%s19722_s4 + $0x228] sm:$0xff]  ;;  %v8544_v35 = vld [vmem:[%s19719_s2 + $0x3a0] sm:$0xff] }
 0x231   :  { %v10012_v18 = vpop.f32.mrb[34].mxu0  ;;  %v1339_v59 = vadd.f32 %v10011_v45, %v1105_v39  ;;  %v8547_v45 = vld [vmem:[%s19719_s2 + $0x3b8] sm:$0xff] }
 0x232   :  { %v10013_v21 = vpop.f32.mrb[35].mxu0 }
 0x233   :  { %v10014_v6 = vadd.f32 %v10013_v21, %v10012_v18  ;;  %v11824_v21 = vpack.c.bf16 %v8595_v42, %v8592_v12 }
 0x235   :  { %v1261_v26 = vpop.f32.mrb[64].mxu1  ;;  %v1344_v3 = vadd.f32 %v10014_v6, %v1110_v53  ;;  %v8601_v6 = vld [vmem:[%s19719_s2 + $0x568] sm:$0xff] }
 0x236   :  { %v13120_v47 = vadd.f32 %v1261_v26, %v1105_v39  ;;  %v1263_v22 = vpop.f32.mrb[65].mxu1  ;;  %v7654_v26 = vld [vmem:[%s19721_s6 + $0x28] sm:$0xff] }
 0x237   :  { %v13121_v25 = vadd.f32 %v1263_v22, %v1105_v39  ;;  %v8598_v39 = vld [vmem:[%s19719_s2 + $0x550] sm:$0xff]  ;;  %v11826_v22 = vpack.c.bf16 %v8547_v45, %v8544_v35  ;;  %7692 = vperm.xlu1 %13221, %v7654_v26   ;;  %v8555_v35 = vld [vmem:[%s19719_s2 + $0x3f8] sm:$0xff] }
 0x238   :  { %v1428_v48 = vmul.f32 1.442695, %v13120_v47  ;;  %vm1422_vm3 = vcmp.gt.f32.partialorder %v13120_v47, 0.0  ;;  %v8558_v45 = vld [vmem:[%s19719_s2 + $0x410] sm:$0xff] }
 0x239   :  { %v1430_v31 = vmul.f32 1.442695, %v13121_v25  ;;  %v1267_v32 = vpop.f32.mrb[66].mxu1  ;;  %vm1423_vm2 = vcmp.gt.f32.partialorder %v13121_v25, 0.0  ;;  %v8554_v26 = vld [vmem:[%s19719_s2 + $0x3f0] sm:$0xff] }
 0x23a   :  { %13222 = vpow2.f32 %v1428_v48  ;;  %v15103_v34 = vadd.f32 %v1267_v32, %v1110_v53  ;;  %v1269_v62 = vpop.f32.mrb[67].mxu1  ;;  %v8534_v48 = vld [vmem:[%s19722_s4 + $0x238] sm:$0xff]  ;;  %v8553_v32 = vld [vmem:[%s19719_s2 + $0x3e8] sm:$0xff] }
 0x23b   :  { %13224 = vpow2.f32 %v1430_v31  ;;  %v13123_v37 = vadd.f32 %v1269_v62, %v1110_v53  ;;  %v11828_v53 = vpack.c.bf16 %v8601_v6, %v8598_v39  ;;  %v8550_v31 = vld [vmem:[%s19719_s2 + $0x3d0] sm:$0xff]  ;;  %v8540_v62 = vld [vmem:[%s19719_s2 + $0x380] sm:$0xff]  ;;  %7702 = vperm.xlu1 %13221, %v7656_v40   ;;  %v8563_v40 = vld [vmem:[%s19719_s2 + $0x438] sm:$0xff] }
 0x23c   :  { %v1434_v27 = vmul.f32 1.442695, %v15103_v34  ;;  %vm1425_vm6 = vcmp.gt.f32.partialorder %v15103_v34, 0.0 }
 0x23d   :  { %v1436_v41 = vmul.f32 1.442695, %v13123_v37  ;;  %v11028_v11 = vpop.f32.mrb[68].mxu1  ;;  %vm1426_vm4 = vcmp.gt.f32.partialorder %v13123_v37, 0.0 }
 0x23e   :  { %13226 = vpow2.f32 %v1434_v27  ;;  %v15109_v30 = vadd.f32 %v11028_v11, %v1344_v3  ;;  %v1413_v46 = vpop.f32.mrb[69].mxu1  ;;  %v8607_v27 = vld [vmem:[%s19719_s2 + $0x598] sm:$0xff]  ;;  %v11830_v11 = vpack.c.bf16 %v8553_v32, %v8550_v31  ;;  %v8628_v31 = vld [vmem:[%s19719_s2 + $0x640] sm:$0xff] }
 0x23f   :  { %13228 = vpow2.f32 %v1436_v41  ;;  %v15111_v51 = vadd.f32 %v1413_v46, %v1339_v59  ;;  %v8631_v32 = vld [vmem:[%s19719_s2 + $0x658] sm:$0xff] }
 0x240   :  { %v1438_v57 = vmul.f32 1.442695, %v15109_v30  ;;  %vm1427_vm8 = vcmp.gt.f32.partialorder %v15109_v30, 0.0 }
 0x241   :  { %v1432_v43 = vmul.f32 1.442695, %v15111_v51  ;;  %vm1424_vm7 = vcmp.gt.f32.partialorder %v15111_v51, 0.0 }
 0x243   :  { %13230 = vpow2.f32 %v1432_v43  ;;  %v8556_v43 = vld [vmem:[%s19719_s2 + $0x400] sm:$0xff] }
 0x244   :  { %v13223_v54 = vpop.eup %13222  ;;  %13232 = vpow2.f32 %v1438_v57  ;;  %v8559_v57 = vld [vmem:[%s19719_s2 + $0x418] sm:$0xff] }
 0x245   :  { %v13225_v17 = vpop.eup %13224  ;;  %v8492_v1 = vadd.f32 -1.0, %v13223_v54 }
 0x246   :  { %v8493_v4 = vadd.f32 -1.0, %v13225_v17  ;;  %v8613_v17 = vld [vmem:[%s19719_s2 + $0x5c8] sm:$0xff] }
 0x247   :  { %v1446_v24 = vsel %vm1422_vm3, %v13120_v47, %v8492_v1  ;;  %v11743_v47 = vpack.c.bf16 %v8532_v9, %v8531_v8  ;;  %v7658_v1 = vld [vmem:[%s19721_s6 + $0x48] sm:$0xff]  ;;  %v11836_v38 = vpack.c.bf16 %v8613_v17, %v8610_v0  ;;  %v8551_v8 = vld [vmem:[%s19719_s2 + $0x3d8] sm:$0xff] }
 0x248   :  { %v13227_v49 = vpop.eup %13226  ;;  %v1447_v13 = vsel %vm1423_vm2, %v13121_v25, %v8493_v4  ;;  %v8533_v25 = vld [vmem:[%s19722_s4 + $0x230] sm:$0xff]  ;;  %7712 = vperm.xlu1 %13221, %v7658_v1   ;;  %v8569_v0 = vld [vmem:[%s19719_s2 + $0x468] sm:$0xff] }
 0x249   :  { %v13229_v10 = vpop.eup %13228  ;;  %v8495_v61 = vadd.f32 -1.0, %v13227_v49  ;;  %1555 = vmatprep.mubr.f32.mxu1 %v1447_v13  ;;  %v11746_v41 = vpack.c.bf16 %v8534_v48, %v8533_v25  ;;  %v8542_v49 = vld [vmem:[%s19719_s2 + $0x390] sm:$0xff]  ;;  %v8545_v13 = vld [vmem:[%s19719_s2 + $0x3a8] sm:$0xff] }
 0x24a   :  { %1556 = vmatmul.mubr.f32.vlgmr.msra.gmra.mrb[70].mxu1 %v1446_v24  ;;  %v8496_v36 = vadd.f32 -1.0, %v13229_v10  ;;  %v8565_v10 = vld [vmem:[%s19719_s2 + $0x448] sm:$0xff]  ;;  %v8552_v24 = vld [vmem:[%s19719_s2 + $0x3e0] sm:$0xff]  ;;  %v11754_v12 = vpack.c.bf16 %v8545_v13, %v8542_v49  ;;  %v11770_v49 = vpack.c.bf16 %v8569_v0, %v8566_v55  ;;  %v8627_v55 = vld [vmem:[%s19719_s2 + $0x638] sm:$0xff] }
 0x24b   :  { %11706 = vmatpush3.bf16.msra.mxu1 %v11705_v5  ;;  %11037 = vmatprep.mubr.msk.f32.mxu1 %vm13356_vm5, %v13354_v14  ;;  %v1449_v18 = vsel %vm1425_vm6, %v15103_v34, %v8495_v61  ;;  %v8537_v34 = vld [vmem:[%s19719_s2 + $0x368] sm:$0xff]  ;;  %v11834_v5 = vpack.c.bf16 %v8559_v57, %v8556_v43  ;;  %v11838_v42 = vpack.c.bf16 %v8565_v10, %v8562_v56  ;;  %v8572_v13 = vld [vmem:[%s19719_s2 + $0x480] sm:$0xff]  ;;  %v8575_v56 = vld [vmem:[%s19719_s2 + $0x498] sm:$0xff] }
 0x24c   :  { %11707 = vmatprep.subr.bf16.mxu1 %v13353_v50  ;;  %v1450_v19 = vsel %vm1426_vm4, %v13123_v37, %v8496_v36  ;;  %v8604_v37 = vld [vmem:[%s19719_s2 + $0x580] sm:$0xff]  ;;  %v11748_v59 = vpack.c.bf16 %v8540_v62, %v8537_v34  ;;  %v8549_v61 = vld [vmem:[%s19719_s2 + $0x3c8] sm:$0xff]  ;;  %v7660_v36 = vld [vmem:[%s19721_s6 + $0x58] sm:$0xff] }
 0x24d   :  { %v13231_v20 = vpop.eup %13230  ;;  %1737 = vmatprep.mubr.f32.mxu0 %v1450_v19  ;;  %v11832_v46 = vpack.c.bf16 %v8607_v27, %v8604_v37  ;;  %v8568_v19 = vld [vmem:[%s19719_s2 + $0x460] sm:$0xff]  ;;  %7722 = vperm.xlu1 %13221, %v7660_v36   ;;  %v8577_v48 = vld [vmem:[%s19719_s2 + $0x4a8] sm:$0xff]  ;;  %v7664_v34 = vld [vmem:[%s19721_s6 + $0x78] sm:$0xff] }
 0x24e   :  { %v8494_v23 = vadd.f32 -1.0, %v13231_v20  ;;  %1738 = vmatmul.mubr.f32.vlgmr.msra.gmra.mrb[36].mxu0 %v1449_v18  ;;  %v13233_v3 = vpop.eup %13232  ;;  %v8622_v20 = vld [vmem:[%s19719_s2 + $0x610] sm:$0xff]  ;;  %v8625_v18 = vld [vmem:[%s19719_s2 + $0x628] sm:$0xff]  ;;  %v8579_v10 = vld [vmem:[%s19719_s2 + $0x4b8] sm:$0xff] }
 0x24f   :  { %11709 = vmatpush3.bf16.msra.mxu1 %v11708_v16  ;;  %11823 = vmatpush3.bf16.msra.mxu0 %v11822_v7  ;;  %v8497_v54 = vadd.f32 -1.0, %v13233_v3  ;;  %v11756_v16 = vpack.c.bf16 %v8552_v24, %v8549_v61  ;;  %v8548_v7 = vld [vmem:[%s19719_s2 + $0x3c0] sm:$0xff]  ;;  %v11844_v25 = vpack.c.bf16 %v8625_v18, %v8622_v20  ;;  %v8637_v43 = vld [vmem:[%s19719_s2 + $0x688] sm:$0xff]  ;;  %v8582_v61 = vld [vmem:[%s19719_s2 + $0x4d0] sm:$0xff]  ;;  %v11774_v24 = vpack.c.bf16 %v8575_v56, %v8572_v13 }
 0x250   :  { %v1448_v29 = vsel %vm1424_vm7, %v15111_v51, %v8494_v23  ;;  %2165 = vmatprep.mubr.f32.mxu0 %v14861_v15  ;;  %11742 = vmatprep.subr.bf16.mxu1 %v13353_v50  ;;  %v8536_v51 = vld [vmem:[%s19719_s2 + $0x360] sm:$0xff]  ;;  %v11758_v39 = vpack.c.bf16 %v8551_v8, %v8548_v7  ;;  %v11760_v23 = vpack.c.bf16 %v8558_v45, %v8555_v35  ;;  %v8573_v1 = vld [vmem:[%s19719_s2 + $0x488] sm:$0xff]  ;;  %v8587_v8 = vld [vmem:[%s19719_s2 + $0x4f8] sm:$0xff] }
 0x251   :  { %11825 = vmatprep.subr.bf16.mxu0 %v11824_v21  ;;  %v11750_v4 = vpack.c.bf16 %v8539_v52, %v8536_v51  ;;  %v1451_v63 = vsel %vm1427_vm8, %v15109_v30, %v8497_v54  ;;  %v8616_v30 = vld [vmem:[%s19719_s2 + $0x5e0] sm:$0xff]  ;;  %v7662_v21 = vld [vmem:[%s19721_s6 + $0x68] sm:$0xff]  ;;  %v8570_v51 = vld [vmem:[%s19719_s2 + $0x470] sm:$0xff]  ;;  %v11776_v36 = vpack.c.bf16 %v8582_v61, %v8579_v10 }
 0x252   :  { %11038 = vmatmul.mubr.msk.f32.vlgmr.msra.gmra.mrb[72].mxu1 %vm939_vm1, %v1448_v29  ;;  %v11840_v9 = vpack.c.bf16 %v8619_v28, %v8616_v30  ;;  %v8561_v29 = vld [vmem:[%s19719_s2 + $0x428] sm:$0xff]  ;;  %7732 = vperm.xlu1 %13221, %v7662_v21   ;;  %v8560_v3 = vld [vmem:[%s19719_s2 + $0x420] sm:$0xff]  ;;  %v8634_v52 = vld [vmem:[%s19719_s2 + $0x670] sm:$0xff] }
 0x253   :  { %11744 = vmatpush3.bf16.msra.mxu1 %v11743_v47  ;;  %11827 = vmatpush3.bf16.msra.mxu0 %v11826_v22  ;;  %v8557_v47 = vld [vmem:[%s19719_s2 + $0x408] sm:$0xff]  ;;  %v8574_v22 = vld [vmem:[%s19719_s2 + $0x490] sm:$0xff]  ;;  %v11766_v54 = vpack.c.bf16 %v8563_v40, %v8560_v3  ;;  %v11852_v17 = vpack.c.bf16 %v8637_v43, %v8634_v52  ;;  %v8584_v7 = vld [vmem:[%s19719_s2 + $0x4e0] sm:$0xff] }
 0x254   :  { %11745 = vmatprep.subr.bf16.mxu1 %v13353_v50  ;;  %11829 = vmatprep.subr.bf16.mxu0 %v11828_v53  ;;  %v8564_v53 = vld [vmem:[%s19719_s2 + $0x440] sm:$0xff]  ;;  %v11762_v62 = vpack.c.bf16 %v8557_v47, %v8554_v26  ;;  %v11846_v37 = vpack.c.bf16 %v8577_v48, %v8574_v22  ;;  %v8578_v30 = vld [vmem:[%s19719_s2 + $0x4b0] sm:$0xff]  ;;  %v8581_v28 = vld [vmem:[%s19719_s2 + $0x4c8] sm:$0xff] }
 0x255   :  { %11048 = vmatprep.mubr.msk.f32.mxu1 %vm13356_vm5, %v13354_v14  ;;  %v11764_v27 = vpack.c.bf16 %v8564_v53, %v8561_v29  ;;  %v8590_v45 = vld [vmem:[%s19719_s2 + $0x510] sm:$0xff]  ;;  %v8593_v20 = vld [vmem:[%s19719_s2 + $0x528] sm:$0xff]  ;;  %v8600_v21 = vld [vmem:[%s19719_s2 + $0x560] sm:$0xff] }
 0x256   :  { %7742 = vperm.xlu1 %13221, %v7664_v34   ;;  %v8597_v18 = vld [vmem:[%s19719_s2 + $0x548] sm:$0xff]  ;;  %v8599_v26 = vld [vmem:[%s19719_s2 + $0x558] sm:$0xff]  ;;  %v8606_v22 = vld [vmem:[%s19719_s2 + $0x590] sm:$0xff] }
 0x257   :  { %11747 = vmatpush3.bf16.msra.mxu1 %v11746_v41  ;;  %11831 = vmatpush3.bf16.msra.mxu0 %v11830_v11  ;;  %v8580_v41 = vld [vmem:[%s19719_s2 + $0x4c0] sm:$0xff]  ;;  %v11848_v11 = vpack.c.bf16 %v8631_v32, %v8628_v31  ;;  %v8603_v47 = vld [vmem:[%s19719_s2 + $0x578] sm:$0xff]  ;;  %v8602_v29 = vld [vmem:[%s19719_s2 + $0x570] sm:$0xff] }
 0x258   :  { %11749 = vmatprep.subr.bf16.mxu1 %v11748_v59  ;;  %11833 = vmatprep.subr.bf16.mxu0 %v11832_v46  ;;  %v8583_v59 = vld [vmem:[%s19719_s2 + $0x4d8] sm:$0xff]  ;;  %v11792_v48 = vpack.c.bf16 %v8606_v22, %v8603_v47  ;;  %v8605_v53 = vld [vmem:[%s19719_s2 + $0x588] sm:$0xff]  ;;  %v8612_v32 = vld [vmem:[%s19719_s2 + $0x5c0] sm:$0xff] }
 0x259   :  { %v8567_v46 = vld [vmem:[%s19719_s2 + $0x458] sm:$0xff]  ;;  %v11850_v57 = vpack.c.bf16 %v8583_v59, %v8580_v41  ;;  %v8609_v31 = vld [vmem:[%s19719_s2 + $0x5a8] sm:$0xff]  ;;  %v11794_v34 = vpack.c.bf16 %v8605_v53, %v8602_v29  ;;  %v8618_v40 = vld [vmem:[%s19719_s2 + $0x5f0] sm:$0xff] }
 0x25a   :  { %11049 = vmatmul.mubr.msk.f32.vlgmr.msra.gmra.mrb[74].mxu1 %vm939_vm1, %v1451_v63  ;;  %v11768_v33 = vpack.c.bf16 %v8570_v51, %v8567_v46  ;;  %v8615_v3 = vld [vmem:[%s19719_s2 + $0x5d8] sm:$0xff]  ;;  %v8614_v59 = vld [vmem:[%s19719_s2 + $0x5d0] sm:$0xff]  ;;  %v8617_v46 = vld [vmem:[%s19719_s2 + $0x5e8] sm:$0xff] }
 0x25b   :  { %11751 = vmatpush1.bf16.msra.mxu1 %v11750_v4  ;;  %2011 = vmatprep.mubr.f32.mxu1 %v14861_v15  ;;  %v8571_v15 = vld [vmem:[%s19719_s2 + $0x478] sm:$0xff]  ;;  %v8576_v4 = vld [vmem:[%s19719_s2 + $0x4a0] sm:$0xff]  ;;  %v8621_v51 = vld [vmem:[%s19719_s2 + $0x608] sm:$0xff]  ;;  %v11802_v43 = vpack.c.bf16 %v8617_v46, %v8614_v59 }
 0x25c   :  { %11835 = vmatpush3.bf16.msra.mxu0 %v11834_v5  ;;  %11753 = vmatprep.subr.bf16.mxu1 %v11752_v2  ;;  %v11842_v6 = vpack.c.bf16 %v8571_v15, %v8568_v19  ;;  %v8640_v5 = vld [vmem:[%s19719_s2 + $0x6a0] sm:$0xff]  ;;  %v8643_v2 = vld [vmem:[%s19719_s2 + $0x6b8] sm:$0xff]  ;;  %v11772_v63 = vpack.c.bf16 %v8576_v4, %v8573_v1  ;;  %v8594_v19 = vld [vmem:[%s19719_s2 + $0x530] sm:$0xff]  ;;  %v11782_v15 = vpack.c.bf16 %v8587_v8, %v8584_v7 }
 0x25d   :  { %11837 = vmatprep.subr.bf16.mxu0 %v11836_v38  ;;  %v11856_v38 = vpack.c.bf16 %v8643_v2, %v8640_v5  ;;  %v8624_v52 = vld [vmem:[%s19719_s2 + $0x620] sm:$0xff]  ;;  %v8630_v0 = vld [vmem:[%s19719_s2 + $0x650] sm:$0xff]  ;;  %v8629_v5 = vld [vmem:[%s19719_s2 + $0x648] sm:$0xff] }
 0x25e   :  { %v11808_v1 = vpack.c.bf16 %v8630_v0, %v8627_v55  ;;  %v8626_v4 = vld [vmem:[%s19719_s2 + $0x630] sm:$0xff]  ;;  %v8633_v2 = vld [vmem:[%s19719_s2 + $0x668] sm:$0xff]  ;;  %v8639_v10 = vld [vmem:[%s19719_s2 + $0x698] sm:$0xff] }
 0x25f   :  { %11755 = vmatpush1.bf16.msra.mxu1 %v11754_v12  ;;  %v15390_v12 = vld [vmem:[#allocation2 + $0x40] sm:$0xff]  ;;  %v11810_v13 = vpack.c.bf16 %v8629_v5, %v8626_v4  ;;  %v8642_v61 = vld [vmem:[%s19719_s2 + $0x6b0] sm:$0xff]  ;;  %v8687_v8 = vld [vmem:[%s19722_s4 + $0x348] sm:$0xff] }
 0x260   :  { %11839 = vmatpush3.bf16.msra.mxu0 %v11838_v42  ;;  %11757 = vmatprep.subr.bf16.mxu1 %v11756_v16  ;;  %v11778_v42 = vpack.c.bf16 %v8581_v28, %v8578_v30  ;;  %v11816_v30 = vpack.c.bf16 %v8642_v61, %v8639_v10  ;;  %v8638_v28 = vld [vmem:[%s19719_s2 + $0x690] sm:$0xff]  ;;  %v8686_v7 = vld [vmem:[%s19722_s4 + $0x340] sm:$0xff]  ;;  %v8708_v47 = vld [vmem:[%s19722_s4 + $0x3e8] sm:$0xff] }
 0x261   :  { %11841 = vmatprep.subr.bf16.mxu0 %v11840_v9  ;;  %v15406_v9 = vld [vmem:[#allocation2 + $0x58] sm:$0xff]  ;;  %v8656_v22 = vld [vmem:[%s19722_s4 + $0x250] sm:$0xff]  ;;  %v8674_v53 = vld [vmem:[%s19722_s4 + $0x2e0] sm:$0xff] }
 0x262   :  { %v8678_v46 = vld [vmem:[%s19722_s4 + $0x300] sm:$0xff]  ;;  %v8681_v55 = vld [vmem:[%s19722_s4 + $0x318] sm:$0xff] }
 0x263   :  { %11759 = vmatpush1.bf16.msra.mxu1 %v11758_v39  ;;  %v11786_v39 = vpack.c.bf16 %v8593_v20, %v8590_v45  ;;  %v8654_v45 = vld [vmem:[%s19722_s4 + $0x240] sm:$0xff]  ;;  %v8685_v10 = vld [vmem:[%s19722_s4 + $0x338] sm:$0xff] }
 0x264   :  { %11843 = vmatpush3.bf16.msra.mxu0 %v11842_v6  ;;  %11761 = vmatprep.subr.bf16.mxu1 %v11760_v23  ;;  %v11788_v6 = vpack.c.bf16 %v8600_v21, %v8597_v18  ;;  %v8596_v23 = vld [vmem:[%s19719_s2 + $0x540] sm:$0xff]  ;;  %v8655_v18 = vld [vmem:[%s19722_s4 + $0x248] sm:$0xff]  ;;  %v8672_v21 = vld [vmem:[%s19722_s4 + $0x2d0] sm:$0xff] }
 0x265   :  { %11845 = vmatprep.subr.bf16.mxu0 %v11844_v25  ;;  %v11790_v25 = vpack.c.bf16 %v8599_v26, %v8596_v23  ;;  %v8707_v26 = vld [vmem:[%s19722_s4 + $0x3e0] sm:$0xff] }
 0x266   :  { %v8682_v5 = vld [vmem:[%s19722_s4 + $0x320] sm:$0xff] }
 0x267   :  { %11763 = vmatpush1.bf16.msra.mxu1 %v11762_v62  ;;  %v11796_v62 = vpack.c.bf16 %v8612_v32, %v8609_v31  ;;  %v8675_v31 = vld [vmem:[%s19722_s4 + $0x2e8] sm:$0xff] }
 0x268   :  { %11847 = vmatpush3.bf16.msra.mxu0 %v11846_v37  ;;  %11765 = vmatprep.subr.bf16.mxu1 %v11764_v27  ;;  %v8608_v37 = vld [vmem:[%s19719_s2 + $0x5a0] sm:$0xff]  ;;  %v8611_v27 = vld [vmem:[%s19719_s2 + $0x5b8] sm:$0xff]  ;;  %v11868_v32 = vpack.c.bf16 %v8675_v31, %v8674_v53 }
 0x269   :  { %11849 = vmatprep.subr.bf16.mxu0 %v11848_v11  ;;  %v11798_v41 = vpack.c.bf16 %v8611_v27, %v8608_v37  ;;  %v11800_v11 = vpack.c.bf16 %v8618_v40, %v8615_v3  ;;  %v8676_v27 = vld [vmem:[%s19722_s4 + $0x2f0] sm:$0xff]  ;;  %v8677_v3 = vld [vmem:[%s19722_s4 + $0x2f8] sm:$0xff]  ;;  %v8691_v31 = vld [vmem:[%s19722_s4 + $0x360] sm:$0xff] }
 0x26a   :  { %v11872_v40 = vpack.c.bf16 %v8677_v3, %v8676_v27 }
 0x26b   :  { %11767 = vmatpush1.bf16.msra.mxu1 %v11766_v54  ;;  %v11804_v54 = vpack.c.bf16 %v8624_v52, %v8621_v51  ;;  %v8679_v51 = vld [vmem:[%s19722_s4 + $0x308] sm:$0xff] }
 0x26c   :  { %11851 = vmatpush3.bf16.msra.mxu0 %v11850_v57  ;;  %11769 = vmatprep.subr.bf16.mxu1 %v11768_v33  ;;  %v8620_v57 = vld [vmem:[%s19719_s2 + $0x600] sm:$0xff]  ;;  %v8623_v33 = vld [vmem:[%s19719_s2 + $0x618] sm:$0xff]  ;;  %v11876_v52 = vpack.c.bf16 %v8679_v51, %v8678_v46  ;;  %v8712_v51 = vld [vmem:[%s19722_s4 + $0x408] sm:$0xff] }
 0x26d   :  { %11853 = vmatprep.subr.bf16.mxu0 %v11852_v17  ;;  %v8711_v46 = vld [vmem:[%s19722_s4 + $0x400] sm:$0xff] }
 0x26f   :  { %2166 = vmatmul.mubr.f32.vlgmr.msra.gmra.mrb[38].mxu0 %v14857_v44  ;;  %11771 = vmatpush1.bf16.msra.mxu1 %v11770_v49  ;;  %v8585_v44 = vld [vmem:[%s19719_s2 + $0x4e8] sm:$0xff]  ;;  %v8636_v49 = vld [vmem:[%s19719_s2 + $0x680] sm:$0xff] }
 0x270   :  { %2170 = vmatprep.mubr.f32.mxu0 %v14876_v60  ;;  %11855 = vmatpush3.bf16.msra.mxu0 %v11852_v17  ;;  %v8588_v60 = vld [vmem:[%s19719_s2 + $0x500] sm:$0xff]  ;;  %v11806_v17 = vpack.c.bf16 %v8623_v33, %v8620_v57  ;;  %v11812_v56 = vpack.c.bf16 %v8636_v49, %v8633_v2  ;;  %v8680_v33 = vld [vmem:[%s19722_s4 + $0x310] sm:$0xff]  ;;  %v8683_v2 = vld [vmem:[%s19722_s4 + $0x328] sm:$0xff] }
 0x271   :  { %11773 = vmatprep.subr.bf16.mxu1 %v11772_v63  ;;  %11857 = vmatprep.subr.bf16.mxu0 %v11856_v38  ;;  %v11780_v16 = vpack.c.bf16 %v8588_v60, %v8585_v44  ;;  %v8632_v63 = vld [vmem:[%s19719_s2 + $0x660] sm:$0xff]  ;;  %v13350_v44 = vld [vmem:[#allocation2 + $0x30] sm:$0xff]  ;;  %v11880_v0 = vpack.c.bf16 %v8681_v55, %v8680_v33  ;;  %v11884_v49 = vpack.c.bf16 %v8683_v2, %v8682_v5  ;;  %v8714_v55 = vld [vmem:[%s19722_s4 + $0x418] sm:$0xff] }
 0x272   :  { %v13351_v60 = vld [vmem:[#allocation2 + $0x50] sm:$0xff]  ;;  %v8715_v5 = vld [vmem:[%s19722_s4 + $0x420] sm:$0xff]  ;;  %v8716_v2 = vld [vmem:[%s19722_s4 + $0x428] sm:$0xff] }
 0x273   :  { %2171 = vmatmul.mubr.f32.gmra.mrb[40].mxu0 %v14872_v58  ;;  %11775 = vmatpush1.bf16.msra.mxu1 %v11774_v24  ;;  %v8591_v58 = vld [vmem:[%s19719_s2 + $0x518] sm:$0xff]  ;;  %v8713_v33 = vld [vmem:[%s19722_s4 + $0x410] sm:$0xff] }
 0x274   :  { %11859 = vmatpush3.bf16.msra.mxu0 %v11856_v38  ;;  %11059 = vmatprep.mubr.msk.f32.mxu0 %vm939_vm1, %v15390_v12  ;;  %v11784_v35 = vpack.c.bf16 %v8594_v19, %v8591_v58  ;;  %v8635_v38 = vld [vmem:[%s19719_s2 + $0x678] sm:$0xff]  ;;  %v11893_v58 = vpack.c.bf16 %v8687_v8, %v8686_v7 }
 0x275   :  { %11777 = vmatprep.subr.bf16.mxu1 %v11776_v36  ;;  %v11814_v24 = vpack.c.bf16 %v8635_v38, %v8632_v63  ;;  %v8641_v36 = vld [vmem:[%s19719_s2 + $0x6a8] sm:$0xff]  ;;  %v8689_v19 = vld [vmem:[%s19722_s4 + $0x358] sm:$0xff]  ;;  %v8684_v38 = vld [vmem:[%s19722_s4 + $0x330] sm:$0xff] }
 0x276   :  { %v11888_v61 = vpack.c.bf16 %v8685_v10, %v8684_v38  ;;  %v8717_v38 = vld [vmem:[%s19722_s4 + $0x430] sm:$0xff]  ;;  %v8718_v10 = vld [vmem:[%s19722_s4 + $0x438] sm:$0xff] }
 0x277   :  { %11060 = vmatmul.mubr.msk.f32.vlgmr.msra.gmra.mrb[42].mxu0 %vm939_vm1, %v15406_v9  ;;  %11779 = vmatpush1.bf16.msra.mxu1 %v11778_v42  ;;  %v11818_v42 = vpack.c.bf16 %v8641_v36, %v8638_v28 }
 0x278   :  { %11781 = vmatprep.subr.bf16.mxu1 %v11780_v16  ;;  %v13352_v16 = vld [vmem:[#allocation2 + $0x48] sm:$0xff] }
 0x27b   :  { %11783 = vmatpush1.bf16.msra.mxu1 %v11782_v15  ;;  %v8670_v15 = vld [vmem:[%s19722_s4 + $0x2c0] sm:$0xff] }
 0x27c   :  { %11785 = vmatprep.subr.bf16.mxu1 %v11784_v35  ;;  %v8671_v35 = vld [vmem:[%s19722_s4 + $0x2c8] sm:$0xff] }
 0x27d   :  { %v11860_v20 = vpack.c.bf16 %v8671_v35, %v8670_v15 }
 0x27f   :  { %11787 = vmatpush1.bf16.msra.mxu1 %v11786_v39  ;;  %v8673_v39 = vld [vmem:[%s19722_s4 + $0x2d8] sm:$0xff]  ;;  %11861 = vmatprep.subr.bf16.mxu0 %v11860_v20 }
 0x280   :  { %11789 = vmatprep.subr.bf16.mxu1 %v11788_v6  ;;  %v11862_v6 = vpack.c.bf16 %v8655_v18, %v8654_v45  ;;  %v11864_v23 = vpack.c.bf16 %v8673_v39, %v8672_v21  ;;  %v15639_v45 = vpop.permute.xlu1 %1933 }
 0x282   :  { %11863 = vmatpush3.bf16.msra.mxu0 %v11862_v6 }
 0x283   :  { %11791 = vmatpush1.bf16.msra.mxu1 %v11790_v25  ;;  %v11898_v25 = vpack.c.bf16 %v8708_v47, %v8707_v26  ;;  %11865 = vmatprep.subr.bf16.mxu0 %v11864_v23 }
 0x284   :  { %11793 = vmatprep.subr.bf16.mxu1 %v11792_v48  ;;  %v8657_v48 = vld [vmem:[%s19722_s4 + $0x258] sm:$0xff]  ;;  %v15641_v23 = vpop.permute.xlu1 %1938 }
 0x285   :  { %v11866_v29 = vpack.c.bf16 %v8657_v48, %v8656_v22 }
 0x287   :  { %11795 = vmatpush1.bf16.msra.mxu1 %v11794_v34  ;;  %v8658_v34 = vld [vmem:[%s19722_s4 + $0x260] sm:$0xff]  ;;  %11867 = vmatpush3.bf16.msra.mxu0 %v11866_v29 }
 0x288   :  { %11797 = vmatprep.subr.bf16.mxu1 %v11796_v62  ;;  %v8659_v62 = vld [vmem:[%s19722_s4 + $0x268] sm:$0xff]  ;;  %11869 = vmatprep.subr.bf16.mxu0 %v11868_v32 }
 0x289   :  { %v11870_v37 = vpack.c.bf16 %v8659_v62, %v8658_v34  ;;  %v8692_v32 = vld [vmem:[%s19722_s4 + $0x368] sm:$0xff]  ;;  %v8709_v34 = vld [vmem:[%s19722_s4 + $0x3f0] sm:$0xff]  ;;  %v8710_v62 = vld [vmem:[%s19722_s4 + $0x3f8] sm:$0xff] }
 0x28a   :  { %v11900_v3 = vpack.c.bf16 %v8692_v32, %v8691_v31 }
 0x28b   :  { %11799 = vmatpush1.bf16.msra.mxu1 %v11798_v41  ;;  %11871 = vmatpush3.bf16.msra.mxu0 %v11870_v37  ;;  %v8660_v41 = vld [vmem:[%s19722_s4 + $0x270] sm:$0xff] }
 0x28c   :  { %11801 = vmatprep.subr.bf16.mxu1 %v11800_v11  ;;  %v8661_v11 = vld [vmem:[%s19722_s4 + $0x278] sm:$0xff]  ;;  %11873 = vmatprep.subr.bf16.mxu0 %v11872_v40  ;;  %v11902_v40 = vpack.c.bf16 %v8710_v62, %v8709_v34 }
 0x28d   :  { %v11874_v59 = vpack.c.bf16 %v8661_v11, %v8660_v41  ;;  %v8693_v41 = vld [vmem:[%s19722_s4 + $0x370] sm:$0xff]  ;;  %v8694_v11 = vld [vmem:[%s19722_s4 + $0x378] sm:$0xff] }
 0x28f   :  { %11803 = vmatpush1.bf16.msra.mxu1 %v11802_v43  ;;  %11875 = vmatpush3.bf16.msra.mxu0 %v11874_v59  ;;  %v8662_v43 = vld [vmem:[%s19722_s4 + $0x280] sm:$0xff] }
 0x290   :  { %11805 = vmatprep.subr.bf16.mxu1 %v11804_v54  ;;  %v8663_v54 = vld [vmem:[%s19722_s4 + $0x288] sm:$0xff]  ;;  %11877 = vmatprep.subr.bf16.mxu0 %v11876_v52  ;;  %v11904_v52 = vpack.c.bf16 %v8694_v11, %v8693_v41 }
 0x291   :  { %v11878_v57 = vpack.c.bf16 %v8663_v54, %v8662_v43  ;;  %v11906_v43 = vpack.c.bf16 %v8712_v51, %v8711_v46  ;;  %v8695_v54 = vld [vmem:[%s19722_s4 + $0x380] sm:$0xff] }
 0x293   :  { %11807 = vmatpush1.bf16.msra.mxu1 %v11806_v17  ;;  %11879 = vmatpush3.bf16.msra.mxu0 %v11878_v57  ;;  %v8664_v17 = vld [vmem:[%s19722_s4 + $0x290] sm:$0xff]  ;;  %v8696_v57 = vld [vmem:[%s19722_s4 + $0x388] sm:$0xff] }
 0x294   :  { %11809 = vmatprep.subr.bf16.mxu1 %v11808_v1  ;;  %v8665_v1 = vld [vmem:[%s19722_s4 + $0x298] sm:$0xff]  ;;  %11881 = vmatprep.subr.bf16.mxu0 %v11880_v0  ;;  %v11908_v0 = vpack.c.bf16 %v8696_v57, %v8695_v54  ;;  %v8733_v54 = vld [vmem:[%s19719_s2 + $0x6e8] sm:$0xff] }
 0x295   :  { %v11882_v4 = vpack.c.bf16 %v8665_v1, %v8664_v17  ;;  %v11910_v17 = vpack.c.bf16 %v8714_v55, %v8713_v33  ;;  %v8697_v1 = vld [vmem:[%s19722_s4 + $0x390] sm:$0xff] }
 0x297   :  { %11811 = vmatpush1.bf16.msra.mxu1 %v11810_v13  ;;  %11883 = vmatpush3.bf16.msra.mxu0 %v11882_v4  ;;  %v8666_v13 = vld [vmem:[%s19722_s4 + $0x2a0] sm:$0xff]  ;;  %v8698_v4 = vld [vmem:[%s19722_s4 + $0x398] sm:$0xff] }
 0x298   :  { %11813 = vmatprep.subr.bf16.mxu1 %v11812_v56  ;;  %v8667_v56 = vld [vmem:[%s19722_s4 + $0x2a8] sm:$0xff]  ;;  %11885 = vmatprep.subr.bf16.mxu0 %v11884_v49  ;;  %v11912_v49 = vpack.c.bf16 %v8698_v4, %v8697_v1 }
 0x299   :  { %v11886_v63 = vpack.c.bf16 %v8667_v56, %v8666_v13  ;;  %v11914_v13 = vpack.c.bf16 %v8716_v2, %v8715_v5  ;;  %v8699_v56 = vld [vmem:[%s19722_s4 + $0x3a0] sm:$0xff]  ;;  %v8787_v2 = vld [vmem:[%s19719_s2 + $0x898] sm:$0xff] }
 0x29a   :  { %2012 = vmatmul.mubr.f32.vlgmr.msra.gmra.mrb[76].mxu1 %v13350_v44  ;;  %v8784_v5 = vld [vmem:[%s19719_s2 + $0x880] sm:$0xff] }
 0x29b   :  { %2017 = vmatprep.mubr.f32.mxu1 %v13351_v60  ;;  %11815 = vmatpush1.bf16.msra.mxu1 %v11814_v24  ;;  %v8668_v24 = vld [vmem:[%s19722_s4 + $0x2b0] sm:$0xff] }
 0x29c   :  { %11817 = vmatprep.subr.bf16.mxu1 %v11816_v30  ;;  %v8669_v30 = vld [vmem:[%s19722_s4 + $0x2b8] sm:$0xff]  ;;  %11887 = vmatpush3.bf16.msra.mxu0 %v11886_v63  ;;  %v8700_v63 = vld [vmem:[%s19722_s4 + $0x3a8] sm:$0xff] }
 0x29d   :  { %v11890_v28 = vpack.c.bf16 %v8669_v30, %v8668_v24  ;;  %11889 = vmatprep.subr.bf16.mxu0 %v11888_v61  ;;  %v11916_v61 = vpack.c.bf16 %v8700_v63, %v8699_v56  ;;  %v11918_v24 = vpack.c.bf16 %v8718_v10, %v8717_v38  ;;  %v8701_v30 = vld [vmem:[%s19722_s4 + $0x3b0] sm:$0xff]  ;;  %v8728_v38 = vld [vmem:[%s19719_s2 + $0x6c0] sm:$0xff]  ;;  %v8731_v10 = vld [vmem:[%s19719_s2 + $0x6d8] sm:$0xff] }
 0x29e   :  { %2018 = vmatmul.mubr.f32.gmra.mrb[78].mxu1 %v13352_v16 }
 0x29f   :  { %11819 = vmatpush1.bf16.msra.mxu1 %v11818_v42  ;;  %2088 = vmatprep.mubr.f32.mxu1 %v13354_v14 }
 0x2a0   :  { %11892 = vmatprep.subr.bf16.mxu1 %v13353_v50  ;;  %11891 = vmatpush3.bf16.msra.mxu0 %v11890_v28  ;;  %v8702_v28 = vld [vmem:[%s19722_s4 + $0x3b8] sm:$0xff] }
 0x2a1   :  { %11930 = vmatprep.subr.bf16.mxu0 %v13353_v50 }
 0x2a2   :  { %8644 = vmatmul.mubr.msk.f32.vlgmr.msra.gmra.mrb[76].mxu1 %vm939_vm1, %v15390_v12  ;;  %v8688_v12 = vld [vmem:[%s19722_s4 + $0x350] sm:$0xff] }
 0x2a3   :  { %2094 = vmatprep.mubr.f32.mxu1 %v13354_v14  ;;  %11894 = vmatpush3.bf16.msra.mxu1 %v11893_v58 }
 0x2a4   :  { %11895 = vmatprep.subr.bf16.mxu1 %v13353_v50 }
 0x2a6   :  { %8645 = vmatmul.mubr.msk.f32.gmra.mrb[78].mxu1 %vm939_vm1, %v15406_v9  ;;  %v11896_v9 = vpack.c.bf16 %v8689_v19, %v8688_v12 }
 0x2a7   :  { %11070 = vmatprep.mubr.msk.f32.mxu1 %vm13356_vm5, %v13354_v14 }
 0x2a8   :  { %11897 = vmatpush3.bf16.msra.mxu1 %v11896_v9 }
 0x2a9   :  { %11899 = vmatprep.subr.bf16.mxu1 %v11898_v25 }
 0x31d   :  { %v10053_v36 = vpop.f32.mrb[70].mxu1 }
 0x31e   :  { %v10054_v44 = vpop.f32.mrb[71].mxu1 }
 0x31f   :  { %v10055_v60 = vadd.f32 %v10054_v44, %v10053_v36  ;;  %v8719_v36 = vld [vmem:[%s19722_s4 + $0x440] sm:$0xff]  ;;  %v8720_v44 = vld [vmem:[%s19722_s4 + $0x448] sm:$0xff] }
 0x321   :  { %v10093_v42 = vpop.f32.mrb[36].mxu0 }
 0x322   :  { %v10094_v16 = vpop.f32.mrb[37].mxu0 }
 0x323   :  { %v10095_v7 = vadd.f32 %v10094_v16, %v10093_v42  ;;  %v11922_v42 = vpack.c.bf16 %v8720_v44, %v8719_v36  ;;  %v8703_v16 = vld [vmem:[%s19722_s4 + $0x3c0] sm:$0xff]  ;;  %v8739_v36 = vld [vmem:[%s19719_s2 + $0x718] sm:$0xff] }
 0x324   :  { %v8735_v44 = vld [vmem:[%s19719_s2 + $0x6f8] sm:$0xff] }
 0x325   :  { %v1627_v8 = vpop.f32.mrb[72].mxu1 }
 0x326   :  { %v1628_v58 = vadd.f32 %v10055_v60, %v1627_v8  ;;  %v11039_v12 = vpop.f32.mrb[73].mxu1  ;;  %v11920_v60 = vpack.c.bf16 %v8702_v28, %v8701_v30  ;;  %v8721_v8 = vld [vmem:[%s19722_s4 + $0x450] sm:$0xff]  ;;  %v12012_v28 = vpack.c.bf16 %v8787_v2, %v8784_v5  ;;  %v8763_v5 = vld [vmem:[%s19719_s2 + $0x7d8] sm:$0xff] }
 0x327   :  { %v8759_v2 = vld [vmem:[%s19719_s2 + $0x7b8] sm:$0xff] }
 0x328   :  { %1632 = vst.msk [vmem:[#allocation3] sm:$0xff] %vm1631_vm9, %v1628_v58  ;;  %v8722_v58 = vld [vmem:[%s19722_s4 + $0x458] sm:$0xff] }
 0x32d   :  { %v1809_v19 = vpop.f32.mrb[74].mxu1 }
 0x32e   :  { %v1810_v9 = vadd.f32 %v10095_v7, %v1809_v19  ;;  %v11050_v15 = vpop.f32.mrb[75].mxu1  ;;  %v8704_v7 = vld [vmem:[%s19722_s4 + $0x3c8] sm:$0xff] }
 0x32f   :  { %v11924_v12 = vpack.c.bf16 %v8704_v7, %v8703_v16  ;;  %v8705_v15 = vld [vmem:[%s19722_s4 + $0x3d0] sm:$0xff]  ;;  %v8793_v16 = vld [vmem:[%s19719_s2 + $0x8c8] sm:$0xff] }
 0x330   :  { %1813 = vst.msk [vmem:[#allocation3 + $0x8] sm:$0xff] %vm1631_vm9, %v1810_v9  ;;  %v11926_v9 = vpack.c.bf16 %v8722_v58, %v8721_v8  ;;  %v2644_v7 = vld [vmem:[#allocation2 + $0x68] sm:$0xff]  ;;  %v11938_v8 = vpack.c.bf16 %v8731_v10, %v8728_v38 }
 0x342   :  { %v10133_v35 = vpop.f32.mrb[38].mxu0 }
 0x343   :  { %v10134_v20 = vpop.f32.mrb[39].mxu0 }
 0x344   :  { %v10135_v18 = vadd.f32 %v10134_v20, %v10133_v35  ;;  %v8706_v35 = vld [vmem:[%s19722_s4 + $0x3d8] sm:$0xff] }
 0x346   :  { %v10136_v21 = vpop.f32.mrb[40].mxu0  ;;  %v2168_v22 = vadd.f32 %v10135_v18, %v15639_v45 }
 0x347   :  { %v10137_v39 = vpop.f32.mrb[41].mxu0 }
 0x348   :  { %v10138_v6 = vadd.f32 %v10137_v39, %v10136_v21  ;;  %v8778_v21 = vld [vmem:[%s19719_s2 + $0x850] sm:$0xff]  ;;  %v8781_v39 = vld [vmem:[%s19719_s2 + $0x868] sm:$0xff] }
 0x34a   :  { %v2173_v26 = vadd.f32 %v10138_v6, %v15641_v23  ;;  %v11061_v47 = vpop.f32.mrb[42].mxu0 }
 0x34b   :  { %v2242_v25 = vpop.f32.mrb[43].mxu0 }
 0x34c   :  { %v15645_v48 = vadd.f32 %v11061_v47, %v2173_v26  ;;  %v2243_v29 = vadd.f32 %v2242_v25, %v2168_v22  ;;  %v11928_v47 = vpack.c.bf16 %v8706_v35, %v8705_v15  ;;  %v8742_v15 = vld [vmem:[%s19719_s2 + $0x730] sm:$0xff] }
 0x34e   :  { %v2261_v53 = vmul.f32 1.442695, %v2243_v29  ;;  %vm2253_vm10 = vcmp.gt.f32.partialorder %v2243_v29, 0.0  ;;  %v2267_v34 = vmul.f32 1.442695, %v15645_v48  ;;  %vm2256_vm15 = vcmp.gt.f32.partialorder %v15645_v48, 0.0 }
 0x350   :  { %13234 = vpow2.f32 %v2261_v53 }
 0x35a   :  { %v13235_v37 = vpop.eup %13234 }
 0x35b   :  { %v8650_v27 = vadd.f32 -1.0, %v13235_v37 }
 0x35d   :  { %v2277_v59 = vsel %vm2253_vm10, %v2243_v29, %v8650_v27  ;;  %v12008_v29 = vpack.c.bf16 %v8781_v39, %v8778_v21  ;;  %v8723_v27 = vld [vmem:[%s19722_s4 + $0x460] sm:$0xff]  ;;  %v8741_v21 = vld [vmem:[%s19719_s2 + $0x728] sm:$0xff] }
 0x35e   :  { %11071 = vmatmul.mubr.msk.f32.vlgmr.msra.gmra.mrb[80].mxu1 %vm939_vm1, %v2277_v59  ;;  %v8725_v59 = vld [vmem:[%s19722_s4 + $0x470] sm:$0xff]  ;;  %v8744_v39 = vld [vmem:[%s19719_s2 + $0x740] sm:$0xff] }
 0x35f   :  { %11901 = vmatpush3.bf16.msra.mxu1 %v11900_v3  ;;  %v8724_v3 = vld [vmem:[%s19722_s4 + $0x468] sm:$0xff] }
 0x360   :  { %11903 = vmatprep.subr.bf16.mxu1 %v11902_v40  ;;  %v11931_v11 = vpack.c.bf16 %v8724_v3, %v8723_v27 }
 0x363   :  { %11905 = vmatpush3.bf16.msra.mxu1 %v11904_v52  ;;  %v8726_v52 = vld [vmem:[%s19722_s4 + $0x478] sm:$0xff] }
 0x364   :  { %11907 = vmatprep.subr.bf16.mxu1 %v11906_v43  ;;  %v8730_v43 = vld [vmem:[%s19719_s2 + $0x6d0] sm:$0xff] }
 0x367   :  { %11909 = vmatpush3.bf16.msra.mxu1 %v11908_v0  ;;  %v8729_v0 = vld [vmem:[%s19719_s2 + $0x6c8] sm:$0xff] }
 0x368   :  { %11911 = vmatprep.subr.bf16.mxu1 %v11910_v17  ;;  %v8732_v17 = vld [vmem:[%s19719_s2 + $0x6e0] sm:$0xff] }
 0x369   :  { %v11936_v63 = vpack.c.bf16 %v8732_v17, %v8729_v0  ;;  %v8752_v0 = vld [vmem:[%s19719_s2 + $0x780] sm:$0xff]  ;;  %v8755_v17 = vld [vmem:[%s19719_s2 + $0x798] sm:$0xff] }
 0x36b   :  { %11913 = vmatpush3.bf16.msra.mxu1 %v11912_v49  ;;  %v11934_v49 = vpack.c.bf16 %v8726_v52, %v8725_v59  ;;  %v8756_v52 = vld [vmem:[%s19719_s2 + $0x7a0] sm:$0xff] }
 0x36c   :  { %11915 = vmatprep.subr.bf16.mxu1 %v11914_v13  ;;  %v12010_v13 = vpack.c.bf16 %v8733_v54, %v8730_v43  ;;  %v8808_v43 = vld [vmem:[%s19719_s2 + $0x940] sm:$0xff]  ;;  %v8811_v54 = vld [vmem:[%s19719_s2 + $0x958] sm:$0xff] }
 0x36f   :  { %11917 = vmatpush3.bf16.msra.mxu1 %v11916_v61  ;;  %v8736_v61 = vld [vmem:[%s19719_s2 + $0x700] sm:$0xff] }
 0x370   :  { %11919 = vmatprep.subr.bf16.mxu1 %v11918_v24  ;;  %v12014_v58 = vpack.c.bf16 %v8739_v36, %v8736_v61  ;;  %v8758_v61 = vld [vmem:[%s19719_s2 + $0x7b0] sm:$0xff]  ;;  %v8769_v36 = vld [vmem:[%s19719_s2 + $0x808] sm:$0xff] }
 0x373   :  { %11921 = vmatpush3.bf16.msra.mxu1 %v11920_v60  ;;  %v8738_v60 = vld [vmem:[%s19719_s2 + $0x710] sm:$0xff] }
 0x374   :  { %11923 = vmatprep.subr.bf16.mxu1 %v11922_v42  ;;  %v8790_v42 = vld [vmem:[%s19719_s2 + $0x8b0] sm:$0xff] }
 0x375   :  { %v2090_v19 = vpop.f32.mrb[76].mxu1 }
 0x376   :  { %v13124_v20 = vadd.f32 %v2090_v19, %v15639_v45  ;;  %v2092_v18 = vpop.f32.mrb[77].mxu1  ;;  %v8734_v19 = vld [vmem:[%s19719_s2 + $0x6f0] sm:$0xff] }
 0x377   :  { %v13125_v6 = vadd.f32 %v2092_v18, %v15639_v45  ;;  %11925 = vmatpush3.bf16.msra.mxu1 %v11924_v12  ;;  %v11940_v12 = vpack.c.bf16 %v8738_v60, %v8735_v44  ;;  %v8745_v18 = vld [vmem:[%s19719_s2 + $0x748] sm:$0xff]  ;;  %v8768_v60 = vld [vmem:[%s19719_s2 + $0x800] sm:$0xff] }
 0x378   :  { %v2257_v26 = vmul.f32 1.442695, %v13124_v20  ;;  %11927 = vmatprep.subr.bf16.mxu1 %v11926_v9  ;;  %vm2251_vm12 = vcmp.gt.f32.partialorder %v13124_v20, 0.0  ;;  %v8737_v9 = vld [vmem:[%s19719_s2 + $0x708] sm:$0xff] }
 0x379   :  { %v2259_v22 = vmul.f32 1.442695, %v13125_v6  ;;  %v2096_v25 = vpop.f32.mrb[78].mxu1  ;;  %vm2252_vm11 = vcmp.gt.f32.partialorder %v13125_v6, 0.0  ;;  %v8765_v44 = vld [vmem:[%s19719_s2 + $0x7e8] sm:$0xff] }
 0x37a   :  { %13236 = vpow2.f32 %v2257_v26  ;;  %v13126_v53 = vadd.f32 %v2096_v25, %v15641_v23  ;;  %v2098_v31 = vpop.f32.mrb[79].mxu1  ;;  %v11942_v26 = vpack.c.bf16 %v8737_v9, %v8734_v19  ;;  %v8740_v25 = vld [vmem:[%s19719_s2 + $0x720] sm:$0xff]  ;;  %v8767_v19 = vld [vmem:[%s19719_s2 + $0x7f8] sm:$0xff] }
 0x37b   :  { %13238 = vpow2.f32 %v2259_v22  ;;  %v13127_v32 = vadd.f32 %v2098_v31, %v15641_v23  ;;  %11929 = vmatpush3.bf16.msra.mxu1 %v11928_v47  ;;  %v12018_v47 = vpack.c.bf16 %v8745_v18, %v8742_v15  ;;  %v11944_v22 = vpack.c.bf16 %v8744_v39, %v8741_v21  ;;  %v8772_v9 = vld [vmem:[%s19719_s2 + $0x820] sm:$0xff]  ;;  %v8774_v18 = vld [vmem:[%s19719_s2 + $0x830] sm:$0xff]  ;;  %v8829_v39 = vld [vmem:[%s19719_s2 + $0x9e8] sm:$0xff] }
 0x37c   :  { %v2263_v62 = vmul.f32 1.442695, %v13126_v53  ;;  %12009 = vmatprep.subr.bf16.mxu1 %v12008_v29  ;;  %vm2254_vm14 = vcmp.gt.f32.partialorder %v13126_v53, 0.0  ;;  %v8743_v29 = vld [vmem:[%s19719_s2 + $0x738] sm:$0xff]  ;;  %v8826_v21 = vld [vmem:[%s19719_s2 + $0x9d0] sm:$0xff] }
 0x37d   :  { %v2265_v37 = vmul.f32 1.442695, %v13127_v32  ;;  %vm2255_vm13 = vcmp.gt.f32.partialorder %v13127_v32, 0.0  ;;  %v11946_v27 = vpack.c.bf16 %v8743_v29, %v8740_v25  ;;  %v12040_v25 = vpack.c.bf16 %v8829_v39, %v8826_v21  ;;  %v8777_v29 = vld [vmem:[%s19719_s2 + $0x848] sm:$0xff]  ;;  %v8818_v21 = vld [vmem:[%s19719_s2 + $0x990] sm:$0xff] }
 0x37e   :  { %13240 = vpow2.f32 %v2263_v62  ;;  %v8750_v62 = vld [vmem:[%s19719_s2 + $0x770] sm:$0xff]  ;;  %v8821_v39 = vld [vmem:[%s19719_s2 + $0x9a8] sm:$0xff] }
 0x37f   :  { %13242 = vpow2.f32 %v2265_v37  ;;  %v8802_v37 = vld [vmem:[%s19719_s2 + $0x910] sm:$0xff] }
 0x380   :  { %13244 = vpow2.f32 %v2267_v34  ;;  %v8747_v34 = vld [vmem:[%s19719_s2 + $0x758] sm:$0xff] }
 0x384   :  { %v13237_v45 = vpop.eup %13236 }
 0x385   :  { %v13239_v40 = vpop.eup %13238  ;;  %v8648_v23 = vadd.f32 -1.0, %v13237_v45  ;;  %v8805_v45 = vld [vmem:[%s19719_s2 + $0x928] sm:$0xff] }
 0x386   :  { %v8649_v41 = vadd.f32 -1.0, %v13239_v40  ;;  %v11948_v40 = vpack.c.bf16 %v8750_v62, %v8747_v34  ;;  %v12024_v59 = vpack.c.bf16 %v8805_v45, %v8802_v37  ;;  %v8776_v62 = vld [vmem:[%s19719_s2 + $0x840] sm:$0xff]  ;;  %v8779_v37 = vld [vmem:[%s19719_s2 + $0x858] sm:$0xff] }
 0x387   :  { %v2275_v33 = vsel %vm2251_vm12, %v13124_v20, %v8648_v23  ;;  %v12016_v20 = vpack.c.bf16 %v8793_v16, %v8790_v42  ;;  %v8746_v23 = vld [vmem:[%s19719_s2 + $0x750] sm:$0xff]  ;;  %v8820_v42 = vld [vmem:[%s19719_s2 + $0x9a0] sm:$0xff]  ;;  %v8823_v16 = vld [vmem:[%s19719_s2 + $0x9b8] sm:$0xff] }
 0x388   :  { %v13241_v46 = vpop.eup %13240  ;;  %v2276_v51 = vsel %vm2252_vm11, %v13125_v6, %v8649_v41  ;;  %v8799_v6 = vld [vmem:[%s19719_s2 + $0x8f8] sm:$0xff]  ;;  %v8749_v41 = vld [vmem:[%s19719_s2 + $0x768] sm:$0xff]  ;;  %v12036_v15 = vpack.c.bf16 %v8823_v16, %v8820_v42  ;;  %v8806_v42 = vld [vmem:[%s19719_s2 + $0x930] sm:$0xff] }
 0x389   :  { %v13243_v57 = vpop.eup %13242  ;;  %2385 = vmatprep.mubr.f32.mxu0 %v2276_v51  ;;  %v8651_v55 = vadd.f32 -1.0, %v13241_v46  ;;  %v8757_v46 = vld [vmem:[%s19719_s2 + $0x7a8] sm:$0xff] }
 0x38a   :  { %v13245_v1 = vpop.eup %13244  ;;  %2386 = vmatmul.mubr.f32.vlgmr.msra.gmra.mrb[44].mxu0 %v2275_v33  ;;  %v8652_v4 = vadd.f32 -1.0, %v13243_v57  ;;  %v8753_v51 = vld [vmem:[%s19719_s2 + $0x788] sm:$0xff]  ;;  %v11950_v57 = vpack.c.bf16 %v8749_v41, %v8746_v23  ;;  %v8786_v23 = vld [vmem:[%s19719_s2 + $0x890] sm:$0xff]  ;;  %v15986_v41 = vld [vmem:[#allocation2 + $0x80] sm:$0xff] }
 0x38b   :  { %11932 = vmatpush3.bf16.msra.mxu0 %v11931_v11  ;;  %11081 = vmatprep.mubr.msk.f32.mxu0 %vm13356_vm5, %v13354_v14  ;;  %v8653_v24 = vadd.f32 -1.0, %v13245_v1  ;;  %v2278_v30 = vsel %vm2254_vm14, %v13126_v53, %v8651_v55  ;;  %v8748_v53 = vld [vmem:[%s19719_s2 + $0x760] sm:$0xff]  ;;  %v8754_v11 = vld [vmem:[%s19719_s2 + $0x790] sm:$0xff]  ;;  %v11952_v55 = vpack.c.bf16 %v8756_v52, %v8753_v51  ;;  %v8789_v52 = vld [vmem:[%s19719_s2 + $0x8a8] sm:$0xff] }
 0x38c   :  { %v2279_v56 = vsel %vm2255_vm13, %v13127_v32, %v8652_v4  ;;  %11933 = vmatprep.subr.bf16.mxu0 %v13353_v50  ;;  %v8751_v32 = vld [vmem:[%s19719_s2 + $0x778] sm:$0xff]  ;;  %v12026_v33 = vpack.c.bf16 %v8757_v46, %v8754_v11  ;;  %v8760_v1 = vld [vmem:[%s19719_s2 + $0x7c0] sm:$0xff]  ;;  %v12028_v4 = vpack.c.bf16 %v8811_v54, %v8808_v43  ;;  %v11970_v11 = vpack.c.bf16 %v8779_v37, %v8776_v62  ;;  %v8785_v46 = vld [vmem:[%s19719_s2 + $0x888] sm:$0xff] }
 0x38d   :  { %2566 = vmatprep.mubr.f32.mxu1 %v2279_v56  ;;  %v2280_v35 = vsel %vm2256_vm15, %v15645_v48, %v8653_v24  ;;  %v8796_v48 = vld [vmem:[%s19719_s2 + $0x8e0] sm:$0xff]  ;;  %v12022_v3 = vpack.c.bf16 %v8751_v32, %v8748_v53  ;;  %v8817_v56 = vld [vmem:[%s19719_s2 + $0x988] sm:$0xff]  ;;  %v12030_v38 = vpack.c.bf16 %v8763_v5, %v8760_v1  ;;  %v8835_v32 = vld [vmem:[%s19719_s2 + $0xa18] sm:$0xff] }
 0x38e   :  { %2567 = vmatmul.mubr.f32.vlgmr.msra.gmra.mrb[82].mxu1 %v2278_v30  ;;  %v12020_v31 = vpack.c.bf16 %v8799_v6, %v8796_v48  ;;  %v8761_v24 = vld [vmem:[%s19719_s2 + $0x7c8] sm:$0xff]  ;;  %v8766_v30 = vld [vmem:[%s19719_s2 + $0x7f0] sm:$0xff]  ;;  %v8780_v53 = vld [vmem:[%s19719_s2 + $0x860] sm:$0xff] }
 0x38f   :  { %11935 = vmatpush3.bf16.msra.mxu0 %v11934_v49  ;;  %12011 = vmatpush3.bf16.msra.mxu1 %v12010_v13  ;;  %v8762_v49 = vld [vmem:[%s19719_s2 + $0x7d0] sm:$0xff]  ;;  %v11968_v45 = vpack.c.bf16 %v8780_v53, %v8777_v29  ;;  %v8792_v43 = vld [vmem:[%s19719_s2 + $0x8c0] sm:$0xff]  ;;  %v16001_v54 = vld [vmem:[#allocation2 + $0x78] sm:$0xff] }
 0x390   :  { %2994 = vmatprep.mubr.f32.mxu1 %v2644_v7  ;;  %11937 = vmatprep.subr.bf16.mxu0 %v11936_v63  ;;  %v8814_v13 = vld [vmem:[%s19719_s2 + $0x970] sm:$0xff]  ;;  %v11954_v63 = vpack.c.bf16 %v8755_v17, %v8752_v0  ;;  %v11956_v10 = vpack.c.bf16 %v8762_v49, %v8759_v2  ;;  %v8788_v0 = vld [vmem:[%s19719_s2 + $0x8a0] sm:$0xff]  ;;  %v8791_v17 = vld [vmem:[%s19719_s2 + $0x8b8] sm:$0xff] }
 0x391   :  { %12013 = vmatprep.subr.bf16.mxu1 %v12012_v28  ;;  %v12032_v28 = vpack.c.bf16 %v8817_v56, %v8814_v13  ;;  %v8795_v1 = vld [vmem:[%s19719_s2 + $0x8d8] sm:$0xff]  ;;  %v16020_v5 = vld [vmem:[#allocation2 + $0x88] sm:$0xff]  ;;  %v11978_v2 = vpack.c.bf16 %v8791_v17, %v8788_v0  ;;  %v8794_v13 = vld [vmem:[%s19719_s2 + $0x8d0] sm:$0xff] }
 0x392   :  { %11082 = vmatmul.mubr.msk.f32.vlgmr.msra.gmra.mrb[46].mxu0 %vm939_vm1, %v2280_v35  ;;  %v8775_v35 = vld [vmem:[%s19719_s2 + $0x838] sm:$0xff]  ;;  %v8797_v56 = vld [vmem:[%s19719_s2 + $0x8e8] sm:$0xff]  ;;  %v8834_v53 = vld [vmem:[%s19719_s2 + $0xa10] sm:$0xff] }
 0x393   :  { %11939 = vmatpush1.bf16.msra.mxu0 %v11938_v8  ;;  %2840 = vmatprep.mubr.f32.mxu0 %v2644_v7  ;;  %v11958_v7 = vpack.c.bf16 %v8761_v24, %v8758_v61  ;;  %v12034_v8 = vpack.c.bf16 %v8769_v36, %v8766_v30  ;;  %v12038_v6 = vpack.c.bf16 %v8775_v35, %v8772_v9  ;;  %v8800_v24 = vld [vmem:[%s19719_s2 + $0x900] sm:$0xff]  ;;  %v8803_v30 = vld [vmem:[%s19719_s2 + $0x918] sm:$0xff]  ;;  %v8810_v36 = vld [vmem:[%s19719_s2 + $0x950] sm:$0xff] }
 0x394   :  { %12015 = vmatpush3.bf16.msra.mxu1 %v12014_v58  ;;  %11941 = vmatprep.subr.bf16.mxu0 %v11940_v12  ;;  %v11960_v58 = vpack.c.bf16 %v8768_v60, %v8765_v44  ;;  %v8764_v12 = vld [vmem:[%s19719_s2 + $0x7e0] sm:$0xff]  ;;  %v11986_v44 = vpack.c.bf16 %v8803_v30, %v8800_v24  ;;  %v8809_v16 = vld [vmem:[%s19719_s2 + $0x948] sm:$0xff]  ;;  %v8815_v9 = vld [vmem:[%s19719_s2 + $0x978] sm:$0xff] }
 0x395   :  { %12017 = vmatprep.subr.bf16.mxu1 %v12016_v20  ;;  %v8771_v20 = vld [vmem:[%s19719_s2 + $0x818] sm:$0xff]  ;;  %v11962_v48 = vpack.c.bf16 %v8767_v19, %v8764_v12  ;;  %v8812_v19 = vld [vmem:[%s19719_s2 + $0x960] sm:$0xff]  ;;  %v8822_v35 = vld [vmem:[%s19719_s2 + $0x9b0] sm:$0xff] }
 0x396   :  { %v8831_v29 = vld [vmem:[%s19719_s2 + $0x9f8] sm:$0xff]  ;;  %v8833_v62 = vld [vmem:[%s19719_s2 + $0xa08] sm:$0xff]  ;;  %v8848_v17 = vld [vmem:[%s19722_s4 + $0x490] sm:$0xff] }
 0x397   :  { %11943 = vmatpush1.bf16.msra.mxu0 %v11942_v26  ;;  %v11964_v26 = vpack.c.bf16 %v8774_v18, %v8771_v20  ;;  %v11994_v20 = vpack.c.bf16 %v8815_v9, %v8812_v19  ;;  %v8900_v0 = vld [vmem:[%s19722_s4 + $0x628] sm:$0xff]  ;;  %v8852_v30 = vld [vmem:[%s19722_s4 + $0x4b0] sm:$0xff]  ;;  %v8873_v9 = vld [vmem:[%s19722_s4 + $0x558] sm:$0xff] }
 0x398   :  { %12019 = vmatpush3.bf16.msra.mxu1 %v12018_v47  ;;  %11945 = vmatprep.subr.bf16.mxu0 %v11944_v22  ;;  %v8770_v47 = vld [vmem:[%s19719_s2 + $0x810] sm:$0xff]  ;;  %v8773_v22 = vld [vmem:[%s19719_s2 + $0x828] sm:$0xff] }
 0x399   :  { %12021 = vmatprep.subr.bf16.mxu1 %v12020_v31  ;;  %v8832_v31 = vld [vmem:[%s19719_s2 + $0xa00] sm:$0xff]  ;;  %v11966_v34 = vpack.c.bf16 %v8773_v22, %v8770_v47  ;;  %v8872_v19 = vld [vmem:[%s19722_s4 + $0x550] sm:$0xff] }
 0x39a   :  { %v8824_v22 = vld [vmem:[%s19719_s2 + $0x9c0] sm:$0xff] }
 0x39b   :  { %11947 = vmatpush1.bf16.msra.mxu0 %v11946_v27  ;;  %v12044_v27 = vpack.c.bf16 %v8835_v32, %v8832_v31  ;;  %v12004_v32 = vpack.c.bf16 %v8834_v53, %v8831_v29  ;;  %v8860_v53 = vld [vmem:[%s19722_s4 + $0x4f0] sm:$0xff] }
 0x39c   :  { %12023 = vmatpush3.bf16.msra.mxu1 %v12022_v3  ;;  %11949 = vmatprep.subr.bf16.mxu0 %v11948_v40  ;;  %v15977_v3 = vld [vmem:[#allocation2 + $0x60] sm:$0xff]  ;;  %v8783_v40 = vld [vmem:[%s19719_s2 + $0x878] sm:$0xff] }
 0x39d   :  { %12025 = vmatprep.subr.bf16.mxu1 %v12024_v59  ;;  %v8782_v59 = vld [vmem:[%s19719_s2 + $0x870] sm:$0xff]  ;;  %v11972_v51 = vpack.c.bf16 %v8786_v23, %v8783_v40  ;;  %v8881_v23 = vld [vmem:[%s19722_s4 + $0x598] sm:$0xff] }
 0x39e   :  { %v8880_v40 = vld [vmem:[%s19722_s4 + $0x590] sm:$0xff] }
 0x39f   :  { %11951 = vmatpush1.bf16.msra.mxu0 %v11950_v57  ;;  %v16004_v57 = vld [vmem:[#allocation2 + $0x70] sm:$0xff] }
 0x3a0   :  { %12027 = vmatpush3.bf16.msra.mxu1 %v12026_v33  ;;  %11953 = vmatprep.subr.bf16.mxu0 %v11952_v55  ;;  %v11974_v33 = vpack.c.bf16 %v8785_v46, %v8782_v59  ;;  %v11976_v55 = vpack.c.bf16 %v8792_v43, %v8789_v52  ;;  %v8863_v59 = vld [vmem:[%s19722_s4 + $0x508] sm:$0xff]  ;;  %v8846_v46 = vld [vmem:[%s19722_s4 + $0x480] sm:$0xff]  ;;  %v8864_v43 = vld [vmem:[%s19722_s4 + $0x510] sm:$0xff] }
 0x3a1   :  { %12029 = vmatprep.subr.bf16.mxu1 %v12028_v4  ;;  %v8798_v4 = vld [vmem:[%s19719_s2 + $0x8f0] sm:$0xff]  ;;  %v8847_v52 = vld [vmem:[%s19722_s4 + $0x488] sm:$0xff] }
 0x3a2   :  { %v11980_v49 = vpack.c.bf16 %v8798_v4, %v8795_v1  ;;  %v8849_v4 = vld [vmem:[%s19722_s4 + $0x498] sm:$0xff] }
 0x3a3   :  { %11955 = vmatpush1.bf16.msra.mxu0 %v11954_v63  ;;  %v8801_v63 = vld [vmem:[%s19719_s2 + $0x908] sm:$0xff] }
 0x3a4   :  { %12031 = vmatpush3.bf16.msra.mxu1 %v12030_v38  ;;  %11957 = vmatprep.subr.bf16.mxu0 %v11956_v10  ;;  %v8804_v38 = vld [vmem:[%s19719_s2 + $0x920] sm:$0xff]  ;;  %v11982_v10 = vpack.c.bf16 %v8797_v56, %v8794_v13 }
 0x3a5   :  { %12033 = vmatprep.subr.bf16.mxu1 %v12032_v28  ;;  %v11984_v61 = vpack.c.bf16 %v8804_v38, %v8801_v63  ;;  %v8807_v28 = vld [vmem:[%s19719_s2 + $0x938] sm:$0xff]  ;;  %v8850_v56 = vld [vmem:[%s19722_s4 + $0x4a0] sm:$0xff]  ;;  %v8851_v63 = vld [vmem:[%s19722_s4 + $0x4a8] sm:$0xff] }
 0x3a6   :  { %v11988_v60 = vpack.c.bf16 %v8810_v36, %v8807_v28  ;;  %v12058_v38 = vpack.c.bf16 %v8851_v63, %v8850_v56  ;;  %v8853_v28 = vld [vmem:[%s19722_s4 + $0x4b8] sm:$0xff]  ;;  %v8901_v56 = vld [vmem:[%s19722_s4 + $0x630] sm:$0xff] }
 0x3a7   :  { %11959 = vmatpush1.bf16.msra.mxu0 %v11958_v7  ;;  %v8813_v7 = vld [vmem:[%s19719_s2 + $0x968] sm:$0xff]  ;;  %v12062_v36 = vpack.c.bf16 %v8853_v28, %v8852_v30  ;;  %v8902_v63 = vld [vmem:[%s19722_s4 + $0x638] sm:$0xff]  ;;  %v8885_v30 = vld [vmem:[%s19722_s4 + $0x5b0] sm:$0xff] }
 0x3a8   :  { %12035 = vmatpush3.bf16.msra.mxu1 %v12034_v8  ;;  %11961 = vmatprep.subr.bf16.mxu0 %v11960_v58  ;;  %v8816_v8 = vld [vmem:[%s19719_s2 + $0x980] sm:$0xff]  ;;  %v11990_v58 = vpack.c.bf16 %v8809_v16, %v8806_v42  ;;  %v8886_v28 = vld [vmem:[%s19722_s4 + $0x5b8] sm:$0xff] }
 0x3a9   :  { %12037 = vmatprep.subr.bf16.mxu1 %v12036_v15  ;;  %v11992_v12 = vpack.c.bf16 %v8816_v8, %v8813_v7  ;;  %v8819_v15 = vld [vmem:[%s19719_s2 + $0x998] sm:$0xff]  ;;  %v8854_v16 = vld [vmem:[%s19722_s4 + $0x4c0] sm:$0xff]  ;;  %v8855_v7 = vld [vmem:[%s19722_s4 + $0x4c8] sm:$0xff] }
 0x3aa   :  { %v11996_v18 = vpack.c.bf16 %v8822_v35, %v8819_v15  ;;  %v12068_v15 = vpack.c.bf16 %v8873_v9, %v8872_v19  ;;  %v8856_v35 = vld [vmem:[%s19722_s4 + $0x4d0] sm:$0xff] }
 0x3ab   :  { %11963 = vmatpush1.bf16.msra.mxu0 %v11962_v48  ;;  %v8825_v48 = vld [vmem:[%s19719_s2 + $0x9c8] sm:$0xff] }
 0x3ac   :  { %12039 = vmatpush3.bf16.msra.mxu1 %v12038_v6  ;;  %11965 = vmatprep.subr.bf16.mxu0 %v11964_v26  ;;  %v8828_v6 = vld [vmem:[%s19719_s2 + $0x9e0] sm:$0xff]  ;;  %v11998_v26 = vpack.c.bf16 %v8821_v39, %v8818_v21  ;;  %v8875_v39 = vld [vmem:[%s19722_s4 + $0x568] sm:$0xff] }
 0x3ad   :  { %12041 = vmatprep.subr.bf16.mxu1 %v12040_v25  ;;  %v12000_v47 = vpack.c.bf16 %v8828_v6, %v8825_v48  ;;  %v8874_v21 = vld [vmem:[%s19722_s4 + $0x560] sm:$0xff] }
 0x3ae   :  { %v12072_v48 = vpack.c.bf16 %v8875_v39, %v8874_v21  ;;  %v8858_v6 = vld [vmem:[%s19722_s4 + $0x4e0] sm:$0xff] }
 0x3af   :  { %2995 = vmatmul.mubr.f32.vlgmr.msra.gmra.mrb[84].mxu1 %v15977_v3  ;;  %11967 = vmatpush1.bf16.msra.mxu0 %v11966_v34  ;;  %v8830_v34 = vld [vmem:[%s19719_s2 + $0x9f0] sm:$0xff] }
 0x3b0   :  { %2999 = vmatprep.mubr.f32.mxu1 %v15986_v41  ;;  %12043 = vmatpush3.bf16.msra.mxu1 %v12040_v25  ;;  %v8827_v25 = vld [vmem:[%s19719_s2 + $0x9d8] sm:$0xff]  ;;  %v12006_v37 = vpack.c.bf16 %v8833_v62, %v8830_v34 }
 0x3b1   :  { %11969 = vmatprep.subr.bf16.mxu0 %v11968_v45  ;;  %12045 = vmatprep.subr.bf16.mxu1 %v12044_v27  ;;  %v12002_v31 = vpack.c.bf16 %v8827_v25, %v8824_v22  ;;  %v8878_v45 = vld [vmem:[%s19722_s4 + $0x580] sm:$0xff]  ;;  %v8876_v22 = vld [vmem:[%s19722_s4 + $0x570] sm:$0xff]  ;;  %v8877_v25 = vld [vmem:[%s19722_s4 + $0x578] sm:$0xff] }
 0x3b2   :  { %v12076_v29 = vpack.c.bf16 %v8877_v25, %v8876_v22 }
 0x3b3   :  { %3000 = vmatmul.mubr.f32.gmra.mrb[86].mxu1 %v16001_v54  ;;  %11971 = vmatpush1.bf16.msra.mxu0 %v11970_v11  ;;  %v8862_v11 = vld [vmem:[%s19722_s4 + $0x500] sm:$0xff] }
 0x3b4   :  { %12047 = vmatpush3.bf16.msra.mxu1 %v12044_v27  ;;  %11092 = vmatprep.mubr.msk.f32.mxu1 %vm939_vm1, %v16004_v57  ;;  %v8879_v27 = vld [vmem:[%s19722_s4 + $0x588] sm:$0xff] }
 0x3b5   :  { %11973 = vmatprep.subr.bf16.mxu0 %v11972_v51  ;;  %v12048_v51 = vpack.c.bf16 %v8863_v59, %v8862_v11 }
 0x3b7   :  { %11093 = vmatmul.mubr.msk.f32.vlgmr.msra.gmra.mrb[88].mxu1 %vm939_vm1, %v16020_v5  ;;  %11975 = vmatpush1.bf16.msra.mxu0 %v11974_v33 }
 0x3b8   :  { %11977 = vmatprep.subr.bf16.mxu0 %v11976_v55  ;;  %v8899_v55 = vld [vmem:[%s19722_s4 + $0x620] sm:$0xff]  ;;  %12049 = vmatprep.subr.bf16.mxu1 %v12048_v51 }
 0x3b9   :  { %v12086_v1 = vpack.c.bf16 %v8900_v0, %v8899_v55 }
 0x3bb   :  { %11979 = vmatpush1.bf16.msra.mxu0 %v11978_v2  ;;  %v8866_v2 = vld [vmem:[%s19722_s4 + $0x520] sm:$0xff] }
 0x3bc   :  { %11981 = vmatprep.subr.bf16.mxu0 %v11980_v49  ;;  %v8867_v49 = vld [vmem:[%s19722_s4 + $0x528] sm:$0xff] }
 0x3bd   :  { %v12056_v13 = vpack.c.bf16 %v8867_v49, %v8866_v2  ;;  %v8883_v49 = vld [vmem:[%s19722_s4 + $0x5a0] sm:$0xff] }
 0x3bf   :  { %11983 = vmatpush1.bf16.msra.mxu0 %v11982_v10  ;;  %v8868_v10 = vld [vmem:[%s19722_s4 + $0x530] sm:$0xff] }
 0x3c0   :  { %11985 = vmatprep.subr.bf16.mxu0 %v11984_v61  ;;  %v8869_v61 = vld [vmem:[%s19722_s4 + $0x538] sm:$0xff] }
 0x3c1   :  { %v12060_v24 = vpack.c.bf16 %v8869_v61, %v8868_v10 }
 0x3c3   :  { %11987 = vmatpush1.bf16.msra.mxu0 %v11986_v44  ;;  %v8870_v44 = vld [vmem:[%s19722_s4 + $0x540] sm:$0xff] }
 0x3c4   :  { %11989 = vmatprep.subr.bf16.mxu0 %v11988_v60  ;;  %v8871_v60 = vld [vmem:[%s19722_s4 + $0x548] sm:$0xff] }
 0x3c5   :  { %v12064_v42 = vpack.c.bf16 %v8871_v60, %v8870_v44  ;;  %v8903_v44 = vld [vmem:[%s19722_s4 + $0x640] sm:$0xff]  ;;  %v8904_v60 = vld [vmem:[%s19722_s4 + $0x648] sm:$0xff] }
 0x3c7   :  { %11991 = vmatpush1.bf16.msra.mxu0 %v11990_v58  ;;  %v12066_v58 = vpack.c.bf16 %v8855_v7, %v8854_v16  ;;  %v12094_v16 = vpack.c.bf16 %v8904_v60, %v8903_v44  ;;  %v8887_v7 = vld [vmem:[%s19722_s4 + $0x5c0] sm:$0xff] }
 0x3c8   :  { %11993 = vmatprep.subr.bf16.mxu0 %v11992_v12 }
 0x3cb   :  { %11995 = vmatpush1.bf16.msra.mxu0 %v11994_v20  ;;  %v8857_v20 = vld [vmem:[%s19722_s4 + $0x4d8] sm:$0xff] }
 0x3cc   :  { %11997 = vmatprep.subr.bf16.mxu0 %v11996_v18  ;;  %v12070_v18 = vpack.c.bf16 %v8857_v20, %v8856_v35  ;;  %v8890_v35 = vld [vmem:[%s19722_s4 + $0x5d8] sm:$0xff]  ;;  %v8907_v20 = vld [vmem:[%s19722_s4 + $0x660] sm:$0xff] }
 0x3cf   :  { %11999 = vmatpush1.bf16.msra.mxu0 %v11998_v26  ;;  %v8859_v26 = vld [vmem:[%s19722_s4 + $0x4e8] sm:$0xff] }
 0x3d0   :  { %12001 = vmatprep.subr.bf16.mxu0 %v12000_v47  ;;  %v12074_v47 = vpack.c.bf16 %v8859_v26, %v8858_v6  ;;  %v8892_v6 = vld [vmem:[%s19722_s4 + $0x5e8] sm:$0xff]  ;;  %v8909_v26 = vld [vmem:[%s19722_s4 + $0x670] sm:$0xff] }
 0x3d2   :  { %2841 = vmatmul.mubr.f32.vlgmr.msra.gmra.mrb[48].mxu0 %v15977_v3  ;;  %v12081_v3 = vpack.c.bf16 %v8879_v27, %v8878_v45 }
 0x3d3   :  { %2846 = vmatprep.mubr.f32.mxu0 %v15986_v41  ;;  %12003 = vmatpush1.bf16.msra.mxu0 %v12002_v31  ;;  %v12084_v41 = vpack.c.bf16 %v8881_v23, %v8880_v40  ;;  %v8861_v31 = vld [vmem:[%s19722_s4 + $0x4f8] sm:$0xff] }
 0x3d4   :  { %12005 = vmatprep.subr.bf16.mxu0 %v12004_v32  ;;  %v12078_v32 = vpack.c.bf16 %v8861_v31, %v8860_v53  ;;  %v8893_v53 = vld [vmem:[%s19722_s4 + $0x5f0] sm:$0xff]  ;;  %v8894_v31 = vld [vmem:[%s19722_s4 + $0x5f8] sm:$0xff] }
 0x3d6   :  { %2847 = vmatmul.mubr.f32.gmra.mrb[50].mxu0 %v16001_v54  ;;  %v8865_v54 = vld [vmem:[%s19722_s4 + $0x518] sm:$0xff] }
 0x3d7   :  { %12007 = vmatpush1.bf16.msra.mxu0 %v12006_v37  ;;  %2917 = vmatprep.mubr.f32.mxu0 %v13354_v14  ;;  %v12052_v33 = vpack.c.bf16 %v8865_v54, %v8864_v43 }
 0x3d8   :  { %12080 = vmatprep.subr.bf16.mxu0 %v13353_v50 }
 0x3da   :  { %8836 = vmatmul.mubr.msk.f32.vlgmr.msra.gmra.mrb[48].mxu0 %vm939_vm1, %v16004_v57  ;;  %v12050_v57 = vpack.c.bf16 %v8847_v52, %v8846_v46 }
 0x3db   :  { %2923 = vmatprep.mubr.f32.mxu0 %v13354_v14  ;;  %12082 = vmatpush3.bf16.msra.mxu0 %v12081_v3 }
 0x3dc   :  { %12083 = vmatprep.subr.bf16.mxu0 %v13353_v50  ;;  %12051 = vmatpush3.bf16.msra.mxu1 %v12050_v57  ;;  %v2763_v57 = vpop.permute.xlu0 %2762 }
 0x3dd   :  { %12053 = vmatprep.subr.bf16.mxu1 %v12052_v33  ;;  %v16232_v33 = vpop.permute.xlu1 %2767 }
 0x3de   :  { %8837 = vmatmul.mubr.msk.f32.gmra.mrb[50].mxu0 %vm939_vm1, %v16020_v5  ;;  %v12054_v5 = vpack.c.bf16 %v8849_v4, %v8848_v17 }
 0x3df   :  { %11103 = vmatprep.mubr.msk.f32.mxu0 %vm13356_vm5, %v13354_v14  ;;  %12085 = vmatpush3.bf16.msra.mxu0 %v12084_v41 }
 0x3e0   :  { %12087 = vmatprep.subr.bf16.mxu0 %v12086_v1  ;;  %12055 = vmatpush3.bf16.msra.mxu1 %v12054_v5 }
 0x3e1   :  { %12057 = vmatprep.subr.bf16.mxu1 %v12056_v13  ;;  %v8884_v13 = vld [vmem:[%s19722_s4 + $0x5a8] sm:$0xff] }
 0x3e2   :  { %v12088_v61 = vpack.c.bf16 %v8884_v13, %v8883_v49  ;;  %v8973_v49 = vld [vmem:[%s19719_s2 + $0xbc8] sm:$0xff] }
 0x3e4   :  { %12059 = vmatpush3.bf16.msra.mxu1 %v12058_v38 }
 0x3e5   :  { %12061 = vmatprep.subr.bf16.mxu1 %v12060_v24  ;;  %v12090_v24 = vpack.c.bf16 %v8902_v63, %v8901_v56 }
 0x3e8   :  { %12063 = vmatpush3.bf16.msra.mxu1 %v12062_v36 }
 0x3e9   :  { %12065 = vmatprep.subr.bf16.mxu1 %v12064_v42  ;;  %v12092_v42 = vpack.c.bf16 %v8886_v28, %v8885_v30 }
 0x3ec   :  { %12067 = vmatpush3.bf16.msra.mxu1 %v12066_v58  ;;  %v8905_v58 = vld [vmem:[%s19722_s4 + $0x650] sm:$0xff] }
 0x3ed   :  { %12069 = vmatprep.subr.bf16.mxu1 %v12068_v15  ;;  %v8889_v15 = vld [vmem:[%s19722_s4 + $0x5d0] sm:$0xff] }
 0x3ee   :  { %v12100_v21 = vpack.c.bf16 %v8890_v35, %v8889_v15 }
 0x3f0   :  { %12071 = vmatpush3.bf16.msra.mxu1 %v12070_v18  ;;  %v8908_v18 = vld [vmem:[%s19722_s4 + $0x668] sm:$0xff] }
 0x3f1   :  { %12073 = vmatprep.subr.bf16.mxu1 %v12072_v48  ;;  %v12102_v39 = vpack.c.bf16 %v8908_v18, %v8907_v20  ;;  %v8891_v48 = vld [vmem:[%s19722_s4 + $0x5e0] sm:$0xff]  ;;  %v8979_v18 = vld [vmem:[%s19719_s2 + $0xbf8] sm:$0xff] }
 0x3f2   :  { %v12104_v22 = vpack.c.bf16 %v8892_v6, %v8891_v48  ;;  %v8976_v20 = vld [vmem:[%s19719_s2 + $0xbe0] sm:$0xff] }
 0x3f4   :  { %12075 = vmatpush3.bf16.msra.mxu1 %v12074_v47  ;;  %v8910_v47 = vld [vmem:[%s19722_s4 + $0x678] sm:$0xff] }
 0x3f5   :  { %12077 = vmatprep.subr.bf16.mxu1 %v12076_v29  ;;  %v12106_v29 = vpack.c.bf16 %v8910_v47, %v8909_v26  ;;  %v8920_v26 = vld [vmem:[%s19719_s2 + $0xa20] sm:$0xff]  ;;  %v8923_v47 = vld [vmem:[%s19719_s2 + $0xa38] sm:$0xff] }
 0x3f8   :  { %12079 = vmatpush3.bf16.msra.mxu1 %v12078_v32 }
 0x3f9   :  { %12118 = vmatprep.subr.bf16.mxu1 %v13353_v50 }
 0x431   :  { %v2457_v8 = vpop.f32.mrb[80].mxu1 }
 0x432   :  { %v11072_v12 = vpop.f32.mrb[81].mxu1 }
 0x433   :  { %v8906_v12 = vld [vmem:[%s19722_s4 + $0x658] sm:$0xff] }
 0x434   :  { %v12098_v9 = vpack.c.bf16 %v8906_v12, %v8905_v58 }
 0x45d   :  { %v10177_v34 = vpop.f32.mrb[44].mxu0 }
 0x45e   :  { %v10178_v62 = vpop.f32.mrb[45].mxu0 }
 0x45f   :  { %v10179_v37 = vadd.f32 %v10178_v62, %v10177_v34  ;;  %v8911_v62 = vld [vmem:[%s19722_s4 + $0x680] sm:$0xff] }
 0x461   :  { %v2458_v45 = vadd.f32 %v10179_v37, %v2457_v8  ;;  %v10217_v27 = vpop.f32.mrb[82].mxu1  ;;  %v8888_v8 = vld [vmem:[%s19722_s4 + $0x5c8] sm:$0xff] }
 0x462   :  { %v10218_v3 = vpop.f32.mrb[83].mxu1  ;;  %v12096_v19 = vpack.c.bf16 %v8888_v8, %v8887_v7  ;;  %v8912_v37 = vld [vmem:[%s19722_s4 + $0x688] sm:$0xff] }
 0x463   :  { %2461 = vst.msk [vmem:[#allocation3 + $0x10] sm:$0xff] %vm1631_vm9, %v2458_v45  ;;  %v10219_v40 = vadd.f32 %v10218_v3, %v10217_v27  ;;  %v12108_v3 = vpack.c.bf16 %v8894_v31, %v8893_v53  ;;  %v8925_v7 = vld [vmem:[%s19719_s2 + $0xa48] sm:$0xff]  ;;  %v12200_v53 = vpack.c.bf16 %v8979_v18, %v8976_v20  ;;  %v8931_v31 = vld [vmem:[%s19719_s2 + $0xa78] sm:$0xff] }
 0x464   :  { %v8955_v20 = vld [vmem:[%s19719_s2 + $0xb38] sm:$0xff] }
 0x465   :  { %v2638_v23 = vpop.f32.mrb[46].mxu0  ;;  %v8951_v18 = vld [vmem:[%s19719_s2 + $0xb18] sm:$0xff] }
 0x466   :  { %v2639_v41 = vadd.f32 %v10219_v40, %v2638_v23  ;;  %v11083_v11 = vpop.f32.mrb[47].mxu0 }
 0x467   :  { %v8895_v11 = vld [vmem:[%s19722_s4 + $0x600] sm:$0xff] }
 0x468   :  { %2642 = vst.msk [vmem:[#allocation3 + $0x18] sm:$0xff] %vm1631_vm9, %v2639_v41  ;;  %v12110_v41 = vpack.c.bf16 %v8912_v37, %v8911_v62  ;;  %v8982_v62 = vld [vmem:[%s19719_s2 + $0xc10] sm:$0xff]  ;;  %v8985_v37 = vld [vmem:[%s19719_s2 + $0xc28] sm:$0xff] }
 0x482   :  { %v10257_v59 = vpop.f32.mrb[84].mxu1 }
 0x483   :  { %v10258_v46 = vpop.f32.mrb[85].mxu1 }
 0x484   :  { %v10259_v51 = vadd.f32 %v10258_v46, %v10257_v59  ;;  %v8896_v59 = vld [vmem:[%s19722_s4 + $0x608] sm:$0xff] }
 0x486   :  { %v10260_v52 = vpop.f32.mrb[86].mxu1  ;;  %v2997_v17 = vadd.f32 %v10259_v51, %v2763_v57 }
 0x487   :  { %v10261_v43 = vpop.f32.mrb[87].mxu1 }
 0x488   :  { %v10262_v54 = vadd.f32 %v10261_v43, %v10260_v52  ;;  %v8913_v52 = vld [vmem:[%s19722_s4 + $0x690] sm:$0xff]  ;;  %v8914_v43 = vld [vmem:[%s19722_s4 + $0x698] sm:$0xff] }
 0x48a   :  { %v3002_v55 = vadd.f32 %v10262_v54, %v16232_v33  ;;  %v11094_v0 = vpop.f32.mrb[88].mxu1 }
 0x48b   :  { %v3071_v1 = vpop.f32.mrb[89].mxu1 }
 0x48c   :  { %v16235_v4 = vadd.f32 %v11094_v0, %v3002_v55  ;;  %v3072_v5 = vadd.f32 %v3071_v1, %v2997_v17  ;;  %v12112_v0 = vpack.c.bf16 %v8896_v59, %v8895_v11  ;;  %v12114_v1 = vpack.c.bf16 %v8914_v43, %v8913_v52  ;;  %v8934_v11 = vld [vmem:[%s19719_s2 + $0xa90] sm:$0xff]  ;;  %v8933_v52 = vld [vmem:[%s19719_s2 + $0xa88] sm:$0xff]  ;;  %v8936_v43 = vld [vmem:[%s19719_s2 + $0xaa0] sm:$0xff] }
 0x48e   :  { %v3090_v2 = vmul.f32 1.442695, %v3072_v5  ;;  %vm3082_vm0 = vcmp.gt.f32.partialorder %v3072_v5, 0.0  ;;  %vm3085_vm7 = vcmp.gt.f32.partialorder %v16235_v4, 0.0 }
 0x490   :  { %13246 = vpow2.f32 %v3090_v2  ;;  %v8898_v2 = vld [vmem:[%s19722_s4 + $0x618] sm:$0xff] }
 0x49a   :  { %v13247_v38 = vpop.eup %13246 }
 0x49b   :  { %v8842_v10 = vadd.f32 -1.0, %v13247_v38  ;;  %v8915_v38 = vld [vmem:[%s19722_s4 + $0x6a0] sm:$0xff] }
 0x49d   :  { %v3106_v36 = vsel %vm3082_vm0, %v3072_v5, %v8842_v10  ;;  %v8897_v5 = vld [vmem:[%s19722_s4 + $0x610] sm:$0xff]  ;;  %v8916_v10 = vld [vmem:[%s19722_s4 + $0x6a8] sm:$0xff] }
 0x49e   :  { %11104 = vmatmul.mubr.msk.f32.vlgmr.msra.gmra.mrb[52].mxu0 %vm939_vm1, %v3106_v36  ;;  %v12116_v13 = vpack.c.bf16 %v8898_v2, %v8897_v5  ;;  %v12119_v28 = vpack.c.bf16 %v8916_v10, %v8915_v38  ;;  %v8917_v36 = vld [vmem:[%s19722_s4 + $0x6b0] sm:$0xff]  ;;  %v8940_v5 = vld [vmem:[%s19719_s2 + $0xac0] sm:$0xff] }
 0x49f   :  { %12089 = vmatpush3.bf16.msra.mxu0 %v12088_v61 }
 0x4a0   :  { %12091 = vmatprep.subr.bf16.mxu0 %v12090_v24 }
 0x4a3   :  { %12093 = vmatpush3.bf16.msra.mxu0 %v12092_v42  ;;  %v8918_v42 = vld [vmem:[%s19722_s4 + $0x6b8] sm:$0xff] }
 0x4a4   :  { %12095 = vmatprep.subr.bf16.mxu0 %v12094_v16  ;;  %v8922_v16 = vld [vmem:[%s19719_s2 + $0xa30] sm:$0xff] }
 0x4a7   :  { %12097 = vmatpush3.bf16.msra.mxu0 %v12096_v19  ;;  %v8921_v19 = vld [vmem:[%s19719_s2 + $0xa28] sm:$0xff] }
 0x4a8   :  { %12099 = vmatprep.subr.bf16.mxu0 %v12098_v9  ;;  %v8924_v9 = vld [vmem:[%s19719_s2 + $0xa40] sm:$0xff] }
 0x4a9   :  { %v12124_v6 = vpack.c.bf16 %v8924_v9, %v8921_v19  ;;  %v8944_v19 = vld [vmem:[%s19719_s2 + $0xae0] sm:$0xff]  ;;  %v8947_v9 = vld [vmem:[%s19719_s2 + $0xaf8] sm:$0xff] }
 0x4ab   :  { %12101 = vmatpush3.bf16.msra.mxu0 %v12100_v21  ;;  %v12122_v21 = vpack.c.bf16 %v8918_v42, %v8917_v36  ;;  %v8948_v42 = vld [vmem:[%s19719_s2 + $0xb00] sm:$0xff] }
 0x4ac   :  { %12103 = vmatprep.subr.bf16.mxu0 %v12102_v39  ;;  %v12198_v39 = vpack.c.bf16 %v8925_v7, %v8922_v16  ;;  %v9000_v16 = vld [vmem:[%s19719_s2 + $0xca0] sm:$0xff]  ;;  %v9003_v7 = vld [vmem:[%s19719_s2 + $0xcb8] sm:$0xff] }
 0x4ad   :  { %v2919_v25 = vpop.f32.mrb[48].mxu0 }
 0x4ae   :  { %v13128_v32 = vadd.f32 %v2919_v25, %v2763_v57  ;;  %v2921_v34 = vpop.f32.mrb[49].mxu0 }
 0x4af   :  { %v13129_v45 = vadd.f32 %v2921_v34, %v2763_v57  ;;  %12105 = vmatpush3.bf16.msra.mxu0 %v12104_v22  ;;  %v3096_v57 = vmul.f32 1.442695, %v16235_v4  ;;  %v8928_v22 = vld [vmem:[%s19719_s2 + $0xa60] sm:$0xff]  ;;  %v8930_v34 = vld [vmem:[%s19719_s2 + $0xa70] sm:$0xff] }
 0x4b0   :  { %v3086_v27 = vmul.f32 1.442695, %v13128_v32  ;;  %12107 = vmatprep.subr.bf16.mxu0 %v12106_v29  ;;  %vm3080_vm3 = vcmp.gt.f32.partialorder %v13128_v32, 0.0 }
 0x4b1   :  { %v3088_v40 = vmul.f32 1.442695, %v13129_v45  ;;  %v2925_v23 = vpop.f32.mrb[50].mxu0  ;;  %vm3081_vm2 = vcmp.gt.f32.partialorder %v13129_v45, 0.0 }
 0x4b2   :  { %13248 = vpow2.f32 %v3086_v27  ;;  %v16317_v46 = vadd.f32 %v2925_v23, %v16232_v33  ;;  %v2927_v51 = vpop.f32.mrb[51].mxu0  ;;  %v12126_v27 = vpack.c.bf16 %v8923_v47, %v8920_v26  ;;  %v8926_v23 = vld [vmem:[%s19719_s2 + $0xa50] sm:$0xff] }
 0x4b3   :  { %13250 = vpow2.f32 %v3088_v40  ;;  %v13131_v54 = vadd.f32 %v2927_v51, %v16232_v33  ;;  %12109 = vmatpush3.bf16.msra.mxu0 %v12108_v3  ;;  %v8970_v33 = vld [vmem:[%s19719_s2 + $0xbb0] sm:$0xff]  ;;  %v12202_v3 = vpack.c.bf16 %v8931_v31, %v8928_v22  ;;  %v8937_v51 = vld [vmem:[%s19719_s2 + $0xaa8] sm:$0xff] }
 0x4b4   :  { %v3092_v55 = vmul.f32 1.442695, %v16317_v46  ;;  %12111 = vmatprep.subr.bf16.mxu0 %v12110_v41  ;;  %v12196_v56 = vpack.c.bf16 %v8973_v49, %v8970_v33  ;;  %vm3083_vm6 = vcmp.gt.f32.partialorder %v16317_v46, 0.0  ;;  %v8929_v41 = vld [vmem:[%s19719_s2 + $0xa68] sm:$0xff]  ;;  %v8943_v33 = vld [vmem:[%s19719_s2 + $0xad8] sm:$0xff]  ;;  %v8950_v22 = vld [vmem:[%s19719_s2 + $0xb10] sm:$0xff] }
 0x4b5   :  { %v3094_v17 = vmul.f32 1.442695, %v13131_v54  ;;  %vm3084_vm4 = vcmp.gt.f32.partialorder %v13131_v54, 0.0  ;;  %v8939_v49 = vld [vmem:[%s19719_s2 + $0xab8] sm:$0xff]  ;;  %v12210_v10 = vpack.c.bf16 %v8943_v33, %v8940_v5  ;;  %v8961_v31 = vld [vmem:[%s19719_s2 + $0xb68] sm:$0xff]  ;;  %v8972_v5 = vld [vmem:[%s19719_s2 + $0xbc0] sm:$0xff] }
 0x4b6   :  { %13252 = vpow2.f32 %v3092_v55  ;;  %v12206_v55 = vpack.c.bf16 %v8937_v51, %v8934_v11  ;;  %v8966_v51 = vld [vmem:[%s19719_s2 + $0xb90] sm:$0xff]  ;;  %v9027_v33 = vld [vmem:[%s19719_s2 + $0xd78] sm:$0xff] }
 0x4b7   :  { %13254 = vpow2.f32 %v3094_v17  ;;  %12113 = vmatpush3.bf16.msra.mxu0 %v12112_v0  ;;  %v12132_v0 = vpack.c.bf16 %v8936_v43, %v8933_v52  ;;  %v8932_v17 = vld [vmem:[%s19719_s2 + $0xa80] sm:$0xff]  ;;  %v9018_v52 = vld [vmem:[%s19719_s2 + $0xd30] sm:$0xff]  ;;  %v9021_v43 = vld [vmem:[%s19719_s2 + $0xd48] sm:$0xff] }
 0x4b8   :  { %13256 = vpow2.f32 %v3096_v57  ;;  %12115 = vmatprep.subr.bf16.mxu0 %v12114_v1  ;;  %v12130_v57 = vpack.c.bf16 %v8929_v41, %v8926_v23  ;;  %v8935_v1 = vld [vmem:[%s19719_s2 + $0xa98] sm:$0xff]  ;;  %v8964_v41 = vld [vmem:[%s19719_s2 + $0xb80] sm:$0xff] }
 0x4b9   :  { %v12134_v38 = vpack.c.bf16 %v8935_v1, %v8932_v17  ;;  %v8959_v23 = vld [vmem:[%s19719_s2 + $0xb58] sm:$0xff]  ;;  %v12228_v17 = vpack.c.bf16 %v9021_v43, %v9018_v52  ;;  %v8969_v1 = vld [vmem:[%s19719_s2 + $0xba8] sm:$0xff]  ;;  %v9010_v52 = vld [vmem:[%s19719_s2 + $0xcf0] sm:$0xff] }
 0x4ba   :  { %v9013_v43 = vld [vmem:[%s19719_s2 + $0xd08] sm:$0xff] }
 0x4bb   :  { %12117 = vmatpush3.bf16.msra.mxu0 %v12116_v13  ;;  %v8942_v13 = vld [vmem:[%s19719_s2 + $0xad0] sm:$0xff] }
 0x4bc   :  { %v13249_v63 = vpop.eup %13248  ;;  %12197 = vmatprep.subr.bf16.mxu0 %v12196_v56  ;;  %v8994_v56 = vld [vmem:[%s19719_s2 + $0xc70] sm:$0xff] }
 0x4bd   :  { %v13251_v61 = vpop.eup %13250  ;;  %v8840_v24 = vadd.f32 -1.0, %v13249_v63  ;;  %v8997_v63 = vld [vmem:[%s19719_s2 + $0xc88] sm:$0xff] }
 0x4be   :  { %v8841_v30 = vadd.f32 -1.0, %v13251_v61  ;;  %v12136_v61 = vpack.c.bf16 %v8942_v13, %v8939_v49  ;;  %v12212_v36 = vpack.c.bf16 %v8997_v63, %v8994_v56  ;;  %v8968_v13 = vld [vmem:[%s19719_s2 + $0xba0] sm:$0xff]  ;;  %v8971_v56 = vld [vmem:[%s19719_s2 + $0xbb8] sm:$0xff]  ;;  %v12156_v63 = vpack.c.bf16 %v8972_v5, %v8969_v1  ;;  %v9026_v5 = vld [vmem:[%s19719_s2 + $0xd70] sm:$0xff] }
 0x4bf   :  { %v3104_v58 = vsel %vm3080_vm3, %v13128_v32, %v8840_v24  ;;  %v8927_v32 = vld [vmem:[%s19719_s2 + $0xa58] sm:$0xff]  ;;  %v8938_v24 = vld [vmem:[%s19719_s2 + $0xab0] sm:$0xff] }
 0x4c0   :  { %v13253_v44 = vpop.eup %13252  ;;  %v3105_v60 = vsel %vm3081_vm2, %v13129_v45, %v8841_v30  ;;  %v3473_v45 = vld [vmem:[#allocation2 + $0x98] sm:$0xff]  ;;  %v12128_v40 = vpack.c.bf16 %v8930_v34, %v8927_v32  ;;  %v8941_v30 = vld [vmem:[%s19719_s2 + $0xac8] sm:$0xff]  ;;  %v8960_v34 = vld [vmem:[%s19719_s2 + $0xb60] sm:$0xff] }
 0x4c1   :  { %v13255_v8 = vpop.eup %13254  ;;  %3214 = vmatprep.mubr.f32.mxu1 %v3105_v60  ;;  %v8843_v12 = vadd.f32 -1.0, %v13253_v44  ;;  %v8949_v44 = vld [vmem:[%s19719_s2 + $0xb08] sm:$0xff]  ;;  %v9023_v1 = vld [vmem:[%s19719_s2 + $0xd58] sm:$0xff] }
 0x4c2   :  { %v13257_v15 = vpop.eup %13256  ;;  %3215 = vmatmul.mubr.f32.vlgmr.msra.gmra.mrb[90].mxu1 %v3104_v58  ;;  %v8844_v35 = vadd.f32 -1.0, %v13255_v8  ;;  %v8945_v60 = vld [vmem:[%s19719_s2 + $0xae8] sm:$0xff]  ;;  %v12138_v8 = vpack.c.bf16 %v8941_v30, %v8938_v24  ;;  %v8978_v24 = vld [vmem:[%s19719_s2 + $0xbf0] sm:$0xff] }
 0x4c3   :  { %12120 = vmatpush3.bf16.msra.mxu1 %v12119_v28  ;;  %11114 = vmatprep.mubr.msk.f32.mxu1 %vm13356_vm5, %v13354_v14  ;;  %v8845_v25 = vadd.f32 -1.0, %v13257_v15  ;;  %v3107_v29 = vsel %vm3083_vm6, %v16317_v46, %v8843_v12  ;;  %v12204_v46 = vpack.c.bf16 %v8985_v37, %v8982_v62  ;;  %v8946_v28 = vld [vmem:[%s19719_s2 + $0xaf0] sm:$0xff]  ;;  %v12140_v12 = vpack.c.bf16 %v8948_v42, %v8945_v60  ;;  %v8952_v15 = vld [vmem:[%s19719_s2 + $0xb20] sm:$0xff]  ;;  %v8957_v32 = vld [vmem:[%s19719_s2 + $0xb48] sm:$0xff] }
 0x4c4   :  { %v3108_v48 = vsel %vm3084_vm4, %v13131_v54, %v8844_v35  ;;  %12121 = vmatprep.subr.bf16.mxu1 %v13353_v50  ;;  %v8991_v54 = vld [vmem:[%s19719_s2 + $0xc58] sm:$0xff]  ;;  %v12214_v58 = vpack.c.bf16 %v8949_v44, %v8946_v28  ;;  %v12216_v35 = vpack.c.bf16 %v9003_v7, %v9000_v16  ;;  %v12218_v26 = vpack.c.bf16 %v8955_v20, %v8952_v15  ;;  %v9012_v62 = vld [vmem:[%s19719_s2 + $0xd00] sm:$0xff]  ;;  %v16579_v30 = vld [vmem:[#allocation2 + $0xb0] sm:$0xff] }
 0x4c5   :  { %3395 = vmatprep.mubr.f32.mxu0 %v3108_v48  ;;  %v3109_v59 = vsel %vm3085_vm7, %v16235_v4, %v8845_v25  ;;  %v8988_v4 = vld [vmem:[%s19719_s2 + $0xc40] sm:$0xff]  ;;  %v9009_v48 = vld [vmem:[%s19719_s2 + $0xce8] sm:$0xff]  ;;  %v9015_v37 = vld [vmem:[%s19719_s2 + $0xd18] sm:$0xff]  ;;  %v12158_v28 = vpack.c.bf16 %v8971_v56, %v8968_v13 }
 0x4c6   :  { %3396 = vmatmul.mubr.f32.vlgmr.msra.gmra.mrb[54].mxu0 %v3107_v29  ;;  %v12208_v2 = vpack.c.bf16 %v8991_v54, %v8988_v4  ;;  %v8953_v25 = vld [vmem:[%s19719_s2 + $0xb28] sm:$0xff]  ;;  %v8958_v29 = vld [vmem:[%s19719_s2 + $0xb50] sm:$0xff]  ;;  %v12224_v11 = vpack.c.bf16 %v9015_v37, %v9012_v62  ;;  %v8984_v16 = vld [vmem:[%s19719_s2 + $0xc20] sm:$0xff] }
 0x4c7   :  { %12123 = vmatpush3.bf16.msra.mxu1 %v12122_v21  ;;  %12199 = vmatpush3.bf16.msra.mxu0 %v12198_v39  ;;  %v8954_v21 = vld [vmem:[%s19719_s2 + $0xb30] sm:$0xff]  ;;  %v8977_v44 = vld [vmem:[%s19719_s2 + $0xbe8] sm:$0xff]  ;;  %v8987_v15 = vld [vmem:[%s19719_s2 + $0xc38] sm:$0xff] }
 0x4c8   :  { %3823 = vmatprep.mubr.f32.mxu0 %v3473_v45  ;;  %12125 = vmatprep.subr.bf16.mxu1 %v12124_v6  ;;  %v9006_v39 = vld [vmem:[%s19719_s2 + $0xcd0] sm:$0xff]  ;;  %v12142_v6 = vpack.c.bf16 %v8947_v9, %v8944_v19  ;;  %v12144_v47 = vpack.c.bf16 %v8954_v21, %v8951_v18  ;;  %v8981_v42 = vld [vmem:[%s19719_s2 + $0xc08] sm:$0xff]  ;;  %v8980_v19 = vld [vmem:[%s19719_s2 + $0xc00] sm:$0xff] }
 0x4c9   :  { %12201 = vmatprep.subr.bf16.mxu0 %v12200_v53  ;;  %v12220_v53 = vpack.c.bf16 %v9009_v48, %v9006_v39  ;;  %v16594_v7 = vld [vmem:[#allocation2 + $0xa8] sm:$0xff]  ;;  %v8983_v9 = vld [vmem:[%s19719_s2 + $0xc18] sm:$0xff]  ;;  %v8986_v39 = vld [vmem:[%s19719_s2 + $0xc30] sm:$0xff] }
 0x4ca   :  { %11115 = vmatmul.mubr.msk.f32.vlgmr.msra.gmra.mrb[92].mxu1 %vm939_vm1, %v3109_v59  ;;  %v8967_v59 = vld [vmem:[%s19719_s2 + $0xb98] sm:$0xff]  ;;  %v12166_v18 = vpack.c.bf16 %v8983_v9, %v8980_v19  ;;  %v8989_v48 = vld [vmem:[%s19719_s2 + $0xc48] sm:$0xff]  ;;  %v8998_v62 = vld [vmem:[%s19719_s2 + $0xc90] sm:$0xff] }
 0x4cb   :  { %12127 = vmatpush1.bf16.msra.mxu1 %v12126_v27  ;;  %3669 = vmatprep.mubr.f32.mxu1 %v3473_v45  ;;  %v12146_v45 = vpack.c.bf16 %v8953_v25, %v8950_v22  ;;  %v12222_v27 = vpack.c.bf16 %v8961_v31, %v8958_v29  ;;  %v12226_v54 = vpack.c.bf16 %v8967_v59, %v8964_v41  ;;  %v16613_v20 = vld [vmem:[#allocation2 + $0xb8] sm:$0xff]  ;;  %v8992_v25 = vld [vmem:[%s19719_s2 + $0xc60] sm:$0xff]  ;;  %v9002_v31 = vld [vmem:[%s19719_s2 + $0xcb0] sm:$0xff] }
 0x4cc   :  { %12203 = vmatpush3.bf16.msra.mxu0 %v12202_v3  ;;  %12129 = vmatprep.subr.bf16.mxu1 %v12128_v40  ;;  %v12148_v3 = vpack.c.bf16 %v8960_v34, %v8957_v32  ;;  %v8956_v40 = vld [vmem:[%s19719_s2 + $0xb40] sm:$0xff]  ;;  %v8995_v29 = vld [vmem:[%s19719_s2 + $0xc78] sm:$0xff]  ;;  %v9001_v37 = vld [vmem:[%s19719_s2 + $0xca8] sm:$0xff] }
 0x4cd   :  { %12205 = vmatprep.subr.bf16.mxu0 %v12204_v46  ;;  %v8963_v46 = vld [vmem:[%s19719_s2 + $0xb78] sm:$0xff]  ;;  %v12150_v4 = vpack.c.bf16 %v8959_v23, %v8956_v40  ;;  %v12174_v32 = vpack.c.bf16 %v8995_v29, %v8992_v25  ;;  %v9004_v23 = vld [vmem:[%s19719_s2 + $0xcc0] sm:$0xff]  ;;  %v9014_v59 = vld [vmem:[%s19719_s2 + $0xd10] sm:$0xff] }
 0x4ce   :  { %v9007_v41 = vld [vmem:[%s19719_s2 + $0xcd8] sm:$0xff]  ;;  %v9025_v13 = vld [vmem:[%s19719_s2 + $0xd68] sm:$0xff]  ;;  %v9040_v9 = vld [vmem:[%s19722_s4 + $0x6d0] sm:$0xff] }
 0x4cf   :  { %12131 = vmatpush1.bf16.msra.mxu1 %v12130_v57  ;;  %v12152_v57 = vpack.c.bf16 %v8966_v51, %v8963_v46  ;;  %v12182_v46 = vpack.c.bf16 %v9007_v41, %v9004_v23  ;;  %v9092_v19 = vld [vmem:[%s19722_s4 + $0x868] sm:$0xff]  ;;  %v9044_v29 = vld [vmem:[%s19722_s4 + $0x6f0] sm:$0xff] }
 0x4d0   :  { %12207 = vmatpush3.bf16.msra.mxu0 %v12206_v55  ;;  %12133 = vmatprep.subr.bf16.mxu1 %v12132_v0  ;;  %v8962_v55 = vld [vmem:[%s19719_s2 + $0xb70] sm:$0xff]  ;;  %v8965_v0 = vld [vmem:[%s19719_s2 + $0xb88] sm:$0xff] }
 0x4d1   :  { %12209 = vmatprep.subr.bf16.mxu0 %v12208_v2  ;;  %v9024_v2 = vld [vmem:[%s19719_s2 + $0xd60] sm:$0xff]  ;;  %v12154_v49 = vpack.c.bf16 %v8965_v0, %v8962_v55  ;;  %v9048_v41 = vld [vmem:[%s19722_s4 + $0x710] sm:$0xff] }
 0x4d2   :  { %v9016_v0 = vld [vmem:[%s19719_s2 + $0xd20] sm:$0xff] }
 0x4d3   :  { %12135 = vmatpush1.bf16.msra.mxu1 %v12134_v38  ;;  %v12232_v38 = vpack.c.bf16 %v9027_v33, %v9024_v2  ;;  %v12192_v33 = vpack.c.bf16 %v9026_v5, %v9023_v1  ;;  %v9052_v5 = vld [vmem:[%s19722_s4 + $0x730] sm:$0xff] }
 0x4d4   :  { %12211 = vmatpush3.bf16.msra.mxu0 %v12210_v10  ;;  %12137 = vmatprep.subr.bf16.mxu1 %v12136_v61  ;;  %v16570_v10 = vld [vmem:[#allocation2 + $0x90] sm:$0xff]  ;;  %v8975_v61 = vld [vmem:[%s19719_s2 + $0xbd8] sm:$0xff] }
 0x4d5   :  { %12213 = vmatprep.subr.bf16.mxu0 %v12212_v36  ;;  %v8974_v36 = vld [vmem:[%s19719_s2 + $0xbd0] sm:$0xff]  ;;  %v12160_v60 = vpack.c.bf16 %v8978_v24, %v8975_v61  ;;  %v9073_v24 = vld [vmem:[%s19722_s4 + $0x7d8] sm:$0xff] }
 0x4d6   :  { %v9072_v61 = vld [vmem:[%s19722_s4 + $0x7d0] sm:$0xff] }
 0x4d7   :  { %12139 = vmatpush1.bf16.msra.mxu1 %v12138_v8  ;;  %v16597_v8 = vld [vmem:[#allocation2 + $0xa0] sm:$0xff] }
 0x4d8   :  { %12215 = vmatpush3.bf16.msra.mxu0 %v12214_v58  ;;  %12141 = vmatprep.subr.bf16.mxu1 %v12140_v12  ;;  %v12162_v58 = vpack.c.bf16 %v8977_v44, %v8974_v36  ;;  %v12164_v12 = vpack.c.bf16 %v8984_v16, %v8981_v42  ;;  %v9055_v36 = vld [vmem:[%s19722_s4 + $0x748] sm:$0xff]  ;;  %v9038_v44 = vld [vmem:[%s19722_s4 + $0x6c0] sm:$0xff]  ;;  %v9056_v16 = vld [vmem:[%s19722_s4 + $0x750] sm:$0xff] }
 0x4d9   :  { %12217 = vmatprep.subr.bf16.mxu0 %v12216_v35  ;;  %v8990_v35 = vld [vmem:[%s19719_s2 + $0xc50] sm:$0xff]  ;;  %v9039_v42 = vld [vmem:[%s19722_s4 + $0x6c8] sm:$0xff] }
 0x4da   :  { %v12168_v21 = vpack.c.bf16 %v8990_v35, %v8987_v15  ;;  %v9041_v35 = vld [vmem:[%s19722_s4 + $0x6d8] sm:$0xff] }
 0x4db   :  { %12143 = vmatpush1.bf16.msra.mxu1 %v12142_v6  ;;  %v8993_v6 = vld [vmem:[%s19719_s2 + $0xc68] sm:$0xff] }
 0x4dc   :  { %12219 = vmatpush3.bf16.msra.mxu0 %v12218_v26  ;;  %12145 = vmatprep.subr.bf16.mxu1 %v12144_v47  ;;  %v8996_v26 = vld [vmem:[%s19719_s2 + $0xc80] sm:$0xff]  ;;  %v12170_v47 = vpack.c.bf16 %v8989_v48, %v8986_v39 }
 0x4dd   :  { %12221 = vmatprep.subr.bf16.mxu0 %v12220_v53  ;;  %v12172_v22 = vpack.c.bf16 %v8996_v26, %v8993_v6  ;;  %v8999_v53 = vld [vmem:[%s19719_s2 + $0xc98] sm:$0xff]  ;;  %v9042_v48 = vld [vmem:[%s19722_s4 + $0x6e0] sm:$0xff]  ;;  %v9043_v6 = vld [vmem:[%s19722_s4 + $0x6e8] sm:$0xff] }
 0x4de   :  { %v12176_v34 = vpack.c.bf16 %v9002_v31, %v8999_v53  ;;  %v12246_v26 = vpack.c.bf16 %v9043_v6, %v9042_v48  ;;  %v9045_v53 = vld [vmem:[%s19722_s4 + $0x6f8] sm:$0xff]  ;;  %v9093_v48 = vld [vmem:[%s19722_s4 + $0x870] sm:$0xff] }
 0x4df   :  { %12147 = vmatpush1.bf16.msra.mxu1 %v12146_v45  ;;  %v9005_v45 = vld [vmem:[%s19719_s2 + $0xcc8] sm:$0xff]  ;;  %v12250_v31 = vpack.c.bf16 %v9045_v53, %v9044_v29  ;;  %v9094_v6 = vld [vmem:[%s19722_s4 + $0x878] sm:$0xff]  ;;  %v9077_v29 = vld [vmem:[%s19722_s4 + $0x7f0] sm:$0xff] }
 0x4e0   :  { %12223 = vmatpush3.bf16.msra.mxu0 %v12222_v27  ;;  %12149 = vmatprep.subr.bf16.mxu1 %v12148_v3  ;;  %v9008_v27 = vld [vmem:[%s19719_s2 + $0xce0] sm:$0xff]  ;;  %v12178_v3 = vpack.c.bf16 %v9001_v37, %v8998_v62  ;;  %v9078_v53 = vld [vmem:[%s19722_s4 + $0x7f8] sm:$0xff] }
 0x4e1   :  { %12225 = vmatprep.subr.bf16.mxu0 %v12224_v11  ;;  %v12180_v40 = vpack.c.bf16 %v9008_v27, %v9005_v45  ;;  %v9011_v11 = vld [vmem:[%s19719_s2 + $0xcf8] sm:$0xff]  ;;  %v9046_v37 = vld [vmem:[%s19722_s4 + $0x700] sm:$0xff]  ;;  %v9047_v45 = vld [vmem:[%s19722_s4 + $0x708] sm:$0xff] }
 0x4e2   :  { %v12184_v51 = vpack.c.bf16 %v9014_v59, %v9011_v11  ;;  %v12254_v27 = vpack.c.bf16 %v9047_v45, %v9046_v37  ;;  %v9049_v11 = vld [vmem:[%s19722_s4 + $0x718] sm:$0xff]  ;;  %v9079_v45 = vld [vmem:[%s19722_s4 + $0x800] sm:$0xff] }
 0x4e3   :  { %12151 = vmatpush1.bf16.msra.mxu1 %v12150_v4  ;;  %v9017_v4 = vld [vmem:[%s19719_s2 + $0xd28] sm:$0xff]  ;;  %v12258_v59 = vpack.c.bf16 %v9049_v11, %v9048_v41  ;;  %v9081_v11 = vld [vmem:[%s19722_s4 + $0x810] sm:$0xff] }
 0x4e4   :  { %12227 = vmatpush3.bf16.msra.mxu0 %v12226_v54  ;;  %12153 = vmatprep.subr.bf16.mxu1 %v12152_v57  ;;  %v9020_v54 = vld [vmem:[%s19719_s2 + $0xd40] sm:$0xff]  ;;  %v12186_v57 = vpack.c.bf16 %v9013_v43, %v9010_v52 }
 0x4e5   :  { %12229 = vmatprep.subr.bf16.mxu0 %v12228_v17  ;;  %v12188_v55 = vpack.c.bf16 %v9020_v54, %v9017_v4  ;;  %v9050_v43 = vld [vmem:[%s19722_s4 + $0x720] sm:$0xff]  ;;  %v9051_v4 = vld [vmem:[%s19722_s4 + $0x728] sm:$0xff] }
 0x4e6   :  { %v12262_v54 = vpack.c.bf16 %v9051_v4, %v9050_v43  ;;  %v9083_v4 = vld [vmem:[%s19722_s4 + $0x820] sm:$0xff] }
 0x4e7   :  { %3824 = vmatmul.mubr.f32.vlgmr.msra.gmra.mrb[56].mxu0 %v16570_v10  ;;  %12155 = vmatpush1.bf16.msra.mxu1 %v12154_v49  ;;  %v9022_v49 = vld [vmem:[%s19719_s2 + $0xd50] sm:$0xff] }
 0x4e8   :  { %3828 = vmatprep.mubr.f32.mxu0 %v16579_v30  ;;  %12231 = vmatpush3.bf16.msra.mxu0 %v12228_v17  ;;  %v9019_v17 = vld [vmem:[%s19719_s2 + $0xd38] sm:$0xff]  ;;  %v12194_v56 = vpack.c.bf16 %v9025_v13, %v9022_v49 }
 0x4e9   :  { %12157 = vmatprep.subr.bf16.mxu1 %v12156_v63  ;;  %12233 = vmatprep.subr.bf16.mxu0 %v12232_v38  ;;  %v12190_v2 = vpack.c.bf16 %v9019_v17, %v9016_v0  ;;  %v9070_v63 = vld [vmem:[%s19722_s4 + $0x7c0] sm:$0xff]  ;;  %v9069_v0 = vld [vmem:[%s19722_s4 + $0x7b8] sm:$0xff] }
 0x4eb   :  { %3829 = vmatmul.mubr.f32.gmra.mrb[58].mxu0 %v16594_v7  ;;  %12159 = vmatpush1.bf16.msra.mxu1 %v12158_v28  ;;  %v9054_v28 = vld [vmem:[%s19722_s4 + $0x740] sm:$0xff] }
 0x4ec   :  { %12235 = vmatpush3.bf16.msra.mxu0 %v12232_v38  ;;  %11125 = vmatprep.mubr.msk.f32.mxu0 %vm939_vm1, %v16597_v8  ;;  %v9071_v38 = vld [vmem:[%s19722_s4 + $0x7c8] sm:$0xff] }
 0x4ed   :  { %12161 = vmatprep.subr.bf16.mxu1 %v12160_v60  ;;  %v12236_v60 = vpack.c.bf16 %v9055_v36, %v9054_v28 }
 0x4ef   :  { %11126 = vmatmul.mubr.msk.f32.vlgmr.msra.gmra.mrb[60].mxu0 %vm939_vm1, %v16613_v20  ;;  %12163 = vmatpush1.bf16.msra.mxu1 %v12162_v58 }
 0x4f0   :  { %12165 = vmatprep.subr.bf16.mxu1 %v12164_v12  ;;  %v9091_v12 = vld [vmem:[%s19722_s4 + $0x860] sm:$0xff]  ;;  %12237 = vmatprep.subr.bf16.mxu0 %v12236_v60 }
 0x4f1   :  { %v12274_v15 = vpack.c.bf16 %v9092_v19, %v9091_v12 }
 0x4f3   :  { %12167 = vmatpush1.bf16.msra.mxu1 %v12166_v18  ;;  %v9058_v18 = vld [vmem:[%s19722_s4 + $0x760] sm:$0xff] }
 0x4f4   :  { %12169 = vmatprep.subr.bf16.mxu1 %v12168_v21  ;;  %v9059_v21 = vld [vmem:[%s19722_s4 + $0x768] sm:$0xff] }
 0x4f5   :  { %v12244_v39 = vpack.c.bf16 %v9059_v21, %v9058_v18  ;;  %v9075_v21 = vld [vmem:[%s19722_s4 + $0x7e0] sm:$0xff] }
 0x4f7   :  { %12171 = vmatpush1.bf16.msra.mxu1 %v12170_v47  ;;  %v9060_v47 = vld [vmem:[%s19722_s4 + $0x770] sm:$0xff] }
 0x4f8   :  { %12173 = vmatprep.subr.bf16.mxu1 %v12172_v22  ;;  %v9061_v22 = vld [vmem:[%s19722_s4 + $0x778] sm:$0xff] }
 0x4f9   :  { %v12248_v25 = vpack.c.bf16 %v9061_v22, %v9060_v47 }
 0x4fb   :  { %12175 = vmatpush1.bf16.msra.mxu1 %v12174_v32  ;;  %v9062_v32 = vld [vmem:[%s19722_s4 + $0x780] sm:$0xff] }
 0x4fc   :  { %12177 = vmatprep.subr.bf16.mxu1 %v12176_v34  ;;  %v9063_v34 = vld [vmem:[%s19722_s4 + $0x788] sm:$0xff] }
 0x4fd   :  { %v12252_v62 = vpack.c.bf16 %v9063_v34, %v9062_v32  ;;  %v9095_v32 = vld [vmem:[%s19722_s4 + $0x880] sm:$0xff]  ;;  %v9096_v34 = vld [vmem:[%s19722_s4 + $0x888] sm:$0xff] }
 0x4fe   :  { %v12282_v37 = vpack.c.bf16 %v9096_v34, %v9095_v32 }
 0x4ff   :  { %12179 = vmatpush1.bf16.msra.mxu1 %v12178_v3  ;;  %v9064_v3 = vld [vmem:[%s19722_s4 + $0x790] sm:$0xff] }
 0x500   :  { %12181 = vmatprep.subr.bf16.mxu1 %v12180_v40  ;;  %v9065_v40 = vld [vmem:[%s19722_s4 + $0x798] sm:$0xff] }
 0x501   :  { %v12256_v23 = vpack.c.bf16 %v9065_v40, %v9064_v3  ;;  %v9097_v3 = vld [vmem:[%s19722_s4 + $0x890] sm:$0xff]  ;;  %v9098_v40 = vld [vmem:[%s19722_s4 + $0x898] sm:$0xff] }
 0x502   :  { %v12286_v41 = vpack.c.bf16 %v9098_v40, %v9097_v3 }
 0x503   :  { %12183 = vmatpush1.bf16.msra.mxu1 %v12182_v46  ;;  %v9066_v46 = vld [vmem:[%s19722_s4 + $0x7a0] sm:$0xff] }
 0x504   :  { %12185 = vmatprep.subr.bf16.mxu1 %v12184_v51  ;;  %v9067_v51 = vld [vmem:[%s19722_s4 + $0x7a8] sm:$0xff] }
 0x505   :  { %v12260_v52 = vpack.c.bf16 %v9067_v51, %v9066_v46  ;;  %v9099_v46 = vld [vmem:[%s19722_s4 + $0x8a0] sm:$0xff]  ;;  %v9100_v51 = vld [vmem:[%s19722_s4 + $0x8a8] sm:$0xff] }
 0x506   :  { %v12290_v43 = vpack.c.bf16 %v9100_v51, %v9099_v46  ;;  %v9168_v46 = vld [vmem:[%s19719_s2 + $0xf40] sm:$0xff]  ;;  %v9171_v51 = vld [vmem:[%s19719_s2 + $0xf58] sm:$0xff] }
 0x507   :  { %12187 = vmatpush1.bf16.msra.mxu1 %v12186_v57  ;;  %v9068_v57 = vld [vmem:[%s19722_s4 + $0x7b0] sm:$0xff] }
 0x508   :  { %12189 = vmatprep.subr.bf16.mxu1 %v12188_v55  ;;  %v12264_v1 = vpack.c.bf16 %v9069_v0, %v9068_v57  ;;  %v9101_v57 = vld [vmem:[%s19722_s4 + $0x8b0] sm:$0xff] }
 0x50a   :  { %3670 = vmatmul.mubr.f32.vlgmr.msra.gmra.mrb[94].mxu1 %v16570_v10  ;;  %v12269_v10 = vpack.c.bf16 %v9071_v38, %v9070_v63 }
 0x50b   :  { %3675 = vmatprep.mubr.f32.mxu1 %v16579_v30  ;;  %12191 = vmatpush1.bf16.msra.mxu1 %v12190_v2  ;;  %v12272_v30 = vpack.c.bf16 %v9073_v24, %v9072_v61  ;;  %v9053_v2 = vld [vmem:[%s19722_s4 + $0x738] sm:$0xff] }
 0x50c   :  { %12193 = vmatprep.subr.bf16.mxu1 %v12192_v33  ;;  %v12266_v33 = vpack.c.bf16 %v9053_v2, %v9052_v5  ;;  %v9085_v5 = vld [vmem:[%s19722_s4 + $0x830] sm:$0xff]  ;;  %v9086_v2 = vld [vmem:[%s19722_s4 + $0x838] sm:$0xff] }
 0x50e   :  { %3676 = vmatmul.mubr.f32.gmra.mrb[96].mxu1 %v16594_v7  ;;  %v9057_v7 = vld [vmem:[%s19722_s4 + $0x758] sm:$0xff] }
 0x50f   :  { %12195 = vmatpush1.bf16.msra.mxu1 %v12194_v56  ;;  %3746 = vmatprep.mubr.f32.mxu1 %v13354_v14  ;;  %v12240_v58 = vpack.c.bf16 %v9057_v7, %v9056_v16 }
 0x510   :  { %12268 = vmatprep.subr.bf16.mxu1 %v13353_v50 }
 0x512   :  { %9028 = vmatmul.mubr.msk.f32.vlgmr.msra.gmra.mrb[94].mxu1 %vm939_vm1, %v16597_v8  ;;  %v12238_v8 = vpack.c.bf16 %v9039_v42, %v9038_v44 }
 0x513   :  { %3752 = vmatprep.mubr.f32.mxu1 %v13354_v14  ;;  %12270 = vmatpush3.bf16.msra.mxu1 %v12269_v10 }
 0x514   :  { %12271 = vmatprep.subr.bf16.mxu1 %v13353_v50  ;;  %12239 = vmatpush3.bf16.msra.mxu0 %v12238_v8  ;;  %v3592_v8 = vpop.permute.xlu0 %3591 }
 0x515   :  { %12241 = vmatprep.subr.bf16.mxu0 %v12240_v58  ;;  %v16825_v58 = vpop.permute.xlu1 %3596 }
 0x516   :  { %9029 = vmatmul.mubr.msk.f32.gmra.mrb[96].mxu1 %vm939_vm1, %v16613_v20  ;;  %v12242_v20 = vpack.c.bf16 %v9041_v35, %v9040_v9 }
 0x517   :  { %11136 = vmatprep.mubr.msk.f32.mxu1 %vm13356_vm5, %v13354_v14  ;;  %12273 = vmatpush3.bf16.msra.mxu1 %v12272_v30 }
 0x518   :  { %12275 = vmatprep.subr.bf16.mxu1 %v12274_v15  ;;  %12243 = vmatpush3.bf16.msra.mxu0 %v12242_v20 }
 0x519   :  { %12245 = vmatprep.subr.bf16.mxu0 %v12244_v39  ;;  %v9076_v39 = vld [vmem:[%s19722_s4 + $0x7e8] sm:$0xff] }
 0x51a   :  { %v12276_v22 = vpack.c.bf16 %v9076_v39, %v9075_v21  ;;  %v9165_v21 = vld [vmem:[%s19719_s2 + $0xf28] sm:$0xff] }
 0x51c   :  { %12247 = vmatpush3.bf16.msra.mxu0 %v12246_v26 }
 0x51d   :  { %12249 = vmatprep.subr.bf16.mxu0 %v12248_v25  ;;  %v12278_v25 = vpack.c.bf16 %v9094_v6, %v9093_v48 }
 0x520   :  { %12251 = vmatpush3.bf16.msra.mxu0 %v12250_v31 }
 0x521   :  { %12253 = vmatprep.subr.bf16.mxu0 %v12252_v62  ;;  %v12280_v62 = vpack.c.bf16 %v9078_v53, %v9077_v29 }
 0x524   :  { %12255 = vmatpush3.bf16.msra.mxu0 %v12254_v27  ;;  %v9080_v27 = vld [vmem:[%s19722_s4 + $0x808] sm:$0xff] }
 0x525   :  { %12257 = vmatprep.subr.bf16.mxu0 %v12256_v23  ;;  %v12284_v23 = vpack.c.bf16 %v9080_v27, %v9079_v45  ;;  %v9117_v45 = vld [vmem:[%s19719_s2 + $0xda8] sm:$0xff] }
 0x528   :  { %12259 = vmatpush3.bf16.msra.mxu0 %v12258_v59  ;;  %v9082_v59 = vld [vmem:[%s19722_s4 + $0x818] sm:$0xff] }
 0x529   :  { %12261 = vmatprep.subr.bf16.mxu0 %v12260_v52  ;;  %v12288_v52 = vpack.c.bf16 %v9082_v59, %v9081_v11 }
 0x52c   :  { %12263 = vmatpush3.bf16.msra.mxu0 %v12262_v54  ;;  %v9084_v54 = vld [vmem:[%s19722_s4 + $0x828] sm:$0xff] }
 0x52d   :  { %12265 = vmatprep.subr.bf16.mxu0 %v12264_v1  ;;  %v12292_v0 = vpack.c.bf16 %v9084_v54, %v9083_v4 }
 0x530   :  { %12267 = vmatpush3.bf16.msra.mxu0 %v12266_v33 }
 0x531   :  { %12306 = vmatprep.subr.bf16.mxu0 %v13353_v50 }
 0x571   :  { %v3286_v55 = vpop.f32.mrb[52].mxu0 }
 0x572   :  { %v11105_v17 = vpop.f32.mrb[53].mxu0 }
 0x595   :  { %v10301_v49 = vpop.f32.mrb[90].mxu1 }
 0x596   :  { %v10302_v13 = vpop.f32.mrb[91].mxu1 }
 0x597   :  { %v10303_v56 = vadd.f32 %v10302_v13, %v10301_v49  ;;  %v9103_v13 = vld [vmem:[%s19722_s4 + $0x8c0] sm:$0xff] }
 0x599   :  { %v3287_v63 = vadd.f32 %v10303_v56, %v3286_v55  ;;  %v10341_v38 = vpop.f32.mrb[54].mxu0  ;;  %v9102_v55 = vld [vmem:[%s19722_s4 + $0x8b8] sm:$0xff]  ;;  %v9104_v56 = vld [vmem:[%s19722_s4 + $0x8c8] sm:$0xff] }
 0x59a   :  { %v10342_v10 = vpop.f32.mrb[55].mxu0  ;;  %v12294_v1 = vpack.c.bf16 %v9102_v55, %v9101_v57  ;;  %v9112_v57 = vld [vmem:[%s19719_s2 + $0xd80] sm:$0xff]  ;;  %v9115_v55 = vld [vmem:[%s19719_s2 + $0xd98] sm:$0xff] }
 0x59b   :  { %3290 = vst.msk [vmem:[#allocation3 + $0x20] sm:$0xff] %vm1631_vm9, %v3287_v63  ;;  %v10343_v61 = vadd.f32 %v10342_v10, %v10341_v38  ;;  %v12296_v10 = vpack.c.bf16 %v9086_v2, %v9085_v5  ;;  %v12388_v5 = vpack.c.bf16 %v9171_v51, %v9168_v46  ;;  %v9123_v2 = vld [vmem:[%s19719_s2 + $0xdd8] sm:$0xff] }
 0x59c   :  { %v9147_v46 = vld [vmem:[%s19719_s2 + $0xe98] sm:$0xff] }
 0x59d   :  { %v3467_v24 = vpop.f32.mrb[92].mxu1  ;;  %v9143_v51 = vld [vmem:[%s19719_s2 + $0xe78] sm:$0xff] }
 0x59e   :  { %v3468_v30 = vadd.f32 %v10343_v61, %v3467_v24  ;;  %v11116_v28 = vpop.f32.mrb[93].mxu1 }
 0x59f   :  { %v9087_v28 = vld [vmem:[%s19722_s4 + $0x840] sm:$0xff] }
 0x5a0   :  { %3471 = vst.msk [vmem:[#allocation3 + $0x28] sm:$0xff] %vm1631_vm9, %v3468_v30  ;;  %v12298_v30 = vpack.c.bf16 %v9104_v56, %v9103_v13  ;;  %v9174_v13 = vld [vmem:[%s19719_s2 + $0xf70] sm:$0xff]  ;;  %v9177_v56 = vld [vmem:[%s19719_s2 + $0xf88] sm:$0xff] }
 0x5ba   :  { %v10381_v36 = vpop.f32.mrb[56].mxu0 }
 0x5bb   :  { %v10382_v44 = vpop.f32.mrb[57].mxu0 }
 0x5bc   :  { %v10383_v60 = vadd.f32 %v10382_v44, %v10381_v36  ;;  %v9088_v36 = vld [vmem:[%s19722_s4 + $0x848] sm:$0xff] }
 0x5be   :  { %v10384_v42 = vpop.f32.mrb[58].mxu0  ;;  %v3826_v9 = vadd.f32 %v10383_v60, %v3592_v8 }
 0x5bf   :  { %v10385_v16 = vpop.f32.mrb[59].mxu0 }
 0x5c0   :  { %v10386_v7 = vadd.f32 %v10385_v16, %v10384_v42  ;;  %v9105_v42 = vld [vmem:[%s19722_s4 + $0x8d0] sm:$0xff]  ;;  %v9106_v16 = vld [vmem:[%s19722_s4 + $0x8d8] sm:$0xff] }
 0x5c2   :  { %v3831_v12 = vadd.f32 %v10386_v7, %v16825_v58  ;;  %v11127_v19 = vpop.f32.mrb[60].mxu0 }
 0x5c3   :  { %v3900_v15 = vpop.f32.mrb[61].mxu0 }
 0x5c4   :  { %v16828_v35 = vadd.f32 %v11127_v19, %v3831_v12  ;;  %v3901_v20 = vadd.f32 %v3900_v15, %v3826_v9  ;;  %v12300_v19 = vpack.c.bf16 %v9088_v36, %v9087_v28  ;;  %v12302_v15 = vpack.c.bf16 %v9106_v16, %v9105_v42  ;;  %v9126_v28 = vld [vmem:[%s19719_s2 + $0xdf0] sm:$0xff]  ;;  %v9125_v42 = vld [vmem:[%s19719_s2 + $0xde8] sm:$0xff]  ;;  %v9128_v16 = vld [vmem:[%s19719_s2 + $0xe00] sm:$0xff] }
 0x5c6   :  { %v3919_v18 = vmul.f32 1.442695, %v3901_v20  ;;  %vm3911_vm8 = vcmp.gt.f32.partialorder %v3901_v20, 0.0  ;;  %vm3914_vm14 = vcmp.gt.f32.partialorder %v16828_v35, 0.0 }
 0x5c8   :  { %13258 = vpow2.f32 %v3919_v18  ;;  %v9090_v18 = vld [vmem:[%s19722_s4 + $0x858] sm:$0xff] }
 0x5d2   :  { %v13259_v26 = vpop.eup %13258 }
 0x5d3   :  { %v9034_v47 = vadd.f32 -1.0, %v13259_v26  ;;  %v9107_v26 = vld [vmem:[%s19722_s4 + $0x8e0] sm:$0xff] }
 0x5d5   :  { %v3935_v31 = vsel %vm3911_vm8, %v3901_v20, %v9034_v47  ;;  %v9089_v20 = vld [vmem:[%s19722_s4 + $0x850] sm:$0xff]  ;;  %v9108_v47 = vld [vmem:[%s19722_s4 + $0x8e8] sm:$0xff] }
 0x5d6   :  { %11137 = vmatmul.mubr.msk.f32.vlgmr.msra.gmra.mrb[98].mxu1 %vm939_vm1, %v3935_v31  ;;  %v12304_v39 = vpack.c.bf16 %v9090_v18, %v9089_v20  ;;  %v12307_v53 = vpack.c.bf16 %v9108_v47, %v9107_v26  ;;  %v9109_v31 = vld [vmem:[%s19722_s4 + $0x8f0] sm:$0xff]  ;;  %v9132_v20 = vld [vmem:[%s19719_s2 + $0xe20] sm:$0xff] }
 0x5d7   :  { %12277 = vmatpush3.bf16.msra.mxu1 %v12276_v22 }
 0x5d8   :  { %12279 = vmatprep.subr.bf16.mxu1 %v12278_v25 }
 0x5db   :  { %12281 = vmatpush3.bf16.msra.mxu1 %v12280_v62  ;;  %v9110_v62 = vld [vmem:[%s19722_s4 + $0x8f8] sm:$0xff] }
 0x5dc   :  { %12283 = vmatprep.subr.bf16.mxu1 %v12282_v37  ;;  %v9114_v37 = vld [vmem:[%s19719_s2 + $0xd90] sm:$0xff] }
 0x5df   :  { %12285 = vmatpush3.bf16.msra.mxu1 %v12284_v23  ;;  %v9113_v23 = vld [vmem:[%s19719_s2 + $0xd88] sm:$0xff] }
 0x5e0   :  { %12287 = vmatprep.subr.bf16.mxu1 %v12286_v41  ;;  %v9116_v41 = vld [vmem:[%s19719_s2 + $0xda0] sm:$0xff] }
 0x5e1   :  { %v12312_v54 = vpack.c.bf16 %v9116_v41, %v9113_v23  ;;  %v9136_v23 = vld [vmem:[%s19719_s2 + $0xe40] sm:$0xff]  ;;  %v9139_v41 = vld [vmem:[%s19719_s2 + $0xe58] sm:$0xff] }
 0x5e3   :  { %12289 = vmatpush3.bf16.msra.mxu1 %v12288_v52  ;;  %v12310_v52 = vpack.c.bf16 %v9110_v62, %v9109_v31  ;;  %v9140_v62 = vld [vmem:[%s19719_s2 + $0xe60] sm:$0xff] }
 0x5e4   :  { %12291 = vmatprep.subr.bf16.mxu1 %v12290_v43  ;;  %v12386_v43 = vpack.c.bf16 %v9117_v45, %v9114_v37  ;;  %v9192_v37 = vld [vmem:[%s19719_s2 + $0x1000] sm:$0xff]  ;;  %v9195_v45 = vld [vmem:[%s19719_s2 + $0x1018] sm:$0xff] }
 0x5e5   :  { %v3748_v17 = vpop.f32.mrb[94].mxu1 }
 0x5e6   :  { %v13132_v33 = vadd.f32 %v3748_v17, %v3592_v8  ;;  %v3750_v49 = vpop.f32.mrb[95].mxu1 }
 0x5e7   :  { %v13133_v63 = vadd.f32 %v3750_v49, %v3592_v8  ;;  %12293 = vmatpush3.bf16.msra.mxu1 %v12292_v0  ;;  %v3925_v8 = vmul.f32 1.442695, %v16828_v35  ;;  %v9120_v0 = vld [vmem:[%s19719_s2 + $0xdc0] sm:$0xff]  ;;  %v9122_v49 = vld [vmem:[%s19719_s2 + $0xdd0] sm:$0xff] }
 0x5e8   :  { %v3915_v38 = vmul.f32 1.442695, %v13132_v33  ;;  %12295 = vmatprep.subr.bf16.mxu1 %v12294_v1  ;;  %vm3909_vm11 = vcmp.gt.f32.partialorder %v13132_v33, 0.0 }
 0x5e9   :  { %v3917_v61 = vmul.f32 1.442695, %v13133_v63  ;;  %v3754_v24 = vpop.f32.mrb[96].mxu1  ;;  %vm3910_vm10 = vcmp.gt.f32.partialorder %v13133_v63, 0.0 }
 0x5ea   :  { %13260 = vpow2.f32 %v3915_v38  ;;  %v16910_v44 = vadd.f32 %v3754_v24, %v16825_v58  ;;  %v3756_v60 = vpop.f32.mrb[97].mxu1  ;;  %v12314_v38 = vpack.c.bf16 %v9115_v55, %v9112_v57  ;;  %v9118_v24 = vld [vmem:[%s19719_s2 + $0xdb0] sm:$0xff] }
 0x5eb   :  { %13262 = vpow2.f32 %v3917_v61  ;;  %v13135_v7 = vadd.f32 %v3756_v60, %v16825_v58  ;;  %12297 = vmatpush3.bf16.msra.mxu1 %v12296_v10  ;;  %v9162_v58 = vld [vmem:[%s19719_s2 + $0xf10] sm:$0xff]  ;;  %v12390_v10 = vpack.c.bf16 %v9123_v2, %v9120_v0  ;;  %v9129_v60 = vld [vmem:[%s19719_s2 + $0xe08] sm:$0xff] }
 0x5ec   :  { %v3921_v12 = vmul.f32 1.442695, %v16910_v44  ;;  %12299 = vmatprep.subr.bf16.mxu1 %v12298_v30  ;;  %v12384_v48 = vpack.c.bf16 %v9165_v21, %v9162_v58  ;;  %vm3912_vm13 = vcmp.gt.f32.partialorder %v16910_v44, 0.0  ;;  %v9121_v30 = vld [vmem:[%s19719_s2 + $0xdc8] sm:$0xff]  ;;  %v9135_v58 = vld [vmem:[%s19719_s2 + $0xe38] sm:$0xff]  ;;  %v9142_v0 = vld [vmem:[%s19719_s2 + $0xe70] sm:$0xff] }
 0x5ed   :  { %v3923_v9 = vmul.f32 1.442695, %v13135_v7  ;;  %vm3913_vm12 = vcmp.gt.f32.partialorder %v13135_v7, 0.0  ;;  %v9131_v21 = vld [vmem:[%s19719_s2 + $0xe18] sm:$0xff]  ;;  %v12398_v47 = vpack.c.bf16 %v9135_v58, %v9132_v20  ;;  %v9153_v2 = vld [vmem:[%s19719_s2 + $0xec8] sm:$0xff]  ;;  %v9164_v20 = vld [vmem:[%s19719_s2 + $0xf20] sm:$0xff] }
 0x5ee   :  { %13264 = vpow2.f32 %v3921_v12  ;;  %v12394_v12 = vpack.c.bf16 %v9129_v60, %v9126_v28  ;;  %v9158_v60 = vld [vmem:[%s19719_s2 + $0xef0] sm:$0xff]  ;;  %v9219_v58 = vld [vmem:[%s19719_s2 + $0x10d8] sm:$0xff] }
 0x5ef   :  { %13266 = vpow2.f32 %v3923_v9  ;;  %12301 = vmatpush3.bf16.msra.mxu1 %v12300_v19  ;;  %v12320_v19 = vpack.c.bf16 %v9128_v16, %v9125_v42  ;;  %v9124_v9 = vld [vmem:[%s19719_s2 + $0xde0] sm:$0xff]  ;;  %v9210_v42 = vld [vmem:[%s19719_s2 + $0x1090] sm:$0xff]  ;;  %v9213_v16 = vld [vmem:[%s19719_s2 + $0x10a8] sm:$0xff] }
 0x5f0   :  { %13268 = vpow2.f32 %v3925_v8  ;;  %12303 = vmatprep.subr.bf16.mxu1 %v12302_v15  ;;  %v12318_v8 = vpack.c.bf16 %v9121_v30, %v9118_v24  ;;  %v9127_v15 = vld [vmem:[%s19719_s2 + $0xdf8] sm:$0xff]  ;;  %v9156_v30 = vld [vmem:[%s19719_s2 + $0xee0] sm:$0xff] }
 0x5f1   :  { %v12322_v26 = vpack.c.bf16 %v9127_v15, %v9124_v9  ;;  %v9151_v24 = vld [vmem:[%s19719_s2 + $0xeb8] sm:$0xff]  ;;  %v12416_v9 = vpack.c.bf16 %v9213_v16, %v9210_v42  ;;  %v9161_v15 = vld [vmem:[%s19719_s2 + $0xf08] sm:$0xff]  ;;  %v9202_v42 = vld [vmem:[%s19719_s2 + $0x1050] sm:$0xff] }
 0x5f2   :  { %v9205_v16 = vld [vmem:[%s19719_s2 + $0x1068] sm:$0xff] }
 0x5f3   :  { %12305 = vmatpush3.bf16.msra.mxu1 %v12304_v39  ;;  %v9134_v39 = vld [vmem:[%s19719_s2 + $0xe30] sm:$0xff] }
 0x5f4   :  { %v13261_v6 = vpop.eup %13260  ;;  %12385 = vmatprep.subr.bf16.mxu1 %v12384_v48  ;;  %v9186_v48 = vld [vmem:[%s19719_s2 + $0xfd0] sm:$0xff] }
 0x5f5   :  { %v13263_v22 = vpop.eup %13262  ;;  %v9032_v25 = vadd.f32 -1.0, %v13261_v6  ;;  %v9189_v6 = vld [vmem:[%s19719_s2 + $0xfe8] sm:$0xff] }
 0x5f6   :  { %v9033_v29 = vadd.f32 -1.0, %v13263_v22  ;;  %v12324_v22 = vpack.c.bf16 %v9134_v39, %v9131_v21  ;;  %v12400_v31 = vpack.c.bf16 %v9189_v6, %v9186_v48  ;;  %v9160_v39 = vld [vmem:[%s19719_s2 + $0xf00] sm:$0xff]  ;;  %v9163_v48 = vld [vmem:[%s19719_s2 + $0xf18] sm:$0xff]  ;;  %v12344_v6 = vpack.c.bf16 %v9164_v20, %v9161_v15  ;;  %v9218_v20 = vld [vmem:[%s19719_s2 + $0x10d0] sm:$0xff] }
 0x5f7   :  { %v3933_v3 = vsel %vm3909_vm11, %v13132_v33, %v9032_v25  ;;  %v9119_v33 = vld [vmem:[%s19719_s2 + $0xdb8] sm:$0xff]  ;;  %v9130_v25 = vld [vmem:[%s19719_s2 + $0xe10] sm:$0xff] }
 0x5f8   :  { %v13265_v32 = vpop.eup %13264  ;;  %v3934_v34 = vsel %vm3910_vm10, %v13133_v63, %v9033_v29  ;;  %v4302_v63 = vld [vmem:[#allocation2 + $0xc8] sm:$0xff]  ;;  %v12316_v61 = vpack.c.bf16 %v9122_v49, %v9119_v33  ;;  %v9152_v49 = vld [vmem:[%s19719_s2 + $0xec0] sm:$0xff]  ;;  %v9215_v15 = vld [vmem:[%s19719_s2 + $0x10b8] sm:$0xff] }
 0x5f9   :  { %v13267_v27 = vpop.eup %13266  ;;  %4043 = vmatprep.mubr.f32.mxu0 %v3934_v34  ;;  %v9035_v40 = vadd.f32 -1.0, %v13265_v32  ;;  %v9133_v29 = vld [vmem:[%s19719_s2 + $0xe28] sm:$0xff] }
 0x5fa   :  { %v13269_v11 = vpop.eup %13268  ;;  %4044 = vmatmul.mubr.f32.vlgmr.msra.gmra.mrb[62].mxu0 %v3933_v3  ;;  %v9036_v59 = vadd.f32 -1.0, %v13267_v27  ;;  %v9141_v32 = vld [vmem:[%s19719_s2 + $0xe68] sm:$0xff]  ;;  %v12326_v27 = vpack.c.bf16 %v9133_v29, %v9130_v25  ;;  %v9170_v25 = vld [vmem:[%s19719_s2 + $0xf50] sm:$0xff]  ;;  %v17172_v29 = vld [vmem:[#allocation2 + $0xe0] sm:$0xff] }
 0x5fb   :  { %12308 = vmatpush3.bf16.msra.mxu0 %v12307_v53  ;;  %11147 = vmatprep.mubr.msk.f32.mxu0 %vm13356_vm5, %v13354_v14  ;;  %v9037_v17 = vadd.f32 -1.0, %v13269_v11  ;;  %v3936_v1 = vsel %vm3912_vm13, %v16910_v44, %v9035_v40  ;;  %v12392_v44 = vpack.c.bf16 %v9177_v56, %v9174_v13  ;;  %v9138_v53 = vld [vmem:[%s19719_s2 + $0xe50] sm:$0xff]  ;;  %v9137_v34 = vld [vmem:[%s19719_s2 + $0xe48] sm:$0xff]  ;;  %v9144_v11 = vld [vmem:[%s19719_s2 + $0xe80] sm:$0xff] }
 0x5fc   :  { %v3937_v4 = vsel %vm3913_vm12, %v13135_v7, %v9036_v59  ;;  %12309 = vmatprep.subr.bf16.mxu0 %v13353_v50  ;;  %v9183_v7 = vld [vmem:[%s19719_s2 + $0xfb8] sm:$0xff]  ;;  %v12402_v3 = vpack.c.bf16 %v9141_v32, %v9138_v53  ;;  %v12328_v40 = vpack.c.bf16 %v9140_v62, %v9137_v34  ;;  %v12404_v59 = vpack.c.bf16 %v9195_v45, %v9192_v37  ;;  %v9149_v33 = vld [vmem:[%s19719_s2 + $0xea8] sm:$0xff]  ;;  %v9204_v13 = vld [vmem:[%s19719_s2 + $0x1060] sm:$0xff] }
 0x5fd   :  { %4224 = vmatprep.mubr.f32.mxu1 %v3937_v4  ;;  %v3938_v36 = vsel %vm3914_vm14, %v16828_v35, %v9037_v17  ;;  %v9180_v35 = vld [vmem:[%s19719_s2 + $0xfa0] sm:$0xff]  ;;  %v9201_v4 = vld [vmem:[%s19719_s2 + $0x1048] sm:$0xff]  ;;  %v12406_v57 = vpack.c.bf16 %v9147_v46, %v9144_v11  ;;  %v9207_v56 = vld [vmem:[%s19719_s2 + $0x1078] sm:$0xff]  ;;  %v12346_v53 = vpack.c.bf16 %v9163_v48, %v9160_v39 }
 0x5fe   :  { %4225 = vmatmul.mubr.f32.vlgmr.msra.gmra.mrb[100].mxu1 %v3936_v1  ;;  %v12396_v18 = vpack.c.bf16 %v9183_v7, %v9180_v35  ;;  %v9145_v17 = vld [vmem:[%s19719_s2 + $0xe88] sm:$0xff]  ;;  %v9150_v1 = vld [vmem:[%s19719_s2 + $0xeb0] sm:$0xff]  ;;  %v12412_v28 = vpack.c.bf16 %v9207_v56, %v9204_v13  ;;  %v9176_v37 = vld [vmem:[%s19719_s2 + $0xf80] sm:$0xff] }
 0x5ff   :  { %12311 = vmatpush3.bf16.msra.mxu0 %v12310_v52  ;;  %12387 = vmatpush3.bf16.msra.mxu1 %v12386_v43  ;;  %v9146_v52 = vld [vmem:[%s19719_s2 + $0xe90] sm:$0xff]  ;;  %v9169_v32 = vld [vmem:[%s19719_s2 + $0xf48] sm:$0xff]  ;;  %v17187_v45 = vld [vmem:[#allocation2 + $0xd8] sm:$0xff] }
 0x600   :  { %4652 = vmatprep.mubr.f32.mxu1 %v4302_v63  ;;  %12313 = vmatprep.subr.bf16.mxu0 %v12312_v54  ;;  %v9198_v43 = vld [vmem:[%s19719_s2 + $0x1030] sm:$0xff]  ;;  %v12330_v54 = vpack.c.bf16 %v9139_v41, %v9136_v23  ;;  %v12332_v55 = vpack.c.bf16 %v9146_v52, %v9143_v51  ;;  %v9173_v62 = vld [vmem:[%s19719_s2 + $0xf68] sm:$0xff]  ;;  %v9172_v23 = vld [vmem:[%s19719_s2 + $0xf60] sm:$0xff] }
 0x601   :  { %12389 = vmatprep.subr.bf16.mxu1 %v12388_v5  ;;  %v12408_v5 = vpack.c.bf16 %v9201_v4, %v9198_v43  ;;  %v9175_v41 = vld [vmem:[%s19719_s2 + $0xf78] sm:$0xff]  ;;  %v17206_v46 = vld [vmem:[#allocation2 + $0xe8] sm:$0xff]  ;;  %v9178_v43 = vld [vmem:[%s19719_s2 + $0xf90] sm:$0xff] }
 0x602   :  { %11148 = vmatmul.mubr.msk.f32.vlgmr.msra.gmra.mrb[64].mxu0 %vm939_vm1, %v3938_v36  ;;  %v9159_v36 = vld [vmem:[%s19719_s2 + $0xef8] sm:$0xff]  ;;  %v12354_v51 = vpack.c.bf16 %v9175_v41, %v9172_v23  ;;  %v9181_v4 = vld [vmem:[%s19719_s2 + $0xfa8] sm:$0xff]  ;;  %v9190_v13 = vld [vmem:[%s19719_s2 + $0xff0] sm:$0xff] }
 0x603   :  { %12315 = vmatpush1.bf16.msra.mxu0 %v12314_v38  ;;  %4498 = vmatprep.mubr.f32.mxu0 %v4302_v63  ;;  %v12334_v63 = vpack.c.bf16 %v9145_v17, %v9142_v0  ;;  %v12410_v38 = vpack.c.bf16 %v9153_v2, %v9150_v1  ;;  %v12414_v7 = vpack.c.bf16 %v9159_v36, %v9156_v30  ;;  %v9179_v11 = vld [vmem:[%s19719_s2 + $0xf98] sm:$0xff]  ;;  %v9184_v17 = vld [vmem:[%s19719_s2 + $0xfc0] sm:$0xff]  ;;  %v9194_v2 = vld [vmem:[%s19719_s2 + $0x1010] sm:$0xff] }
 0x604   :  { %12391 = vmatpush3.bf16.msra.mxu1 %v12390_v10  ;;  %12317 = vmatprep.subr.bf16.mxu0 %v12316_v61  ;;  %v12336_v10 = vpack.c.bf16 %v9152_v49, %v9149_v33  ;;  %v9148_v61 = vld [vmem:[%s19719_s2 + $0xea0] sm:$0xff]  ;;  %v9187_v1 = vld [vmem:[%s19719_s2 + $0xfd8] sm:$0xff]  ;;  %v9193_v56 = vld [vmem:[%s19719_s2 + $0x1008] sm:$0xff] }
 0x605   :  { %12393 = vmatprep.subr.bf16.mxu1 %v12392_v44  ;;  %v9155_v44 = vld [vmem:[%s19719_s2 + $0xed8] sm:$0xff]  ;;  %v12338_v35 = vpack.c.bf16 %v9151_v24, %v9148_v61  ;;  %v12362_v33 = vpack.c.bf16 %v9187_v1, %v9184_v17  ;;  %v9196_v24 = vld [vmem:[%s19719_s2 + $0x1020] sm:$0xff]  ;;  %v9206_v36 = vld [vmem:[%s19719_s2 + $0x1070] sm:$0xff] }
 0x606   :  { %v9199_v30 = vld [vmem:[%s19719_s2 + $0x1038] sm:$0xff]  ;;  %v9217_v39 = vld [vmem:[%s19719_s2 + $0x10c8] sm:$0xff]  ;;  %v9232_v41 = vld [vmem:[%s19722_s4 + $0x910] sm:$0xff] }
 0x607   :  { %12319 = vmatpush1.bf16.msra.mxu0 %v12318_v8  ;;  %v12340_v8 = vpack.c.bf16 %v9158_v60, %v9155_v44  ;;  %v12370_v44 = vpack.c.bf16 %v9199_v30, %v9196_v24  ;;  %v9284_v23 = vld [vmem:[%s19722_s4 + $0xaa8] sm:$0xff]  ;;  %v9236_v1 = vld [vmem:[%s19722_s4 + $0x930] sm:$0xff] }
 0x608   :  { %12395 = vmatpush3.bf16.msra.mxu1 %v12394_v12  ;;  %12321 = vmatprep.subr.bf16.mxu0 %v12320_v19  ;;  %v9154_v12 = vld [vmem:[%s19719_s2 + $0xed0] sm:$0xff]  ;;  %v9157_v19 = vld [vmem:[%s19719_s2 + $0xee8] sm:$0xff] }
 0x609   :  { %12397 = vmatprep.subr.bf16.mxu1 %v12396_v18  ;;  %v9216_v18 = vld [vmem:[%s19719_s2 + $0x10c0] sm:$0xff]  ;;  %v12342_v21 = vpack.c.bf16 %v9157_v19, %v9154_v12  ;;  %v9240_v30 = vld [vmem:[%s19722_s4 + $0x950] sm:$0xff] }
 0x60a   :  { %v9208_v19 = vld [vmem:[%s19719_s2 + $0x1080] sm:$0xff] }
 0x60b   :  { %12323 = vmatpush1.bf16.msra.mxu0 %v12322_v26  ;;  %v12420_v26 = vpack.c.bf16 %v9219_v58, %v9216_v18  ;;  %v12380_v58 = vpack.c.bf16 %v9218_v20, %v9215_v15  ;;  %v9244_v20 = vld [vmem:[%s19722_s4 + $0x970] sm:$0xff] }
 0x60c   :  { %12399 = vmatpush3.bf16.msra.mxu1 %v12398_v47  ;;  %12325 = vmatprep.subr.bf16.mxu0 %v12324_v22  ;;  %v17163_v47 = vld [vmem:[#allocation2 + $0xc0] sm:$0xff]  ;;  %v9167_v22 = vld [vmem:[%s19719_s2 + $0xf38] sm:$0xff] }
 0x60d   :  { %12401 = vmatprep.subr.bf16.mxu1 %v12400_v31  ;;  %v9166_v31 = vld [vmem:[%s19719_s2 + $0xf30] sm:$0xff]  ;;  %v12348_v34 = vpack.c.bf16 %v9170_v25, %v9167_v22  ;;  %v9265_v25 = vld [vmem:[%s19722_s4 + $0xa18] sm:$0xff] }
 0x60e   :  { %v9264_v22 = vld [vmem:[%s19722_s4 + $0xa10] sm:$0xff] }
 0x60f   :  { %12327 = vmatpush1.bf16.msra.mxu0 %v12326_v27  ;;  %v17190_v27 = vld [vmem:[#allocation2 + $0xd0] sm:$0xff] }
 0x610   :  { %12403 = vmatpush3.bf16.msra.mxu1 %v12402_v3  ;;  %12329 = vmatprep.subr.bf16.mxu0 %v12328_v40  ;;  %v12350_v3 = vpack.c.bf16 %v9169_v32, %v9166_v31  ;;  %v12352_v40 = vpack.c.bf16 %v9176_v37, %v9173_v62  ;;  %v9247_v31 = vld [vmem:[%s19722_s4 + $0x988] sm:$0xff]  ;;  %v9230_v32 = vld [vmem:[%s19722_s4 + $0x900] sm:$0xff]  ;;  %v9248_v37 = vld [vmem:[%s19722_s4 + $0x990] sm:$0xff] }
 0x611   :  { %12405 = vmatprep.subr.bf16.mxu1 %v12404_v59  ;;  %v9182_v59 = vld [vmem:[%s19719_s2 + $0xfb0] sm:$0xff]  ;;  %v9231_v62 = vld [vmem:[%s19722_s4 + $0x908] sm:$0xff] }
 0x612   :  { %v12356_v52 = vpack.c.bf16 %v9182_v59, %v9179_v11  ;;  %v9233_v59 = vld [vmem:[%s19722_s4 + $0x918] sm:$0xff] }
 0x613   :  { %12331 = vmatpush1.bf16.msra.mxu0 %v12330_v54  ;;  %v9185_v54 = vld [vmem:[%s19719_s2 + $0xfc8] sm:$0xff] }
 0x614   :  { %12407 = vmatpush3.bf16.msra.mxu1 %v12406_v57  ;;  %12333 = vmatprep.subr.bf16.mxu0 %v12332_v55  ;;  %v9188_v57 = vld [vmem:[%s19719_s2 + $0xfe0] sm:$0xff]  ;;  %v12358_v55 = vpack.c.bf16 %v9181_v4, %v9178_v43 }
 0x615   :  { %12409 = vmatprep.subr.bf16.mxu1 %v12408_v5  ;;  %v12360_v0 = vpack.c.bf16 %v9188_v57, %v9185_v54  ;;  %v9191_v5 = vld [vmem:[%s19719_s2 + $0xff8] sm:$0xff]  ;;  %v9234_v4 = vld [vmem:[%s19722_s4 + $0x920] sm:$0xff]  ;;  %v9235_v54 = vld [vmem:[%s19722_s4 + $0x928] sm:$0xff] }
 0x616   :  { %v12364_v49 = vpack.c.bf16 %v9194_v2, %v9191_v5  ;;  %v12434_v57 = vpack.c.bf16 %v9235_v54, %v9234_v4  ;;  %v9237_v5 = vld [vmem:[%s19722_s4 + $0x938] sm:$0xff]  ;;  %v9285_v4 = vld [vmem:[%s19722_s4 + $0xab0] sm:$0xff] }
 0x617   :  { %12335 = vmatpush1.bf16.msra.mxu0 %v12334_v63  ;;  %v9197_v63 = vld [vmem:[%s19719_s2 + $0x1028] sm:$0xff]  ;;  %v12438_v2 = vpack.c.bf16 %v9237_v5, %v9236_v1  ;;  %v9286_v54 = vld [vmem:[%s19722_s4 + $0xab8] sm:$0xff]  ;;  %v9269_v1 = vld [vmem:[%s19722_s4 + $0xa30] sm:$0xff] }
 0x618   :  { %12411 = vmatpush3.bf16.msra.mxu1 %v12410_v38  ;;  %12337 = vmatprep.subr.bf16.mxu0 %v12336_v10  ;;  %v9200_v38 = vld [vmem:[%s19719_s2 + $0x1040] sm:$0xff]  ;;  %v12366_v10 = vpack.c.bf16 %v9193_v56, %v9190_v13  ;;  %v9270_v5 = vld [vmem:[%s19722_s4 + $0xa38] sm:$0xff] }
 0x619   :  { %12413 = vmatprep.subr.bf16.mxu1 %v12412_v28  ;;  %v12368_v61 = vpack.c.bf16 %v9200_v38, %v9197_v63  ;;  %v9203_v28 = vld [vmem:[%s19719_s2 + $0x1058] sm:$0xff]  ;;  %v9238_v56 = vld [vmem:[%s19722_s4 + $0x940] sm:$0xff]  ;;  %v9239_v63 = vld [vmem:[%s19722_s4 + $0x948] sm:$0xff] }
 0x61a   :  { %v12372_v60 = vpack.c.bf16 %v9206_v36, %v9203_v28  ;;  %v12442_v38 = vpack.c.bf16 %v9239_v63, %v9238_v56  ;;  %v9241_v28 = vld [vmem:[%s19722_s4 + $0x958] sm:$0xff]  ;;  %v9271_v63 = vld [vmem:[%s19722_s4 + $0xa40] sm:$0xff] }
 0x61b   :  { %12339 = vmatpush1.bf16.msra.mxu0 %v12338_v35  ;;  %v9209_v35 = vld [vmem:[%s19719_s2 + $0x1088] sm:$0xff]  ;;  %v12446_v36 = vpack.c.bf16 %v9241_v28, %v9240_v30  ;;  %v9273_v28 = vld [vmem:[%s19722_s4 + $0xa50] sm:$0xff] }
 0x61c   :  { %12415 = vmatpush3.bf16.msra.mxu1 %v12414_v7  ;;  %12341 = vmatprep.subr.bf16.mxu0 %v12340_v8  ;;  %v9212_v7 = vld [vmem:[%s19719_s2 + $0x10a0] sm:$0xff]  ;;  %v12374_v8 = vpack.c.bf16 %v9205_v16, %v9202_v42 }
 0x61d   :  { %12417 = vmatprep.subr.bf16.mxu1 %v12416_v9  ;;  %v12376_v12 = vpack.c.bf16 %v9212_v7, %v9209_v35  ;;  %v9242_v16 = vld [vmem:[%s19722_s4 + $0x960] sm:$0xff]  ;;  %v9243_v35 = vld [vmem:[%s19722_s4 + $0x968] sm:$0xff] }
 0x61e   :  { %v12450_v7 = vpack.c.bf16 %v9243_v35, %v9242_v16  ;;  %v9275_v35 = vld [vmem:[%s19722_s4 + $0xa60] sm:$0xff] }
 0x61f   :  { %4653 = vmatmul.mubr.f32.vlgmr.msra.gmra.mrb[102].mxu1 %v17163_v47  ;;  %12343 = vmatpush1.bf16.msra.mxu0 %v12342_v21  ;;  %v9214_v21 = vld [vmem:[%s19719_s2 + $0x10b0] sm:$0xff] }
 0x620   :  { %4657 = vmatprep.mubr.f32.mxu1 %v17172_v29  ;;  %12419 = vmatpush3.bf16.msra.mxu1 %v12416_v9  ;;  %v9211_v9 = vld [vmem:[%s19719_s2 + $0x1098] sm:$0xff]  ;;  %v12382_v48 = vpack.c.bf16 %v9217_v39, %v9214_v21 }
 0x621   :  { %12345 = vmatprep.subr.bf16.mxu0 %v12344_v6  ;;  %12421 = vmatprep.subr.bf16.mxu1 %v12420_v26  ;;  %v12378_v18 = vpack.c.bf16 %v9211_v9, %v9208_v19  ;;  %v9262_v6 = vld [vmem:[%s19722_s4 + $0xa00] sm:$0xff]  ;;  %v9261_v19 = vld [vmem:[%s19722_s4 + $0x9f8] sm:$0xff] }
 0x623   :  { %4658 = vmatmul.mubr.f32.gmra.mrb[104].mxu1 %v17187_v45  ;;  %12347 = vmatpush1.bf16.msra.mxu0 %v12346_v53  ;;  %v9246_v53 = vld [vmem:[%s19722_s4 + $0x980] sm:$0xff] }
 0x624   :  { %12423 = vmatpush3.bf16.msra.mxu1 %v12420_v26  ;;  %11158 = vmatprep.mubr.msk.f32.mxu1 %vm939_vm1, %v17190_v27  ;;  %v9263_v26 = vld [vmem:[%s19722_s4 + $0xa08] sm:$0xff] }
 0x625   :  { %12349 = vmatprep.subr.bf16.mxu0 %v12348_v34  ;;  %v12424_v34 = vpack.c.bf16 %v9247_v31, %v9246_v53 }
 0x627   :  { %11159 = vmatmul.mubr.msk.f32.vlgmr.msra.gmra.mrb[106].mxu1 %vm939_vm1, %v17206_v46  ;;  %12351 = vmatpush1.bf16.msra.mxu0 %v12350_v3 }
 0x628   :  { %12353 = vmatprep.subr.bf16.mxu0 %v12352_v40  ;;  %v9283_v40 = vld [vmem:[%s19722_s4 + $0xaa0] sm:$0xff]  ;;  %12425 = vmatprep.subr.bf16.mxu1 %v12424_v34 }
 0x629   :  { %v12462_v11 = vpack.c.bf16 %v9284_v23, %v9283_v40 }
 0x62b   :  { %12355 = vmatpush1.bf16.msra.mxu0 %v12354_v51  ;;  %v9250_v51 = vld [vmem:[%s19722_s4 + $0x9a0] sm:$0xff] }
 0x62c   :  { %12357 = vmatprep.subr.bf16.mxu0 %v12356_v52  ;;  %v9251_v52 = vld [vmem:[%s19722_s4 + $0x9a8] sm:$0xff] }
 0x62d   :  { %v12432_v43 = vpack.c.bf16 %v9251_v52, %v9250_v51  ;;  %v9267_v52 = vld [vmem:[%s19722_s4 + $0xa20] sm:$0xff] }
 0x62f   :  { %12359 = vmatpush1.bf16.msra.mxu0 %v12358_v55  ;;  %v9252_v55 = vld [vmem:[%s19722_s4 + $0x9b0] sm:$0xff] }
 0x630   :  { %12361 = vmatprep.subr.bf16.mxu0 %v12360_v0  ;;  %v9253_v0 = vld [vmem:[%s19722_s4 + $0x9b8] sm:$0xff] }
 0x631   :  { %v12436_v17 = vpack.c.bf16 %v9253_v0, %v9252_v55 }
 0x633   :  { %12363 = vmatpush1.bf16.msra.mxu0 %v12362_v33  ;;  %v9254_v33 = vld [vmem:[%s19722_s4 + $0x9c0] sm:$0xff] }
 0x634   :  { %12365 = vmatprep.subr.bf16.mxu0 %v12364_v49  ;;  %v9255_v49 = vld [vmem:[%s19722_s4 + $0x9c8] sm:$0xff] }
 0x635   :  { %v12440_v13 = vpack.c.bf16 %v9255_v49, %v9254_v33  ;;  %v9287_v33 = vld [vmem:[%s19722_s4 + $0xac0] sm:$0xff]  ;;  %v9288_v49 = vld [vmem:[%s19722_s4 + $0xac8] sm:$0xff] }
 0x636   :  { %v12470_v56 = vpack.c.bf16 %v9288_v49, %v9287_v33 }
 0x637   :  { %12367 = vmatpush1.bf16.msra.mxu0 %v12366_v10  ;;  %v9256_v10 = vld [vmem:[%s19722_s4 + $0x9d0] sm:$0xff] }
 0x638   :  { %12369 = vmatprep.subr.bf16.mxu0 %v12368_v61  ;;  %v9257_v61 = vld [vmem:[%s19722_s4 + $0x9d8] sm:$0xff] }
 0x639   :  { %v12444_v24 = vpack.c.bf16 %v9257_v61, %v9256_v10  ;;  %v9289_v10 = vld [vmem:[%s19722_s4 + $0xad0] sm:$0xff]  ;;  %v9290_v61 = vld [vmem:[%s19722_s4 + $0xad8] sm:$0xff] }
 0x63a   :  { %v12474_v30 = vpack.c.bf16 %v9290_v61, %v9289_v10 }
 0x63b   :  { %12371 = vmatpush1.bf16.msra.mxu0 %v12370_v44  ;;  %v9258_v44 = vld [vmem:[%s19722_s4 + $0x9e0] sm:$0xff] }
 0x63c   :  { %12373 = vmatprep.subr.bf16.mxu0 %v12372_v60  ;;  %v9259_v60 = vld [vmem:[%s19722_s4 + $0x9e8] sm:$0xff] }
 0x63d   :  { %v12448_v42 = vpack.c.bf16 %v9259_v60, %v9258_v44  ;;  %v9291_v44 = vld [vmem:[%s19722_s4 + $0xae0] sm:$0xff]  ;;  %v9292_v60 = vld [vmem:[%s19722_s4 + $0xae8] sm:$0xff] }
 0x63e   :  { %v12478_v16 = vpack.c.bf16 %v9292_v60, %v9291_v44  ;;  %v9360_v44 = vld [vmem:[%s19719_s2 + $0x12a0] sm:$0xff]  ;;  %v9363_v60 = vld [vmem:[%s19719_s2 + $0x12b8] sm:$0xff] }
 0x63f   :  { %12375 = vmatpush1.bf16.msra.mxu0 %v12374_v8  ;;  %v9260_v8 = vld [vmem:[%s19722_s4 + $0x9f0] sm:$0xff] }
 0x640   :  { %12377 = vmatprep.subr.bf16.mxu0 %v12376_v12  ;;  %v12452_v15 = vpack.c.bf16 %v9261_v19, %v9260_v8  ;;  %v9293_v8 = vld [vmem:[%s19722_s4 + $0xaf0] sm:$0xff] }
 0x642   :  { %4499 = vmatmul.mubr.f32.vlgmr.msra.gmra.mrb[66].mxu0 %v17163_v47  ;;  %v12457_v47 = vpack.c.bf16 %v9263_v26, %v9262_v6 }
 0x643   :  { %4504 = vmatprep.mubr.f32.mxu0 %v17172_v29  ;;  %12379 = vmatpush1.bf16.msra.mxu0 %v12378_v18  ;;  %v12460_v29 = vpack.c.bf16 %v9265_v25, %v9264_v22  ;;  %v9245_v18 = vld [vmem:[%s19722_s4 + $0x978] sm:$0xff] }
 0x644   :  { %12381 = vmatprep.subr.bf16.mxu0 %v12380_v58  ;;  %v12454_v58 = vpack.c.bf16 %v9245_v18, %v9244_v20  ;;  %v9277_v20 = vld [vmem:[%s19722_s4 + $0xa70] sm:$0xff]  ;;  %v9278_v18 = vld [vmem:[%s19722_s4 + $0xa78] sm:$0xff] }
 0x646   :  { %4505 = vmatmul.mubr.f32.gmra.mrb[68].mxu0 %v17187_v45  ;;  %v9249_v45 = vld [vmem:[%s19722_s4 + $0x998] sm:$0xff] }
 0x647   :  { %12383 = vmatpush1.bf16.msra.mxu0 %v12382_v48  ;;  %4575 = vmatprep.mubr.f32.mxu0 %v13354_v14  ;;  %v12428_v3 = vpack.c.bf16 %v9249_v45, %v9248_v37 }
 0x648   :  { %12456 = vmatprep.subr.bf16.mxu0 %v13353_v50 }
 0x64a   :  { %9220 = vmatmul.mubr.msk.f32.vlgmr.msra.gmra.mrb[66].mxu0 %vm939_vm1, %v17190_v27  ;;  %v12426_v27 = vpack.c.bf16 %v9231_v62, %v9230_v32 }
 0x64b   :  { %4581 = vmatprep.mubr.f32.mxu0 %v13354_v14  ;;  %12458 = vmatpush3.bf16.msra.mxu0 %v12457_v47 }
 0x64c   :  { %12459 = vmatprep.subr.bf16.mxu0 %v13353_v50  ;;  %12427 = vmatpush3.bf16.msra.mxu1 %v12426_v27  ;;  %v4421_v27 = vpop.permute.xlu0 %4420 }
 0x64d   :  { %12429 = vmatprep.subr.bf16.mxu1 %v12428_v3  ;;  %v17418_v3 = vpop.permute.xlu1 %4425 }
 0x64e   :  { %9221 = vmatmul.mubr.msk.f32.gmra.mrb[68].mxu0 %vm939_vm1, %v17206_v46  ;;  %v12430_v46 = vpack.c.bf16 %v9233_v59, %v9232_v41 }
 0x64f   :  { %11169 = vmatprep.mubr.msk.f32.mxu0 %vm13356_vm5, %v13354_v14  ;;  %12461 = vmatpush3.bf16.msra.mxu0 %v12460_v29 }
 0x650   :  { %12463 = vmatprep.subr.bf16.mxu0 %v12462_v11  ;;  %12431 = vmatpush3.bf16.msra.mxu1 %v12430_v46 }
 0x651   :  { %12433 = vmatprep.subr.bf16.mxu1 %v12432_v43  ;;  %v9268_v43 = vld [vmem:[%s19722_s4 + $0xa28] sm:$0xff] }
 0x652   :  { %v12464_v0 = vpack.c.bf16 %v9268_v43, %v9267_v52  ;;  %v9357_v52 = vld [vmem:[%s19719_s2 + $0x1288] sm:$0xff] }
 0x654   :  { %12435 = vmatpush3.bf16.msra.mxu1 %v12434_v57 }
 0x655   :  { %12437 = vmatprep.subr.bf16.mxu1 %v12436_v17  ;;  %v12466_v17 = vpack.c.bf16 %v9286_v54, %v9285_v4 }
 0x658   :  { %12439 = vmatpush3.bf16.msra.mxu1 %v12438_v2 }
 0x659   :  { %12441 = vmatprep.subr.bf16.mxu1 %v12440_v13  ;;  %v12468_v13 = vpack.c.bf16 %v9270_v5, %v9269_v1 }
 0x65c   :  { %12443 = vmatpush3.bf16.msra.mxu1 %v12442_v38  ;;  %v9272_v38 = vld [vmem:[%s19722_s4 + $0xa48] sm:$0xff] }
 0x65d   :  { %12445 = vmatprep.subr.bf16.mxu1 %v12444_v24  ;;  %v12472_v24 = vpack.c.bf16 %v9272_v38, %v9271_v63  ;;  %v9309_v63 = vld [vmem:[%s19719_s2 + $0x1108] sm:$0xff] }
 0x660   :  { %12447 = vmatpush3.bf16.msra.mxu1 %v12446_v36  ;;  %v9274_v36 = vld [vmem:[%s19722_s4 + $0xa58] sm:$0xff] }
 0x661   :  { %12449 = vmatprep.subr.bf16.mxu1 %v12448_v42  ;;  %v12476_v42 = vpack.c.bf16 %v9274_v36, %v9273_v28 }
 0x664   :  { %12451 = vmatpush3.bf16.msra.mxu1 %v12450_v7  ;;  %v9276_v7 = vld [vmem:[%s19722_s4 + $0xa68] sm:$0xff] }
 0x665   :  { %12453 = vmatprep.subr.bf16.mxu1 %v12452_v15  ;;  %v12480_v19 = vpack.c.bf16 %v9276_v7, %v9275_v35 }
 0x668   :  { %12455 = vmatpush3.bf16.msra.mxu1 %v12454_v58 }
 0x669   :  { %12494 = vmatprep.subr.bf16.mxu1 %v13353_v50 }
 0x6a9   :  { %v4115_v12 = vpop.f32.mrb[98].mxu1 }
 0x6aa   :  { %v11138_v9 = vpop.f32.mrb[99].mxu1 }
 0x6cd   :  { %v10425_v21 = vpop.f32.mrb[62].mxu0 }
 0x6ce   :  { %v10426_v39 = vpop.f32.mrb[63].mxu0 }
 0x6cf   :  { %v10427_v48 = vadd.f32 %v10426_v39, %v10425_v21  ;;  %v9295_v39 = vld [vmem:[%s19722_s4 + $0xb00] sm:$0xff] }
 0x6d1   :  { %v4116_v6 = vadd.f32 %v10427_v48, %v4115_v12  ;;  %v10465_v26 = vpop.f32.mrb[100].mxu1  ;;  %v9294_v12 = vld [vmem:[%s19722_s4 + $0xaf8] sm:$0xff]  ;;  %v9296_v48 = vld [vmem:[%s19722_s4 + $0xb08] sm:$0xff] }
 0x6d2   :  { %v10466_v47 = vpop.f32.mrb[101].mxu1  ;;  %v12482_v15 = vpack.c.bf16 %v9294_v12, %v9293_v8  ;;  %v9304_v8 = vld [vmem:[%s19719_s2 + $0x10e0] sm:$0xff]  ;;  %v9307_v12 = vld [vmem:[%s19719_s2 + $0x10f8] sm:$0xff] }
 0x6d3   :  { %4119 = vst.msk [vmem:[#allocation3 + $0x30] sm:$0xff] %vm1631_vm9, %v4116_v6  ;;  %v10467_v22 = vadd.f32 %v10466_v47, %v10465_v26  ;;  %v12484_v47 = vpack.c.bf16 %v9278_v18, %v9277_v20  ;;  %v12576_v20 = vpack.c.bf16 %v9363_v60, %v9360_v44  ;;  %v9315_v18 = vld [vmem:[%s19719_s2 + $0x1138] sm:$0xff] }
 0x6d4   :  { %v9339_v44 = vld [vmem:[%s19719_s2 + $0x11f8] sm:$0xff] }
 0x6d5   :  { %v4296_v25 = vpop.f32.mrb[64].mxu0  ;;  %v9335_v60 = vld [vmem:[%s19719_s2 + $0x11d8] sm:$0xff] }
 0x6d6   :  { %v4297_v29 = vadd.f32 %v10467_v22, %v4296_v25  ;;  %v11149_v53 = vpop.f32.mrb[65].mxu0 }
 0x6d7   :  { %v9279_v53 = vld [vmem:[%s19722_s4 + $0xa80] sm:$0xff] }
 0x6d8   :  { %4300 = vst.msk [vmem:[#allocation3 + $0x38] sm:$0xff] %vm1631_vm9, %v4297_v29  ;;  %v12486_v29 = vpack.c.bf16 %v9296_v48, %v9295_v39  ;;  %v9366_v39 = vld [vmem:[%s19719_s2 + $0x12d0] sm:$0xff]  ;;  %v9369_v48 = vld [vmem:[%s19719_s2 + $0x12e8] sm:$0xff] }
 0x6f2   :  { %v10505_v31 = vpop.f32.mrb[102].mxu1 }
 0x6f3   :  { %v10506_v32 = vpop.f32.mrb[103].mxu1 }
 0x6f4   :  { %v10507_v34 = vadd.f32 %v10506_v32, %v10505_v31  ;;  %v9280_v31 = vld [vmem:[%s19722_s4 + $0xa88] sm:$0xff] }
 0x6f6   :  { %v10508_v62 = vpop.f32.mrb[104].mxu1  ;;  %v4655_v41 = vadd.f32 %v10507_v34, %v4421_v27 }
 0x6f7   :  { %v10509_v37 = vpop.f32.mrb[105].mxu1 }
 0x6f8   :  { %v10510_v45 = vadd.f32 %v10509_v37, %v10508_v62  ;;  %v9297_v62 = vld [vmem:[%s19722_s4 + $0xb10] sm:$0xff]  ;;  %v9298_v37 = vld [vmem:[%s19722_s4 + $0xb18] sm:$0xff] }
 0x6fa   :  { %v4660_v40 = vadd.f32 %v10510_v45, %v17418_v3  ;;  %v11160_v23 = vpop.f32.mrb[106].mxu1 }
 0x6fb   :  { %v4729_v11 = vpop.f32.mrb[107].mxu1 }
 0x6fc   :  { %v17421_v59 = vadd.f32 %v11160_v23, %v4660_v40  ;;  %v4730_v46 = vadd.f32 %v4729_v11, %v4655_v41  ;;  %v12488_v23 = vpack.c.bf16 %v9280_v31, %v9279_v53  ;;  %v12490_v11 = vpack.c.bf16 %v9298_v37, %v9297_v62  ;;  %v9318_v53 = vld [vmem:[%s19719_s2 + $0x1150] sm:$0xff]  ;;  %v9317_v62 = vld [vmem:[%s19719_s2 + $0x1148] sm:$0xff]  ;;  %v9320_v37 = vld [vmem:[%s19719_s2 + $0x1160] sm:$0xff] }
 0x6fe   :  { %v4748_v51 = vmul.f32 1.442695, %v4730_v46  ;;  %vm4740_vm15 = vcmp.gt.f32.partialorder %v4730_v46, 0.0  ;;  %vm4743_vm6 = vcmp.gt.f32.partialorder %v17421_v59, 0.0 }
 0x700   :  { %13270 = vpow2.f32 %v4748_v51  ;;  %v9282_v51 = vld [vmem:[%s19722_s4 + $0xa98] sm:$0xff] }
 0x70a   :  { %v13271_v57 = vpop.eup %13270 }
 0x70b   :  { %v9226_v55 = vadd.f32 -1.0, %v13271_v57  ;;  %v9299_v57 = vld [vmem:[%s19722_s4 + $0xb20] sm:$0xff] }
 0x70d   :  { %v4764_v2 = vsel %vm4740_vm15, %v4730_v46, %v9226_v55  ;;  %v9281_v46 = vld [vmem:[%s19722_s4 + $0xa90] sm:$0xff]  ;;  %v9300_v55 = vld [vmem:[%s19722_s4 + $0xb28] sm:$0xff] }
 0x70e   :  { %11170 = vmatmul.mubr.msk.f32.vlgmr.msra.gmra.mrb[70].mxu0 %vm939_vm1, %v4764_v2  ;;  %v12492_v43 = vpack.c.bf16 %v9282_v51, %v9281_v46  ;;  %v12495_v5 = vpack.c.bf16 %v9300_v55, %v9299_v57  ;;  %v9301_v2 = vld [vmem:[%s19722_s4 + $0xb30] sm:$0xff]  ;;  %v9324_v46 = vld [vmem:[%s19719_s2 + $0x1180] sm:$0xff] }
 0x70f   :  { %12465 = vmatpush3.bf16.msra.mxu0 %v12464_v0 }
 0x710   :  { %12467 = vmatprep.subr.bf16.mxu0 %v12466_v17 }
 0x713   :  { %12469 = vmatpush3.bf16.msra.mxu0 %v12468_v13  ;;  %v9302_v13 = vld [vmem:[%s19722_s4 + $0xb38] sm:$0xff] }
 0x714   :  { %12471 = vmatprep.subr.bf16.mxu0 %v12470_v56  ;;  %v9306_v56 = vld [vmem:[%s19719_s2 + $0x10f0] sm:$0xff] }
 0x717   :  { %12473 = vmatpush3.bf16.msra.mxu0 %v12472_v24  ;;  %v9305_v24 = vld [vmem:[%s19719_s2 + $0x10e8] sm:$0xff] }
 0x718   :  { %12475 = vmatprep.subr.bf16.mxu0 %v12474_v30  ;;  %v9308_v30 = vld [vmem:[%s19719_s2 + $0x1100] sm:$0xff] }
 0x719   :  { %v12500_v7 = vpack.c.bf16 %v9308_v30, %v9305_v24  ;;  %v9328_v24 = vld [vmem:[%s19719_s2 + $0x11a0] sm:$0xff]  ;;  %v9331_v30 = vld [vmem:[%s19719_s2 + $0x11b8] sm:$0xff] }
 0x71b   :  { %12477 = vmatpush3.bf16.msra.mxu0 %v12476_v42  ;;  %v12498_v42 = vpack.c.bf16 %v9302_v13, %v9301_v2  ;;  %v9332_v13 = vld [vmem:[%s19719_s2 + $0x11c0] sm:$0xff] }
 0x71c   :  { %12479 = vmatprep.subr.bf16.mxu0 %v12478_v16  ;;  %v12574_v16 = vpack.c.bf16 %v9309_v63, %v9306_v56  ;;  %v9384_v56 = vld [vmem:[%s19719_s2 + $0x1360] sm:$0xff]  ;;  %v9387_v63 = vld [vmem:[%s19719_s2 + $0x1378] sm:$0xff] }
 0x71d   :  { %v4577_v9 = vpop.f32.mrb[66].mxu0 }
 0x71e   :  { %v13136_v58 = vadd.f32 %v4577_v9, %v4421_v27  ;;  %v4579_v21 = vpop.f32.mrb[67].mxu0 }
 0x71f   :  { %v13137_v6 = vadd.f32 %v4579_v21, %v4421_v27  ;;  %12481 = vmatpush3.bf16.msra.mxu0 %v12480_v19  ;;  %v4754_v27 = vmul.f32 1.442695, %v17421_v59  ;;  %v9312_v19 = vld [vmem:[%s19719_s2 + $0x1120] sm:$0xff]  ;;  %v9314_v21 = vld [vmem:[%s19719_s2 + $0x1130] sm:$0xff] }
 0x720   :  { %v4744_v26 = vmul.f32 1.442695, %v13136_v58  ;;  %12483 = vmatprep.subr.bf16.mxu0 %v12482_v15  ;;  %vm4738_vm2 = vcmp.gt.f32.partialorder %v13136_v58, 0.0 }
 0x721   :  { %v4746_v22 = vmul.f32 1.442695, %v13137_v6  ;;  %v4583_v25 = vpop.f32.mrb[68].mxu0  ;;  %vm4739_vm0 = vcmp.gt.f32.partialorder %v13137_v6, 0.0 }
 0x722   :  { %13272 = vpow2.f32 %v4744_v26  ;;  %v17503_v32 = vadd.f32 %v4583_v25, %v17418_v3  ;;  %v4585_v34 = vpop.f32.mrb[69].mxu0  ;;  %v12502_v26 = vpack.c.bf16 %v9307_v12, %v9304_v8  ;;  %v9310_v25 = vld [vmem:[%s19719_s2 + $0x1110] sm:$0xff] }
 0x723   :  { %13274 = vpow2.f32 %v4746_v22  ;;  %v13139_v45 = vadd.f32 %v4585_v34, %v17418_v3  ;;  %12485 = vmatpush3.bf16.msra.mxu0 %v12484_v47  ;;  %v9354_v3 = vld [vmem:[%s19719_s2 + $0x1270] sm:$0xff]  ;;  %v12578_v47 = vpack.c.bf16 %v9315_v18, %v9312_v19  ;;  %v9321_v34 = vld [vmem:[%s19719_s2 + $0x1168] sm:$0xff] }
 0x724   :  { %v4750_v40 = vmul.f32 1.442695, %v17503_v32  ;;  %12487 = vmatprep.subr.bf16.mxu0 %v12486_v29  ;;  %v12572_v4 = vpack.c.bf16 %v9357_v52, %v9354_v3  ;;  %vm4741_vm4 = vcmp.gt.f32.partialorder %v17503_v32, 0.0  ;;  %v9313_v29 = vld [vmem:[%s19719_s2 + $0x1128] sm:$0xff]  ;;  %v9327_v3 = vld [vmem:[%s19719_s2 + $0x1198] sm:$0xff]  ;;  %v9334_v19 = vld [vmem:[%s19719_s2 + $0x11d0] sm:$0xff] }
 0x725   :  { %v4752_v41 = vmul.f32 1.442695, %v13139_v45  ;;  %vm4742_vm3 = vcmp.gt.f32.partialorder %v13139_v45, 0.0  ;;  %v9323_v52 = vld [vmem:[%s19719_s2 + $0x1178] sm:$0xff]  ;;  %v12586_v55 = vpack.c.bf16 %v9327_v3, %v9324_v46  ;;  %v9345_v18 = vld [vmem:[%s19719_s2 + $0x1228] sm:$0xff]  ;;  %v9356_v46 = vld [vmem:[%s19719_s2 + $0x1280] sm:$0xff] }
 0x726   :  { %13276 = vpow2.f32 %v4750_v40  ;;  %v12582_v40 = vpack.c.bf16 %v9321_v34, %v9318_v53  ;;  %v9350_v34 = vld [vmem:[%s19719_s2 + $0x1250] sm:$0xff]  ;;  %v9411_v3 = vld [vmem:[%s19719_s2 + $0x1438] sm:$0xff] }
 0x727   :  { %13278 = vpow2.f32 %v4752_v41  ;;  %12489 = vmatpush3.bf16.msra.mxu0 %v12488_v23  ;;  %v12508_v23 = vpack.c.bf16 %v9320_v37, %v9317_v62  ;;  %v9316_v41 = vld [vmem:[%s19719_s2 + $0x1140] sm:$0xff]  ;;  %v9402_v62 = vld [vmem:[%s19719_s2 + $0x13f0] sm:$0xff]  ;;  %v9405_v37 = vld [vmem:[%s19719_s2 + $0x1408] sm:$0xff] }
 0x728   :  { %13280 = vpow2.f32 %v4754_v27  ;;  %12491 = vmatprep.subr.bf16.mxu0 %v12490_v11  ;;  %v12506_v27 = vpack.c.bf16 %v9313_v29, %v9310_v25  ;;  %v9319_v11 = vld [vmem:[%s19719_s2 + $0x1158] sm:$0xff]  ;;  %v9348_v29 = vld [vmem:[%s19719_s2 + $0x1240] sm:$0xff] }
 0x729   :  { %v12510_v57 = vpack.c.bf16 %v9319_v11, %v9316_v41  ;;  %v9343_v25 = vld [vmem:[%s19719_s2 + $0x1218] sm:$0xff]  ;;  %v12604_v41 = vpack.c.bf16 %v9405_v37, %v9402_v62  ;;  %v9353_v11 = vld [vmem:[%s19719_s2 + $0x1268] sm:$0xff]  ;;  %v9394_v62 = vld [vmem:[%s19719_s2 + $0x13b0] sm:$0xff] }
 0x72a   :  { %v9397_v37 = vld [vmem:[%s19719_s2 + $0x13c8] sm:$0xff] }
 0x72b   :  { %12493 = vmatpush3.bf16.msra.mxu0 %v12492_v43  ;;  %v9326_v43 = vld [vmem:[%s19719_s2 + $0x1190] sm:$0xff] }
 0x72c   :  { %v13273_v54 = vpop.eup %13272  ;;  %12573 = vmatprep.subr.bf16.mxu0 %v12572_v4  ;;  %v9378_v4 = vld [vmem:[%s19719_s2 + $0x1330] sm:$0xff] }
 0x72d   :  { %v13275_v0 = vpop.eup %13274  ;;  %v9224_v17 = vadd.f32 -1.0, %v13273_v54  ;;  %v9381_v54 = vld [vmem:[%s19719_s2 + $0x1348] sm:$0xff] }
 0x72e   :  { %v9225_v1 = vadd.f32 -1.0, %v13275_v0  ;;  %v12512_v0 = vpack.c.bf16 %v9326_v43, %v9323_v52  ;;  %v12588_v2 = vpack.c.bf16 %v9381_v54, %v9378_v4  ;;  %v9352_v43 = vld [vmem:[%s19719_s2 + $0x1260] sm:$0xff]  ;;  %v9355_v4 = vld [vmem:[%s19719_s2 + $0x1278] sm:$0xff]  ;;  %v12532_v54 = vpack.c.bf16 %v9356_v46, %v9353_v11  ;;  %v9410_v46 = vld [vmem:[%s19719_s2 + $0x1430] sm:$0xff] }
 0x72f   :  { %v4762_v10 = vsel %vm4738_vm2, %v13136_v58, %v9224_v17  ;;  %v9311_v58 = vld [vmem:[%s19719_s2 + $0x1118] sm:$0xff]  ;;  %v9322_v17 = vld [vmem:[%s19719_s2 + $0x1170] sm:$0xff] }
 0x730   :  { %v13277_v33 = vpop.eup %13276  ;;  %v4763_v49 = vsel %vm4739_vm0, %v13137_v6, %v9225_v1  ;;  %v5131_v6 = vld [vmem:[#allocation2 + $0xf8] sm:$0xff]  ;;  %v12504_v22 = vpack.c.bf16 %v9314_v21, %v9311_v58  ;;  %v9325_v1 = vld [vmem:[%s19719_s2 + $0x1188] sm:$0xff]  ;;  %v9344_v21 = vld [vmem:[%s19719_s2 + $0x1220] sm:$0xff] }
 0x731   :  { %v13279_v38 = vpop.eup %13278  ;;  %4872 = vmatprep.mubr.f32.mxu1 %v4763_v49  ;;  %v9227_v61 = vadd.f32 -1.0, %v13277_v33  ;;  %v9333_v33 = vld [vmem:[%s19719_s2 + $0x11c8] sm:$0xff]  ;;  %v9407_v11 = vld [vmem:[%s19719_s2 + $0x1418] sm:$0xff] }
 0x732   :  { %v13281_v28 = vpop.eup %13280  ;;  %4873 = vmatmul.mubr.f32.vlgmr.msra.gmra.mrb[108].mxu1 %v4762_v10  ;;  %v9228_v36 = vadd.f32 -1.0, %v13279_v38  ;;  %v9329_v49 = vld [vmem:[%s19719_s2 + $0x11a8] sm:$0xff]  ;;  %v12514_v38 = vpack.c.bf16 %v9325_v1, %v9322_v17  ;;  %v9362_v17 = vld [vmem:[%s19719_s2 + $0x12b0] sm:$0xff] }
 0x733   :  { %12496 = vmatpush3.bf16.msra.mxu1 %v12495_v5  ;;  %11180 = vmatprep.mubr.msk.f32.mxu1 %vm13356_vm5, %v13354_v14  ;;  %v9229_v9 = vadd.f32 -1.0, %v13281_v28  ;;  %v4765_v15 = vsel %vm4741_vm4, %v17503_v32, %v9227_v61  ;;  %v12580_v32 = vpack.c.bf16 %v9369_v48, %v9366_v39  ;;  %v9330_v5 = vld [vmem:[%s19719_s2 + $0x11b0] sm:$0xff]  ;;  %v12516_v61 = vpack.c.bf16 %v9332_v13, %v9329_v49  ;;  %v9336_v28 = vld [vmem:[%s19719_s2 + $0x11e0] sm:$0xff]  ;;  %v9341_v58 = vld [vmem:[%s19719_s2 + $0x1208] sm:$0xff] }
 0x734   :  { %v4766_v35 = vsel %vm4742_vm3, %v13139_v45, %v9228_v36  ;;  %12497 = vmatprep.subr.bf16.mxu1 %v13353_v50  ;;  %v9375_v45 = vld [vmem:[%s19719_s2 + $0x1318] sm:$0xff]  ;;  %v12590_v10 = vpack.c.bf16 %v9333_v33, %v9330_v5  ;;  %v12592_v36 = vpack.c.bf16 %v9387_v63, %v9384_v56  ;;  %v12594_v8 = vpack.c.bf16 %v9339_v44, %v9336_v28  ;;  %v9396_v39 = vld [vmem:[%s19719_s2 + $0x13c0] sm:$0xff]  ;;  %v17765_v1 = vld [vmem:[#allocation2 + $0x110] sm:$0xff] }
 0x735   :  { %5053 = vmatprep.mubr.f32.mxu0 %v4766_v35  ;;  %v4767_v31 = vsel %vm4743_vm6, %v17421_v59, %v9229_v9  ;;  %v9372_v59 = vld [vmem:[%s19719_s2 + $0x1300] sm:$0xff]  ;;  %v9393_v35 = vld [vmem:[%s19719_s2 + $0x13a8] sm:$0xff]  ;;  %v9399_v48 = vld [vmem:[%s19719_s2 + $0x13d8] sm:$0xff]  ;;  %v12534_v5 = vpack.c.bf16 %v9355_v4, %v9352_v43 }
 0x736   :  { %5054 = vmatmul.mubr.f32.vlgmr.msra.gmra.mrb[72].mxu0 %v4765_v15  ;;  %v12584_v51 = vpack.c.bf16 %v9375_v45, %v9372_v59  ;;  %v9337_v9 = vld [vmem:[%s19719_s2 + $0x11e8] sm:$0xff]  ;;  %v9342_v15 = vld [vmem:[%s19719_s2 + $0x1210] sm:$0xff]  ;;  %v12600_v53 = vpack.c.bf16 %v9399_v48, %v9396_v39  ;;  %v9368_v56 = vld [vmem:[%s19719_s2 + $0x12e0] sm:$0xff] }
 0x737   :  { %12499 = vmatpush3.bf16.msra.mxu1 %v12498_v42  ;;  %12575 = vmatpush3.bf16.msra.mxu0 %v12574_v16  ;;  %v9338_v42 = vld [vmem:[%s19719_s2 + $0x11f0] sm:$0xff]  ;;  %v9361_v33 = vld [vmem:[%s19719_s2 + $0x12a8] sm:$0xff]  ;;  %v9371_v28 = vld [vmem:[%s19719_s2 + $0x12f8] sm:$0xff] }
 0x738   :  { %5481 = vmatprep.mubr.f32.mxu0 %v5131_v6  ;;  %12501 = vmatprep.subr.bf16.mxu1 %v12500_v7  ;;  %v9390_v16 = vld [vmem:[%s19719_s2 + $0x1390] sm:$0xff]  ;;  %v12518_v7 = vpack.c.bf16 %v9331_v30, %v9328_v24  ;;  %v12520_v12 = vpack.c.bf16 %v9338_v42, %v9335_v60  ;;  %v9365_v13 = vld [vmem:[%s19719_s2 + $0x12c8] sm:$0xff]  ;;  %v9364_v24 = vld [vmem:[%s19719_s2 + $0x12c0] sm:$0xff] }
 0x739   :  { %12577 = vmatprep.subr.bf16.mxu0 %v12576_v20  ;;  %v12596_v20 = vpack.c.bf16 %v9393_v35, %v9390_v16  ;;  %v17780_v63 = vld [vmem:[#allocation2 + $0x108] sm:$0xff]  ;;  %v9367_v30 = vld [vmem:[%s19719_s2 + $0x12d8] sm:$0xff]  ;;  %v9370_v16 = vld [vmem:[%s19719_s2 + $0x12f0] sm:$0xff] }
 0x73a   :  { %11181 = vmatmul.mubr.msk.f32.vlgmr.msra.gmra.mrb[110].mxu1 %vm939_vm1, %v4767_v31  ;;  %v9351_v31 = vld [vmem:[%s19719_s2 + $0x1258] sm:$0xff]  ;;  %v12542_v60 = vpack.c.bf16 %v9367_v30, %v9364_v24  ;;  %v9373_v35 = vld [vmem:[%s19719_s2 + $0x1308] sm:$0xff]  ;;  %v9382_v39 = vld [vmem:[%s19719_s2 + $0x1350] sm:$0xff] }
 0x73b   :  { %12503 = vmatpush1.bf16.msra.mxu1 %v12502_v26  ;;  %5327 = vmatprep.mubr.f32.mxu1 %v5131_v6  ;;  %v12522_v6 = vpack.c.bf16 %v9337_v9, %v9334_v19  ;;  %v12598_v26 = vpack.c.bf16 %v9345_v18, %v9342_v15  ;;  %v12602_v45 = vpack.c.bf16 %v9351_v31, %v9348_v29  ;;  %v17799_v44 = vld [vmem:[#allocation2 + $0x118] sm:$0xff]  ;;  %v9376_v9 = vld [vmem:[%s19719_s2 + $0x1320] sm:$0xff]  ;;  %v9386_v18 = vld [vmem:[%s19719_s2 + $0x1370] sm:$0xff] }
 0x73c   :  { %12579 = vmatpush3.bf16.msra.mxu0 %v12578_v47  ;;  %12505 = vmatprep.subr.bf16.mxu1 %v12504_v22  ;;  %v12524_v47 = vpack.c.bf16 %v9344_v21, %v9341_v58  ;;  %v9340_v22 = vld [vmem:[%s19719_s2 + $0x1200] sm:$0xff]  ;;  %v9379_v15 = vld [vmem:[%s19719_s2 + $0x1338] sm:$0xff]  ;;  %v9385_v48 = vld [vmem:[%s19719_s2 + $0x1368] sm:$0xff] }
 0x73d   :  { %12581 = vmatprep.subr.bf16.mxu0 %v12580_v32  ;;  %v9347_v32 = vld [vmem:[%s19719_s2 + $0x1238] sm:$0xff]  ;;  %v12526_v59 = vpack.c.bf16 %v9343_v25, %v9340_v22  ;;  %v12550_v58 = vpack.c.bf16 %v9379_v15, %v9376_v9  ;;  %v9388_v25 = vld [vmem:[%s19719_s2 + $0x1380] sm:$0xff]  ;;  %v9398_v31 = vld [vmem:[%s19719_s2 + $0x13d0] sm:$0xff] }
 0x73e   :  { %v9391_v29 = vld [vmem:[%s19719_s2 + $0x1398] sm:$0xff]  ;;  %v9409_v43 = vld [vmem:[%s19719_s2 + $0x1428] sm:$0xff]  ;;  %v9424_v30 = vld [vmem:[%s19722_s4 + $0xb50] sm:$0xff] }
 0x73f   :  { %12507 = vmatpush1.bf16.msra.mxu1 %v12506_v27  ;;  %v12528_v27 = vpack.c.bf16 %v9350_v34, %v9347_v32  ;;  %v12558_v32 = vpack.c.bf16 %v9391_v29, %v9388_v25  ;;  %v9476_v24 = vld [vmem:[%s19722_s4 + $0xce8] sm:$0xff]  ;;  %v9428_v15 = vld [vmem:[%s19722_s4 + $0xb70] sm:$0xff] }
 0x740   :  { %12583 = vmatpush3.bf16.msra.mxu0 %v12582_v40  ;;  %12509 = vmatprep.subr.bf16.mxu1 %v12508_v23  ;;  %v9346_v40 = vld [vmem:[%s19719_s2 + $0x1230] sm:$0xff]  ;;  %v9349_v23 = vld [vmem:[%s19719_s2 + $0x1248] sm:$0xff] }
 0x741   :  { %12585 = vmatprep.subr.bf16.mxu0 %v12584_v51  ;;  %v9408_v51 = vld [vmem:[%s19719_s2 + $0x1420] sm:$0xff]  ;;  %v12530_v52 = vpack.c.bf16 %v9349_v23, %v9346_v40  ;;  %v9432_v29 = vld [vmem:[%s19722_s4 + $0xb90] sm:$0xff] }
 0x742   :  { %v9400_v23 = vld [vmem:[%s19719_s2 + $0x13e0] sm:$0xff] }
 0x743   :  { %12511 = vmatpush1.bf16.msra.mxu1 %v12510_v57  ;;  %v12608_v57 = vpack.c.bf16 %v9411_v3, %v9408_v51  ;;  %v12568_v3 = vpack.c.bf16 %v9410_v46, %v9407_v11  ;;  %v9436_v46 = vld [vmem:[%s19722_s4 + $0xbb0] sm:$0xff] }
 0x744   :  { %12587 = vmatpush3.bf16.msra.mxu0 %v12586_v55  ;;  %12513 = vmatprep.subr.bf16.mxu1 %v12512_v0  ;;  %v17756_v55 = vld [vmem:[#allocation2 + $0xf0] sm:$0xff]  ;;  %v9359_v0 = vld [vmem:[%s19719_s2 + $0x1298] sm:$0xff] }
 0x745   :  { %12589 = vmatprep.subr.bf16.mxu0 %v12588_v2  ;;  %v9358_v2 = vld [vmem:[%s19719_s2 + $0x1290] sm:$0xff]  ;;  %v12536_v49 = vpack.c.bf16 %v9362_v17, %v9359_v0  ;;  %v9457_v17 = vld [vmem:[%s19722_s4 + $0xc58] sm:$0xff] }
 0x746   :  { %v9456_v0 = vld [vmem:[%s19722_s4 + $0xc50] sm:$0xff] }
 0x747   :  { %12515 = vmatpush1.bf16.msra.mxu1 %v12514_v38  ;;  %v17783_v38 = vld [vmem:[#allocation2 + $0x100] sm:$0xff] }
 0x748   :  { %12591 = vmatpush3.bf16.msra.mxu0 %v12590_v10  ;;  %12517 = vmatprep.subr.bf16.mxu1 %v12516_v61  ;;  %v12538_v10 = vpack.c.bf16 %v9361_v33, %v9358_v2  ;;  %v12540_v61 = vpack.c.bf16 %v9368_v56, %v9365_v13  ;;  %v9439_v2 = vld [vmem:[%s19722_s4 + $0xbc8] sm:$0xff]  ;;  %v9422_v33 = vld [vmem:[%s19722_s4 + $0xb40] sm:$0xff]  ;;  %v9440_v56 = vld [vmem:[%s19722_s4 + $0xbd0] sm:$0xff] }
 0x749   :  { %12593 = vmatprep.subr.bf16.mxu0 %v12592_v36  ;;  %v9374_v36 = vld [vmem:[%s19719_s2 + $0x1310] sm:$0xff]  ;;  %v9423_v13 = vld [vmem:[%s19722_s4 + $0xb48] sm:$0xff] }
 0x74a   :  { %v12544_v42 = vpack.c.bf16 %v9374_v36, %v9371_v28  ;;  %v9425_v36 = vld [vmem:[%s19722_s4 + $0xb58] sm:$0xff] }
 0x74b   :  { %12519 = vmatpush1.bf16.msra.mxu1 %v12518_v7  ;;  %v9377_v7 = vld [vmem:[%s19719_s2 + $0x1328] sm:$0xff] }
 0x74c   :  { %12595 = vmatpush3.bf16.msra.mxu0 %v12594_v8  ;;  %12521 = vmatprep.subr.bf16.mxu1 %v12520_v12  ;;  %v9380_v8 = vld [vmem:[%s19719_s2 + $0x1340] sm:$0xff]  ;;  %v12546_v12 = vpack.c.bf16 %v9373_v35, %v9370_v16 }
 0x74d   :  { %12597 = vmatprep.subr.bf16.mxu0 %v12596_v20  ;;  %v12548_v19 = vpack.c.bf16 %v9380_v8, %v9377_v7  ;;  %v9383_v20 = vld [vmem:[%s19719_s2 + $0x1358] sm:$0xff]  ;;  %v9426_v35 = vld [vmem:[%s19722_s4 + $0xb60] sm:$0xff]  ;;  %v9427_v7 = vld [vmem:[%s19722_s4 + $0xb68] sm:$0xff] }
 0x74e   :  { %v12552_v21 = vpack.c.bf16 %v9386_v18, %v9383_v20  ;;  %v12622_v8 = vpack.c.bf16 %v9427_v7, %v9426_v35  ;;  %v9429_v20 = vld [vmem:[%s19722_s4 + $0xb78] sm:$0xff]  ;;  %v9477_v35 = vld [vmem:[%s19722_s4 + $0xcf0] sm:$0xff] }
 0x74f   :  { %12523 = vmatpush1.bf16.msra.mxu1 %v12522_v6  ;;  %v9389_v6 = vld [vmem:[%s19719_s2 + $0x1388] sm:$0xff]  ;;  %v12626_v18 = vpack.c.bf16 %v9429_v20, %v9428_v15  ;;  %v9478_v7 = vld [vmem:[%s19722_s4 + $0xcf8] sm:$0xff]  ;;  %v9461_v15 = vld [vmem:[%s19722_s4 + $0xc70] sm:$0xff] }
 0x750   :  { %12599 = vmatpush3.bf16.msra.mxu0 %v12598_v26  ;;  %12525 = vmatprep.subr.bf16.mxu1 %v12524_v47  ;;  %v9392_v26 = vld [vmem:[%s19719_s2 + $0x13a0] sm:$0xff]  ;;  %v12554_v47 = vpack.c.bf16 %v9385_v48, %v9382_v39  ;;  %v9462_v20 = vld [vmem:[%s19722_s4 + $0xc78] sm:$0xff] }
 0x751   :  { %12601 = vmatprep.subr.bf16.mxu0 %v12600_v53  ;;  %v12556_v22 = vpack.c.bf16 %v9392_v26, %v9389_v6  ;;  %v9395_v53 = vld [vmem:[%s19719_s2 + $0x13b8] sm:$0xff]  ;;  %v9430_v48 = vld [vmem:[%s19722_s4 + $0xb80] sm:$0xff]  ;;  %v9431_v6 = vld [vmem:[%s19722_s4 + $0xb88] sm:$0xff] }
 0x752   :  { %v12560_v34 = vpack.c.bf16 %v9398_v31, %v9395_v53  ;;  %v12630_v26 = vpack.c.bf16 %v9431_v6, %v9430_v48  ;;  %v9433_v53 = vld [vmem:[%s19722_s4 + $0xb98] sm:$0xff]  ;;  %v9463_v6 = vld [vmem:[%s19722_s4 + $0xc80] sm:$0xff] }
 0x753   :  { %12527 = vmatpush1.bf16.msra.mxu1 %v12526_v59  ;;  %v9401_v59 = vld [vmem:[%s19719_s2 + $0x13e8] sm:$0xff]  ;;  %v12634_v31 = vpack.c.bf16 %v9433_v53, %v9432_v29  ;;  %v9465_v53 = vld [vmem:[%s19722_s4 + $0xc90] sm:$0xff] }
 0x754   :  { %12603 = vmatpush3.bf16.msra.mxu0 %v12602_v45  ;;  %12529 = vmatprep.subr.bf16.mxu1 %v12528_v27  ;;  %v9404_v45 = vld [vmem:[%s19719_s2 + $0x1400] sm:$0xff]  ;;  %v12562_v27 = vpack.c.bf16 %v9397_v37, %v9394_v62 }
 0x755   :  { %12605 = vmatprep.subr.bf16.mxu0 %v12604_v41  ;;  %v12564_v40 = vpack.c.bf16 %v9404_v45, %v9401_v59  ;;  %v9434_v37 = vld [vmem:[%s19722_s4 + $0xba0] sm:$0xff]  ;;  %v9435_v59 = vld [vmem:[%s19722_s4 + $0xba8] sm:$0xff] }
 0x756   :  { %v12638_v45 = vpack.c.bf16 %v9435_v59, %v9434_v37  ;;  %v9467_v59 = vld [vmem:[%s19722_s4 + $0xca0] sm:$0xff] }
 0x757   :  { %5482 = vmatmul.mubr.f32.vlgmr.msra.gmra.mrb[74].mxu0 %v17756_v55  ;;  %12531 = vmatpush1.bf16.msra.mxu1 %v12530_v52  ;;  %v9406_v52 = vld [vmem:[%s19719_s2 + $0x1410] sm:$0xff] }
 0x758   :  { %5486 = vmatprep.mubr.f32.mxu0 %v17765_v1  ;;  %12607 = vmatpush3.bf16.msra.mxu0 %v12604_v41  ;;  %v9403_v41 = vld [vmem:[%s19719_s2 + $0x13f8] sm:$0xff]  ;;  %v12570_v4 = vpack.c.bf16 %v9409_v43, %v9406_v52 }
 0x759   :  { %12533 = vmatprep.subr.bf16.mxu1 %v12532_v54  ;;  %12609 = vmatprep.subr.bf16.mxu0 %v12608_v57  ;;  %v12566_v51 = vpack.c.bf16 %v9403_v41, %v9400_v23  ;;  %v9454_v54 = vld [vmem:[%s19722_s4 + $0xc40] sm:$0xff]  ;;  %v9453_v23 = vld [vmem:[%s19722_s4 + $0xc38] sm:$0xff] }
 0x75b   :  { %5487 = vmatmul.mubr.f32.gmra.mrb[76].mxu0 %v17780_v63  ;;  %12535 = vmatpush1.bf16.msra.mxu1 %v12534_v5  ;;  %v9438_v5 = vld [vmem:[%s19722_s4 + $0xbc0] sm:$0xff] }
 0x75c   :  { %12611 = vmatpush3.bf16.msra.mxu0 %v12608_v57  ;;  %11191 = vmatprep.mubr.msk.f32.mxu0 %vm939_vm1, %v17783_v38  ;;  %v9455_v57 = vld [vmem:[%s19722_s4 + $0xc48] sm:$0xff] }
 0x75d   :  { %12537 = vmatprep.subr.bf16.mxu1 %v12536_v49  ;;  %v12612_v49 = vpack.c.bf16 %v9439_v2, %v9438_v5 }
 0x75f   :  { %11192 = vmatmul.mubr.msk.f32.vlgmr.msra.gmra.mrb[78].mxu0 %vm939_vm1, %v17799_v44  ;;  %12539 = vmatpush1.bf16.msra.mxu1 %v12538_v10 }
 0x760   :  { %12541 = vmatprep.subr.bf16.mxu1 %v12540_v61  ;;  %v9475_v61 = vld [vmem:[%s19722_s4 + $0xce0] sm:$0xff]  ;;  %12613 = vmatprep.subr.bf16.mxu0 %v12612_v49 }
 0x761   :  { %v12650_v28 = vpack.c.bf16 %v9476_v24, %v9475_v61 }
 0x763   :  { %12543 = vmatpush1.bf16.msra.mxu1 %v12542_v60  ;;  %v9442_v60 = vld [vmem:[%s19722_s4 + $0xbe0] sm:$0xff] }
 0x764   :  { %12545 = vmatprep.subr.bf16.mxu1 %v12544_v42  ;;  %v9443_v42 = vld [vmem:[%s19722_s4 + $0xbe8] sm:$0xff] }
 0x765   :  { %v12620_v16 = vpack.c.bf16 %v9443_v42, %v9442_v60  ;;  %v9459_v42 = vld [vmem:[%s19722_s4 + $0xc60] sm:$0xff] }
 0x767   :  { %12547 = vmatpush1.bf16.msra.mxu1 %v12546_v12  ;;  %v9444_v12 = vld [vmem:[%s19722_s4 + $0xbf0] sm:$0xff] }
 0x768   :  { %12549 = vmatprep.subr.bf16.mxu1 %v12548_v19  ;;  %v9445_v19 = vld [vmem:[%s19722_s4 + $0xbf8] sm:$0xff] }
 0x769   :  { %v12624_v9 = vpack.c.bf16 %v9445_v19, %v9444_v12 }
 0x76b   :  { %12551 = vmatpush1.bf16.msra.mxu1 %v12550_v58  ;;  %v9446_v58 = vld [vmem:[%s19722_s4 + $0xc00] sm:$0xff] }
 0x76c   :  { %12553 = vmatprep.subr.bf16.mxu1 %v12552_v21  ;;  %v9447_v21 = vld [vmem:[%s19722_s4 + $0xc08] sm:$0xff] }
 0x76d   :  { %v12628_v39 = vpack.c.bf16 %v9447_v21, %v9446_v58  ;;  %v9479_v58 = vld [vmem:[%s19722_s4 + $0xd00] sm:$0xff]  ;;  %v9480_v21 = vld [vmem:[%s19722_s4 + $0xd08] sm:$0xff] }
 0x76e   :  { %v12658_v48 = vpack.c.bf16 %v9480_v21, %v9479_v58 }
 0x76f   :  { %12555 = vmatpush1.bf16.msra.mxu1 %v12554_v47  ;;  %v9448_v47 = vld [vmem:[%s19722_s4 + $0xc10] sm:$0xff] }
 0x770   :  { %12557 = vmatprep.subr.bf16.mxu1 %v12556_v22  ;;  %v9449_v22 = vld [vmem:[%s19722_s4 + $0xc18] sm:$0xff] }
 0x771   :  { %v12632_v25 = vpack.c.bf16 %v9449_v22, %v9448_v47  ;;  %v9481_v47 = vld [vmem:[%s19722_s4 + $0xd10] sm:$0xff]  ;;  %v9482_v22 = vld [vmem:[%s19722_s4 + $0xd18] sm:$0xff] }
 0x772   :  { %v12662_v29 = vpack.c.bf16 %v9482_v22, %v9481_v47 }
 0x773   :  { %12559 = vmatpush1.bf16.msra.mxu1 %v12558_v32  ;;  %v9450_v32 = vld [vmem:[%s19722_s4 + $0xc20] sm:$0xff] }
 0x774   :  { %12561 = vmatprep.subr.bf16.mxu1 %v12560_v34  ;;  %v9451_v34 = vld [vmem:[%s19722_s4 + $0xc28] sm:$0xff] }
 0x775   :  { %v12636_v62 = vpack.c.bf16 %v9451_v34, %v9450_v32  ;;  %v9483_v32 = vld [vmem:[%s19722_s4 + $0xd20] sm:$0xff]  ;;  %v9484_v34 = vld [vmem:[%s19722_s4 + $0xd28] sm:$0xff] }
 0x776   :  { %v12666_v37 = vpack.c.bf16 %v9484_v34, %v9483_v32  ;;  %v9552_v32 = vld [vmem:[%s19719_s2 + $0x1600] sm:$0xff]  ;;  %v9555_v34 = vld [vmem:[%s19719_s2 + $0x1618] sm:$0xff] }
 0x777   :  { %12563 = vmatpush1.bf16.msra.mxu1 %v12562_v27  ;;  %v9452_v27 = vld [vmem:[%s19722_s4 + $0xc30] sm:$0xff] }
 0x778   :  { %12565 = vmatprep.subr.bf16.mxu1 %v12564_v40  ;;  %v12640_v11 = vpack.c.bf16 %v9453_v23, %v9452_v27  ;;  %v9485_v27 = vld [vmem:[%s19722_s4 + $0xd30] sm:$0xff] }
 0x77a   :  { %5328 = vmatmul.mubr.f32.vlgmr.msra.gmra.mrb[112].mxu1 %v17756_v55  ;;  %v12645_v55 = vpack.c.bf16 %v9455_v57, %v9454_v54 }
 0x77b   :  { %5333 = vmatprep.mubr.f32.mxu1 %v17765_v1  ;;  %12567 = vmatpush1.bf16.msra.mxu1 %v12566_v51  ;;  %v12648_v1 = vpack.c.bf16 %v9457_v17, %v9456_v0  ;;  %v9437_v51 = vld [vmem:[%s19722_s4 + $0xbb8] sm:$0xff] }
 0x77c   :  { %12569 = vmatprep.subr.bf16.mxu1 %v12568_v3  ;;  %v12642_v3 = vpack.c.bf16 %v9437_v51, %v9436_v46  ;;  %v9469_v46 = vld [vmem:[%s19722_s4 + $0xcb0] sm:$0xff]  ;;  %v9470_v51 = vld [vmem:[%s19722_s4 + $0xcb8] sm:$0xff] }
 0x77e   :  { %5334 = vmatmul.mubr.f32.gmra.mrb[114].mxu1 %v17780_v63  ;;  %v9441_v63 = vld [vmem:[%s19722_s4 + $0xbd8] sm:$0xff] }
 0x77f   :  { %12571 = vmatpush1.bf16.msra.mxu1 %v12570_v4  ;;  %5404 = vmatprep.mubr.f32.mxu1 %v13354_v14  ;;  %v12616_v10 = vpack.c.bf16 %v9441_v63, %v9440_v56 }
 0x780   :  { %12644 = vmatprep.subr.bf16.mxu1 %v13353_v50 }
 0x782   :  { %9412 = vmatmul.mubr.msk.f32.vlgmr.msra.gmra.mrb[112].mxu1 %vm939_vm1, %v17783_v38  ;;  %v12614_v38 = vpack.c.bf16 %v9423_v13, %v9422_v33 }
 0x783   :  { %5410 = vmatprep.mubr.f32.mxu1 %v13354_v14  ;;  %12646 = vmatpush3.bf16.msra.mxu1 %v12645_v55 }
 0x784   :  { %12647 = vmatprep.subr.bf16.mxu1 %v13353_v50  ;;  %12615 = vmatpush3.bf16.msra.mxu0 %v12614_v38  ;;  %v5250_v38 = vpop.permute.xlu0 %5249 }
 0x785   :  { %12617 = vmatprep.subr.bf16.mxu0 %v12616_v10  ;;  %v18011_v10 = vpop.permute.xlu1 %5254 }
 0x786   :  { %9413 = vmatmul.mubr.msk.f32.gmra.mrb[114].mxu1 %vm939_vm1, %v17799_v44  ;;  %v12618_v44 = vpack.c.bf16 %v9425_v36, %v9424_v30 }
 0x787   :  { %11202 = vmatprep.mubr.msk.f32.mxu1 %vm13356_vm5, %v13354_v14  ;;  %12649 = vmatpush3.bf16.msra.mxu1 %v12648_v1 }
 0x788   :  { %12651 = vmatprep.subr.bf16.mxu1 %v12650_v28  ;;  %12619 = vmatpush3.bf16.msra.mxu0 %v12618_v44 }
 0x789   :  { %12621 = vmatprep.subr.bf16.mxu0 %v12620_v16  ;;  %v9460_v16 = vld [vmem:[%s19722_s4 + $0xc68] sm:$0xff] }
 0x78a   :  { %v12652_v19 = vpack.c.bf16 %v9460_v16, %v9459_v42  ;;  %v9549_v42 = vld [vmem:[%s19719_s2 + $0x15e8] sm:$0xff] }
 0x78c   :  { %12623 = vmatpush3.bf16.msra.mxu0 %v12622_v8 }
 0x78d   :  { %12625 = vmatprep.subr.bf16.mxu0 %v12624_v9  ;;  %v12654_v9 = vpack.c.bf16 %v9478_v7, %v9477_v35 }
 0x790   :  { %12627 = vmatpush3.bf16.msra.mxu0 %v12626_v18 }
 0x791   :  { %12629 = vmatprep.subr.bf16.mxu0 %v12628_v39  ;;  %v12656_v39 = vpack.c.bf16 %v9462_v20, %v9461_v15 }
 0x794   :  { %12631 = vmatpush3.bf16.msra.mxu0 %v12630_v26  ;;  %v9464_v26 = vld [vmem:[%s19722_s4 + $0xc88] sm:$0xff] }
 0x795   :  { %12633 = vmatprep.subr.bf16.mxu0 %v12632_v25  ;;  %v12660_v25 = vpack.c.bf16 %v9464_v26, %v9463_v6  ;;  %v9501_v6 = vld [vmem:[%s19719_s2 + $0x1468] sm:$0xff] }
 0x798   :  { %12635 = vmatpush3.bf16.msra.mxu0 %v12634_v31  ;;  %v9466_v31 = vld [vmem:[%s19722_s4 + $0xc98] sm:$0xff] }
 0x799   :  { %12637 = vmatprep.subr.bf16.mxu0 %v12636_v62  ;;  %v12664_v62 = vpack.c.bf16 %v9466_v31, %v9465_v53 }
 0x79c   :  { %12639 = vmatpush3.bf16.msra.mxu0 %v12638_v45  ;;  %v9468_v45 = vld [vmem:[%s19722_s4 + $0xca8] sm:$0xff] }
 0x79d   :  { %12641 = vmatprep.subr.bf16.mxu0 %v12640_v11  ;;  %v12668_v23 = vpack.c.bf16 %v9468_v45, %v9467_v59 }
 0x7a0   :  { %12643 = vmatpush3.bf16.msra.mxu0 %v12642_v3 }
 0x7a1   :  { %12682 = vmatprep.subr.bf16.mxu0 %v13353_v50 }
 0x7e1   :  { %v4944_v40 = vpop.f32.mrb[70].mxu0 }
 0x7e2   :  { %v11171_v41 = vpop.f32.mrb[71].mxu0 }
 0x805   :  { %v10549_v52 = vpop.f32.mrb[108].mxu1 }
 0x806   :  { %v10550_v43 = vpop.f32.mrb[109].mxu1 }
 0x807   :  { %v10551_v4 = vadd.f32 %v10550_v43, %v10549_v52  ;;  %v9487_v43 = vld [vmem:[%s19722_s4 + $0xd40] sm:$0xff] }
 0x809   :  { %v4945_v54 = vadd.f32 %v10551_v4, %v4944_v40  ;;  %v10589_v57 = vpop.f32.mrb[72].mxu0  ;;  %v9486_v40 = vld [vmem:[%s19722_s4 + $0xd38] sm:$0xff]  ;;  %v9488_v4 = vld [vmem:[%s19722_s4 + $0xd48] sm:$0xff] }
 0x80a   :  { %v10590_v55 = vpop.f32.mrb[73].mxu0  ;;  %v12670_v11 = vpack.c.bf16 %v9486_v40, %v9485_v27  ;;  %v9496_v27 = vld [vmem:[%s19719_s2 + $0x1440] sm:$0xff]  ;;  %v9499_v40 = vld [vmem:[%s19719_s2 + $0x1458] sm:$0xff] }
 0x80b   :  { %4948 = vst.msk [vmem:[#allocation3 + $0x40] sm:$0xff] %vm1631_vm9, %v4945_v54  ;;  %v10591_v0 = vadd.f32 %v10590_v55, %v10589_v57  ;;  %v12672_v55 = vpack.c.bf16 %v9470_v51, %v9469_v46  ;;  %v12764_v46 = vpack.c.bf16 %v9555_v34, %v9552_v32  ;;  %v9507_v51 = vld [vmem:[%s19719_s2 + $0x1498] sm:$0xff] }
 0x80c   :  { %v9531_v32 = vld [vmem:[%s19719_s2 + $0x1558] sm:$0xff] }
 0x80d   :  { %v5125_v17 = vpop.f32.mrb[110].mxu1  ;;  %v9527_v34 = vld [vmem:[%s19719_s2 + $0x1538] sm:$0xff] }
 0x80e   :  { %v5126_v1 = vadd.f32 %v10591_v0, %v5125_v17  ;;  %v11182_v5 = vpop.f32.mrb[111].mxu1 }
 0x80f   :  { %v9471_v5 = vld [vmem:[%s19722_s4 + $0xcc0] sm:$0xff] }
 0x810   :  { %5129 = vst.msk [vmem:[#allocation3 + $0x48] sm:$0xff] %vm1631_vm9, %v5126_v1  ;;  %v12674_v1 = vpack.c.bf16 %v9488_v4, %v9487_v43  ;;  %v9558_v43 = vld [vmem:[%s19719_s2 + $0x1630] sm:$0xff]  ;;  %v9561_v4 = vld [vmem:[%s19719_s2 + $0x1648] sm:$0xff] }
 0x82a   :  { %v10629_v2 = vpop.f32.mrb[74].mxu0 }
 0x82b   :  { %v10630_v33 = vpop.f32.mrb[75].mxu0 }
 0x82c   :  { %v10631_v49 = vadd.f32 %v10630_v33, %v10629_v2  ;;  %v9472_v2 = vld [vmem:[%s19722_s4 + $0xcc8] sm:$0xff] }
 0x82e   :  { %v10632_v13 = vpop.f32.mrb[76].mxu0  ;;  %v5484_v30 = vadd.f32 %v10631_v49, %v5250_v38 }
 0x82f   :  { %v10633_v56 = vpop.f32.mrb[77].mxu0 }
 0x830   :  { %v10634_v63 = vadd.f32 %v10633_v56, %v10632_v13  ;;  %v9489_v13 = vld [vmem:[%s19722_s4 + $0xd50] sm:$0xff]  ;;  %v9490_v56 = vld [vmem:[%s19722_s4 + $0xd58] sm:$0xff] }
 0x832   :  { %v5489_v61 = vadd.f32 %v10634_v63, %v18011_v10  ;;  %v11193_v24 = vpop.f32.mrb[78].mxu0 }
 0x833   :  { %v5558_v28 = vpop.f32.mrb[79].mxu0 }
 0x834   :  { %v18014_v36 = vadd.f32 %v11193_v24, %v5489_v61  ;;  %v5559_v44 = vadd.f32 %v5558_v28, %v5484_v30  ;;  %v12676_v24 = vpack.c.bf16 %v9472_v2, %v9471_v5  ;;  %v12678_v28 = vpack.c.bf16 %v9490_v56, %v9489_v13  ;;  %v9510_v5 = vld [vmem:[%s19719_s2 + $0x14b0] sm:$0xff]  ;;  %v9509_v13 = vld [vmem:[%s19719_s2 + $0x14a8] sm:$0xff]  ;;  %v9512_v56 = vld [vmem:[%s19719_s2 + $0x14c0] sm:$0xff] }
 0x836   :  { %v5577_v60 = vmul.f32 1.442695, %v5559_v44  ;;  %vm5569_vm7 = vcmp.gt.f32.partialorder %v5559_v44, 0.0  ;;  %vm5572_vm13 = vcmp.gt.f32.partialorder %v18014_v36, 0.0 }
 0x838   :  { %13282 = vpow2.f32 %v5577_v60  ;;  %v9474_v60 = vld [vmem:[%s19722_s4 + $0xcd8] sm:$0xff] }
 0x842   :  { %v13283_v8 = vpop.eup %13282 }
 0x843   :  { %v9418_v12 = vadd.f32 -1.0, %v13283_v8  ;;  %v9491_v8 = vld [vmem:[%s19722_s4 + $0xd60] sm:$0xff] }
 0x845   :  { %v5593_v18 = vsel %vm5569_vm7, %v5559_v44, %v9418_v12  ;;  %v9473_v44 = vld [vmem:[%s19722_s4 + $0xcd0] sm:$0xff]  ;;  %v9492_v12 = vld [vmem:[%s19722_s4 + $0xd68] sm:$0xff] }
 0x846   :  { %11203 = vmatmul.mubr.msk.f32.vlgmr.msra.gmra.mrb[116].mxu1 %vm939_vm1, %v5593_v18  ;;  %v12680_v16 = vpack.c.bf16 %v9474_v60, %v9473_v44  ;;  %v12683_v20 = vpack.c.bf16 %v9492_v12, %v9491_v8  ;;  %v9493_v18 = vld [vmem:[%s19722_s4 + $0xd70] sm:$0xff]  ;;  %v9516_v44 = vld [vmem:[%s19719_s2 + $0x14e0] sm:$0xff] }
 0x847   :  { %12653 = vmatpush3.bf16.msra.mxu1 %v12652_v19 }
 0x848   :  { %12655 = vmatprep.subr.bf16.mxu1 %v12654_v9 }
 0x84b   :  { %12657 = vmatpush3.bf16.msra.mxu1 %v12656_v39  ;;  %v9494_v39 = vld [vmem:[%s19722_s4 + $0xd78] sm:$0xff] }
 0x84c   :  { %12659 = vmatprep.subr.bf16.mxu1 %v12658_v48  ;;  %v9498_v48 = vld [vmem:[%s19719_s2 + $0x1450] sm:$0xff] }
 0x84f   :  { %12661 = vmatpush3.bf16.msra.mxu1 %v12660_v25  ;;  %v9497_v25 = vld [vmem:[%s19719_s2 + $0x1448] sm:$0xff] }
 0x850   :  { %12663 = vmatprep.subr.bf16.mxu1 %v12662_v29  ;;  %v9500_v29 = vld [vmem:[%s19719_s2 + $0x1460] sm:$0xff] }
 0x851   :  { %v12688_v45 = vpack.c.bf16 %v9500_v29, %v9497_v25  ;;  %v9520_v25 = vld [vmem:[%s19719_s2 + $0x1500] sm:$0xff]  ;;  %v9523_v29 = vld [vmem:[%s19719_s2 + $0x1518] sm:$0xff] }
 0x853   :  { %12665 = vmatpush3.bf16.msra.mxu1 %v12664_v62  ;;  %v12686_v62 = vpack.c.bf16 %v9494_v39, %v9493_v18  ;;  %v9524_v39 = vld [vmem:[%s19719_s2 + $0x1520] sm:$0xff] }
 0x854   :  { %12667 = vmatprep.subr.bf16.mxu1 %v12666_v37  ;;  %v12762_v37 = vpack.c.bf16 %v9501_v6, %v9498_v48  ;;  %v9576_v48 = vld [vmem:[%s19719_s2 + $0x16c0] sm:$0xff]  ;;  %v9579_v6 = vld [vmem:[%s19719_s2 + $0x16d8] sm:$0xff] }
 0x855   :  { %v5406_v41 = vpop.f32.mrb[112].mxu1 }
 0x856   :  { %v13140_v3 = vadd.f32 %v5406_v41, %v5250_v38  ;;  %v5408_v52 = vpop.f32.mrb[113].mxu1 }
 0x857   :  { %v13141_v54 = vadd.f32 %v5408_v52, %v5250_v38  ;;  %12669 = vmatpush3.bf16.msra.mxu1 %v12668_v23  ;;  %v5583_v38 = vmul.f32 1.442695, %v18014_v36  ;;  %v9504_v23 = vld [vmem:[%s19719_s2 + $0x1480] sm:$0xff]  ;;  %v9506_v52 = vld [vmem:[%s19719_s2 + $0x1490] sm:$0xff] }
 0x858   :  { %v5573_v57 = vmul.f32 1.442695, %v13140_v3  ;;  %12671 = vmatprep.subr.bf16.mxu1 %v12670_v11  ;;  %vm5567_vm10 = vcmp.gt.f32.partialorder %v13140_v3, 0.0 }
 0x859   :  { %v5575_v0 = vmul.f32 1.442695, %v13141_v54  ;;  %v5412_v17 = vpop.f32.mrb[114].mxu1  ;;  %vm5568_vm8 = vcmp.gt.f32.partialorder %v13141_v54, 0.0 }
 0x85a   :  { %13284 = vpow2.f32 %v5573_v57  ;;  %v18096_v33 = vadd.f32 %v5412_v17, %v18011_v10  ;;  %v5414_v49 = vpop.f32.mrb[115].mxu1  ;;  %v12690_v57 = vpack.c.bf16 %v9499_v40, %v9496_v27  ;;  %v9502_v17 = vld [vmem:[%s19719_s2 + $0x1470] sm:$0xff] }
 0x85b   :  { %13286 = vpow2.f32 %v5575_v0  ;;  %v13143_v63 = vadd.f32 %v5414_v49, %v18011_v10  ;;  %12673 = vmatpush3.bf16.msra.mxu1 %v12672_v55  ;;  %v9546_v10 = vld [vmem:[%s19719_s2 + $0x15d0] sm:$0xff]  ;;  %v12766_v55 = vpack.c.bf16 %v9507_v51, %v9504_v23  ;;  %v9513_v49 = vld [vmem:[%s19719_s2 + $0x14c8] sm:$0xff] }
 0x85c   :  { %v5579_v61 = vmul.f32 1.442695, %v18096_v33  ;;  %12675 = vmatprep.subr.bf16.mxu1 %v12674_v1  ;;  %v12760_v35 = vpack.c.bf16 %v9549_v42, %v9546_v10  ;;  %vm5570_vm12 = vcmp.gt.f32.partialorder %v18096_v33, 0.0  ;;  %v9505_v1 = vld [vmem:[%s19719_s2 + $0x1488] sm:$0xff]  ;;  %v9519_v10 = vld [vmem:[%s19719_s2 + $0x14f8] sm:$0xff]  ;;  %v9526_v23 = vld [vmem:[%s19719_s2 + $0x1530] sm:$0xff] }
 0x85d   :  { %v5581_v30 = vmul.f32 1.442695, %v13143_v63  ;;  %vm5571_vm11 = vcmp.gt.f32.partialorder %v13143_v63, 0.0  ;;  %v9515_v42 = vld [vmem:[%s19719_s2 + $0x14d8] sm:$0xff]  ;;  %v12774_v12 = vpack.c.bf16 %v9519_v10, %v9516_v44  ;;  %v9537_v51 = vld [vmem:[%s19719_s2 + $0x1588] sm:$0xff]  ;;  %v9548_v44 = vld [vmem:[%s19719_s2 + $0x15e0] sm:$0xff] }
 0x85e   :  { %13288 = vpow2.f32 %v5579_v61  ;;  %v12770_v61 = vpack.c.bf16 %v9513_v49, %v9510_v5  ;;  %v9542_v49 = vld [vmem:[%s19719_s2 + $0x15b0] sm:$0xff]  ;;  %v9603_v10 = vld [vmem:[%s19719_s2 + $0x1798] sm:$0xff] }
 0x85f   :  { %13290 = vpow2.f32 %v5581_v30  ;;  %12677 = vmatpush3.bf16.msra.mxu1 %v12676_v24  ;;  %v12696_v24 = vpack.c.bf16 %v9512_v56, %v9509_v13  ;;  %v9508_v30 = vld [vmem:[%s19719_s2 + $0x14a0] sm:$0xff]  ;;  %v9594_v13 = vld [vmem:[%s19719_s2 + $0x1750] sm:$0xff]  ;;  %v9597_v56 = vld [vmem:[%s19719_s2 + $0x1768] sm:$0xff] }
 0x860   :  { %13292 = vpow2.f32 %v5583_v38  ;;  %12679 = vmatprep.subr.bf16.mxu1 %v12678_v28  ;;  %v12694_v38 = vpack.c.bf16 %v9505_v1, %v9502_v17  ;;  %v9511_v28 = vld [vmem:[%s19719_s2 + $0x14b8] sm:$0xff]  ;;  %v9540_v1 = vld [vmem:[%s19719_s2 + $0x15a0] sm:$0xff] }
 0x861   :  { %v12698_v8 = vpack.c.bf16 %v9511_v28, %v9508_v30  ;;  %v9535_v17 = vld [vmem:[%s19719_s2 + $0x1578] sm:$0xff]  ;;  %v12792_v30 = vpack.c.bf16 %v9597_v56, %v9594_v13  ;;  %v9545_v28 = vld [vmem:[%s19719_s2 + $0x15c8] sm:$0xff]  ;;  %v9586_v13 = vld [vmem:[%s19719_s2 + $0x1710] sm:$0xff] }
 0x862   :  { %v9589_v56 = vld [vmem:[%s19719_s2 + $0x1728] sm:$0xff] }
 0x863   :  { %12681 = vmatpush3.bf16.msra.mxu1 %v12680_v16  ;;  %v9518_v16 = vld [vmem:[%s19719_s2 + $0x14f0] sm:$0xff] }
 0x864   :  { %v13285_v7 = vpop.eup %13284  ;;  %12761 = vmatprep.subr.bf16.mxu1 %v12760_v35  ;;  %v9570_v35 = vld [vmem:[%s19719_s2 + $0x1690] sm:$0xff] }
 0x865   :  { %v13287_v19 = vpop.eup %13286  ;;  %v9416_v9 = vadd.f32 -1.0, %v13285_v7  ;;  %v9573_v7 = vld [vmem:[%s19719_s2 + $0x16a8] sm:$0xff] }
 0x866   :  { %v9417_v15 = vadd.f32 -1.0, %v13287_v19  ;;  %v12700_v19 = vpack.c.bf16 %v9518_v16, %v9515_v42  ;;  %v12776_v18 = vpack.c.bf16 %v9573_v7, %v9570_v35  ;;  %v9544_v16 = vld [vmem:[%s19719_s2 + $0x15c0] sm:$0xff]  ;;  %v9547_v35 = vld [vmem:[%s19719_s2 + $0x15d8] sm:$0xff]  ;;  %v12720_v7 = vpack.c.bf16 %v9548_v44, %v9545_v28  ;;  %v9602_v44 = vld [vmem:[%s19719_s2 + $0x1790] sm:$0xff] }
 0x867   :  { %v5591_v47 = vsel %vm5567_vm10, %v13140_v3, %v9416_v9  ;;  %v9503_v3 = vld [vmem:[%s19719_s2 + $0x1478] sm:$0xff]  ;;  %v9514_v9 = vld [vmem:[%s19719_s2 + $0x14d0] sm:$0xff] }
 0x868   :  { %v13289_v58 = vpop.eup %13288  ;;  %v5592_v21 = vsel %vm5568_vm8, %v13141_v54, %v9417_v15  ;;  %v5960_v54 = vld [vmem:[#allocation2 + $0x128] sm:$0xff]  ;;  %v12692_v0 = vpack.c.bf16 %v9506_v52, %v9503_v3  ;;  %v9536_v52 = vld [vmem:[%s19719_s2 + $0x1580] sm:$0xff]  ;;  %v9599_v28 = vld [vmem:[%s19719_s2 + $0x1778] sm:$0xff] }
 0x869   :  { %v13291_v26 = vpop.eup %13290  ;;  %5701 = vmatprep.mubr.f32.mxu0 %v5592_v21  ;;  %v9419_v22 = vadd.f32 -1.0, %v13289_v58  ;;  %v9517_v15 = vld [vmem:[%s19719_s2 + $0x14e8] sm:$0xff] }
 0x86a   :  { %v13293_v53 = vpop.eup %13292  ;;  %5702 = vmatmul.mubr.f32.vlgmr.msra.gmra.mrb[80].mxu0 %v5591_v47  ;;  %v9420_v31 = vadd.f32 -1.0, %v13291_v26  ;;  %v9525_v58 = vld [vmem:[%s19719_s2 + $0x1528] sm:$0xff]  ;;  %v12702_v26 = vpack.c.bf16 %v9517_v15, %v9514_v9  ;;  %v9554_v9 = vld [vmem:[%s19719_s2 + $0x1610] sm:$0xff]  ;;  %v18358_v15 = vld [vmem:[#allocation2 + $0x140] sm:$0xff] }
 0x86b   :  { %12684 = vmatpush3.bf16.msra.mxu0 %v12683_v20  ;;  %11213 = vmatprep.mubr.msk.f32.mxu0 %vm13356_vm5, %v13354_v14  ;;  %v9421_v41 = vadd.f32 -1.0, %v13293_v53  ;;  %v5594_v11 = vsel %vm5570_vm12, %v18096_v33, %v9419_v22  ;;  %v12768_v33 = vpack.c.bf16 %v9561_v4, %v9558_v43  ;;  %v9522_v20 = vld [vmem:[%s19719_s2 + $0x1510] sm:$0xff]  ;;  %v9521_v21 = vld [vmem:[%s19719_s2 + $0x1508] sm:$0xff]  ;;  %v9528_v53 = vld [vmem:[%s19719_s2 + $0x1540] sm:$0xff] }
 0x86c   :  { %v5595_v59 = vsel %vm5571_vm11, %v13143_v63, %v9420_v31  ;;  %12685 = vmatprep.subr.bf16.mxu0 %v13353_v50  ;;  %v9567_v63 = vld [vmem:[%s19719_s2 + $0x1678] sm:$0xff]  ;;  %v12778_v47 = vpack.c.bf16 %v9525_v58, %v9522_v20  ;;  %v12704_v22 = vpack.c.bf16 %v9524_v39, %v9521_v21  ;;  %v12780_v31 = vpack.c.bf16 %v9579_v6, %v9576_v48  ;;  %v9533_v3 = vld [vmem:[%s19719_s2 + $0x1568] sm:$0xff]  ;;  %v9588_v43 = vld [vmem:[%s19719_s2 + $0x1720] sm:$0xff] }
 0x86d   :  { %5882 = vmatprep.mubr.f32.mxu1 %v5595_v59  ;;  %v5596_v2 = vsel %vm5572_vm13, %v18014_v36, %v9421_v41  ;;  %v9564_v36 = vld [vmem:[%s19719_s2 + $0x1660] sm:$0xff]  ;;  %v9585_v59 = vld [vmem:[%s19719_s2 + $0x1708] sm:$0xff]  ;;  %v12782_v27 = vpack.c.bf16 %v9531_v32, %v9528_v53  ;;  %v9591_v4 = vld [vmem:[%s19719_s2 + $0x1738] sm:$0xff]  ;;  %v12722_v20 = vpack.c.bf16 %v9547_v35, %v9544_v16 }
 0x86e   :  { %5883 = vmatmul.mubr.f32.vlgmr.msra.gmra.mrb[118].mxu1 %v5594_v11  ;;  %v12772_v60 = vpack.c.bf16 %v9567_v63, %v9564_v36  ;;  %v9529_v41 = vld [vmem:[%s19719_s2 + $0x1548] sm:$0xff]  ;;  %v9534_v11 = vld [vmem:[%s19719_s2 + $0x1570] sm:$0xff]  ;;  %v12788_v5 = vpack.c.bf16 %v9591_v4, %v9588_v43  ;;  %v9560_v48 = vld [vmem:[%s19719_s2 + $0x1640] sm:$0xff] }
 0x86f   :  { %12687 = vmatpush3.bf16.msra.mxu0 %v12686_v62  ;;  %12763 = vmatpush3.bf16.msra.mxu1 %v12762_v37  ;;  %v9530_v62 = vld [vmem:[%s19719_s2 + $0x1550] sm:$0xff]  ;;  %v9553_v58 = vld [vmem:[%s19719_s2 + $0x1608] sm:$0xff]  ;;  %v18373_v6 = vld [vmem:[#allocation2 + $0x138] sm:$0xff] }
 0x870   :  { %6310 = vmatprep.mubr.f32.mxu1 %v5960_v54  ;;  %12689 = vmatprep.subr.bf16.mxu0 %v12688_v45  ;;  %v9582_v37 = vld [vmem:[%s19719_s2 + $0x16f0] sm:$0xff]  ;;  %v12706_v45 = vpack.c.bf16 %v9523_v29, %v9520_v25  ;;  %v12708_v40 = vpack.c.bf16 %v9530_v62, %v9527_v34  ;;  %v9557_v39 = vld [vmem:[%s19719_s2 + $0x1628] sm:$0xff]  ;;  %v9556_v25 = vld [vmem:[%s19719_s2 + $0x1620] sm:$0xff] }
 0x871   :  { %12765 = vmatprep.subr.bf16.mxu1 %v12764_v46  ;;  %v12784_v46 = vpack.c.bf16 %v9585_v59, %v9582_v37  ;;  %v9559_v29 = vld [vmem:[%s19719_s2 + $0x1638] sm:$0xff]  ;;  %v18392_v32 = vld [vmem:[#allocation2 + $0x148] sm:$0xff]  ;;  %v9562_v37 = vld [vmem:[%s19719_s2 + $0x1650] sm:$0xff] }
 0x872   :  { %11214 = vmatmul.mubr.msk.f32.vlgmr.msra.gmra.mrb[82].mxu0 %vm939_vm1, %v5596_v2  ;;  %v9543_v2 = vld [vmem:[%s19719_s2 + $0x15b8] sm:$0xff]  ;;  %v12730_v34 = vpack.c.bf16 %v9559_v29, %v9556_v25  ;;  %v9565_v59 = vld [vmem:[%s19719_s2 + $0x1668] sm:$0xff]  ;;  %v9574_v43 = vld [vmem:[%s19719_s2 + $0x16b0] sm:$0xff] }
 0x873   :  { %12691 = vmatpush1.bf16.msra.mxu0 %v12690_v57  ;;  %6156 = vmatprep.mubr.f32.mxu0 %v5960_v54  ;;  %v12710_v54 = vpack.c.bf16 %v9529_v41, %v9526_v23  ;;  %v12786_v57 = vpack.c.bf16 %v9537_v51, %v9534_v11  ;;  %v12790_v63 = vpack.c.bf16 %v9543_v2, %v9540_v1  ;;  %v9563_v53 = vld [vmem:[%s19719_s2 + $0x1658] sm:$0xff]  ;;  %v9568_v41 = vld [vmem:[%s19719_s2 + $0x1680] sm:$0xff]  ;;  %v9578_v51 = vld [vmem:[%s19719_s2 + $0x16d0] sm:$0xff] }
 0x874   :  { %12767 = vmatpush3.bf16.msra.mxu1 %v12766_v55  ;;  %12693 = vmatprep.subr.bf16.mxu0 %v12692_v0  ;;  %v12712_v55 = vpack.c.bf16 %v9536_v52, %v9533_v3  ;;  %v9532_v0 = vld [vmem:[%s19719_s2 + $0x1560] sm:$0xff]  ;;  %v9571_v11 = vld [vmem:[%s19719_s2 + $0x1698] sm:$0xff]  ;;  %v9577_v4 = vld [vmem:[%s19719_s2 + $0x16c8] sm:$0xff] }
 0x875   :  { %12769 = vmatprep.subr.bf16.mxu1 %v12768_v33  ;;  %v9539_v33 = vld [vmem:[%s19719_s2 + $0x1598] sm:$0xff]  ;;  %v12714_v36 = vpack.c.bf16 %v9535_v17, %v9532_v0  ;;  %v12738_v3 = vpack.c.bf16 %v9571_v11, %v9568_v41  ;;  %v9580_v17 = vld [vmem:[%s19719_s2 + $0x16e0] sm:$0xff]  ;;  %v9590_v2 = vld [vmem:[%s19719_s2 + $0x1730] sm:$0xff] }
 0x876   :  { %v9583_v1 = vld [vmem:[%s19719_s2 + $0x16f8] sm:$0xff]  ;;  %v9601_v16 = vld [vmem:[%s19719_s2 + $0x1788] sm:$0xff]  ;;  %v9616_v29 = vld [vmem:[%s19722_s4 + $0xd90] sm:$0xff] }
 0x877   :  { %12695 = vmatpush1.bf16.msra.mxu0 %v12694_v38  ;;  %v12716_v38 = vpack.c.bf16 %v9542_v49, %v9539_v33  ;;  %v12746_v33 = vpack.c.bf16 %v9583_v1, %v9580_v17  ;;  %v9668_v25 = vld [vmem:[%s19722_s4 + $0xf28] sm:$0xff]  ;;  %v9620_v11 = vld [vmem:[%s19722_s4 + $0xdb0] sm:$0xff] }
 0x878   :  { %12771 = vmatpush3.bf16.msra.mxu1 %v12770_v61  ;;  %12697 = vmatprep.subr.bf16.mxu0 %v12696_v24  ;;  %v9538_v61 = vld [vmem:[%s19719_s2 + $0x1590] sm:$0xff]  ;;  %v9541_v24 = vld [vmem:[%s19719_s2 + $0x15a8] sm:$0xff] }
 0x879   :  { %12773 = vmatprep.subr.bf16.mxu1 %v12772_v60  ;;  %v9600_v60 = vld [vmem:[%s19719_s2 + $0x1780] sm:$0xff]  ;;  %v12718_v42 = vpack.c.bf16 %v9541_v24, %v9538_v61  ;;  %v9624_v1 = vld [vmem:[%s19722_s4 + $0xdd0] sm:$0xff] }
 0x87a   :  { %v9592_v24 = vld [vmem:[%s19719_s2 + $0x1740] sm:$0xff] }
 0x87b   :  { %12699 = vmatpush1.bf16.msra.mxu0 %v12698_v8  ;;  %v12796_v8 = vpack.c.bf16 %v9603_v10, %v9600_v60  ;;  %v12756_v10 = vpack.c.bf16 %v9602_v44, %v9599_v28  ;;  %v9628_v44 = vld [vmem:[%s19722_s4 + $0xdf0] sm:$0xff] }
 0x87c   :  { %12775 = vmatpush3.bf16.msra.mxu1 %v12774_v12  ;;  %12701 = vmatprep.subr.bf16.mxu0 %v12700_v19  ;;  %v18349_v12 = vld [vmem:[#allocation2 + $0x120] sm:$0xff]  ;;  %v9551_v19 = vld [vmem:[%s19719_s2 + $0x15f8] sm:$0xff] }
 0x87d   :  { %12777 = vmatprep.subr.bf16.mxu1 %v12776_v18  ;;  %v9550_v18 = vld [vmem:[%s19719_s2 + $0x15f0] sm:$0xff]  ;;  %v12724_v21 = vpack.c.bf16 %v9554_v9, %v9551_v19  ;;  %v9649_v9 = vld [vmem:[%s19722_s4 + $0xe98] sm:$0xff] }
 0x87e   :  { %v9648_v19 = vld [vmem:[%s19722_s4 + $0xe90] sm:$0xff] }
 0x87f   :  { %12703 = vmatpush1.bf16.msra.mxu0 %v12702_v26  ;;  %v18376_v26 = vld [vmem:[#allocation2 + $0x130] sm:$0xff] }
 0x880   :  { %12779 = vmatpush3.bf16.msra.mxu1 %v12778_v47  ;;  %12705 = vmatprep.subr.bf16.mxu0 %v12704_v22  ;;  %v12726_v47 = vpack.c.bf16 %v9553_v58, %v9550_v18  ;;  %v12728_v22 = vpack.c.bf16 %v9560_v48, %v9557_v39  ;;  %v9631_v18 = vld [vmem:[%s19722_s4 + $0xe08] sm:$0xff]  ;;  %v9614_v58 = vld [vmem:[%s19722_s4 + $0xd80] sm:$0xff]  ;;  %v9632_v48 = vld [vmem:[%s19722_s4 + $0xe10] sm:$0xff] }
 0x881   :  { %12781 = vmatprep.subr.bf16.mxu1 %v12780_v31  ;;  %v9566_v31 = vld [vmem:[%s19719_s2 + $0x1670] sm:$0xff]  ;;  %v9615_v39 = vld [vmem:[%s19722_s4 + $0xd88] sm:$0xff] }
 0x882   :  { %v12732_v62 = vpack.c.bf16 %v9566_v31, %v9563_v53  ;;  %v9617_v31 = vld [vmem:[%s19722_s4 + $0xd98] sm:$0xff] }
 0x883   :  { %12707 = vmatpush1.bf16.msra.mxu0 %v12706_v45  ;;  %v9569_v45 = vld [vmem:[%s19719_s2 + $0x1688] sm:$0xff] }
 0x884   :  { %12783 = vmatpush3.bf16.msra.mxu1 %v12782_v27  ;;  %12709 = vmatprep.subr.bf16.mxu0 %v12708_v40  ;;  %v9572_v27 = vld [vmem:[%s19719_s2 + $0x16a0] sm:$0xff]  ;;  %v12734_v40 = vpack.c.bf16 %v9565_v59, %v9562_v37 }
 0x885   :  { %12785 = vmatprep.subr.bf16.mxu1 %v12784_v46  ;;  %v12736_v23 = vpack.c.bf16 %v9572_v27, %v9569_v45  ;;  %v9575_v46 = vld [vmem:[%s19719_s2 + $0x16b8] sm:$0xff]  ;;  %v9618_v59 = vld [vmem:[%s19722_s4 + $0xda0] sm:$0xff]  ;;  %v9619_v45 = vld [vmem:[%s19722_s4 + $0xda8] sm:$0xff] }
 0x886   :  { %v12740_v52 = vpack.c.bf16 %v9578_v51, %v9575_v46  ;;  %v12810_v27 = vpack.c.bf16 %v9619_v45, %v9618_v59  ;;  %v9621_v46 = vld [vmem:[%s19722_s4 + $0xdb8] sm:$0xff]  ;;  %v9669_v59 = vld [vmem:[%s19722_s4 + $0xf30] sm:$0xff] }
 0x887   :  { %12711 = vmatpush1.bf16.msra.mxu0 %v12710_v54  ;;  %v9581_v54 = vld [vmem:[%s19719_s2 + $0x16e8] sm:$0xff]  ;;  %v12814_v51 = vpack.c.bf16 %v9621_v46, %v9620_v11  ;;  %v9670_v45 = vld [vmem:[%s19722_s4 + $0xf38] sm:$0xff]  ;;  %v9653_v11 = vld [vmem:[%s19722_s4 + $0xeb0] sm:$0xff] }
 0x888   :  { %12787 = vmatpush3.bf16.msra.mxu1 %v12786_v57  ;;  %12713 = vmatprep.subr.bf16.mxu0 %v12712_v55  ;;  %v9584_v57 = vld [vmem:[%s19719_s2 + $0x1700] sm:$0xff]  ;;  %v12742_v55 = vpack.c.bf16 %v9577_v4, %v9574_v43  ;;  %v9654_v46 = vld [vmem:[%s19722_s4 + $0xeb8] sm:$0xff] }
 0x889   :  { %12789 = vmatprep.subr.bf16.mxu1 %v12788_v5  ;;  %v12744_v0 = vpack.c.bf16 %v9584_v57, %v9581_v54  ;;  %v9587_v5 = vld [vmem:[%s19719_s2 + $0x1718] sm:$0xff]  ;;  %v9622_v4 = vld [vmem:[%s19722_s4 + $0xdc0] sm:$0xff]  ;;  %v9623_v54 = vld [vmem:[%s19722_s4 + $0xdc8] sm:$0xff] }
 0x88a   :  { %v12748_v49 = vpack.c.bf16 %v9590_v2, %v9587_v5  ;;  %v12818_v57 = vpack.c.bf16 %v9623_v54, %v9622_v4  ;;  %v9625_v5 = vld [vmem:[%s19722_s4 + $0xdd8] sm:$0xff]  ;;  %v9655_v54 = vld [vmem:[%s19722_s4 + $0xec0] sm:$0xff] }
 0x88b   :  { %12715 = vmatpush1.bf16.msra.mxu0 %v12714_v36  ;;  %v9593_v36 = vld [vmem:[%s19719_s2 + $0x1748] sm:$0xff]  ;;  %v12822_v2 = vpack.c.bf16 %v9625_v5, %v9624_v1  ;;  %v9657_v5 = vld [vmem:[%s19722_s4 + $0xed0] sm:$0xff] }
 0x88c   :  { %12791 = vmatpush3.bf16.msra.mxu1 %v12790_v63  ;;  %12717 = vmatprep.subr.bf16.mxu0 %v12716_v38  ;;  %v9596_v63 = vld [vmem:[%s19719_s2 + $0x1760] sm:$0xff]  ;;  %v12750_v38 = vpack.c.bf16 %v9589_v56, %v9586_v13 }
 0x88d   :  { %12793 = vmatprep.subr.bf16.mxu1 %v12792_v30  ;;  %v12752_v61 = vpack.c.bf16 %v9596_v63, %v9593_v36  ;;  %v9626_v56 = vld [vmem:[%s19722_s4 + $0xde0] sm:$0xff]  ;;  %v9627_v36 = vld [vmem:[%s19722_s4 + $0xde8] sm:$0xff] }
 0x88e   :  { %v12826_v63 = vpack.c.bf16 %v9627_v36, %v9626_v56  ;;  %v9659_v36 = vld [vmem:[%s19722_s4 + $0xee0] sm:$0xff] }
 0x88f   :  { %6311 = vmatmul.mubr.f32.vlgmr.msra.gmra.mrb[120].mxu1 %v18349_v12  ;;  %12719 = vmatpush1.bf16.msra.mxu0 %v12718_v42  ;;  %v9598_v42 = vld [vmem:[%s19719_s2 + $0x1770] sm:$0xff] }
 0x890   :  { %6315 = vmatprep.mubr.f32.mxu1 %v18358_v15  ;;  %12795 = vmatpush3.bf16.msra.mxu1 %v12792_v30  ;;  %v9595_v30 = vld [vmem:[%s19719_s2 + $0x1758] sm:$0xff]  ;;  %v12758_v35 = vpack.c.bf16 %v9601_v16, %v9598_v42 }
 0x891   :  { %12721 = vmatprep.subr.bf16.mxu0 %v12720_v7  ;;  %12797 = vmatprep.subr.bf16.mxu1 %v12796_v8  ;;  %v12754_v60 = vpack.c.bf16 %v9595_v30, %v9592_v24  ;;  %v9646_v7 = vld [vmem:[%s19722_s4 + $0xe80] sm:$0xff]  ;;  %v9645_v24 = vld [vmem:[%s19722_s4 + $0xe78] sm:$0xff] }
 0x893   :  { %6316 = vmatmul.mubr.f32.gmra.mrb[122].mxu1 %v18373_v6  ;;  %12723 = vmatpush1.bf16.msra.mxu0 %v12722_v20  ;;  %v9630_v20 = vld [vmem:[%s19722_s4 + $0xe00] sm:$0xff] }
 0x894   :  { %12799 = vmatpush3.bf16.msra.mxu1 %v12796_v8  ;;  %11224 = vmatprep.mubr.msk.f32.mxu1 %vm939_vm1, %v18376_v26  ;;  %v9647_v8 = vld [vmem:[%s19722_s4 + $0xe88] sm:$0xff] }
 0x895   :  { %12725 = vmatprep.subr.bf16.mxu0 %v12724_v21  ;;  %v12800_v21 = vpack.c.bf16 %v9631_v18, %v9630_v20 }
 0x897   :  { %11225 = vmatmul.mubr.msk.f32.vlgmr.msra.gmra.mrb[124].mxu1 %vm939_vm1, %v18392_v32  ;;  %12727 = vmatpush1.bf16.msra.mxu0 %v12726_v47 }
 0x898   :  { %12729 = vmatprep.subr.bf16.mxu0 %v12728_v22  ;;  %v9667_v22 = vld [vmem:[%s19722_s4 + $0xf20] sm:$0xff]  ;;  %12801 = vmatprep.subr.bf16.mxu1 %v12800_v21 }
 0x899   :  { %v12838_v53 = vpack.c.bf16 %v9668_v25, %v9667_v22 }
 0x89b   :  { %12731 = vmatpush1.bf16.msra.mxu0 %v12730_v34  ;;  %v9634_v34 = vld [vmem:[%s19722_s4 + $0xe20] sm:$0xff] }
 0x89c   :  { %12733 = vmatprep.subr.bf16.mxu0 %v12732_v62  ;;  %v9635_v62 = vld [vmem:[%s19722_s4 + $0xe28] sm:$0xff] }
 0x89d   :  { %v12808_v37 = vpack.c.bf16 %v9635_v62, %v9634_v34  ;;  %v9651_v62 = vld [vmem:[%s19722_s4 + $0xea0] sm:$0xff] }
 0x89f   :  { %12735 = vmatpush1.bf16.msra.mxu0 %v12734_v40  ;;  %v9636_v40 = vld [vmem:[%s19722_s4 + $0xe30] sm:$0xff] }
 0x8a0   :  { %12737 = vmatprep.subr.bf16.mxu0 %v12736_v23  ;;  %v9637_v23 = vld [vmem:[%s19722_s4 + $0xe38] sm:$0xff] }
 0x8a1   :  { %v12812_v41 = vpack.c.bf16 %v9637_v23, %v9636_v40 }
 0x8a3   :  { %12739 = vmatpush1.bf16.msra.mxu0 %v12738_v3  ;;  %v9638_v3 = vld [vmem:[%s19722_s4 + $0xe40] sm:$0xff] }
 0x8a4   :  { %12741 = vmatprep.subr.bf16.mxu0 %v12740_v52  ;;  %v9639_v52 = vld [vmem:[%s19722_s4 + $0xe48] sm:$0xff] }
 0x8a5   :  { %v12816_v43 = vpack.c.bf16 %v9639_v52, %v9638_v3  ;;  %v9671_v3 = vld [vmem:[%s19722_s4 + $0xf40] sm:$0xff]  ;;  %v9672_v52 = vld [vmem:[%s19722_s4 + $0xf48] sm:$0xff] }
 0x8a6   :  { %v12846_v4 = vpack.c.bf16 %v9672_v52, %v9671_v3 }
 0x8a7   :  { %12743 = vmatpush1.bf16.msra.mxu0 %v12742_v55  ;;  %v9640_v55 = vld [vmem:[%s19722_s4 + $0xe50] sm:$0xff] }
 0x8a8   :  { %12745 = vmatprep.subr.bf16.mxu0 %v12744_v0  ;;  %v9641_v0 = vld [vmem:[%s19722_s4 + $0xe58] sm:$0xff] }
 0x8a9   :  { %v12820_v17 = vpack.c.bf16 %v9641_v0, %v9640_v55  ;;  %v9673_v55 = vld [vmem:[%s19722_s4 + $0xf50] sm:$0xff]  ;;  %v9674_v0 = vld [vmem:[%s19722_s4 + $0xf58] sm:$0xff] }
 0x8aa   :  { %v12850_v1 = vpack.c.bf16 %v9674_v0, %v9673_v55 }
 0x8ab   :  { %12747 = vmatpush1.bf16.msra.mxu0 %v12746_v33  ;;  %v9642_v33 = vld [vmem:[%s19722_s4 + $0xe60] sm:$0xff] }
 0x8ac   :  { %12749 = vmatprep.subr.bf16.mxu0 %v12748_v49  ;;  %v9643_v49 = vld [vmem:[%s19722_s4 + $0xe68] sm:$0xff] }
 0x8ad   :  { %v12824_v13 = vpack.c.bf16 %v9643_v49, %v9642_v33  ;;  %v9675_v33 = vld [vmem:[%s19722_s4 + $0xf60] sm:$0xff]  ;;  %v9676_v49 = vld [vmem:[%s19722_s4 + $0xf68] sm:$0xff] }
 0x8ae   :  { %v12854_v56 = vpack.c.bf16 %v9676_v49, %v9675_v33  ;;  %v9744_v33 = vld [vmem:[%s19719_s2 + $0x1960] sm:$0xff]  ;;  %v9747_v49 = vld [vmem:[%s19719_s2 + $0x1978] sm:$0xff] }
 0x8af   :  { %12751 = vmatpush1.bf16.msra.mxu0 %v12750_v38  ;;  %v9644_v38 = vld [vmem:[%s19722_s4 + $0xe70] sm:$0xff] }
 0x8b0   :  { %12753 = vmatprep.subr.bf16.mxu0 %v12752_v61  ;;  %v12828_v28 = vpack.c.bf16 %v9645_v24, %v9644_v38  ;;  %v9677_v38 = vld [vmem:[%s19722_s4 + $0xf70] sm:$0xff] }
 0x8b2   :  { %6157 = vmatmul.mubr.f32.vlgmr.msra.gmra.mrb[84].mxu0 %v18349_v12  ;;  %v12833_v12 = vpack.c.bf16 %v9647_v8, %v9646_v7 }
 0x8b3   :  { %6162 = vmatprep.mubr.f32.mxu0 %v18358_v15  ;;  %12755 = vmatpush1.bf16.msra.mxu0 %v12754_v60  ;;  %v12836_v15 = vpack.c.bf16 %v9649_v9, %v9648_v19  ;;  %v9629_v60 = vld [vmem:[%s19722_s4 + $0xdf8] sm:$0xff] }
 0x8b4   :  { %12757 = vmatprep.subr.bf16.mxu0 %v12756_v10  ;;  %v12830_v10 = vpack.c.bf16 %v9629_v60, %v9628_v44  ;;  %v9661_v44 = vld [vmem:[%s19722_s4 + $0xef0] sm:$0xff]  ;;  %v9662_v60 = vld [vmem:[%s19722_s4 + $0xef8] sm:$0xff] }
 0x8b6   :  { %6163 = vmatmul.mubr.f32.gmra.mrb[86].mxu0 %v18373_v6  ;;  %v9633_v6 = vld [vmem:[%s19722_s4 + $0xe18] sm:$0xff] }
 0x8b7   :  { %12759 = vmatpush1.bf16.msra.mxu0 %v12758_v35  ;;  %6233 = vmatprep.mubr.f32.mxu0 %v13354_v14  ;;  %v12804_v47 = vpack.c.bf16 %v9633_v6, %v9632_v48 }
 0x8b8   :  { %12832 = vmatprep.subr.bf16.mxu0 %v13353_v50 }
 0x8ba   :  { %9604 = vmatmul.mubr.msk.f32.vlgmr.msra.gmra.mrb[84].mxu0 %vm939_vm1, %v18376_v26  ;;  %v12802_v26 = vpack.c.bf16 %v9615_v39, %v9614_v58 }
 0x8bb   :  { %6239 = vmatprep.mubr.f32.mxu0 %v13354_v14  ;;  %12834 = vmatpush3.bf16.msra.mxu0 %v12833_v12 }
 0x8bc   :  { %12835 = vmatprep.subr.bf16.mxu0 %v13353_v50  ;;  %12803 = vmatpush3.bf16.msra.mxu1 %v12802_v26  ;;  %v6079_v26 = vpop.permute.xlu0 %6078 }
 0x8bd   :  { %12805 = vmatprep.subr.bf16.mxu1 %v12804_v47  ;;  %v18604_v47 = vpop.permute.xlu1 %6083 }
 0x8be   :  { %9605 = vmatmul.mubr.msk.f32.gmra.mrb[86].mxu0 %vm939_vm1, %v18392_v32  ;;  %v12806_v32 = vpack.c.bf16 %v9617_v31, %v9616_v29 }
 0x8bf   :  { %11235 = vmatprep.mubr.msk.f32.mxu0 %vm13356_vm5, %v13354_v14  ;;  %12837 = vmatpush3.bf16.msra.mxu0 %v12836_v15 }
 0x8c0   :  { %12839 = vmatprep.subr.bf16.mxu0 %v12838_v53  ;;  %12807 = vmatpush3.bf16.msra.mxu1 %v12806_v32 }
 0x8c1   :  { %12809 = vmatprep.subr.bf16.mxu1 %v12808_v37  ;;  %v9652_v37 = vld [vmem:[%s19722_s4 + $0xea8] sm:$0xff] }
 0x8c2   :  { %v12840_v23 = vpack.c.bf16 %v9652_v37, %v9651_v62  ;;  %v9741_v62 = vld [vmem:[%s19719_s2 + $0x1948] sm:$0xff] }
 0x8c4   :  { %12811 = vmatpush3.bf16.msra.mxu1 %v12810_v27 }
 0x8c5   :  { %12813 = vmatprep.subr.bf16.mxu1 %v12812_v41  ;;  %v12842_v41 = vpack.c.bf16 %v9670_v45, %v9669_v59 }
 0x8c8   :  { %12815 = vmatpush3.bf16.msra.mxu1 %v12814_v51 }
 0x8c9   :  { %12817 = vmatprep.subr.bf16.mxu1 %v12816_v43  ;;  %v12844_v43 = vpack.c.bf16 %v9654_v46, %v9653_v11 }
 0x8cc   :  { %12819 = vmatpush3.bf16.msra.mxu1 %v12818_v57  ;;  %v9656_v57 = vld [vmem:[%s19722_s4 + $0xec8] sm:$0xff] }
 0x8cd   :  { %12821 = vmatprep.subr.bf16.mxu1 %v12820_v17  ;;  %v12848_v17 = vpack.c.bf16 %v9656_v57, %v9655_v54  ;;  %v9693_v54 = vld [vmem:[%s19719_s2 + $0x17c8] sm:$0xff] }
 0x8d0   :  { %12823 = vmatpush3.bf16.msra.mxu1 %v12822_v2  ;;  %v9658_v2 = vld [vmem:[%s19722_s4 + $0xed8] sm:$0xff] }
 0x8d1   :  { %12825 = vmatprep.subr.bf16.mxu1 %v12824_v13  ;;  %v12852_v13 = vpack.c.bf16 %v9658_v2, %v9657_v5 }
 0x8d4   :  { %12827 = vmatpush3.bf16.msra.mxu1 %v12826_v63  ;;  %v9660_v63 = vld [vmem:[%s19722_s4 + $0xee8] sm:$0xff] }
 0x8d5   :  { %12829 = vmatprep.subr.bf16.mxu1 %v12828_v28  ;;  %v12856_v24 = vpack.c.bf16 %v9660_v63, %v9659_v36 }
 0x8d8   :  { %12831 = vmatpush3.bf16.msra.mxu1 %v12830_v10 }
 0x8d9   :  { %12870 = vmatprep.subr.bf16.mxu1 %v13353_v50 }
 0x919   :  { %v5773_v61 = vpop.f32.mrb[116].mxu1 }
 0x91a   :  { %v11204_v30 = vpop.f32.mrb[117].mxu1 }
 0x93d   :  { %v10673_v42 = vpop.f32.mrb[80].mxu0 }
 0x93e   :  { %v10674_v16 = vpop.f32.mrb[81].mxu0 }
 0x93f   :  { %v10675_v35 = vadd.f32 %v10674_v16, %v10673_v42  ;;  %v9679_v16 = vld [vmem:[%s19722_s4 + $0xf80] sm:$0xff] }
 0x941   :  { %v5774_v7 = vadd.f32 %v10675_v35, %v5773_v61  ;;  %v10713_v8 = vpop.f32.mrb[118].mxu1  ;;  %v9678_v61 = vld [vmem:[%s19722_s4 + $0xf78] sm:$0xff]  ;;  %v9680_v35 = vld [vmem:[%s19722_s4 + $0xf88] sm:$0xff] }
 0x942   :  { %v10714_v12 = vpop.f32.mrb[119].mxu1  ;;  %v12858_v28 = vpack.c.bf16 %v9678_v61, %v9677_v38  ;;  %v9688_v38 = vld [vmem:[%s19719_s2 + $0x17a0] sm:$0xff]  ;;  %v9691_v61 = vld [vmem:[%s19719_s2 + $0x17b8] sm:$0xff] }
 0x943   :  { %5777 = vst.msk [vmem:[#allocation3 + $0x50] sm:$0xff] %vm1631_vm9, %v5774_v7  ;;  %v10715_v19 = vadd.f32 %v10714_v12, %v10713_v8  ;;  %v12860_v12 = vpack.c.bf16 %v9662_v60, %v9661_v44  ;;  %v12952_v44 = vpack.c.bf16 %v9747_v49, %v9744_v33  ;;  %v9699_v60 = vld [vmem:[%s19719_s2 + $0x17f8] sm:$0xff] }
 0x944   :  { %v9723_v33 = vld [vmem:[%s19719_s2 + $0x18b8] sm:$0xff] }
 0x945   :  { %v5954_v9 = vpop.f32.mrb[82].mxu0  ;;  %v9719_v49 = vld [vmem:[%s19719_s2 + $0x1898] sm:$0xff] }
 0x946   :  { %v5955_v15 = vadd.f32 %v10715_v19, %v5954_v9  ;;  %v11215_v20 = vpop.f32.mrb[83].mxu0 }
 0x947   :  { %v9663_v20 = vld [vmem:[%s19722_s4 + $0xf00] sm:$0xff] }
 0x948   :  { %5958 = vst.msk [vmem:[#allocation3 + $0x58] sm:$0xff] %vm1631_vm9, %v5955_v15  ;;  %v12862_v15 = vpack.c.bf16 %v9680_v35, %v9679_v16  ;;  %v9750_v16 = vld [vmem:[%s19719_s2 + $0x1990] sm:$0xff]  ;;  %v9753_v35 = vld [vmem:[%s19719_s2 + $0x19a8] sm:$0xff] }
 0x962   :  { %v10753_v18 = vpop.f32.mrb[120].mxu1 }
 0x963   :  { %v10754_v58 = vpop.f32.mrb[121].mxu1 }
 0x964   :  { %v10755_v21 = vadd.f32 %v10754_v58, %v10753_v18  ;;  %v9664_v18 = vld [vmem:[%s19722_s4 + $0xf08] sm:$0xff] }
 0x966   :  { %v10756_v39 = vpop.f32.mrb[122].mxu1  ;;  %v6313_v29 = vadd.f32 %v10755_v21, %v6079_v26 }
 0x967   :  { %v10757_v48 = vpop.f32.mrb[123].mxu1 }
 0x968   :  { %v10758_v6 = vadd.f32 %v10757_v48, %v10756_v39  ;;  %v9681_v39 = vld [vmem:[%s19722_s4 + $0xf90] sm:$0xff]  ;;  %v9682_v48 = vld [vmem:[%s19722_s4 + $0xf98] sm:$0xff] }
 0x96a   :  { %v6318_v22 = vadd.f32 %v10758_v6, %v18604_v47  ;;  %v11226_v25 = vpop.f32.mrb[124].mxu1 }
 0x96b   :  { %v6387_v53 = vpop.f32.mrb[125].mxu1 }
 0x96c   :  { %v18607_v31 = vadd.f32 %v11226_v25, %v6318_v22  ;;  %v6388_v32 = vadd.f32 %v6387_v53, %v6313_v29  ;;  %v12864_v25 = vpack.c.bf16 %v9664_v18, %v9663_v20  ;;  %v12866_v53 = vpack.c.bf16 %v9682_v48, %v9681_v39  ;;  %v9702_v20 = vld [vmem:[%s19719_s2 + $0x1810] sm:$0xff]  ;;  %v9701_v39 = vld [vmem:[%s19719_s2 + $0x1808] sm:$0xff]  ;;  %v9704_v48 = vld [vmem:[%s19719_s2 + $0x1820] sm:$0xff] }
 0x96e   :  { %v6406_v34 = vmul.f32 1.442695, %v6388_v32  ;;  %vm6398_vm14 = vcmp.gt.f32.partialorder %v6388_v32, 0.0  ;;  %vm6401_vm4 = vcmp.gt.f32.partialorder %v18607_v31, 0.0 }
 0x970   :  { %13294 = vpow2.f32 %v6406_v34  ;;  %v9666_v34 = vld [vmem:[%s19722_s4 + $0xf18] sm:$0xff] }
 0x97a   :  { %v13295_v27 = vpop.eup %13294 }
 0x97b   :  { %v9610_v40 = vadd.f32 -1.0, %v13295_v27  ;;  %v9683_v27 = vld [vmem:[%s19722_s4 + $0xfa0] sm:$0xff] }
 0x97d   :  { %v6422_v51 = vsel %vm6398_vm14, %v6388_v32, %v9610_v40  ;;  %v9665_v32 = vld [vmem:[%s19722_s4 + $0xf10] sm:$0xff]  ;;  %v9684_v40 = vld [vmem:[%s19722_s4 + $0xfa8] sm:$0xff] }
 0x97e   :  { %11236 = vmatmul.mubr.msk.f32.vlgmr.msra.gmra.mrb[88].mxu0 %vm939_vm1, %v6422_v51  ;;  %v12868_v37 = vpack.c.bf16 %v9666_v34, %v9665_v32  ;;  %v12871_v46 = vpack.c.bf16 %v9684_v40, %v9683_v27  ;;  %v9685_v51 = vld [vmem:[%s19722_s4 + $0xfb0] sm:$0xff]  ;;  %v9708_v32 = vld [vmem:[%s19719_s2 + $0x1840] sm:$0xff] }
 0x97f   :  { %12841 = vmatpush3.bf16.msra.mxu0 %v12840_v23 }
 0x980   :  { %12843 = vmatprep.subr.bf16.mxu0 %v12842_v41 }
 0x983   :  { %12845 = vmatpush3.bf16.msra.mxu0 %v12844_v43  ;;  %v9686_v43 = vld [vmem:[%s19722_s4 + $0xfb8] sm:$0xff] }
 0x984   :  { %12847 = vmatprep.subr.bf16.mxu0 %v12846_v4  ;;  %v9690_v4 = vld [vmem:[%s19719_s2 + $0x17b0] sm:$0xff] }
 0x987   :  { %12849 = vmatpush3.bf16.msra.mxu0 %v12848_v17  ;;  %v9689_v17 = vld [vmem:[%s19719_s2 + $0x17a8] sm:$0xff] }
 0x988   :  { %12851 = vmatprep.subr.bf16.mxu0 %v12850_v1  ;;  %v9692_v1 = vld [vmem:[%s19719_s2 + $0x17c0] sm:$0xff] }
 0x989   :  { %v12876_v63 = vpack.c.bf16 %v9692_v1, %v9689_v17  ;;  %v9712_v17 = vld [vmem:[%s19719_s2 + $0x1860] sm:$0xff]  ;;  %v9715_v1 = vld [vmem:[%s19719_s2 + $0x1878] sm:$0xff] }
 0x98b   :  { %12853 = vmatpush3.bf16.msra.mxu0 %v12852_v13  ;;  %v12874_v13 = vpack.c.bf16 %v9686_v43, %v9685_v51  ;;  %v9716_v43 = vld [vmem:[%s19719_s2 + $0x1880] sm:$0xff] }
 0x98c   :  { %12855 = vmatprep.subr.bf16.mxu0 %v12854_v56  ;;  %v12950_v56 = vpack.c.bf16 %v9693_v54, %v9690_v4  ;;  %v9768_v4 = vld [vmem:[%s19719_s2 + $0x1a20] sm:$0xff]  ;;  %v9771_v54 = vld [vmem:[%s19719_s2 + $0x1a38] sm:$0xff] }
 0x98d   :  { %v6235_v30 = vpop.f32.mrb[84].mxu0 }
 0x98e   :  { %v13144_v10 = vadd.f32 %v6235_v30, %v6079_v26  ;;  %v6237_v42 = vpop.f32.mrb[85].mxu0 }
 0x98f   :  { %v13145_v7 = vadd.f32 %v6237_v42, %v6079_v26  ;;  %12857 = vmatpush3.bf16.msra.mxu0 %v12856_v24  ;;  %v6412_v26 = vmul.f32 1.442695, %v18607_v31  ;;  %v9696_v24 = vld [vmem:[%s19719_s2 + $0x17e0] sm:$0xff]  ;;  %v9698_v42 = vld [vmem:[%s19719_s2 + $0x17f0] sm:$0xff] }
 0x990   :  { %v6402_v8 = vmul.f32 1.442695, %v13144_v10  ;;  %12859 = vmatprep.subr.bf16.mxu0 %v12858_v28  ;;  %vm6396_vm0 = vcmp.gt.f32.partialorder %v13144_v10, 0.0 }
 0x991   :  { %v6404_v19 = vmul.f32 1.442695, %v13145_v7  ;;  %v6241_v9 = vpop.f32.mrb[86].mxu0  ;;  %vm6397_vm15 = vcmp.gt.f32.partialorder %v13145_v7, 0.0 }
 0x992   :  { %13296 = vpow2.f32 %v6402_v8  ;;  %v18689_v58 = vadd.f32 %v6241_v9, %v18604_v47  ;;  %v6243_v21 = vpop.f32.mrb[87].mxu0  ;;  %v12878_v8 = vpack.c.bf16 %v9691_v61, %v9688_v38  ;;  %v9694_v9 = vld [vmem:[%s19719_s2 + $0x17d0] sm:$0xff] }
 0x993   :  { %13298 = vpow2.f32 %v6404_v19  ;;  %v13147_v6 = vadd.f32 %v6243_v21, %v18604_v47  ;;  %12861 = vmatpush3.bf16.msra.mxu0 %v12860_v12  ;;  %v9738_v47 = vld [vmem:[%s19719_s2 + $0x1930] sm:$0xff]  ;;  %v12954_v12 = vpack.c.bf16 %v9699_v60, %v9696_v24  ;;  %v9705_v21 = vld [vmem:[%s19719_s2 + $0x1828] sm:$0xff] }
 0x994   :  { %v6408_v22 = vmul.f32 1.442695, %v18689_v58  ;;  %12863 = vmatprep.subr.bf16.mxu0 %v12862_v15  ;;  %v12948_v59 = vpack.c.bf16 %v9741_v62, %v9738_v47  ;;  %vm6399_vm3 = vcmp.gt.f32.partialorder %v18689_v58, 0.0  ;;  %v9697_v15 = vld [vmem:[%s19719_s2 + $0x17e8] sm:$0xff]  ;;  %v9711_v47 = vld [vmem:[%s19719_s2 + $0x1858] sm:$0xff]  ;;  %v9718_v24 = vld [vmem:[%s19719_s2 + $0x1890] sm:$0xff] }
 0x995   :  { %v6410_v29 = vmul.f32 1.442695, %v13147_v6  ;;  %vm6400_vm2 = vcmp.gt.f32.partialorder %v13147_v6, 0.0  ;;  %v9707_v62 = vld [vmem:[%s19719_s2 + $0x1838] sm:$0xff]  ;;  %v12962_v40 = vpack.c.bf16 %v9711_v47, %v9708_v32  ;;  %v9729_v60 = vld [vmem:[%s19719_s2 + $0x18e8] sm:$0xff]  ;;  %v9740_v32 = vld [vmem:[%s19719_s2 + $0x1940] sm:$0xff] }
 0x996   :  { %13300 = vpow2.f32 %v6408_v22  ;;  %v12958_v22 = vpack.c.bf16 %v9705_v21, %v9702_v20  ;;  %v9734_v21 = vld [vmem:[%s19719_s2 + $0x1910] sm:$0xff]  ;;  %v9795_v47 = vld [vmem:[%s19719_s2 + $0x1af8] sm:$0xff] }
 0x997   :  { %13302 = vpow2.f32 %v6410_v29  ;;  %12865 = vmatpush3.bf16.msra.mxu0 %v12864_v25  ;;  %v12884_v25 = vpack.c.bf16 %v9704_v48, %v9701_v39  ;;  %v9700_v29 = vld [vmem:[%s19719_s2 + $0x1800] sm:$0xff]  ;;  %v9786_v39 = vld [vmem:[%s19719_s2 + $0x1ab0] sm:$0xff]  ;;  %v9789_v48 = vld [vmem:[%s19719_s2 + $0x1ac8] sm:$0xff] }
 0x998   :  { %13304 = vpow2.f32 %v6412_v26  ;;  %12867 = vmatprep.subr.bf16.mxu0 %v12866_v53  ;;  %v12882_v26 = vpack.c.bf16 %v9697_v15, %v9694_v9  ;;  %v9703_v53 = vld [vmem:[%s19719_s2 + $0x1818] sm:$0xff]  ;;  %v9732_v15 = vld [vmem:[%s19719_s2 + $0x1900] sm:$0xff] }
 0x999   :  { %v12886_v27 = vpack.c.bf16 %v9703_v53, %v9700_v29  ;;  %v9727_v9 = vld [vmem:[%s19719_s2 + $0x18d8] sm:$0xff]  ;;  %v12980_v29 = vpack.c.bf16 %v9789_v48, %v9786_v39  ;;  %v9737_v53 = vld [vmem:[%s19719_s2 + $0x1928] sm:$0xff]  ;;  %v9778_v39 = vld [vmem:[%s19719_s2 + $0x1a70] sm:$0xff] }
 0x99a   :  { %v9781_v48 = vld [vmem:[%s19719_s2 + $0x1a88] sm:$0xff] }
 0x99b   :  { %12869 = vmatpush3.bf16.msra.mxu0 %v12868_v37  ;;  %v9710_v37 = vld [vmem:[%s19719_s2 + $0x1850] sm:$0xff] }
 0x99c   :  { %v13297_v45 = vpop.eup %13296  ;;  %12949 = vmatprep.subr.bf16.mxu0 %v12948_v59  ;;  %v9762_v59 = vld [vmem:[%s19719_s2 + $0x19f0] sm:$0xff] }
 0x99d   :  { %v13299_v23 = vpop.eup %13298  ;;  %v9608_v41 = vadd.f32 -1.0, %v13297_v45  ;;  %v9765_v45 = vld [vmem:[%s19719_s2 + $0x1a08] sm:$0xff] }
 0x99e   :  { %v9609_v11 = vadd.f32 -1.0, %v13299_v23  ;;  %v12888_v23 = vpack.c.bf16 %v9710_v37, %v9707_v62  ;;  %v12964_v51 = vpack.c.bf16 %v9765_v45, %v9762_v59  ;;  %v9736_v37 = vld [vmem:[%s19719_s2 + $0x1920] sm:$0xff]  ;;  %v9739_v59 = vld [vmem:[%s19719_s2 + $0x1938] sm:$0xff]  ;;  %v12908_v45 = vpack.c.bf16 %v9740_v32, %v9737_v53  ;;  %v9794_v32 = vld [vmem:[%s19719_s2 + $0x1af0] sm:$0xff] }
 0x99f   :  { %v6420_v55 = vsel %vm6396_vm0, %v13144_v10, %v9608_v41  ;;  %v9695_v10 = vld [vmem:[%s19719_s2 + $0x17d8] sm:$0xff]  ;;  %v9706_v41 = vld [vmem:[%s19719_s2 + $0x1830] sm:$0xff] }
 0x9a0   :  { %v13301_v3 = vpop.eup %13300  ;;  %v6421_v52 = vsel %vm6397_vm15, %v13145_v7, %v9609_v11  ;;  %v6789_v7 = vld [vmem:[#allocation2 + $0x158] sm:$0xff]  ;;  %v12880_v19 = vpack.c.bf16 %v9698_v42, %v9695_v10  ;;  %v9709_v11 = vld [vmem:[%s19719_s2 + $0x1848] sm:$0xff]  ;;  %v9728_v42 = vld [vmem:[%s19719_s2 + $0x18e0] sm:$0xff] }
 0x9a1   :  { %v13303_v57 = vpop.eup %13302  ;;  %6530 = vmatprep.mubr.f32.mxu1 %v6421_v52  ;;  %v9611_v0 = vadd.f32 -1.0, %v13301_v3  ;;  %v9717_v3 = vld [vmem:[%s19719_s2 + $0x1888] sm:$0xff]  ;;  %v9791_v53 = vld [vmem:[%s19719_s2 + $0x1ad8] sm:$0xff] }
 0x9a2   :  { %v13305_v5 = vpop.eup %13304  ;;  %6531 = vmatmul.mubr.f32.vlgmr.msra.gmra.mrb[126].mxu1 %v6420_v55  ;;  %v9612_v2 = vadd.f32 -1.0, %v13303_v57  ;;  %v9713_v52 = vld [vmem:[%s19719_s2 + $0x1868] sm:$0xff]  ;;  %v12890_v57 = vpack.c.bf16 %v9709_v11, %v9706_v41  ;;  %v9746_v41 = vld [vmem:[%s19719_s2 + $0x1970] sm:$0xff] }
 0x9a3   :  { %12872 = vmatpush3.bf16.msra.mxu1 %v12871_v46  ;;  %11246 = vmatprep.mubr.msk.f32.mxu1 %vm13356_vm5, %v13354_v14  ;;  %v9613_v30 = vadd.f32 -1.0, %v13305_v5  ;;  %v6423_v28 = vsel %vm6399_vm3, %v18689_v58, %v9611_v0  ;;  %v12956_v58 = vpack.c.bf16 %v9753_v35, %v9750_v16  ;;  %v9714_v46 = vld [vmem:[%s19719_s2 + $0x1870] sm:$0xff]  ;;  %v12892_v0 = vpack.c.bf16 %v9716_v43, %v9713_v52  ;;  %v9720_v5 = vld [vmem:[%s19719_s2 + $0x18a0] sm:$0xff]  ;;  %v9725_v10 = vld [vmem:[%s19719_s2 + $0x18c8] sm:$0xff] }
 0x9a4   :  { %v6424_v36 = vsel %vm6400_vm2, %v13147_v6, %v9612_v2  ;;  %12873 = vmatprep.subr.bf16.mxu1 %v13353_v50  ;;  %v9759_v6 = vld [vmem:[%s19719_s2 + $0x19d8] sm:$0xff]  ;;  %v12966_v55 = vpack.c.bf16 %v9717_v3, %v9714_v46  ;;  %v12968_v2 = vpack.c.bf16 %v9771_v54, %v9768_v4  ;;  %v12970_v38 = vpack.c.bf16 %v9723_v33, %v9720_v5  ;;  %v9780_v16 = vld [vmem:[%s19719_s2 + $0x1a80] sm:$0xff]  ;;  %v18951_v11 = vld [vmem:[#allocation2 + $0x170] sm:$0xff] }
 0x9a5   :  { %6711 = vmatprep.mubr.f32.mxu0 %v6424_v36  ;;  %v6425_v18 = vsel %vm6401_vm4, %v18607_v31, %v9613_v30  ;;  %v9756_v31 = vld [vmem:[%s19719_s2 + $0x19c0] sm:$0xff]  ;;  %v9777_v36 = vld [vmem:[%s19719_s2 + $0x1a68] sm:$0xff]  ;;  %v9783_v35 = vld [vmem:[%s19719_s2 + $0x1a98] sm:$0xff]  ;;  %v12910_v46 = vpack.c.bf16 %v9739_v59, %v9736_v37 }
 0x9a6   :  { %6712 = vmatmul.mubr.f32.vlgmr.msra.gmra.mrb[90].mxu0 %v6423_v28  ;;  %v12960_v34 = vpack.c.bf16 %v9759_v6, %v9756_v31  ;;  %v9721_v30 = vld [vmem:[%s19719_s2 + $0x18a8] sm:$0xff]  ;;  %v9726_v28 = vld [vmem:[%s19719_s2 + $0x18d0] sm:$0xff]  ;;  %v12976_v20 = vpack.c.bf16 %v9783_v35, %v9780_v16  ;;  %v9752_v4 = vld [vmem:[%s19719_s2 + $0x19a0] sm:$0xff] }
 0x9a7   :  { %12875 = vmatpush3.bf16.msra.mxu1 %v12874_v13  ;;  %12951 = vmatpush3.bf16.msra.mxu0 %v12950_v56  ;;  %v9722_v13 = vld [vmem:[%s19719_s2 + $0x18b0] sm:$0xff]  ;;  %v9745_v3 = vld [vmem:[%s19719_s2 + $0x1968] sm:$0xff]  ;;  %v9755_v5 = vld [vmem:[%s19719_s2 + $0x19b8] sm:$0xff] }
 0x9a8   :  { %7139 = vmatprep.mubr.f32.mxu0 %v6789_v7  ;;  %12877 = vmatprep.subr.bf16.mxu1 %v12876_v63  ;;  %v9774_v56 = vld [vmem:[%s19719_s2 + $0x1a50] sm:$0xff]  ;;  %v12894_v63 = vpack.c.bf16 %v9715_v1, %v9712_v17  ;;  %v12896_v61 = vpack.c.bf16 %v9722_v13, %v9719_v49  ;;  %v9749_v43 = vld [vmem:[%s19719_s2 + $0x1988] sm:$0xff]  ;;  %v9748_v17 = vld [vmem:[%s19719_s2 + $0x1980] sm:$0xff] }
 0x9a9   :  { %12953 = vmatprep.subr.bf16.mxu0 %v12952_v44  ;;  %v12972_v44 = vpack.c.bf16 %v9777_v36, %v9774_v56  ;;  %v18966_v54 = vld [vmem:[#allocation2 + $0x168] sm:$0xff]  ;;  %v9751_v1 = vld [vmem:[%s19719_s2 + $0x1998] sm:$0xff]  ;;  %v9754_v56 = vld [vmem:[%s19719_s2 + $0x19b0] sm:$0xff] }
 0x9aa   :  { %11247 = vmatmul.mubr.msk.f32.vlgmr.msra.gmra.mrb[128].mxu1 %vm939_vm1, %v6425_v18  ;;  %v9735_v18 = vld [vmem:[%s19719_s2 + $0x1918] sm:$0xff]  ;;  %v12918_v49 = vpack.c.bf16 %v9751_v1, %v9748_v17  ;;  %v9757_v36 = vld [vmem:[%s19719_s2 + $0x19c8] sm:$0xff]  ;;  %v9766_v16 = vld [vmem:[%s19719_s2 + $0x1a10] sm:$0xff] }
 0x9ab   :  { %12879 = vmatpush1.bf16.msra.mxu1 %v12878_v8  ;;  %6985 = vmatprep.mubr.f32.mxu1 %v6789_v7  ;;  %v12898_v7 = vpack.c.bf16 %v9721_v30, %v9718_v24  ;;  %v12974_v8 = vpack.c.bf16 %v9729_v60, %v9726_v28  ;;  %v12978_v6 = vpack.c.bf16 %v9735_v18, %v9732_v15  ;;  %v18985_v33 = vld [vmem:[#allocation2 + $0x178] sm:$0xff]  ;;  %v9760_v30 = vld [vmem:[%s19719_s2 + $0x19e0] sm:$0xff]  ;;  %v9770_v60 = vld [vmem:[%s19719_s2 + $0x1a30] sm:$0xff] }
 0x9ac   :  { %12955 = vmatpush3.bf16.msra.mxu0 %v12954_v12  ;;  %12881 = vmatprep.subr.bf16.mxu1 %v12880_v19  ;;  %v12900_v12 = vpack.c.bf16 %v9728_v42, %v9725_v10  ;;  %v9724_v19 = vld [vmem:[%s19719_s2 + $0x18c0] sm:$0xff]  ;;  %v9763_v28 = vld [vmem:[%s19719_s2 + $0x19f8] sm:$0xff]  ;;  %v9769_v35 = vld [vmem:[%s19719_s2 + $0x1a28] sm:$0xff] }
 0x9ad   :  { %12957 = vmatprep.subr.bf16.mxu0 %v12956_v58  ;;  %v9731_v58 = vld [vmem:[%s19719_s2 + $0x18f8] sm:$0xff]  ;;  %v12902_v31 = vpack.c.bf16 %v9727_v9, %v9724_v19  ;;  %v12926_v10 = vpack.c.bf16 %v9763_v28, %v9760_v30  ;;  %v9772_v9 = vld [vmem:[%s19719_s2 + $0x1a40] sm:$0xff]  ;;  %v9782_v18 = vld [vmem:[%s19719_s2 + $0x1a90] sm:$0xff] }
 0x9ae   :  { %v9775_v15 = vld [vmem:[%s19719_s2 + $0x1a58] sm:$0xff]  ;;  %v9793_v37 = vld [vmem:[%s19719_s2 + $0x1ae8] sm:$0xff]  ;;  %v9859_v1 = vld [vmem:[%s19722_s4 + $0x1160] sm:$0xff] }
 0x9af   :  { %12883 = vmatpush1.bf16.msra.mxu1 %v12882_v26  ;;  %v12904_v26 = vpack.c.bf16 %v9734_v21, %v9731_v58  ;;  %v12934_v58 = vpack.c.bf16 %v9775_v15, %v9772_v9  ;;  %v9809_v17 = vld [vmem:[%s19722_s4 + $0xfd8] sm:$0xff]  ;;  %v9812_v28 = vld [vmem:[%s19722_s4 + $0xff0] sm:$0xff] }
 0x9b0   :  { %12959 = vmatpush3.bf16.msra.mxu0 %v12958_v22  ;;  %12885 = vmatprep.subr.bf16.mxu1 %v12884_v25  ;;  %v9730_v22 = vld [vmem:[%s19719_s2 + $0x18f0] sm:$0xff]  ;;  %v9733_v25 = vld [vmem:[%s19719_s2 + $0x1908] sm:$0xff] }
 0x9b1   :  { %12961 = vmatprep.subr.bf16.mxu0 %v12960_v34  ;;  %v9792_v34 = vld [vmem:[%s19719_s2 + $0x1ae0] sm:$0xff]  ;;  %v12906_v62 = vpack.c.bf16 %v9733_v25, %v9730_v22  ;;  %v9816_v15 = vld [vmem:[%s19722_s4 + $0x1010] sm:$0xff] }
 0x9b2   :  { %v9784_v25 = vld [vmem:[%s19719_s2 + $0x1aa0] sm:$0xff] }
 0x9b3   :  { %12887 = vmatpush1.bf16.msra.mxu1 %v12886_v27  ;;  %v12984_v27 = vpack.c.bf16 %v9795_v47, %v9792_v34  ;;  %v12944_v47 = vpack.c.bf16 %v9794_v32, %v9791_v53  ;;  %v9821_v53 = vld [vmem:[%s19722_s4 + $0x1038] sm:$0xff] }
 0x9b4   :  { %12963 = vmatpush3.bf16.msra.mxu0 %v12962_v40  ;;  %12889 = vmatprep.subr.bf16.mxu1 %v12888_v23  ;;  %v18942_v40 = vld [vmem:[#allocation2 + $0x150] sm:$0xff]  ;;  %v9743_v23 = vld [vmem:[%s19719_s2 + $0x1958] sm:$0xff] }
 0x9b5   :  { %12965 = vmatprep.subr.bf16.mxu0 %v12964_v51  ;;  %v9742_v51 = vld [vmem:[%s19719_s2 + $0x1950] sm:$0xff]  ;;  %v12912_v52 = vpack.c.bf16 %v9746_v41, %v9743_v23  ;;  %v9841_v41 = vld [vmem:[%s19722_s4 + $0x10d8] sm:$0xff] }
 0x9b6   :  { %v9840_v23 = vld [vmem:[%s19722_s4 + $0x10d0] sm:$0xff] }
 0x9b7   :  { %12891 = vmatpush1.bf16.msra.mxu1 %v12890_v57  ;;  %v18969_v57 = vld [vmem:[#allocation2 + $0x160] sm:$0xff] }
 0x9b8   :  { %12967 = vmatpush3.bf16.msra.mxu0 %v12966_v55  ;;  %12893 = vmatprep.subr.bf16.mxu1 %v12892_v0  ;;  %v12914_v55 = vpack.c.bf16 %v9745_v3, %v9742_v51  ;;  %v12916_v0 = vpack.c.bf16 %v9752_v4, %v9749_v43  ;;  %v9823_v51 = vld [vmem:[%s19722_s4 + $0x1048] sm:$0xff]  ;;  %v9806_v3 = vld [vmem:[%s19722_s4 + $0xfc0] sm:$0xff]  ;;  %v9824_v4 = vld [vmem:[%s19722_s4 + $0x1050] sm:$0xff] }
 0x9b9   :  { %12969 = vmatprep.subr.bf16.mxu0 %v12968_v2  ;;  %v9758_v2 = vld [vmem:[%s19719_s2 + $0x19d0] sm:$0xff]  ;;  %v9807_v43 = vld [vmem:[%s19722_s4 + $0xfc8] sm:$0xff] }
 0x9ba   :  { %v12920_v13 = vpack.c.bf16 %v9758_v2, %v9755_v5  ;;  %v9860_v5 = vld [vmem:[%s19722_s4 + $0x1168] sm:$0xff] }
 0x9bb   :  { %12895 = vmatpush1.bf16.msra.mxu1 %v12894_v63  ;;  %v9761_v63 = vld [vmem:[%s19719_s2 + $0x19e8] sm:$0xff] }
 0x9bc   :  { %12971 = vmatpush3.bf16.msra.mxu0 %v12970_v38  ;;  %12897 = vmatprep.subr.bf16.mxu1 %v12896_v61  ;;  %v9764_v38 = vld [vmem:[%s19719_s2 + $0x1a00] sm:$0xff]  ;;  %v12922_v61 = vpack.c.bf16 %v9757_v36, %v9754_v56 }
 0x9bd   :  { %12973 = vmatprep.subr.bf16.mxu0 %v12972_v44  ;;  %v12924_v24 = vpack.c.bf16 %v9764_v38, %v9761_v63  ;;  %v9767_v44 = vld [vmem:[%s19719_s2 + $0x1a18] sm:$0xff]  ;;  %v9810_v36 = vld [vmem:[%s19722_s4 + $0xfe0] sm:$0xff]  ;;  %v9811_v63 = vld [vmem:[%s19722_s4 + $0xfe8] sm:$0xff] }
 0x9be   :  { %v12928_v42 = vpack.c.bf16 %v9770_v60, %v9767_v44  ;;  %v12998_v38 = vpack.c.bf16 %v9811_v63, %v9810_v36  ;;  %v9813_v44 = vld [vmem:[%s19722_s4 + $0xff8] sm:$0xff]  ;;  %v9861_v36 = vld [vmem:[%s19722_s4 + $0x1170] sm:$0xff] }
 0x9bf   :  { %12899 = vmatpush1.bf16.msra.mxu1 %v12898_v7  ;;  %v9773_v7 = vld [vmem:[%s19719_s2 + $0x1a48] sm:$0xff]  ;;  %v13002_v60 = vpack.c.bf16 %v9813_v44, %v9812_v28  ;;  %v9862_v63 = vld [vmem:[%s19722_s4 + $0x1178] sm:$0xff]  ;;  %v9845_v28 = vld [vmem:[%s19722_s4 + $0x10f0] sm:$0xff] }
 0x9c0   :  { %12975 = vmatpush3.bf16.msra.mxu0 %v12974_v8  ;;  %12901 = vmatprep.subr.bf16.mxu1 %v12900_v12  ;;  %v9776_v8 = vld [vmem:[%s19719_s2 + $0x1a60] sm:$0xff]  ;;  %v12930_v12 = vpack.c.bf16 %v9769_v35, %v9766_v16  ;;  %v9846_v44 = vld [vmem:[%s19722_s4 + $0x10f8] sm:$0xff] }
 0x9c1   :  { %12977 = vmatprep.subr.bf16.mxu0 %v12976_v20  ;;  %v12932_v19 = vpack.c.bf16 %v9776_v8, %v9773_v7  ;;  %v9779_v20 = vld [vmem:[%s19719_s2 + $0x1a78] sm:$0xff]  ;;  %v9814_v35 = vld [vmem:[%s19722_s4 + $0x1000] sm:$0xff]  ;;  %v9815_v7 = vld [vmem:[%s19722_s4 + $0x1008] sm:$0xff] }
 0x9c2   :  { %v12936_v21 = vpack.c.bf16 %v9782_v18, %v9779_v20  ;;  %v13006_v8 = vpack.c.bf16 %v9815_v7, %v9814_v35  ;;  %v9817_v20 = vld [vmem:[%s19722_s4 + $0x1018] sm:$0xff]  ;;  %v9847_v7 = vld [vmem:[%s19722_s4 + $0x1100] sm:$0xff] }
 0x9c3   :  { %12903 = vmatpush1.bf16.msra.mxu1 %v12902_v31  ;;  %v9785_v31 = vld [vmem:[%s19719_s2 + $0x1aa8] sm:$0xff]  ;;  %v13010_v18 = vpack.c.bf16 %v9817_v20, %v9816_v15  ;;  %v9849_v20 = vld [vmem:[%s19722_s4 + $0x1110] sm:$0xff] }
 0x9c4   :  { %12979 = vmatpush3.bf16.msra.mxu0 %v12978_v6  ;;  %12905 = vmatprep.subr.bf16.mxu1 %v12904_v26  ;;  %v9788_v6 = vld [vmem:[%s19719_s2 + $0x1ac0] sm:$0xff]  ;;  %v12938_v26 = vpack.c.bf16 %v9781_v48, %v9778_v39 }
 0x9c5   :  { %12981 = vmatprep.subr.bf16.mxu0 %v12980_v29  ;;  %v12940_v22 = vpack.c.bf16 %v9788_v6, %v9785_v31  ;;  %v9818_v39 = vld [vmem:[%s19722_s4 + $0x1020] sm:$0xff]  ;;  %v9819_v31 = vld [vmem:[%s19722_s4 + $0x1028] sm:$0xff] }
 0x9c6   :  { %v13014_v6 = vpack.c.bf16 %v9819_v31, %v9818_v39  ;;  %v9851_v31 = vld [vmem:[%s19722_s4 + $0x1120] sm:$0xff] }
 0x9c7   :  { %7140 = vmatmul.mubr.f32.vlgmr.msra.gmra.mrb[92].mxu0 %v18942_v40  ;;  %12907 = vmatpush1.bf16.msra.mxu1 %v12906_v62  ;;  %v9790_v62 = vld [vmem:[%s19719_s2 + $0x1ad0] sm:$0xff] }
 0x9c8   :  { %7144 = vmatprep.mubr.f32.mxu0 %v18951_v11  ;;  %12983 = vmatpush3.bf16.msra.mxu0 %v12980_v29  ;;  %v9787_v29 = vld [vmem:[%s19719_s2 + $0x1ab8] sm:$0xff]  ;;  %v12946_v59 = vpack.c.bf16 %v9793_v37, %v9790_v62 }
 0x9c9   :  { %12909 = vmatprep.subr.bf16.mxu1 %v12908_v45  ;;  %12985 = vmatprep.subr.bf16.mxu0 %v12984_v27  ;;  %v12942_v34 = vpack.c.bf16 %v9787_v29, %v9784_v25  ;;  %v9838_v45 = vld [vmem:[%s19722_s4 + $0x10c0] sm:$0xff]  ;;  %v9837_v25 = vld [vmem:[%s19722_s4 + $0x10b8] sm:$0xff]  ;;  %v9820_v29 = vld [vmem:[%s19722_s4 + $0x1030] sm:$0xff] }
 0x9cb   :  { %7145 = vmatmul.mubr.f32.gmra.mrb[94].mxu0 %v18966_v54  ;;  %12911 = vmatpush1.bf16.msra.mxu1 %v12910_v46  ;;  %v9822_v46 = vld [vmem:[%s19722_s4 + $0x1040] sm:$0xff] }
 0x9cc   :  { %12987 = vmatpush3.bf16.msra.mxu0 %v12984_v27  ;;  %11257 = vmatprep.mubr.msk.f32.mxu0 %vm939_vm1, %v18969_v57  ;;  %v9839_v27 = vld [vmem:[%s19722_s4 + $0x10c8] sm:$0xff] }
 0x9cd   :  { %12913 = vmatprep.subr.bf16.mxu1 %v12912_v52  ;;  %v12988_v52 = vpack.c.bf16 %v9823_v51, %v9822_v46 }
 0x9cf   :  { %11258 = vmatmul.mubr.msk.f32.vlgmr.msra.gmra.mrb[96].mxu0 %vm939_vm1, %v18985_v33  ;;  %12915 = vmatpush1.bf16.msra.mxu1 %v12914_v55 }
 0x9d0   :  { %12917 = vmatprep.subr.bf16.mxu1 %v12916_v0  ;;  %v9808_v0 = vld [vmem:[%s19722_s4 + $0xfd0] sm:$0xff]  ;;  %12989 = vmatprep.subr.bf16.mxu0 %v12988_v52 }
 0x9d1   :  { %v12994_v2 = vpack.c.bf16 %v9809_v17, %v9808_v0 }
 0x9d3   :  { %12919 = vmatpush1.bf16.msra.mxu1 %v12918_v49  ;;  %v9826_v49 = vld [vmem:[%s19722_s4 + $0x1060] sm:$0xff] }
 0x9d4   :  { %12921 = vmatprep.subr.bf16.mxu1 %v12920_v13  ;;  %v9827_v13 = vld [vmem:[%s19722_s4 + $0x1068] sm:$0xff] }
 0x9d5   :  { %v12996_v56 = vpack.c.bf16 %v9827_v13, %v9826_v49  ;;  %v9843_v13 = vld [vmem:[%s19722_s4 + $0x10e0] sm:$0xff] }
 0x9d7   :  { %12923 = vmatpush1.bf16.msra.mxu1 %v12922_v61  ;;  %v9828_v61 = vld [vmem:[%s19722_s4 + $0x1070] sm:$0xff] }
 0x9d8   :  { %12925 = vmatprep.subr.bf16.mxu1 %v12924_v24  ;;  %v9829_v24 = vld [vmem:[%s19722_s4 + $0x1078] sm:$0xff] }
 0x9d9   :  { %v13000_v30 = vpack.c.bf16 %v9829_v24, %v9828_v61 }
 0x9db   :  { %12927 = vmatpush1.bf16.msra.mxu1 %v12926_v10  ;;  %v9830_v10 = vld [vmem:[%s19722_s4 + $0x1080] sm:$0xff] }
 0x9dc   :  { %12929 = vmatprep.subr.bf16.mxu1 %v12928_v42  ;;  %v9831_v42 = vld [vmem:[%s19722_s4 + $0x1088] sm:$0xff] }
 0x9dd   :  { %v13004_v16 = vpack.c.bf16 %v9831_v42, %v9830_v10  ;;  %v9863_v10 = vld [vmem:[%s19722_s4 + $0x1180] sm:$0xff]  ;;  %v9864_v42 = vld [vmem:[%s19722_s4 + $0x1188] sm:$0xff] }
 0x9de   :  { %v13034_v35 = vpack.c.bf16 %v9864_v42, %v9863_v10 }
 0x9df   :  { %12931 = vmatpush1.bf16.msra.mxu1 %v12930_v12  ;;  %v9832_v12 = vld [vmem:[%s19722_s4 + $0x1090] sm:$0xff] }
 0x9e0   :  { %12933 = vmatprep.subr.bf16.mxu1 %v12932_v19  ;;  %v9833_v19 = vld [vmem:[%s19722_s4 + $0x1098] sm:$0xff] }
 0x9e1   :  { %v13008_v9 = vpack.c.bf16 %v9833_v19, %v9832_v12  ;;  %v9865_v12 = vld [vmem:[%s19722_s4 + $0x1190] sm:$0xff]  ;;  %v9866_v19 = vld [vmem:[%s19722_s4 + $0x1198] sm:$0xff] }
 0x9e2   :  { %v13038_v15 = vpack.c.bf16 %v9866_v19, %v9865_v12  ;;  %v7634_v12 = vld [vmem:[#allocation3 + $0x8] sm:$0xff] }
 0x9e3   :  { %12935 = vmatpush1.bf16.msra.mxu1 %v12934_v58  ;;  %v9834_v58 = vld [vmem:[%s19722_s4 + $0x10a0] sm:$0xff] }
 0x9e4   :  { %12937 = vmatprep.subr.bf16.mxu1 %v12936_v21  ;;  %v9835_v21 = vld [vmem:[%s19722_s4 + $0x10a8] sm:$0xff] }
 0x9e5   :  { %v13012_v48 = vpack.c.bf16 %v9835_v21, %v9834_v58  ;;  %v9867_v58 = vld [vmem:[%s19722_s4 + $0x11a0] sm:$0xff]  ;;  %v9868_v21 = vld [vmem:[%s19722_s4 + $0x11a8] sm:$0xff] }
 0x9e7   :  { %12939 = vmatpush1.bf16.msra.mxu1 %v12938_v26  ;;  %v9836_v26 = vld [vmem:[%s19722_s4 + $0x10b0] sm:$0xff] }
 0x9e8   :  { %12941 = vmatprep.subr.bf16.mxu1 %v12940_v22 }
 0x9ea   :  { %6986 = vmatmul.mubr.f32.vlgmr.msra.gmra.mrb[130].mxu1 %v18942_v40  ;;  %v13021_v40 = vpack.c.bf16 %v9839_v27, %v9838_v45 }
 0x9eb   :  { %6991 = vmatprep.mubr.f32.mxu1 %v18951_v11  ;;  %12943 = vmatpush1.bf16.msra.mxu1 %v12942_v34  ;;  %v13024_v11 = vpack.c.bf16 %v9841_v41, %v9840_v23  ;;  %v13016_v34 = vpack.c.bf16 %v9837_v25, %v9836_v26  ;;  %v9869_v26 = vld [vmem:[%s19722_s4 + $0x11b0] sm:$0xff] }
 0x9ec   :  { %12945 = vmatprep.subr.bf16.mxu1 %v12944_v47  ;;  %v13018_v47 = vpack.c.bf16 %v9821_v53, %v9820_v29 }
 0x9ee   :  { %6992 = vmatmul.mubr.f32.gmra.mrb[132].mxu1 %v18966_v54  ;;  %v9825_v54 = vld [vmem:[%s19722_s4 + $0x1058] sm:$0xff] }
 0x9ef   :  { %12947 = vmatpush1.bf16.msra.mxu1 %v12946_v59  ;;  %7062 = vmatprep.mubr.f32.mxu1 %v13354_v14  ;;  %v12992_v55 = vpack.c.bf16 %v9825_v54, %v9824_v4 }
 0x9f0   :  { %13020 = vmatprep.subr.bf16.mxu1 %v13353_v50 }
 0x9f2   :  { %9796 = vmatmul.mubr.msk.f32.vlgmr.msra.gmra.mrb[130].mxu1 %vm939_vm1, %v18969_v57  ;;  %v12990_v57 = vpack.c.bf16 %v9807_v43, %v9806_v3 }
 0x9f3   :  { %7068 = vmatprep.mubr.f32.mxu1 %v13354_v14  ;;  %13022 = vmatpush3.bf16.msra.mxu1 %v13021_v40 }
 0x9f4   :  { %13023 = vmatprep.subr.bf16.mxu1 %v13353_v50  ;;  %12991 = vmatpush3.bf16.msra.mxu0 %v12990_v57  ;;  %v6908_v57 = vpop.permute.xlu0 %6907 }
 0x9f5   :  { %12993 = vmatprep.subr.bf16.mxu0 %v12992_v55  ;;  %v19197_v55 = vpop.permute.xlu1 %6912 }
 0x9f6   :  { %9797 = vmatmul.mubr.msk.f32.gmra.mrb[132].mxu1 %vm939_vm1, %v18985_v33  ;;  %v13026_v33 = vpack.c.bf16 %v9860_v5, %v9859_v1 }
 0x9f7   :  { %11268 = vmatprep.mubr.msk.f32.mxu1 %vm13356_vm5, %v13354_v14  ;;  %13025 = vmatpush3.bf16.msra.mxu1 %v13024_v11 }
 0x9f8   :  { %13027 = vmatprep.subr.bf16.mxu1 %v13026_v33  ;;  %12995 = vmatpush3.bf16.msra.mxu0 %v12994_v2 }
 0x9f9   :  { %12997 = vmatprep.subr.bf16.mxu0 %v12996_v56  ;;  %v9844_v56 = vld [vmem:[%s19722_s4 + $0x10e8] sm:$0xff] }
 0x9fa   :  { %v13028_v24 = vpack.c.bf16 %v9844_v56, %v9843_v13  ;;  %v9875_v56 = vld [vmem:[%s19722_s4 + $0x11e0] sm:$0xff] }
 0x9fc   :  { %12999 = vmatpush3.bf16.msra.mxu0 %v12998_v38 }
 0x9fd   :  { %13001 = vmatprep.subr.bf16.mxu0 %v13000_v30  ;;  %v13030_v30 = vpack.c.bf16 %v9862_v63, %v9861_v36  ;;  %v9876_v36 = vld [vmem:[%s19722_s4 + $0x11e8] sm:$0xff] }
 0xa00   :  { %13003 = vmatpush3.bf16.msra.mxu0 %v13002_v60 }
 0xa01   :  { %13005 = vmatprep.subr.bf16.mxu0 %v13004_v16  ;;  %v13032_v16 = vpack.c.bf16 %v9846_v44, %v9845_v28  ;;  %v9877_v44 = vld [vmem:[%s19722_s4 + $0x11f0] sm:$0xff] }
 0xa04   :  { %13007 = vmatpush3.bf16.msra.mxu0 %v13006_v8  ;;  %v9848_v8 = vld [vmem:[%s19722_s4 + $0x1108] sm:$0xff] }
 0xa05   :  { %13009 = vmatprep.subr.bf16.mxu0 %v13008_v9  ;;  %v13036_v9 = vpack.c.bf16 %v9848_v8, %v9847_v7 }
 0xa08   :  { %13011 = vmatpush3.bf16.msra.mxu0 %v13010_v18  ;;  %v9850_v18 = vld [vmem:[%s19722_s4 + $0x1118] sm:$0xff] }
 0xa09   :  { %13013 = vmatprep.subr.bf16.mxu0 %v13012_v48  ;;  %v13040_v39 = vpack.c.bf16 %v9850_v18, %v9849_v20  ;;  %v13042_v48 = vpack.c.bf16 %v9868_v21, %v9867_v58  ;;  %v7633_v20 = vld [vmem:[#allocation3] sm:$0xff]  ;;  %v7636_v58 = vld [vmem:[#allocation3 + $0x18] sm:$0xff] }
 0xa0a   :  { %v13064_v18 = vpack.c.bf16 %v7634_v12, %v7633_v20 }
 0xa0c   :  { %13015 = vmatpush3.bf16.msra.mxu0 %v13014_v6  ;;  %v9852_v6 = vld [vmem:[%s19722_s4 + $0x1128] sm:$0xff] }
 0xa0d   :  { %13017 = vmatprep.subr.bf16.mxu0 %v13016_v34  ;;  %v13044_v25 = vpack.c.bf16 %v9852_v6, %v9851_v31  ;;  %v9854_v34 = vld [vmem:[%s19722_s4 + $0x1138] sm:$0xff]  ;;  %v7638_v31 = vld [vmem:[#allocation3 + $0x28] sm:$0xff]  ;;  %v7637_v6 = vld [vmem:[#allocation3 + $0x20] sm:$0xff] }
 0xa10   :  { %13019 = vmatpush3.bf16.msra.mxu0 %v13018_v47 }
 0xa11   :  { %13058 = vmatprep.subr.bf16.mxu0 %v13353_v50 }
 0xa51   :  { %v6602_v22 = vpop.f32.mrb[88].mxu0 }
 0xa52   :  { %v11237_v32 = vpop.f32.mrb[89].mxu0 }
 0xa53   :  { %v9853_v32 = vld [vmem:[%s19722_s4 + $0x1130] sm:$0xff] }
 0xa75   :  { %v10797_v62 = vpop.f32.mrb[126].mxu1 }
 0xa76   :  { %v10798_v37 = vpop.f32.mrb[127].mxu1 }
 0xa77   :  { %v10799_v59 = vadd.f32 %v10798_v37, %v10797_v62  ;;  %v9871_v37 = vld [vmem:[%s19722_s4 + $0x11c0] sm:$0xff] }
 0xa79   :  { %v6603_v45 = vadd.f32 %v10799_v59, %v6602_v22  ;;  %v10837_v27 = vpop.f32.mrb[90].mxu0  ;;  %v9870_v22 = vld [vmem:[%s19722_s4 + $0x11b8] sm:$0xff]  ;;  %v9872_v59 = vld [vmem:[%s19722_s4 + $0x11c8] sm:$0xff] }
 0xa7a   :  { %v10838_v40 = vpop.f32.mrb[91].mxu0  ;;  %v13046_v53 = vpack.c.bf16 %v9870_v22, %v9869_v26  ;;  %v13072_v26 = vpack.c.bf16 %v7638_v31, %v7637_v6  ;;  %v7640_v22 = vld [vmem:[#allocation3 + $0x38] sm:$0xff] }
 0xa7b   :  { %6606 = vst.msk [vmem:[#allocation3 + $0x60] sm:$0xff] %vm1631_vm9, %v6603_v45  ;;  %v10839_v23 = vadd.f32 %v10838_v40, %v10837_v27  ;;  %v13048_v40 = vpack.c.bf16 %v9854_v34, %v9853_v32  ;;  %v7643_v34 = vld [vmem:[#allocation3 + $0x50] sm:$0xff] }
 0xa7d   :  { %v6783_v41 = vpop.f32.mrb[128].mxu1 }
 0xa7e   :  { %v6784_v11 = vadd.f32 %v10839_v23, %v6783_v41  ;;  %v11248_v46 = vpop.f32.mrb[129].mxu1 }
 0xa7f   :  { %v9855_v46 = vld [vmem:[%s19722_s4 + $0x1140] sm:$0xff] }
 0xa80   :  { %6787 = vst.msk [vmem:[#allocation3 + $0x68] sm:$0xff] %vm1631_vm9, %v6784_v11  ;;  %v13050_v11 = vpack.c.bf16 %v9872_v59, %v9871_v37 }
 0xa82   :  { %v7645_v37 = vld [vmem:[#allocation3 + $0x60] sm:$0xff] }
 0xa9a   :  { %v10877_v51 = vpop.f32.mrb[92].mxu0 }
 0xa9b   :  { %v10878_v3 = vpop.f32.mrb[93].mxu0 }
 0xa9c   :  { %v10879_v52 = vadd.f32 %v10878_v3, %v10877_v51  ;;  %v9856_v51 = vld [vmem:[%s19722_s4 + $0x1148] sm:$0xff] }
 0xa9e   :  { %v10880_v43 = vpop.f32.mrb[94].mxu0  ;;  %v7142_v1 = vadd.f32 %v10879_v52, %v6908_v57 }
 0xa9f   :  { %v10881_v4 = vpop.f32.mrb[95].mxu0 }
 0xaa0   :  { %v10882_v54 = vadd.f32 %v10881_v4, %v10880_v43  ;;  %v9873_v43 = vld [vmem:[%s19722_s4 + $0x11d0] sm:$0xff]  ;;  %v9874_v4 = vld [vmem:[%s19722_s4 + $0x11d8] sm:$0xff] }
 0xaa2   :  { %v7147_v0 = vadd.f32 %v10882_v54, %v19197_v55  ;;  %v11259_v17 = vpop.f32.mrb[96].mxu0 }
 0xaa3   :  { %v7216_v5 = vpop.f32.mrb[97].mxu0 }
 0xaa4   :  { %v19200_v2 = vadd.f32 %v11259_v17, %v7147_v0  ;;  %v7217_v33 = vadd.f32 %v7216_v5, %v7142_v1  ;;  %v13052_v17 = vpack.c.bf16 %v9856_v51, %v9855_v46  ;;  %v13054_v5 = vpack.c.bf16 %v9874_v4, %v9873_v43 }
 0xaa6   :  { %v7235_v49 = vmul.f32 1.442695, %v7217_v33  ;;  %vm7227_vm6 = vcmp.gt.f32.partialorder %v7217_v33, 0.0  ;;  %vm7230_vm12 = vcmp.gt.f32.partialorder %v19200_v2, 0.0 }
 0xaa8   :  { %13306 = vpow2.f32 %v7235_v49  ;;  %v9858_v49 = vld [vmem:[%s19722_s4 + $0x1158] sm:$0xff] }
 0xab2   :  { %v13307_v38 = vpop.eup %13306 }
 0xab3   :  { %v9802_v61 = vadd.f32 -1.0, %v13307_v38 }
 0xab5   :  { %v7251_v60 = vsel %vm7227_vm6, %v7217_v33, %v9802_v61  ;;  %v9857_v33 = vld [vmem:[%s19722_s4 + $0x1150] sm:$0xff] }
 0xab6   :  { %11269 = vmatmul.mubr.msk.f32.vlgmr.msra.gmra.mrb[134].mxu1 %vm939_vm1, %v7251_v60  ;;  %v9878_v60 = vld [vmem:[%s19722_s4 + $0x11f8] sm:$0xff] }
 0xab7   :  { %13029 = vmatpush3.bf16.msra.mxu1 %v13028_v24  ;;  %v13059_v24 = vpack.c.bf16 %v9876_v36, %v9875_v56  ;;  %v13062_v8 = vpack.c.bf16 %v9878_v60, %v9877_v44  ;;  %v7624_v56 = vld [vmem:[%s19723_s5 + $0x38] sm:$0xff]  ;;  %v7625_v36 = vld [vmem:[%s19723_s5 + $0x40] sm:$0xff]  ;;  %v7673_v60 = vpop.permute.xlu1 %7672 }
 0xab8   :  { %13031 = vmatprep.subr.bf16.mxu1 %v13030_v30  ;;  %v7632_v44 = vld [vmem:[%s19723_s5 + $0x78] sm:$0xff] }
 0xabb   :  { %13033 = vmatpush3.bf16.msra.mxu1 %v13032_v16 }
 0xabc   :  { %13035 = vmatprep.subr.bf16.mxu1 %v13034_v35 }
 0xabf   :  { %13037 = vmatpush3.bf16.msra.mxu1 %v13036_v9 }
 0xac0   :  { %13039 = vmatprep.subr.bf16.mxu1 %v13038_v15 }
 0xac3   :  { %13041 = vmatpush3.bf16.msra.mxu1 %v13040_v39  ;;  %v7635_v39 = vld [vmem:[#allocation3 + $0x10] sm:$0xff] }
 0xac4   :  { %13043 = vmatprep.subr.bf16.mxu1 %v13042_v48  ;;  %v13068_v48 = vpack.c.bf16 %v7636_v58, %v7635_v39 }
 0xac5   :  { %v7064_v29 = vpop.f32.mrb[130].mxu1 }
 0xac6   :  { %v13148_v47 = vadd.f32 %v7064_v29, %v6908_v57  ;;  %v7066_v62 = vpop.f32.mrb[131].mxu1 }
 0xac7   :  { %v13149_v45 = vadd.f32 %v7066_v62, %v6908_v57  ;;  %13045 = vmatpush3.bf16.msra.mxu1 %v13044_v25  ;;  %v7241_v57 = vmul.f32 1.442695, %v19200_v2  ;;  %v7639_v25 = vld [vmem:[#allocation3 + $0x30] sm:$0xff]  ;;  %v7646_v62 = vld [vmem:[#allocation3 + $0x68] sm:$0xff] }
 0xac8   :  { %v7231_v27 = vmul.f32 1.442695, %v13148_v47  ;;  %13047 = vmatprep.subr.bf16.mxu1 %v13046_v53  ;;  %vm7225_vm8 = vcmp.gt.f32.partialorder %v13148_v47, 0.0  ;;  %v13076_v29 = vpack.c.bf16 %v7640_v22, %v7639_v25  ;;  %v7641_v53 = vld [vmem:[#allocation3 + $0x40] sm:$0xff]  ;;  %v13088_v59 = vpack.c.bf16 %v7646_v62, %v7645_v37 }
 0xac9   :  { %v7233_v23 = vmul.f32 1.442695, %v13149_v45  ;;  %v7070_v41 = vpop.f32.mrb[132].mxu1  ;;  %vm7226_vm7 = vcmp.gt.f32.partialorder %v13149_v45, 0.0 }
 0xaca   :  { %13308 = vpow2.f32 %v7231_v27  ;;  %v13150_v3 = vadd.f32 %v7070_v41, %v19197_v55  ;;  %v7072_v52 = vpop.f32.mrb[133].mxu1 }
 0xacb   :  { %13310 = vpow2.f32 %v7233_v23  ;;  %v13151_v54 = vadd.f32 %v7072_v52, %v19197_v55  ;;  %13049 = vmatpush3.bf16.msra.mxu1 %v13048_v40  ;;  %v13056_v55 = vpack.c.bf16 %v9858_v49, %v9857_v33  ;;  %v7620_v33 = vld [vmem:[%s19723_s5 + $0x18] sm:$0xff]  ;;  %v7621_v49 = vld [vmem:[%s19723_s5 + $0x20] sm:$0xff] }
 0xacc   :  { %v7237_v0 = vmul.f32 1.442695, %v13150_v3  ;;  %13051 = vmatprep.subr.bf16.mxu1 %v13050_v11  ;;  %vm7228_vm11 = vcmp.gt.f32.partialorder %v13150_v3, 0.0 }
 0xacd   :  { %v7239_v1 = vmul.f32 1.442695, %v13151_v54  ;;  %vm7229_vm10 = vcmp.gt.f32.partialorder %v13151_v54, 0.0 }
 0xace   :  { %13312 = vpow2.f32 %v7237_v0 }
 0xacf   :  { %13314 = vpow2.f32 %v7239_v1  ;;  %13053 = vmatpush3.bf16.msra.mxu1 %v13052_v17  ;;  %v7618_v1 = vld [vmem:[%s19723_s5 + $0x8] sm:$0xff] }
 0xad0   :  { %13316 = vpow2.f32 %v7241_v57  ;;  %13055 = vmatprep.subr.bf16.mxu1 %v13054_v5  ;;  %v7619_v5 = vld [vmem:[%s19723_s5 + $0x10] sm:$0xff] }
 0xad3   :  { %13057 = vmatpush3.bf16.msra.mxu1 %v13056_v55  ;;  %v7622_v55 = vld [vmem:[%s19723_s5 + $0x28] sm:$0xff] }
 0xad4   :  { %v13309_v13 = vpop.eup %13308  ;;  %13096 = vmatprep.subr.bf16.mxu1 %v13353_v50 }
 0xad5   :  { %v13311_v63 = vpop.eup %13310  ;;  %v9800_v38 = vadd.f32 -1.0, %v13309_v13  ;;  %v7623_v13 = vld [vmem:[%s19723_s5 + $0x30] sm:$0xff] }
 0xad6   :  { %v9801_v61 = vadd.f32 -1.0, %v13311_v63  ;;  %v7626_v63 = vld [vmem:[%s19723_s5 + $0x48] sm:$0xff] }
 0xad7   :  { %v7249_v42 = vsel %vm7225_vm8, %v13148_v47, %v9800_v38  ;;  %v7627_v38 = vld [vmem:[%s19723_s5 + $0x50] sm:$0xff] }
 0xad8   :  { %v13313_v30 = vpop.eup %13312  ;;  %v7250_v28 = vsel %vm7226_vm7, %v13149_v45, %v9801_v61  ;;  %v7617_v45 = vld [vmem:[%s19723_s5] sm:$0xff]  ;;  %v7628_v61 = vld [vmem:[%s19723_s5 + $0x58] sm:$0xff] }
 0xad9   :  { %v13315_v10 = vpop.eup %13314  ;;  %7359 = vmatprep.mubr.f32.mxu0 %v7250_v28  ;;  %v9803_v16 = vadd.f32 -1.0, %v13313_v30  ;;  %v7630_v30 = vld [vmem:[%s19723_s5 + $0x68] sm:$0xff]  ;;  %v7631_v28 = vld [vmem:[%s19723_s5 + $0x70] sm:$0xff] }
 0xada   :  { %v13317_v35 = vpop.eup %13316  ;;  %7360 = vmatmul.mubr.f32.vlgmr.msra.gmra.mrb[98].mxu0 %v7249_v42  ;;  %v9804_v7 = vadd.f32 -1.0, %v13315_v10  ;;  %v7683_v10 = vpop.permute.xlu1 %7682 }
 0xadb   :  { %13060 = vmatpush3.bf16.msra.mxu0 %v13059_v24  ;;  %11279 = vmatprep.mubr.msk.f32.mxu0 %vm13356_vm5, %v13354_v14  ;;  %v9805_v9 = vadd.f32 -1.0, %v13317_v35  ;;  %v7252_v15 = vsel %vm7228_vm11, %v13150_v3, %v9803_v16  ;;  %v7629_v24 = vld [vmem:[%s19723_s5 + $0x60] sm:$0xff]  ;;  %v7668_v42 = vpop.permute.xlu0 %7667 }
 0xadc   :  { %v7253_v19 = vsel %vm7229_vm10, %v13151_v54, %v9804_v7  ;;  %13061 = vmatprep.subr.bf16.mxu0 %v13353_v50 }
 0xadd   :  { %7540 = vmatprep.mubr.f32.mxu1 %v7253_v19  ;;  %v7254_v21 = vsel %vm7230_vm12, %v19200_v2, %v9805_v9  ;;  %v7644_v2 = vld [vmem:[#allocation3 + $0x58] sm:$0xff] }
 0xade   :  { %7541 = vmatmul.mubr.f32.vlgmr.msra.gmra.mrb[136].mxu1 %v7252_v15  ;;  %v13084_v47 = vpack.c.bf16 %v7644_v2, %v7643_v34  ;;  %v7693_v16 = vpop.permute.xlu1 %7692 }
 0xadf   :  { %13063 = vmatpush3.bf16.msra.mxu0 %v13062_v8  ;;  %11370 = vmatprep.mubr.msk.f32.mxu1 %vm13356_vm5, %v13354_v14  ;;  %v7642_v14 = vld [vmem:[#allocation3 + $0x48] sm:$0xff]  ;;  %v7678_v7 = vpop.permute.xlu0 %7677 }
 0xae0   :  { %13065 = vmatprep.subr.bf16.mxu0 %v13064_v18  ;;  %v13080_v32 = vpack.c.bf16 %v7642_v14, %v7641_v53 }
 0xae2   :  { %11280 = vmatmul.mubr.msk.f32.vlgmr.msra.gmra.mrb[100].mxu0 %vm939_vm1, %v7254_v21  ;;  %v7703_v15 = vpop.permute.xlu1 %7702 }
 0xae3   :  { %13067 = vmatpush3.bf16.msra.mxu0 %v13064_v18  ;;  %11314 = vmatprep.mubr.f32.mxu0 %v7617_v45 }
 0xae4   :  { %13069 = vmatprep.subr.bf16.mxu0 %v13068_v48 }
 0xae7   :  { %13071 = vmatpush3.bf16.msra.mxu0 %v13068_v48  ;;  %v7688_v48 = vpop.permute.xlu0 %7687 }
 0xae8   :  { %13073 = vmatprep.subr.bf16.mxu0 %v13072_v26 }
 0xaeb   :  { %13075 = vmatpush3.bf16.msra.mxu0 %v13072_v26  ;;  %v7698_v34 = vpop.permute.xlu0 %7697 }
 0xaec   :  { %13077 = vmatprep.subr.bf16.mxu0 %v13076_v29 }
 0xaef   :  { %13079 = vmatpush3.bf16.msra.mxu0 %v13076_v29  ;;  %v7713_v29 = vpop.permute.xlu1 %7712 }
 0xaf0   :  { %13081 = vmatprep.subr.bf16.mxu0 %v13080_v32 }
 0xaf3   :  { %13083 = vmatpush3.bf16.msra.mxu0 %v13080_v32 }
 0xaf4   :  { %13085 = vmatprep.subr.bf16.mxu0 %v13084_v47 }
 0xaf7   :  { %13087 = vmatpush3.bf16.msra.mxu0 %v13084_v47 }
 0xaf8   :  { %13089 = vmatprep.subr.bf16.mxu0 %v13088_v59 }
 0xafb   :  { %13091 = vmatpush3.bf16.msra.mxu0 %v13088_v59 }
 0xb89   :  { %v7431_v27 = vpop.f32.mrb[134].mxu1 }
 0xb8a   :  { %v11270_v40 = vpop.f32.mrb[135].mxu1 }
 0xb8b   :  { %v7723_v40 = vpop.permute.xlu1 %7722 }
 0xbad   :  { %v10921_v23 = vpop.f32.mrb[98].mxu0 }
 0xbae   :  { %v10922_v41 = vpop.f32.mrb[99].mxu0 }
 0xbaf   :  { %v10923_v11 = vadd.f32 %v10922_v41, %v10921_v23 }
 0xbb1   :  { %v7432_v46 = vadd.f32 %v10923_v11, %v7431_v27  ;;  %v10961_v51 = vpop.f32.mrb[136].mxu1  ;;  %v7987_v11 = vld [vmem:[%s19724_s7 + $0x88] sm:$0xff] }
 0xbb2   :  { %v10962_v3 = vpop.f32.mrb[137].mxu1 }
 0xbb3   :  { %7435 = vst.msk [vmem:[#allocation3 + $0x70] sm:$0xff] %vm1631_vm9, %v7432_v46  ;;  %v10963_v52 = vadd.f32 %v10962_v3, %v10961_v51  ;;  %v7971_v46 = vld [vmem:[%s19724_s7 + $0x8] sm:$0xff] }
 0xbb5   :  { %v7612_v43 = vpop.f32.mrb[100].mxu0 }
 0xbb6   :  { %v7613_v4 = vadd.f32 %v10963_v52, %v7612_v43  ;;  %v11281_v54 = vpop.f32.mrb[101].mxu0 }
 0xbb8   :  { %7616 = vst.msk [vmem:[#allocation3 + $0x78] sm:$0xff] %vm1631_vm9, %v7613_v4 }
 0xbba   :  { %v7647_v57 = vld [vmem:[#allocation3 + $0x70] sm:$0xff] }
 0xbbf   :  { %v7648_v0 = vld [vmem:[#allocation3 + $0x78] sm:$0xff] }
 0xbc0   :  { %v13092_v17 = vpack.c.bf16 %v7648_v0, %v7647_v57  ;;  %v7708_v57 = vpop.permute.xlu0 %7707 }
 0xbc2   :  { %13093 = vmatprep.subr.bf16.mxu0 %v13092_v17 }
 0xbc3   :  { %13095 = vmatpush3.bf16.msra.mxu0 %v13092_v17 }
 0xbc6   :  { %11315 = vmatmul.mubr.f32.vlgmr.msra.gmra.mrb[102].mxu0 %v7618_v1  ;;  %v7970_v1 = vld [vmem:[%s19724_s7] sm:$0xff] }
 0xbc7   :  { %11317 = vmatprep.mubr.f32.mxu0 %v7619_v5 }
 0xbca   :  { %11318 = vmatmul.mubr.f32.gmra.mrb[104].mxu0 %v7620_v33 }
 0xbcb   :  { %11320 = vmatprep.mubr.f32.mxu0 %v7621_v49 }
 0xbce   :  { %11321 = vmatmul.mubr.f32.gmra.mrb[106].mxu0 %v7622_v55 }
 0xbcf   :  { %11323 = vmatprep.mubr.f32.mxu0 %v7623_v13 }
 0xbd2   :  { %11324 = vmatmul.mubr.f32.gmra.mrb[108].mxu0 %v7624_v56  ;;  %v7973_v56 = vld [vmem:[%s19724_s7 + $0x18] sm:$0xff] }
 0xbd3   :  { %11326 = vmatprep.mubr.f32.mxu0 %v7625_v36 }
 0xbd6   :  { %11327 = vmatmul.mubr.f32.gmra.mrb[110].mxu0 %v7626_v63 }
 0xbd7   :  { %11329 = vmatprep.mubr.f32.mxu0 %v7627_v38 }
 0xbda   :  { %11330 = vmatmul.mubr.f32.gmra.mrb[112].mxu0 %v7628_v61 }
 0xbdb   :  { %11332 = vmatprep.mubr.f32.mxu0 %v7629_v24  ;;  %v7733_v24 = vpop.permute.xlu1 %7732 }
 0xbde   :  { %11333 = vmatmul.mubr.f32.gmra.mrb[114].mxu0 %v7630_v30 }
 0xbdf   :  { %11335 = vmatprep.mubr.f32.mxu0 %v7631_v28 }
 0xbe2   :  { %11336 = vmatmul.mubr.f32.gmra.mrb[116].mxu0 %v7632_v44  ;;  %v7986_v44 = vld [vmem:[%s19724_s7 + $0x80] sm:$0xff] }
 0xc99   :  { %v11316_v35 = vpop.f32.mrb[102].mxu0 }
 0xc9a   :  { %v7817_v8 = vadd.f32 %v11316_v35, %v7673_v60  ;;  %v7811_v12 = vpop.f32.mrb[103].mxu0 }
 0xc9b   :  { %v7812_v19 = vadd.f32 %v7811_v12, %v7668_v42  ;;  %v7972_v42 = vld [vmem:[%s19724_s7 + $0x10] sm:$0xff] }
 0xc9c   :  { %v7908_v9 = vmul.f32 1.442695, %v7817_v8  ;;  %vm7891_vm1 = vcmp.gt.f32.partialorder %v7817_v8, 0.0 }
 0xc9d   :  { %v7906_v20 = vmul.f32 1.442695, %v7812_v19  ;;  %v11319_v18 = vpop.f32.mrb[104].mxu0  ;;  %vm7890_vm5 = vcmp.gt.f32.partialorder %v7812_v19, 0.0 }
 0xc9e   :  { %13318 = vpow2.f32 %v7908_v9  ;;  %v7827_v58 = vadd.f32 %v11319_v18, %v7683_v10  ;;  %v7821_v21 = vpop.f32.mrb[105].mxu0 }
 0xc9f   :  { %13320 = vpow2.f32 %v7906_v20  ;;  %v19367_v39 = vadd.f32 %v7821_v21, %v7678_v7  ;;  %v7718_v21 = vpop.permute.xlu0 %7717 }
 0xca0   :  { %v7912_v31 = vmul.f32 1.442695, %v7827_v58  ;;  %vm7893_vm13 = vcmp.gt.f32.partialorder %v7827_v58, 0.0 }
 0xca1   :  { %v7910_v6 = vmul.f32 1.442695, %v19367_v39  ;;  %v11322_v26 = vpop.f32.mrb[106].mxu0  ;;  %vm7892_vm14 = vcmp.gt.f32.partialorder %v19367_v39, 0.0 }
 0xca2   :  { %13322 = vpow2.f32 %v7912_v31  ;;  %v19370_v22 = vadd.f32 %v11322_v26, %v7693_v16  ;;  %v7831_v25 = vpop.f32.mrb[107].mxu0  ;;  %v7743_v26 = vpop.permute.xlu1 %7742 }
 0xca3   :  { %13324 = vpow2.f32 %v7910_v6  ;;  %v19372_v14 = vadd.f32 %v7831_v25, %v7688_v48 }
 0xca4   :  { %v7916_v53 = vmul.f32 1.442695, %v19370_v22  ;;  %vm7895_vm15 = vcmp.gt.f32.partialorder %v19370_v22, 0.0 }
 0xca5   :  { %v7914_v32 = vmul.f32 1.442695, %v19372_v14  ;;  %v11325_v2 = vpop.f32.mrb[108].mxu0  ;;  %vm7894_vm0 = vcmp.gt.f32.partialorder %v19372_v14, 0.0 }
 0xca6   :  { %v19376_v47 = vadd.f32 %v11325_v2, %v7703_v15  ;;  %v7841_v62 = vpop.f32.mrb[109].mxu0  ;;  %13326 = vpow2.f32 %v7916_v53 }
 0xca7   :  { %v19378_v37 = vadd.f32 %v7841_v62, %v7698_v34  ;;  %13328 = vpow2.f32 %v7914_v32 }
 0xca8   :  { %v13319_v59 = vpop.eup %13318  ;;  %v7920_v45 = vmul.f32 1.442695, %v19376_v47  ;;  %vm7897_vm2 = vcmp.gt.f32.partialorder %v19376_v47, 0.0 }
 0xca9   :  { %v13321_v27 = vpop.eup %13320  ;;  %v11328_v23 = vpop.f32.mrb[110].mxu0  ;;  %v9881_v41 = vadd.f32 -1.0, %v13319_v59  ;;  %v7918_v51 = vmul.f32 1.442695, %v19378_v37  ;;  %vm7896_vm3 = vcmp.gt.f32.partialorder %v19378_v37, 0.0 }
 0xcaa   :  { %v19388_v3 = vadd.f32 %v11328_v23, %v7713_v29  ;;  %v7851_v52 = vpop.f32.mrb[111].mxu0  ;;  %v9880_v43 = vadd.f32 -1.0, %v13321_v27  ;;  %13330 = vpow2.f32 %v7920_v45 }
 0xcab   :  { %v7955_v4 = vsel %vm7891_vm1, %v7817_v8, %v9881_v41  ;;  %v19394_v49 = vadd.f32 %v7851_v52, %v7708_v57  ;;  %13332 = vpow2.f32 %v7918_v51  ;;  %v7974_v41 = vld [vmem:[%s19724_s7 + $0x20] sm:$0xff] }
 0xcac   :  { %v13323_v54 = vpop.eup %13322  ;;  %v8019_v0 = vmul.f32 %v7987_v11, %v7955_v4  ;;  %v8003_v17 = vmul.f32 %v7971_v46, %v7955_v4  ;;  %v7924_v33 = vmul.f32 1.442695, %v19388_v3  ;;  %v7954_v36 = vsel %vm7890_vm5, %v7812_v19, %v9880_v43  ;;  %v7988_v11 = vld [vmem:[%s19724_s7 + $0x90] sm:$0xff]  ;;  %v7728_v4 = vpop.permute.xlu0 %7727 }
 0xcad   :  { %v13325_v5 = vpop.eup %13324  ;;  %v11331_v55 = vpop.f32.mrb[112].mxu0  ;;  %v9883_v13 = vadd.f32 -1.0, %v13323_v54  ;;  %v8002_v28 = vmul.f32 %v7970_v1, %v7954_v36  ;;  %v7922_v35 = vmul.f32 1.442695, %v19394_v49  ;;  %v8018_v18 = vmul.f32 %v7986_v44, %v7954_v36 }
 0xcae   :  { %v7861_v63 = vpop.f32.mrb[113].mxu0  ;;  %v8085_v38 = vsel %vm1631_vm9, %v8019_v0, 0.0  ;;  %v8037_v61 = vsel %vm1631_vm9, %v8003_v17, 0.0  ;;  %v9882_v10 = vadd.f32 -1.0, %v13325_v5  ;;  %13334 = vpow2.f32 %v7924_v33  ;;  %v7977_v5 = vld [vmem:[%s19724_s7 + $0x38] sm:$0xff]  ;;  %v7991_v33 = vld [vmem:[%s19724_s7 + $0xa8] sm:$0xff] }
 0xcaf   :  { %8086 = vadd.xlane.f32.xlu0 %v8085_v38  ;;  %8038 = vadd.xlane.f32.xlu1 %v8037_v61  ;;  %v7957_v30 = vsel %vm7893_vm13, %v7827_v58, %v9883_v13  ;;  %v19409_v7 = vadd.f32 %v11331_v55, %v7723_v40  ;;  %v8034_v15 = vsel %vm1631_vm9, %v8002_v28, 0.0  ;;  %v7989_v58 = vld [vmem:[%s19724_s7 + $0x98] sm:$0xff]  ;;  %v19419_v31 = vadd.f32 %v7861_v63, %v7718_v21  ;;  %v7990_v28 = vld [vmem:[%s19724_s7 + $0xa0] sm:$0xff] }
 0xcb0   :  { %v8005_v60 = vmul.f32 %v7973_v56, %v7957_v30  ;;  %v13327_v16 = vpop.eup %13326  ;;  %v7956_v20 = vsel %vm7892_vm14, %v19367_v39, %v9882_v10  ;;  %v7975_v39 = vld [vmem:[%s19724_s7 + $0x28] sm:$0xff]  ;;  %13336 = vpow2.f32 %v7922_v35  ;;  %v8021_v53 = vmul.f32 %v7989_v58, %v7957_v30  ;;  %v7976_v30 = vld [vmem:[%s19724_s7 + $0x30] sm:$0xff] }
 0xcb1   :  { %v11334_v8 = vpop.f32.mrb[114].mxu0  ;;  %v13329_v12 = vpop.eup %13328  ;;  %v8004_v48 = vmul.f32 %v7972_v42, %v7956_v20  ;;  %v9885_v6 = vadd.f32 -1.0, %v13327_v16  ;;  %v7928_v25 = vmul.f32 1.442695, %v19409_v7  ;;  %v8082_v45 = vsel %vm1631_vm9, %v8018_v18, 0.0 }
 0xcb2   :  { %v7871_v19 = vpop.f32.mrb[115].mxu0  ;;  %v8043_v9 = vsel %vm1631_vm9, %v8005_v60, 0.0  ;;  %v9884_v32 = vadd.f32 -1.0, %v13329_v12  ;;  %v19444_v52 = vadd.f32 %v11334_v8, %v7733_v24  ;;  %v8020_v0 = vmul.f32 %v7988_v11, %v7956_v20  ;;  %v7738_v60 = vpop.permute.xlu0 %7737  ;;  %v7993_v12 = vld [vmem:[%s19724_s7 + $0xb8] sm:$0xff]  ;;  %v7995_v11 = vld [vmem:[%s19724_s7 + $0xc8] sm:$0xff] }
 0xcb3   :  { %8044 = vadd.xlane.f32.xlu1 %v8043_v9  ;;  %8035 = vadd.xlane.f32.xlu0 %v8034_v15  ;;  %v8040_v59 = vsel %vm1631_vm9, %v8004_v48, 0.0  ;;  %v7959_v27 = vsel %vm7895_vm15, %v19370_v22, %v9885_v6  ;;  %v7926_v22 = vmul.f32 1.442695, %v19419_v31  ;;  %13338 = vpow2.f32 %v7928_v25  ;;  %v7979_v15 = vld [vmem:[%s19724_s7 + $0x48] sm:$0xff] }
 0xcb4   :  { %v13331_v2 = vpop.eup %13330  ;;  %v8007_v40 = vmul.f32 %v7975_v39, %v7959_v27  ;;  %v7958_v23 = vsel %vm7894_vm0, %v19372_v14, %v9884_v32  ;;  %v8091_v14 = vsel %vm1631_vm9, %v8021_v53, 0.0  ;;  %v7932_v13 = vmul.f32 1.442695, %v19444_v52  ;;  %v7992_v53 = vld [vmem:[%s19724_s7 + $0xb0] sm:$0xff] }
 0xcb5   :  { %v11337_v29 = vpop.f32.mrb[116].mxu0  ;;  %v13333_v46 = vpop.eup %13332  ;;  %v9887_v43 = vadd.f32 -1.0, %v13331_v2  ;;  %v8006_v57 = vmul.f32 %v7974_v41, %v7958_v23  ;;  %v19457_v56 = vadd.f32 %v7871_v19, %v7728_v4  ;;  %v8023_v38 = vmul.f32 %v7991_v33, %v7959_v27  ;;  %v7981_v41 = vld [vmem:[%s19724_s7 + $0x58] sm:$0xff] }
 0xcb6   :  { %v19425_v34 = vadd.f32 %v11337_v29, %v7743_v26  ;;  %v7881_v62 = vpop.f32.mrb[117].mxu0  ;;  %v8049_v54 = vsel %vm1631_vm9, %v8007_v40, 0.0  ;;  %v9886_v55 = vadd.f32 -1.0, %v13333_v46  ;;  %vm7899_vm4 = vcmp.gt.f32.partialorder %v19388_v3, 0.0  ;;  %v7978_v29 = vld [vmem:[%s19724_s7 + $0x40] sm:$0xff] }
 0xcb7   :  { %8041 = vadd.xlane.f32.xlu1 %v8040_v59  ;;  %8083 = vadd.xlane.f32.xlu0 %v8082_v45  ;;  %v7961_v1 = vsel %vm7897_vm2, %v19376_v47, %v9887_v43  ;;  %v8046_v36 = vsel %vm1631_vm9, %v8006_v57, 0.0  ;;  %v8088_v47 = vsel %vm1631_vm9, %v8020_v0, 0.0  ;;  %v7930_v10 = vmul.f32 1.442695, %v19457_v56  ;;  %v7994_v57 = vld [vmem:[%s19724_s7 + $0xc0] sm:$0xff] }
 0xcb8   :  { %v7936_v51 = vmul.f32 1.442695, %v19425_v34  ;;  %v13335_v17 = vpop.eup %13334  ;;  %v8009_v63 = vmul.f32 %v7977_v5, %v7961_v1  ;;  %v7960_v24 = vsel %vm7896_vm3, %v19378_v37, %v9886_v55  ;;  %v19470_v42 = vadd.f32 %v7881_v62, %v7738_v60  ;;  %v8001_v62 = vld [vmem:[%s19724_s7 + $0xf8] sm:$0xff] }
 0xcb9   :  { %v9889_v44 = vadd.f32 -1.0, %v13335_v17  ;;  %v8097_v37 = vsel %vm1631_vm9, %v8023_v38, 0.0  ;;  %v8008_v35 = vmul.f32 %v7976_v30, %v7960_v24  ;;  %v8022_v8 = vmul.f32 %v7990_v28, %v7958_v23  ;;  %v7982_v30 = vld [vmem:[%s19724_s7 + $0x60] sm:$0xff]  ;;  %v7996_v28 = vld [vmem:[%s19724_s7 + $0xd0] sm:$0xff] }
 0xcba   :  { %13340 = vpow2.f32 %v7936_v51  ;;  %v13337_v61 = vpop.eup %13336  ;;  %v8055_v16 = vsel %vm1631_vm9, %v8009_v63, 0.0  ;;  %vm7898_vm6 = vcmp.gt.f32.partialorder %v19394_v49, 0.0  ;;  %v7934_v58 = vmul.f32 1.442695, %v19470_v42 }
 0xcbb   :  { %8050 = vadd.xlane.f32.xlu1 %v8049_v54  ;;  %8092 = vadd.xlane.f32.xlu0 %v8091_v14  ;;  %13342 = vpow2.f32 %v7926_v22  ;;  %v7963_v9 = vsel %vm7899_vm4, %v19388_v3, %v9889_v44  ;;  %v9888_v20 = vadd.f32 -1.0, %v13337_v61  ;;  %v8025_v21 = vmul.f32 %v7993_v12, %v7961_v1  ;;  %v7980_v54 = vld [vmem:[%s19724_s7 + $0x50] sm:$0xff] }
 0xcbc   :  { %13344 = vpow2.f32 %v7932_v13  ;;  %vm7905_vm7 = vcmp.gt.f32.partialorder %v19425_v34, 0.0  ;;  %v8052_v6 = vsel %vm1631_vm9, %v8008_v35, 0.0  ;;  %v8094_v39 = vsel %vm1631_vm9, %v8022_v8, 0.0  ;;  %v7983_v13 = vld [vmem:[%s19724_s7 + $0x68] sm:$0xff]  ;;  %v7984_v35 = vld [vmem:[%s19724_s7 + $0x70] sm:$0xff] }
 0xcbd   :  { %v13339_v19 = vpop.eup %13338  ;;  %13346 = vpow2.f32 %v7930_v10  ;;  %v8011_v3 = vmul.f32 %v7979_v15, %v7963_v9  ;;  %v7962_v25 = vsel %vm7898_vm6, %v19394_v49, %v9888_v20  ;;  %vm7901_vm8 = vcmp.gt.f32.partialorder %v19409_v7, 0.0  ;;  %v7999_v8 = vld [vmem:[%s19724_s7 + $0xe8] sm:$0xff]  ;;  %v7998_v20 = vld [vmem:[%s19724_s7 + $0xe0] sm:$0xff] }
 0xcbe   :  { %v9891_v32 = vadd.f32 -1.0, %v13339_v19  ;;  %13348 = vpow2.f32 %v7934_v58  ;;  %v8103_v49 = vsel %vm1631_vm9, %v8025_v21, 0.0  ;;  %v8010_v45 = vmul.f32 %v7978_v29, %v7962_v25 }
 0xcbf   :  { %8047 = vadd.xlane.f32.xlu1 %v8046_v36  ;;  %8089 = vadd.xlane.f32.xlu0 %v8088_v47  ;;  %v8061_v59 = vsel %vm1631_vm9, %v8011_v3, 0.0  ;;  %v8024_v27 = vmul.f32 %v7992_v53, %v7960_v24  ;;  %vm7900_vm10 = vcmp.gt.f32.partialorder %v19419_v31, 0.0  ;;  %v8027_v43 = vmul.f32 %v7995_v11, %v7963_v9  ;;  %v7997_v36 = vld [vmem:[%s19724_s7 + $0xd8] sm:$0xff]  ;;  %v8000_v3 = vld [vmem:[%s19724_s7 + $0xf0] sm:$0xff] }
 0xcc0   :  { %v8058_v22 = vsel %vm1631_vm9, %v8010_v45, 0.0  ;;  %vm7903_vm11 = vcmp.gt.f32.partialorder %v19444_v52, 0.0  ;;  %v8026_v33 = vmul.f32 %v7994_v57, %v7962_v25  ;;  %vm7902_vm12 = vcmp.gt.f32.partialorder %v19457_v56, 0.0 }
 0xcc1   :  { %v8100_v51 = vsel %vm1631_vm9, %v8024_v27, 0.0  ;;  %v8109_v1 = vsel %vm1631_vm9, %v8027_v43, 0.0  ;;  %vm7904_vm1 = vcmp.gt.f32.partialorder %v19470_v42, 0.0  ;;  %v8368_v43 = vld [vmem:[%s19725_s8 + $0x58] sm:$0xff]  ;;  %vm8180_vm5 = vcmask 195712  }
 0xcc2   :  { %v8106_v38 = vsel %vm1631_vm9, %v8026_v33, 0.0  ;;  %vm8187_vm13 = vcmask 261312   ;;  %vm8194_vm14 = vcmask 326912   ;;  %vm8201_vm15 = vcmask 392512  }
 0xcc3   :  { %8056 = vadd.xlane.f32.xlu1 %v8055_v16  ;;  %8098 = vadd.xlane.f32.xlu0 %v8097_v37  ;;  %vm8208_vm0 = vcmask 458112   ;;  %vm8215_vm2 = vcmask 523712   ;;  %vm8222_vm3 = vcmask 589312   ;;  %vm8229_vm4 = vcmask 654912  }
 0xcc4   :  { %v13341_v18 = vpop.eup %13340  ;;  %vm8236_vm6 = vcmask 720512  }
 0xcc5   :  { %v9895_v48 = vadd.f32 -1.0, %v13341_v18  ;;  %v13343_v26 = vpop.eup %13342 }
 0xcc6   :  { %v13345_v23 = vpop.eup %13344  ;;  %v9890_v46 = vadd.f32 -1.0, %v13343_v26 }
 0xcc7   :  { %8053 = vadd.xlane.f32.xlu1 %v8052_v6  ;;  %8095 = vadd.xlane.f32.xlu0 %v8094_v39  ;;  %v19494_v2 = vsel %vm7905_vm7, %v19425_v34, %v9895_v48  ;;  %v7965_v34 = vsel %vm7901_vm8, %v19409_v7, %v9891_v32  ;;  %v13347_v4 = vpop.eup %13346  ;;  %v9893_v0 = vadd.f32 -1.0, %v13345_v23  ;;  %v8357_v6 = vld [vmem:[%s19725_s8] sm:$0xff]  ;;  %v8358_v39 = vld [vmem:[%s19725_s8 + $0x8] sm:$0xff]  ;;  %v8359_v32 = vld [vmem:[%s19725_s8 + $0x10] sm:$0xff]  ;;  %vm8243_vm7 = vcmask 786112  }
 0xcc8   :  { %v19503_v40 = vmul.f32 %v8001_v62, %v19494_v2  ;;  %v8013_v14 = vmul.f32 %v7981_v41, %v7965_v34  ;;  %v7964_v7 = vsel %vm7900_vm10, %v19419_v31, %v9890_v46  ;;  %v13349_v55 = vpop.eup %13348  ;;  %v9892_v47 = vadd.f32 -1.0, %v13347_v4  ;;  %v8364_v41 = vld [vmem:[%s19725_s8 + $0x38] sm:$0xff]  ;;  %v8366_v46 = vld [vmem:[%s19725_s8 + $0x48] sm:$0xff] }
 0xcc9   :  { %v8012_v5 = vmul.f32 %v7980_v54, %v7964_v7  ;;  %v7967_v31 = vsel %vm7903_vm11, %v19444_v52, %v9893_v0  ;;  %v8029_v24 = vmul.f32 %v7997_v36, %v7965_v34  ;;  %v9894_v44 = vadd.f32 -1.0, %v13349_v55  ;;  %v8363_v34 = vld [vmem:[%s19725_s8 + $0x30] sm:$0xff]  ;;  %v8370_v54 = vld [vmem:[%s19725_s8 + $0x68] sm:$0xff] }
 0xcca   :  { %v8067_v17 = vsel %vm1631_vm9, %v8013_v14, 0.0  ;;  %v8015_v61 = vmul.f32 %v7983_v13, %v7967_v31  ;;  %v7966_v52 = vsel %vm7902_vm12, %v19457_v56, %v9892_v47  ;;  %v8028_v37 = vmul.f32 %v7996_v28, %v7964_v7  ;;  %v8367_v14 = vld [vmem:[%s19725_s8 + $0x50] sm:$0xff]  ;;  %v8369_v7 = vld [vmem:[%s19725_s8 + $0x60] sm:$0xff] }
 0xccb   :  { %8062 = vadd.xlane.f32.xlu1 %v8061_v59  ;;  %8104 = vadd.xlane.f32.xlu0 %v8103_v49  ;;  %v8064_v63 = vsel %vm1631_vm9, %v8012_v5, 0.0  ;;  %v8115_v10 = vsel %vm1631_vm9, %v8029_v24, 0.0  ;;  %v8014_v16 = vmul.f32 %v7982_v30, %v7966_v52  ;;  %v7968_v56 = vsel %vm7904_vm1, %v19470_v42, %v9894_v44  ;;  %v7985_v42 = vld [vmem:[%s19724_s7 + $0x78] sm:$0xff]  ;;  %v8361_v49 = vld [vmem:[%s19725_s8 + $0x20] sm:$0xff]  ;;  %v8362_v59 = vld [vmem:[%s19725_s8 + $0x28] sm:$0xff] }
 0xccc   :  { %v8073_v60 = vsel %vm1631_vm9, %v8015_v61, 0.0  ;;  %v8112_v19 = vsel %vm1631_vm9, %v8028_v37, 0.0  ;;  %v8016_v9 = vmul.f32 %v7984_v35, %v7968_v56  ;;  %v8031_v15 = vmul.f32 %v7999_v8, %v7967_v31  ;;  %v8371_v0 = vld [vmem:[%s19725_s8 + $0x70] sm:$0xff] }
 0xccd   :  { %v8070_v12 = vsel %vm1631_vm9, %v8014_v16, 0.0  ;;  %v8017_v21 = vmul.f32 %v7985_v42, %v19494_v2  ;;  %v8030_v48 = vmul.f32 %v7998_v20, %v7966_v52  ;;  %v13097_v26 = vpack.c.bf16 %v8358_v39, %v8357_v6  ;;  %v8360_v2 = vld [vmem:[%s19725_s8 + $0x18] sm:$0xff] }
 0xcce   :  { %v8076_v18 = vsel %vm1631_vm9, %v8016_v9, 0.0  ;;  %v8121_v58 = vsel %vm1631_vm9, %v8031_v15, 0.0  ;;  %v8032_v53 = vmul.f32 %v8000_v3, %v7968_v56  ;;  %v13100_v62 = vpack.c.bf16 %v8360_v2, %v8359_v32 }
 0xccf   :  { %8059 = vadd.xlane.f32.xlu1 %v8058_v22  ;;  %8101 = vadd.xlane.f32.xlu0 %v8100_v51  ;;  %v8079_v25 = vsel %vm1631_vm9, %v8017_v21, 0.0  ;;  %v8118_v29 = vsel %vm1631_vm9, %v8030_v48, 0.0  ;;  %v13103_v27 = vpack.c.bf16 %v8362_v59, %v8361_v49  ;;  %v8127_v23 = vsel %vm1631_vm9, %v19503_v40, 0.0  ;;  %v8365_v40 = vld [vmem:[%s19725_s8 + $0x40] sm:$0xff] }
 0xcd0   :  { %13098 = vmatpush3.bf16.msra.mxu1 %v13097_v26  ;;  %v8124_v45 = vsel %vm1631_vm9, %v8032_v53, 0.0  ;;  %v13106_v11 = vpack.c.bf16 %v8364_v41, %v8363_v34  ;;  %v13109_v22 = vpack.c.bf16 %v8366_v46, %v8365_v40  ;;  %v8443_v51 = vld [vmem:[%s19726_s9] sm:$0x3]  ;;  %v13112_v4 = vpack.c.bf16 %v8368_v43, %v8367_v14 }
 0xcd1   :  { %13099 = vmatprep.subr.bf16.mxu1 %v13353_v50  ;;  %v13115_v57 = vpack.c.bf16 %v8370_v54, %v8369_v7  ;;  %v8162_v52 = vlaneseq  ;;  %vm8173_vm9 = vcmask 130112   ;;  %vm8250_vm8 = vcmask 851712  }
 0xcd2   :  { %vm8257_vm10 = vcmask 917312   ;;  %vm8264_vm11 = vcmask 982912   ;;  %vm8271_vm12 = vcmask 1048512   ;;  %vm8352_vm1 = vcmask 1041409  }
 0xcd3   :  { %8068 = vadd.xlane.f32.xlu1 %v8067_v17  ;;  %8110 = vadd.xlane.f32.xlu0 %v8109_v1  ;;  %v8372_v17 = vld [vmem:[%s19725_s8 + $0x78] sm:$0xff]  ;;  %v19637_v44 = vand.u32 127, %v8162_v52  ;;  %v19644_v37 = vshrl.u32 %v8162_v52, 7 }
 0xcd4   :  { %13101 = vmatpush3.bf16.msra.mxu1 %v13100_v62  ;;  %v13118_v1 = vpack.c.bf16 %v8372_v17, %v8371_v0 }
 0xcd5   :  { %13102 = vmatprep.subr.bf16.mxu1 %v13353_v50  ;;  %v8175_v16 = vadd.s32 4294967280, %v19637_v44  ;;  %v8168_v56 = vadd.s32 4294967288, %v19637_v44  ;;  %v8189_v15 = vadd.s32 4294967264, %v19637_v44  ;;  %v8203_v48 = vadd.s32 4294967248, %v19637_v44 }
 0xcd6   :  { %v8196_v53 = vadd.s32 4294967256, %v19637_v44  ;;  %v8210_v32 = vadd.s32 4294967240, %v19637_v44 }
 0xcd7   :  { %8065 = vadd.xlane.f32.xlu1 %v8064_v63  ;;  %8107 = vadd.xlane.f32.xlu0 %v8106_v38  ;;  %v8178_v9 = vsub.s32 %v8175_v16, %v19644_v37  ;;  %v8171_v42 = vsub.s32 %v8168_v56, %v19644_v37  ;;  %v8192_v3 = vsub.s32 %v8189_v15, %v19644_v37 }
 0xcd8   :  { %13104 = vmatpush3.bf16.msra.mxu1 %v13103_v27  ;;  %v8217_v27 = vadd.s32 4294967232, %v19637_v44  ;;  %v8199_v46 = vsub.s32 %v8196_v53, %v19644_v37 }
 0xcd9   :  { %13105 = vmatprep.subr.bf16.mxu1 %v13353_v50 }
 0xcda   :  { %v8220_v54 = vsub.s32 %v8217_v27, %v19644_v37 }
 0xcdb   :  { %8074 = vadd.xlane.f32.xlu1 %v8073_v60  ;;  %8116 = vadd.xlane.f32.xlu0 %v8115_v10 }
 0xcdc   :  { %13107 = vmatpush3.bf16.msra.mxu1 %v13106_v11 }
 0xcdd   :  { %13108 = vmatprep.subr.bf16.mxu1 %v13353_v50 }
 0xcdf   :  { %8071 = vadd.xlane.f32.xlu1 %v8070_v12  ;;  %8113 = vadd.xlane.f32.xlu0 %v8112_v19  ;;  %v8166_v12 = vsub.s32 %v19637_v44, %v19644_v37  ;;  %v8182_v19 = vadd.s32 4294967272, %v19637_v44 }
 0xce0   :  { %13110 = vmatpush3.bf16.msra.mxu1 %v13109_v22 }
 0xce1   :  { %13111 = vmatprep.subr.bf16.mxu1 %v13353_v50  ;;  %v8185_v6 = vsub.s32 %v8182_v19, %v19644_v37 }
 0xce3   :  { %8077 = vadd.xlane.f32.xlu1 %v8076_v18  ;;  %8122 = vadd.xlane.f32.xlu0 %v8121_v58 }
 0xce4   :  { %13113 = vmatpush3.bf16.msra.mxu1 %v13112_v4 }
 0xce5   :  { %13114 = vmatprep.subr.bf16.mxu1 %v13353_v50 }
 0xce7   :  { %8080 = vadd.xlane.f32.xlu1 %v8079_v25  ;;  %8119 = vadd.xlane.f32.xlu0 %v8118_v29 }
 0xce8   :  { %13116 = vmatpush3.bf16.msra.mxu1 %v13115_v57  ;;  %v8231_v57 = vadd.s32 4294967216, %v19637_v44 }
 0xce9   :  { %13117 = vmatprep.subr.bf16.mxu1 %v13353_v50 }
 0xcea   :  { %v8234_v52 = vsub.s32 %v8231_v57, %v19644_v37 }
 0xceb   :  { %8125 = vadd.xlane.f32.xlu0 %v8124_v45  ;;  %v8206_v45 = vsub.s32 %v8203_v48, %v19644_v37 }
 0xcec   :  { %13119 = vmatpush3.bf16.msra.mxu1 %v13118_v1 }
 0xcef   :  { %8128 = vadd.xlane.f32.xlu0 %v8127_v23 }
 0xcf8   :  { %8446 = vperm.xlu1 %13221, %v8443_v51   ;;  %v8213_v51 = vsub.s32 %v8210_v32, %v19644_v37 }
 0xd3c   :  { %v8087_v5 = vpop.xlane.xlu0 %8086  ;;  %v8039_v33 = vpop.xlane.xlu1 %8038 }
 0xd3d   :  { %v8280_v25 = vrot.slane %v8087_v5, %v8171_v42  ;;  %v8172_v29 = vrot.slane %v8039_v33, %v8171_v42 }
 0xd40   :  { %v8045_v55 = vpop.xlane.xlu1 %8044  ;;  %v8036_v31 = vpop.xlane.xlu0 %8035 }
 0xd41   :  { %v8167_v58 = vrot.slane %v8036_v31, %v8166_v12  ;;  %v8186_v40 = vrot.slane %v8045_v55, %v8185_v6  ;;  %v8224_v31 = vadd.s32 4294967224, %v19637_v44 }
 0xd43   :  { %v8174_v49 = vsel %vm8173_vm9, %v8172_v29, %v8167_v58 }
 0xd44   :  { %v8042_v13 = vpop.xlane.xlu1 %8041  ;;  %v8084_v36 = vpop.xlane.xlu0 %8083 }
 0xd45   :  { %v8276_v21 = vrot.slane %v8084_v36, %v8166_v12  ;;  %v8179_v39 = vrot.slane %v8042_v13, %v8178_v9  ;;  %v8238_v13 = vadd.s32 4294967208, %v19637_v44 }
 0xd47   :  { %v8281_v59 = vsel %vm8173_vm9, %v8280_v25, %v8276_v21  ;;  %v8181_v23 = vsel %vm8180_vm5, %v8179_v39, %v8174_v49  ;;  %v8241_v19 = vsub.s32 %v8238_v13, %v19644_v37  ;;  %v8259_v21 = vadd.s32 4294967184, %v19637_v44 }
 0xd48   :  { %v19629_v47 = vpop.xlane.xlu1 %8050  ;;  %v8093_v63 = vpop.xlane.xlu0 %8092  ;;  %v8188_v4 = vsel %vm8187_vm13, %v8186_v40, %v8181_v23  ;;  %v8266_v25 = vadd.s32 4294967176, %v19637_v44  ;;  %vm8355_vm9 = vcmask 1041408  }
 0xd49   :  { %v8290_v22 = vrot.slane %v8093_v63, %v8185_v6  ;;  %v8200_v33 = vrot.slane %v19629_v47, %v8199_v46 }
 0xd4c   :  { %v8048_v50 = vpop.xlane.xlu1 %8047  ;;  %v8090_v38 = vpop.xlane.xlu0 %8089 }
 0xd4d   :  { %v8285_v26 = vrot.slane %v8090_v38, %v8178_v9  ;;  %v8193_v34 = vrot.slane %v8048_v50, %v8192_v3  ;;  %v8252_v9 = vadd.s32 4294967192, %v19637_v44 }
 0xd4f   :  { %v8286_v41 = vsel %vm8180_vm5, %v8285_v26, %v8281_v59  ;;  %v8195_v0 = vsel %vm8194_vm14, %v8193_v34, %v8188_v4  ;;  %v8255_v29 = vsub.s32 %v8252_v9, %v19644_v37  ;;  %vm8450_vm5 = vcmask 58368  }
 0xd50   :  { %v19631_v61 = vpop.xlane.xlu1 %8056  ;;  %v19633_v24 = vpop.xlane.xlu0 %8098  ;;  %v8291_v7 = vsel %vm8187_vm13, %v8290_v22, %v8286_v41  ;;  %v8202_v50 = vsel %vm8201_vm15, %v8200_v33, %v8195_v0 }
 0xd51   :  { %v8300_v55 = vrot.slane %v19633_v24, %v8199_v46  ;;  %v8214_v56 = vrot.slane %v19631_v61, %v8213_v51 }
 0xd54   :  { %v19635_v30 = vpop.xlane.xlu1 %8053  ;;  %v8096_v28 = vpop.xlane.xlu0 %8095 }
 0xd55   :  { %v8295_v11 = vrot.slane %v8096_v28, %v8192_v3  ;;  %v8207_v17 = vrot.slane %v19635_v30, %v8206_v45  ;;  %v8245_v30 = vadd.s32 4294967200, %v19637_v44  ;;  %v8269_v44 = vsub.s32 %v8266_v25, %v19644_v37 }
 0xd57   :  { %v8296_v1 = vsel %vm8194_vm14, %v8295_v11, %v8291_v7  ;;  %v8209_v28 = vsel %vm8208_vm0, %v8207_v17, %v8202_v50 }
 0xd58   :  { %v19639_v60 = vpop.xlane.xlu1 %8062  ;;  %v19641_v10 = vpop.xlane.xlu0 %8104  ;;  %v8301_v38 = vsel %vm8201_vm15, %v8300_v55, %v8296_v1  ;;  %v8216_v42 = vsel %vm8215_vm2, %v8214_v56, %v8209_v28 }
 0xd59   :  { %v8310_v12 = vrot.slane %v19641_v10, %v8213_v51 }
 0xd5c   :  { %v19647_v35 = vpop.xlane.xlu1 %8059  ;;  %v19649_v8 = vpop.xlane.xlu0 %8101 }
 0xd5d   :  { %v8305_v5 = vrot.slane %v19649_v8, %v8206_v45  ;;  %v8221_v47 = vrot.slane %v19647_v35, %v8220_v54  ;;  %v8227_v8 = vsub.s32 %v8224_v31, %v19644_v37  ;;  %v8248_v35 = vsub.s32 %v8245_v30, %v19644_v37 }
 0xd5f   :  { %v8306_v24 = vsel %vm8208_vm0, %v8305_v5, %v8301_v38  ;;  %v8223_v61 = vsel %vm8222_vm3, %v8221_v47, %v8216_v42  ;;  %v8228_v3 = vrot.slane %v19639_v60, %v8227_v8 }
 0xd60   :  { %v19657_v20 = vpop.xlane.xlu1 %8068  ;;  %v19659_v18 = vpop.xlane.xlu0 %8110  ;;  %v8311_v58 = vsel %vm8215_vm2, %v8310_v12, %v8306_v24 }
 0xd61   :  { %v8320_v26 = vrot.slane %v19659_v18, %v8227_v8  ;;  %v8230_v32 = vsel %vm8229_vm4, %v8228_v3, %v8223_v61  ;;  %v8242_v60 = vrot.slane %v19657_v20, %v8241_v19 }
 0xd64   :  { %v19666_v2 = vpop.xlane.xlu1 %8065  ;;  %v8108_v62 = vpop.xlane.xlu0 %8107 }
 0xd65   :  { %v8315_v16 = vrot.slane %v8108_v62, %v8220_v54  ;;  %v8235_v48 = vrot.slane %v19666_v2, %v8234_v52  ;;  %v8262_v2 = vsub.s32 %v8259_v21, %v19644_v37 }
 0xd67   :  { %v8316_v6 = vsel %vm8222_vm3, %v8315_v16, %v8311_v58  ;;  %v8237_v49 = vsel %vm8236_vm6, %v8235_v48, %v8230_v32 }
 0xd68   :  { %v19674_v14 = vpop.xlane.xlu1 %8074  ;;  %v19676_v43 = vpop.xlane.xlu0 %8116  ;;  %v8321_v62 = vsel %vm8229_vm4, %v8320_v26, %v8316_v6  ;;  %v8244_v41 = vsel %vm8243_vm7, %v8242_v60, %v8237_v49 }
 0xd69   :  { %v8330_v18 = vrot.slane %v19676_v43, %v8241_v19  ;;  %v8256_v4 = vrot.slane %v19674_v14, %v8255_v29 }
 0xd6c   :  { %v8072_v36 = vpop.xlane.xlu1 %8071  ;;  %v8114_v63 = vpop.xlane.xlu0 %8113 }
 0xd6d   :  { %v8325_v10 = vrot.slane %v8114_v63, %v8234_v52  ;;  %v8249_v59 = vrot.slane %v8072_v36, %v8248_v35 }
 0xd6f   :  { %v8326_v45 = vsel %vm8236_vm6, %v8325_v10, %v8321_v62  ;;  %v8251_v40 = vsel %vm8250_vm8, %v8249_v59, %v8244_v41 }
 0xd70   :  { %v8123_v15 = vpop.xlane.xlu0 %8122  ;;  %v8078_v39 = vpop.xlane.xlu1 %8077  ;;  %v8331_v11 = vsel %vm8243_vm7, %v8330_v18, %v8326_v45  ;;  %v8258_v43 = vsel %vm8257_vm10, %v8256_v4, %v8251_v40 }
 0xd71   :  { %v8263_v46 = vrot.slane %v8078_v39, %v8262_v2  ;;  %v8340_v7 = vrot.slane %v8123_v15, %v8255_v29 }
 0xd73   :  { %v8265_v37 = vsel %vm8264_vm11, %v8263_v46, %v8258_v43 }
 0xd74   :  { %v8120_v53 = vpop.xlane.xlu0 %8119  ;;  %v8081_v23 = vpop.xlane.xlu1 %8080 }
 0xd75   :  { %v8335_v27 = vrot.slane %v8120_v53, %v8248_v35  ;;  %v8270_v54 = vrot.slane %v8081_v23, %v8269_v44 }
 0xd77   :  { %v8336_v22 = vsel %vm8250_vm8, %v8335_v27, %v8331_v11  ;;  %v8272_v1 = vsel %vm8271_vm12, %v8270_v54, %v8265_v37 }
 0xd78   :  { %v8126_v34 = vpop.xlane.xlu0 %8125  ;;  %v8341_v57 = vsel %vm8257_vm10, %v8340_v7, %v8336_v22  ;;  %v8447_v55 = vpop.permute.xlu1 %8446 }
 0xd79   :  { %v8345_v51 = vrot.slane %v8126_v34, %v8262_v2 }
 0xd7b   :  { %v8346_v17 = vsel %vm8264_vm11, %v8345_v51, %v8341_v57 }
 0xd7c   :  { %v8129_v20 = vpop.xlane.xlu0 %8128 }
 0xd7d   :  { %v8350_v0 = vrot.slane %v8129_v20, %v8269_v44 }
 0xd7f   :  { %v8351_v5 = vsel %vm8271_vm12, %v8350_v0, %v8346_v17 }
 0xd80   :  { %v8353_v33 = vsel %vm8352_vm1, %v8351_v5, %v8272_v1 }
 0xd81   :  { %11371 = vmatmul.mubr.msk.f32.vlgmr.msra.gmra.mrb[138].mxu1 %vm8355_vm9, %v8353_v33 }
 0xe54   :  { %v8439_v31 = vpop.f32.mrb[138].mxu1 }
 0xe55   :  { %v8449_v14 = vadd.f32 %v8447_v55, %v8439_v31  ;;  %v11372_v13 = vpop.f32.mrb[139].mxu1 }
 0xe57   :  { %8451 = vst.msk [vmem:[%s19727_s10] sm:$0x3] %vm8450_vm5, %v8449_v14 }

</bundles_post_ra>
